<compile_context>
chip_gen: v7x
topology: tpu7x:2x2x1
jax: 0.10.0
libtpu: 0.0.40
codegen_flags: <defaults>
</compile_context>

<pallas_src>
import numpy as np

import jax
import jax.numpy as jnp
from jax.experimental import pallas as pl
from jax.experimental.pallas import tpu as pltpu

BN_EPS = 1e-5          # nn.BatchNorm2d default eps
LRELU_SLOPE = 0.01     # nn.LeakyReLU() default negative_slope
FILTERS = 16

# Whole-array-in-VMEM spec (gridless call, no blocking).
_VMEM = pl.BlockSpec(memory_space=pltpu.MemorySpace.VMEM)


# ---------------------------------------------------------------------------
# Fused Pallas kernel
# ---------------------------------------------------------------------------
def _bn_lrelu_t(y):
    """BatchNorm (batch stats, gamma=1, beta=0) + LeakyReLU on a transposed
    (channels, batch*pixels) f32 activation block (one-pass statistics)."""
    m = y.shape[1]
    inv_m = 1.0 / m
    s1 = jnp.sum(y, axis=1, keepdims=True)
    s2 = jnp.sum(y * y, axis=1, keepdims=True)
    mean = s1 * inv_m
    var = jnp.maximum(s2 * inv_m - mean * mean, 0.0)
    yn = (y - mean) * jax.lax.rsqrt(var + BN_EPS)
    return jnp.where(yn >= 0.0, yn, LRELU_SLOPE * yn)


def _disc_fused_kernel(p1_ref, w1_ref,
                       s2_ref, w2_ref,
                       s3_ref, w3_ref,
                       s4_ref, w4_ref,
                       s5_ref, wh_ref, bh_ref,
                       o_ref):
    # ---- layer 1: dense patch matmul (patches built in the wrapper) -------
    # w1: (C1, 16) bf16, p1: (16, M1=N*256) bf16 -> (C1, M1) f32
    acc = jnp.dot(w1_ref[...], p1_ref[...], preferred_element_type=jnp.float32)
    a = _bn_lrelu_t(acc)

    # ---- layers 2..4: 16 per-tap matmuls via constant gather matrices -----
    # Gather first (cheaper FLOP order), then the tap weight; f32 accumulate.
    for s_ref, w_ref in ((s2_ref, w2_ref), (s3_ref, w3_ref), (s4_ref, w4_ref)):
        a_bf = a.astype(jnp.bfloat16)
        n_taps, _, m_out = s_ref.shape
        c_out = w_ref.shape[1]
        acc = jnp.zeros((c_out, m_out), jnp.float32)
        for t in range(n_taps):                       # statically unrolled
            # tap gather (exact: 0/1 matrix): (C_in, M_in) @ (M_in, M_out)
            g = jnp.dot(a_bf, s_ref[t],
                        preferred_element_type=jnp.float32).astype(jnp.bfloat16)
            # tap weights:                    (C_out, C_in) @ (C_in, M_out)
            acc = acc + jnp.dot(w_ref[t], g,
                                preferred_element_type=jnp.float32)
        a = _bn_lrelu_t(acc)

    # ---- output conv (2x2, stride 1, pad 0) + bias + sigmoid --------------
    a_bf = a.astype(jnp.bfloat16)
    n_batch = s5_ref.shape[2]
    logit = jnp.zeros((1, n_batch), jnp.float32)
    for t in range(s5_ref.shape[0]):
        g = jnp.dot(a_bf, s5_ref[t],
                    preferred_element_type=jnp.float32).astype(jnp.bfloat16)
        logit = logit + jnp.dot(wh_ref[t], g,
                                preferred_element_type=jnp.float32)
    logit = logit + bh_ref[...]
    o_ref[...] = jax.nn.sigmoid(logit)                # (1, N) f32 probs


# ---------------------------------------------------------------------------
# Forward wrapper (one XLA prep fusion + one pallas_call)
# ---------------------------------------------------------------------------
def _layer1_patches_t(x_nchw):
    # conv1 im2col, transposed: (kh*kw*Cin, N*OH*OW) = (16, N*256) bf16.
    # The only non-Pallas work in the forward pass (input is data-dependent).
    n = x_nchw.shape[0]
    xp = jnp.pad(x_nchw[:, 0, :, :], ((0, 0), (1, 1), (1, 1)))   # (N, 34, 34)
    taps = []
    for ki in range(4):
        for kj in range(4):
            taps.append(xp[:, ki:ki + 32:2, kj:kj + 32:2])       # (N, 16, 16)
    p = jnp.stack(taps, axis=0)                                  # (16, N, 16, 16)
    return p.reshape(16, n * 16 * 16).astype(jnp.bfloat16)


def discriminator_forward(x_nchw, params):
    n = x_nchw.shape[0]
    p1t = _layer1_patches_t(x_nchw)
    out = pl.pallas_call(
        _disc_fused_kernel,
        out_shape=jax.ShapeDtypeStruct((1, n), jnp.float32),
        in_specs=[_VMEM] * 11,
        out_specs=_VMEM,
    )(p1t, *params)
    return out.reshape(n, 1, 1, 1)


# ---------------------------------------------------------------------------
# Parameter init (mimics PyTorch defaults) + one-time weight preparation
# ---------------------------------------------------------------------------
def init_params(key):
    f = FILTERS
    shapes = [(f, 1, 4, 4), (2 * f, f, 4, 4),
              (4 * f, 2 * f, 4, 4), (8 * f, 4 * f, 4, 4)]
    conv_params = []
    for s in shapes:
        key, kw_, kb_ = jax.random.split(key, 3)
        fan_in = s[1] * s[2] * s[3]
        bound = 1.0 / jnp.sqrt(fan_in)          # Conv2d default uniform bound
        w = jax.random.uniform(kw_, s, jnp.float32, -bound, bound)
        b = jax.random.uniform(kb_, (s[0],), jnp.float32, -bound, bound)
        conv_params.append((w, b))
    # output conv: xavier_uniform, gain('sigmoid') == 1.0, bias = 0
    key, kw_ = jax.random.split(key)
    fan_in, fan_out = 8 * f * 2 * 2, 1 * 2 * 2
    limit = jnp.sqrt(6.0 / (fan_in + fan_out))
    w_out = jax.random.uniform(kw_, (1, 8 * f, 2, 2), jnp.float32,
                               -limit, limit)
    b_out = jnp.zeros((1,), jnp.float32)
    return conv_params, (w_out, b_out)
    # TODO(synk): BatchNorm running_mean/running_var buffer updates are a
    # training side effect and are not modeled (they do not affect the output).


def _make_selection(n, h, w, kh, kw, stride, pad):
    """Constant 0/1 gather matrices, one per conv tap.

    s[t, m_in, m_out] == 1 iff input pixel m_in (flat (batch, ih, iw)) is the
    (ki, kj) = divmod(t, kw) tap of output pixel m_out (flat (batch, oh, ow));
    taps landing on zero padding get all-zero columns.  Right-multiplying a
    transposed activation (C, M_in) by s[t] performs that tap's im2col gather
    as a plain MXU matmul (robust lowering: no strided slices needed)."""
    oh = (h + 2 * pad - kh) // stride + 1
    ow = (w + 2 * pad - kw) // stride + 1
    s = np.zeros((kh * kw, n * h * w, n * oh * ow), np.float32)
    for ki in range(kh):
        for kj in range(kw):
            t = ki * kw + kj
            for b in range(n):
                for oi in range(oh):
                    ih = stride * oi + ki - pad
                    if ih < 0 or ih >= h:
                        continue
                    for oj in range(ow):
                        iw = stride * oj + kj - pad
                        if iw < 0 or iw >= w:
                            continue
                        s[t, b * h * w + ih * w + iw,
                          b * oh * ow + oi * ow + oj] = 1.0
    return s


def prepare_params(conv_params, out_params, batch):
    """Hoisted out of the hot path: per-tap transposed conv weights and the
    constant gather matrices, cast to bf16 MXU operands.  Conv1..conv4 biases
    are dropped (they cancel exactly in BatchNorm's mean subtraction)."""
    n = batch
    in_spatial = (32, 16, 8, 4)       # spatial size of each conv's input
    flat = []
    # layer 1 consumes wrapper-built patches: weight (C1, kh*kw*Cin) = (16, 16)
    w1 = conv_params[0][0]
    flat.append(w1.reshape(w1.shape[0], 16).astype(jnp.bfloat16))
    # layers 2..4: (taps, M_in, M_out) gather + (taps, Cout, Cin) weights
    for idx in (1, 2, 3):
        w = conv_params[idx][0]
        h = in_spatial[idx]
        sel = _make_selection(n, h, h, 4, 4, 2, 1)
        flat.append(jnp.asarray(sel, dtype=jnp.bfloat16))
        wt = jnp.transpose(w, (2, 3, 0, 1)).reshape(16, w.shape[0], w.shape[1])
        flat.append(wt.astype(jnp.bfloat16))
    # output conv (2x2, stride 1, no pad) + bias
    w_out, b_out = out_params
    sel5 = _make_selection(n, 2, 2, 2, 2, 1, 0)
    flat.append(jnp.asarray(sel5, dtype=jnp.bfloat16))
    wht = jnp.transpose(w_out, (2, 3, 0, 1)).reshape(4, 1, w_out.shape[1])
    flat.append(wht.astype(jnp.bfloat16))
    flat.append(b_out.reshape(1, 1).astype(jnp.float32))
    return tuple(flat)


# ---------------------------------------------------------------------------
# Plain-JAX f32 reference (for an in-script correctness cross-check)
# ---------------------------------------------------------------------------
def _reference_forward(x, conv_params, out_params):
    a = x
    for w, b in conv_params:
        y = jax.lax.conv_general_dilated(
            a, w, window_strides=(2, 2), padding=((1, 1), (1, 1)),
            dimension_numbers=("NCHW", "OIHW", "NCHW"))
        y = y + b.reshape(1, -1, 1, 1)
        mean = jnp.mean(y, axis=(0, 2, 3), keepdims=True)
        var = jnp.mean(jnp.square(y - mean), axis=(0, 2, 3), keepdims=True)
        yn = (y - mean) * jax.lax.rsqrt(var + BN_EPS)
        a = jnp.where(yn >= 0.0, yn, LRELU_SLOPE * yn)
    w_out, b_out = out_params
    logit = jax.lax.conv_general_dilated(
        a, w_out, window_strides=(1, 1), padding=((0, 0), (0, 0)),
        dimension_numbers=("NCHW", "OIHW", "NCHW"))
    logit = logit + b_out.reshape(1, -1, 1, 1)
    return jax.nn.sigmoid(logit)


if __name__ == "__main__":
    key = jax.random.PRNGKey(0)
    key, kx = jax.random.split(key)
    # MNIST images resized to 32x32 (required for the 2x2 output conv), NCHW.
    x = jax.random.normal(kx, (2, 1, 32, 32), dtype=jnp.float32)

    conv_params, out_params = init_params(key)
    params = prepare_params(conv_params, out_params, batch=x.shape[0])

    fwd = jax.jit(discriminator_forward)
    y = fwd(x, params)
    jax.block_until_ready(y)

    assert y.shape == (2, 1, 1, 1), y.shape
    assert bool(jnp.all((y >= 0.0) & (y <= 1.0)))

    # Cross-check vs a plain-JAX f32 reference (bf16 MXU operands -> small
    # rounding differences; tolerance is generous but catches index errors).
    y_ref = jax.jit(_reference_forward)(x, conv_params, out_params)
    max_err = float(jnp.max(jnp.abs(y - y_ref)))
    assert max_err < 5e-2, f"mismatch vs reference: {max_err}"

    print("KERNEL_OK")
</pallas_src>

<mosaic_0001>
module attributes {stable_mosaic.version = 11 : i64} {
  func.func @_disc_fused_kernel(%arg0: memref<16x512xbf16, #tpu.memory_space<vmem>>, %arg1: memref<16x16xbf16, #tpu.memory_space<vmem>>, %arg2: memref<16x512x128xbf16, #tpu.memory_space<vmem>>, %arg3: memref<16x32x16xbf16, #tpu.memory_space<vmem>>, %arg4: memref<16x128x32xbf16, #tpu.memory_space<vmem>>, %arg5: memref<16x64x32xbf16, #tpu.memory_space<vmem>>, %arg6: memref<16x32x8xbf16, #tpu.memory_space<vmem>>, %arg7: memref<16x128x64xbf16, #tpu.memory_space<vmem>>, %arg8: memref<4x8x2xbf16, #tpu.memory_space<vmem>>, %arg9: memref<4x1x128xbf16, #tpu.memory_space<vmem>>, %arg10: memref<1x1xf32, #tpu.memory_space<vmem>>, %arg11: memref<1x2xf32, #tpu.memory_space<vmem>>) attributes {dimension_semantics = [], scalar_prefetch = 0 : i64, scratch_operands = 0 : i64, tpu.core_type = #tpu.core_type<tc>} {
    %c0 = arith.constant 0 : index
    %c0_0 = arith.constant 0 : index
    %0 = vector.load %arg1[%c0, %c0_0] : memref<16x16xbf16, #tpu.memory_space<vmem>>, vector<16x16xbf16>
    %c0_1 = arith.constant 0 : index
    %c0_2 = arith.constant 0 : index
    %1 = vector.load %arg0[%c0_1, %c0_2] : memref<16x512xbf16, #tpu.memory_space<vmem>>, vector<16x512xbf16>
    %cst = arith.constant dense<0.000000e+00> : vector<16x512xf32>
    %2 = tpu.matmul %0, %1, %cst {dimension_numbers = #tpu.dot_dimension_numbers<[1], [0], [0], [1], [0, 0, 1, 1], [], []>} : vector<16x16xbf16>, vector<16x512xbf16>, vector<16x512xf32> -> vector<16x512xf32>
    %cst_3 = arith.constant dense<0.000000e+00> : vector<16xf32>
    %3 = vector.multi_reduction <add>, %2, %cst_3 [1] : vector<16x512xf32> to vector<16xf32>
    %4 = vector.shape_cast %3 : vector<16xf32> to vector<16x1xf32>
    %5 = arith.mulf %2, %2 : vector<16x512xf32>
    %cst_4 = arith.constant dense<0.000000e+00> : vector<16xf32>
    %6 = vector.multi_reduction <add>, %5, %cst_4 [1] : vector<16x512xf32> to vector<16xf32>
    %7 = vector.shape_cast %6 : vector<16xf32> to vector<16x1xf32>
    %cst_5 = arith.constant 0.001953125 : f32
    %8 = vector.broadcast %cst_5 : f32 to vector<16x1xf32>
    %9 = arith.mulf %4, %8 : vector<16x1xf32>
    %cst_6 = arith.constant 0.001953125 : f32
    %10 = vector.broadcast %cst_6 : f32 to vector<16x1xf32>
    %11 = arith.mulf %7, %10 : vector<16x1xf32>
    %12 = arith.mulf %9, %9 : vector<16x1xf32>
    %13 = arith.subf %11, %12 : vector<16x1xf32>
    %cst_7 = arith.constant 0.000000e+00 : f32
    %14 = vector.broadcast %cst_7 : f32 to vector<16x1xf32>
    %15 = arith.maximumf %13, %14 : vector<16x1xf32>
    %16 = vector.broadcast %9 : vector<16x1xf32> to vector<16x512xf32>
    %17 = arith.subf %2, %16 : vector<16x512xf32>
    %cst_8 = arith.constant 9.99999974E-6 : f32
    %18 = vector.broadcast %cst_8 : f32 to vector<16x1xf32>
    %19 = arith.addf %15, %18 : vector<16x1xf32>
    %20 = math.rsqrt %19 : vector<16x1xf32>
    %21 = vector.broadcast %20 : vector<16x1xf32> to vector<16x512xf32>
    %22 = arith.mulf %17, %21 : vector<16x512xf32>
    %cst_9 = arith.constant 0.000000e+00 : f32
    %23 = vector.broadcast %cst_9 : f32 to vector<16x512xf32>
    %24 = arith.cmpf oge, %22, %23 : vector<16x512xf32>
    %cst_10 = arith.constant 0.00999999977 : f32
    %25 = vector.broadcast %cst_10 : f32 to vector<16x512xf32>
    %26 = arith.mulf %25, %22 : vector<16x512xf32>
    %27 = arith.select %24, %22, %26 : vector<16x512xi1>, vector<16x512xf32>
    %28 = arith.truncf %27 : vector<16x512xf32> to vector<16x512xbf16>
    %cst_11 = arith.constant 0.000000e+00 : f32
    %29 = vector.broadcast %cst_11 : f32 to vector<32x128xf32>
    %c0_12 = arith.constant 0 : index
    %c0_13 = arith.constant 0 : index
    %c0_14 = arith.constant 0 : index
    %30 = vector.load %arg2[%c0_12, %c0_13, %c0_14] : memref<16x512x128xbf16, #tpu.memory_space<vmem>>, vector<1x512x128xbf16>
    %31 = vector.shape_cast %30 : vector<1x512x128xbf16> to vector<512x128xbf16>
    %cst_15 = arith.constant dense<0.000000e+00> : vector<16x128xf32>
    %32 = tpu.matmul %28, %31, %cst_15 {dimension_numbers = #tpu.dot_dimension_numbers<[1], [0], [0], [1], [0, 0, 1, 1], [], []>} : vector<16x512xbf16>, vector<512x128xbf16>, vector<16x128xf32> -> vector<16x128xf32>
    %33 = arith.truncf %32 : vector<16x128xf32> to vector<16x128xbf16>
    %c0_16 = arith.constant 0 : index
    %c0_17 = arith.constant 0 : index
    %c0_18 = arith.constant 0 : index
    %34 = vector.load %arg3[%c0_16, %c0_17, %c0_18] : memref<16x32x16xbf16, #tpu.memory_space<vmem>>, vector<1x32x16xbf16>
    %35 = vector.shape_cast %34 : vector<1x32x16xbf16> to vector<32x16xbf16>
    %cst_19 = arith.constant dense<0.000000e+00> : vector<32x128xf32>
    %36 = tpu.matmul %35, %33, %cst_19 {dimension_numbers = #tpu.dot_dimension_numbers<[1], [0], [0], [1], [0, 0, 1, 1], [], []>} : vector<32x16xbf16>, vector<16x128xbf16>, vector<32x128xf32> -> vector<32x128xf32>
    %37 = arith.addf %29, %36 : vector<32x128xf32>
    %c1 = arith.constant 1 : index
    %c0_20 = arith.constant 0 : index
    %c0_21 = arith.constant 0 : index
    %38 = vector.load %arg2[%c1, %c0_20, %c0_21] : memref<16x512x128xbf16, #tpu.memory_space<vmem>>, vector<1x512x128xbf16>
    %39 = vector.shape_cast %38 : vector<1x512x128xbf16> to vector<512x128xbf16>
    %cst_22 = arith.constant dense<0.000000e+00> : vector<16x128xf32>
    %40 = tpu.matmul %28, %39, %cst_22 {dimension_numbers = #tpu.dot_dimension_numbers<[1], [0], [0], [1], [0, 0, 1, 1], [], []>} : vector<16x512xbf16>, vector<512x128xbf16>, vector<16x128xf32> -> vector<16x128xf32>
    %41 = arith.truncf %40 : vector<16x128xf32> to vector<16x128xbf16>
    %c1_23 = arith.constant 1 : index
    %c0_24 = arith.constant 0 : index
    %c0_25 = arith.constant 0 : index
    %42 = vector.load %arg3[%c1_23, %c0_24, %c0_25] : memref<16x32x16xbf16, #tpu.memory_space<vmem>>, vector<1x32x16xbf16>
    %43 = vector.shape_cast %42 : vector<1x32x16xbf16> to vector<32x16xbf16>
    %cst_26 = arith.constant dense<0.000000e+00> : vector<32x128xf32>
    %44 = tpu.matmul %43, %41, %cst_26 {dimension_numbers = #tpu.dot_dimension_numbers<[1], [0], [0], [1], [0, 0, 1, 1], [], []>} : vector<32x16xbf16>, vector<16x128xbf16>, vector<32x128xf32> -> vector<32x128xf32>
    %45 = arith.addf %37, %44 : vector<32x128xf32>
    %c2 = arith.constant 2 : index
    %c0_27 = arith.constant 0 : index
    %c0_28 = arith.constant 0 : index
    %46 = vector.load %arg2[%c2, %c0_27, %c0_28] : memref<16x512x128xbf16, #tpu.memory_space<vmem>>, vector<1x512x128xbf16>
    %47 = vector.shape_cast %46 : vector<1x512x128xbf16> to vector<512x128xbf16>
    %cst_29 = arith.constant dense<0.000000e+00> : vector<16x128xf32>
    %48 = tpu.matmul %28, %47, %cst_29 {dimension_numbers = #tpu.dot_dimension_numbers<[1], [0], [0], [1], [0, 0, 1, 1], [], []>} : vector<16x512xbf16>, vector<512x128xbf16>, vector<16x128xf32> -> vector<16x128xf32>
    %49 = arith.truncf %48 : vector<16x128xf32> to vector<16x128xbf16>
    %c2_30 = arith.constant 2 : index
    %c0_31 = arith.constant 0 : index
    %c0_32 = arith.constant 0 : index
    %50 = vector.load %arg3[%c2_30, %c0_31, %c0_32] : memref<16x32x16xbf16, #tpu.memory_space<vmem>>, vector<1x32x16xbf16>
    %51 = vector.shape_cast %50 : vector<1x32x16xbf16> to vector<32x16xbf16>
    %cst_33 = arith.constant dense<0.000000e+00> : vector<32x128xf32>
    %52 = tpu.matmul %51, %49, %cst_33 {dimension_numbers = #tpu.dot_dimension_numbers<[1], [0], [0], [1], [0, 0, 1, 1], [], []>} : vector<32x16xbf16>, vector<16x128xbf16>, vector<32x128xf32> -> vector<32x128xf32>
    %53 = arith.addf %45, %52 : vector<32x128xf32>
    %c3 = arith.constant 3 : index
    %c0_34 = arith.constant 0 : index
    %c0_35 = arith.constant 0 : index
    %54 = vector.load %arg2[%c3, %c0_34, %c0_35] : memref<16x512x128xbf16, #tpu.memory_space<vmem>>, vector<1x512x128xbf16>
    %55 = vector.shape_cast %54 : vector<1x512x128xbf16> to vector<512x128xbf16>
    %cst_36 = arith.constant dense<0.000000e+00> : vector<16x128xf32>
    %56 = tpu.matmul %28, %55, %cst_36 {dimension_numbers = #tpu.dot_dimension_numbers<[1], [0], [0], [1], [0, 0, 1, 1], [], []>} : vector<16x512xbf16>, vector<512x128xbf16>, vector<16x128xf32> -> vector<16x128xf32>
    %57 = arith.truncf %56 : vector<16x128xf32> to vector<16x128xbf16>
    %c3_37 = arith.constant 3 : index
    %c0_38 = arith.constant 0 : index
    %c0_39 = arith.constant 0 : index
    %58 = vector.load %arg3[%c3_37, %c0_38, %c0_39] : memref<16x32x16xbf16, #tpu.memory_space<vmem>>, vector<1x32x16xbf16>
    %59 = vector.shape_cast %58 : vector<1x32x16xbf16> to vector<32x16xbf16>
    %cst_40 = arith.constant dense<0.000000e+00> : vector<32x128xf32>
    %60 = tpu.matmul %59, %57, %cst_40 {dimension_numbers = #tpu.dot_dimension_numbers<[1], [0], [0], [1], [0, 0, 1, 1], [], []>} : vector<32x16xbf16>, vector<16x128xbf16>, vector<32x128xf32> -> vector<32x128xf32>
    %61 = arith.addf %53, %60 : vector<32x128xf32>
    %c4 = arith.constant 4 : index
    %c0_41 = arith.constant 0 : index
    %c0_42 = arith.constant 0 : index
    %62 = vector.load %arg2[%c4, %c0_41, %c0_42] : memref<16x512x128xbf16, #tpu.memory_space<vmem>>, vector<1x512x128xbf16>
    %63 = vector.shape_cast %62 : vector<1x512x128xbf16> to vector<512x128xbf16>
    %cst_43 = arith.constant dense<0.000000e+00> : vector<16x128xf32>
    %64 = tpu.matmul %28, %63, %cst_43 {dimension_numbers = #tpu.dot_dimension_numbers<[1], [0], [0], [1], [0, 0, 1, 1], [], []>} : vector<16x512xbf16>, vector<512x128xbf16>, vector<16x128xf32> -> vector<16x128xf32>
    %65 = arith.truncf %64 : vector<16x128xf32> to vector<16x128xbf16>
    %c4_44 = arith.constant 4 : index
    %c0_45 = arith.constant 0 : index
    %c0_46 = arith.constant 0 : index
    %66 = vector.load %arg3[%c4_44, %c0_45, %c0_46] : memref<16x32x16xbf16, #tpu.memory_space<vmem>>, vector<1x32x16xbf16>
    %67 = vector.shape_cast %66 : vector<1x32x16xbf16> to vector<32x16xbf16>
    %cst_47 = arith.constant dense<0.000000e+00> : vector<32x128xf32>
    %68 = tpu.matmul %67, %65, %cst_47 {dimension_numbers = #tpu.dot_dimension_numbers<[1], [0], [0], [1], [0, 0, 1, 1], [], []>} : vector<32x16xbf16>, vector<16x128xbf16>, vector<32x128xf32> -> vector<32x128xf32>
    %69 = arith.addf %61, %68 : vector<32x128xf32>
    %c5 = arith.constant 5 : index
    %c0_48 = arith.constant 0 : index
    %c0_49 = arith.constant 0 : index
    %70 = vector.load %arg2[%c5, %c0_48, %c0_49] : memref<16x512x128xbf16, #tpu.memory_space<vmem>>, vector<1x512x128xbf16>
    %71 = vector.shape_cast %70 : vector<1x512x128xbf16> to vector<512x128xbf16>
    %cst_50 = arith.constant dense<0.000000e+00> : vector<16x128xf32>
    %72 = tpu.matmul %28, %71, %cst_50 {dimension_numbers = #tpu.dot_dimension_numbers<[1], [0], [0], [1], [0, 0, 1, 1], [], []>} : vector<16x512xbf16>, vector<512x128xbf16>, vector<16x128xf32> -> vector<16x128xf32>
    %73 = arith.truncf %72 : vector<16x128xf32> to vector<16x128xbf16>
    %c5_51 = arith.constant 5 : index
    %c0_52 = arith.constant 0 : index
    %c0_53 = arith.constant 0 : index
    %74 = vector.load %arg3[%c5_51, %c0_52, %c0_53] : memref<16x32x16xbf16, #tpu.memory_space<vmem>>, vector<1x32x16xbf16>
    %75 = vector.shape_cast %74 : vector<1x32x16xbf16> to vector<32x16xbf16>
    %cst_54 = arith.constant dense<0.000000e+00> : vector<32x128xf32>
    %76 = tpu.matmul %75, %73, %cst_54 {dimension_numbers = #tpu.dot_dimension_numbers<[1], [0], [0], [1], [0, 0, 1, 1], [], []>} : vector<32x16xbf16>, vector<16x128xbf16>, vector<32x128xf32> -> vector<32x128xf32>
    %77 = arith.addf %69, %76 : vector<32x128xf32>
    %c6 = arith.constant 6 : index
    %c0_55 = arith.constant 0 : index
    %c0_56 = arith.constant 0 : index
    %78 = vector.load %arg2[%c6, %c0_55, %c0_56] : memref<16x512x128xbf16, #tpu.memory_space<vmem>>, vector<1x512x128xbf16>
    %79 = vector.shape_cast %78 : vector<1x512x128xbf16> to vector<512x128xbf16>
    %cst_57 = arith.constant dense<0.000000e+00> : vector<16x128xf32>
    %80 = tpu.matmul %28, %79, %cst_57 {dimension_numbers = #tpu.dot_dimension_numbers<[1], [0], [0], [1], [0, 0, 1, 1], [], []>} : vector<16x512xbf16>, vector<512x128xbf16>, vector<16x128xf32> -> vector<16x128xf32>
    %81 = arith.truncf %80 : vector<16x128xf32> to vector<16x128xbf16>
    %c6_58 = arith.constant 6 : index
    %c0_59 = arith.constant 0 : index
    %c0_60 = arith.constant 0 : index
    %82 = vector.load %arg3[%c6_58, %c0_59, %c0_60] : memref<16x32x16xbf16, #tpu.memory_space<vmem>>, vector<1x32x16xbf16>
    %83 = vector.shape_cast %82 : vector<1x32x16xbf16> to vector<32x16xbf16>
    %cst_61 = arith.constant dense<0.000000e+00> : vector<32x128xf32>
    %84 = tpu.matmul %83, %81, %cst_61 {dimension_numbers = #tpu.dot_dimension_numbers<[1], [0], [0], [1], [0, 0, 1, 1], [], []>} : vector<32x16xbf16>, vector<16x128xbf16>, vector<32x128xf32> -> vector<32x128xf32>
    %85 = arith.addf %77, %84 : vector<32x128xf32>
    %c7 = arith.constant 7 : index
    %c0_62 = arith.constant 0 : index
    %c0_63 = arith.constant 0 : index
    %86 = vector.load %arg2[%c7, %c0_62, %c0_63] : memref<16x512x128xbf16, #tpu.memory_space<vmem>>, vector<1x512x128xbf16>
    %87 = vector.shape_cast %86 : vector<1x512x128xbf16> to vector<512x128xbf16>
    %cst_64 = arith.constant dense<0.000000e+00> : vector<16x128xf32>
    %88 = tpu.matmul %28, %87, %cst_64 {dimension_numbers = #tpu.dot_dimension_numbers<[1], [0], [0], [1], [0, 0, 1, 1], [], []>} : vector<16x512xbf16>, vector<512x128xbf16>, vector<16x128xf32> -> vector<16x128xf32>
    %89 = arith.truncf %88 : vector<16x128xf32> to vector<16x128xbf16>
    %c7_65 = arith.constant 7 : index
    %c0_66 = arith.constant 0 : index
    %c0_67 = arith.constant 0 : index
    %90 = vector.load %arg3[%c7_65, %c0_66, %c0_67] : memref<16x32x16xbf16, #tpu.memory_space<vmem>>, vector<1x32x16xbf16>
    %91 = vector.shape_cast %90 : vector<1x32x16xbf16> to vector<32x16xbf16>
    %cst_68 = arith.constant dense<0.000000e+00> : vector<32x128xf32>
    %92 = tpu.matmul %91, %89, %cst_68 {dimension_numbers = #tpu.dot_dimension_numbers<[1], [0], [0], [1], [0, 0, 1, 1], [], []>} : vector<32x16xbf16>, vector<16x128xbf16>, vector<32x128xf32> -> vector<32x128xf32>
    %93 = arith.addf %85, %92 : vector<32x128xf32>
    %c8 = arith.constant 8 : index
    %c0_69 = arith.constant 0 : index
    %c0_70 = arith.constant 0 : index
    %94 = vector.load %arg2[%c8, %c0_69, %c0_70] : memref<16x512x128xbf16, #tpu.memory_space<vmem>>, vector<1x512x128xbf16>
    %95 = vector.shape_cast %94 : vector<1x512x128xbf16> to vector<512x128xbf16>
    %cst_71 = arith.constant dense<0.000000e+00> : vector<16x128xf32>
    %96 = tpu.matmul %28, %95, %cst_71 {dimension_numbers = #tpu.dot_dimension_numbers<[1], [0], [0], [1], [0, 0, 1, 1], [], []>} : vector<16x512xbf16>, vector<512x128xbf16>, vector<16x128xf32> -> vector<16x128xf32>
    %97 = arith.truncf %96 : vector<16x128xf32> to vector<16x128xbf16>
    %c8_72 = arith.constant 8 : index
    %c0_73 = arith.constant 0 : index
    %c0_74 = arith.constant 0 : index
    %98 = vector.load %arg3[%c8_72, %c0_73, %c0_74] : memref<16x32x16xbf16, #tpu.memory_space<vmem>>, vector<1x32x16xbf16>
    %99 = vector.shape_cast %98 : vector<1x32x16xbf16> to vector<32x16xbf16>
    %cst_75 = arith.constant dense<0.000000e+00> : vector<32x128xf32>
    %100 = tpu.matmul %99, %97, %cst_75 {dimension_numbers = #tpu.dot_dimension_numbers<[1], [0], [0], [1], [0, 0, 1, 1], [], []>} : vector<32x16xbf16>, vector<16x128xbf16>, vector<32x128xf32> -> vector<32x128xf32>
    %101 = arith.addf %93, %100 : vector<32x128xf32>
    %c9 = arith.constant 9 : index
    %c0_76 = arith.constant 0 : index
    %c0_77 = arith.constant 0 : index
    %102 = vector.load %arg2[%c9, %c0_76, %c0_77] : memref<16x512x128xbf16, #tpu.memory_space<vmem>>, vector<1x512x128xbf16>
    %103 = vector.shape_cast %102 : vector<1x512x128xbf16> to vector<512x128xbf16>
    %cst_78 = arith.constant dense<0.000000e+00> : vector<16x128xf32>
    %104 = tpu.matmul %28, %103, %cst_78 {dimension_numbers = #tpu.dot_dimension_numbers<[1], [0], [0], [1], [0, 0, 1, 1], [], []>} : vector<16x512xbf16>, vector<512x128xbf16>, vector<16x128xf32> -> vector<16x128xf32>
    %105 = arith.truncf %104 : vector<16x128xf32> to vector<16x128xbf16>
    %c9_79 = arith.constant 9 : index
    %c0_80 = arith.constant 0 : index
    %c0_81 = arith.constant 0 : index
    %106 = vector.load %arg3[%c9_79, %c0_80, %c0_81] : memref<16x32x16xbf16, #tpu.memory_space<vmem>>, vector<1x32x16xbf16>
    %107 = vector.shape_cast %106 : vector<1x32x16xbf16> to vector<32x16xbf16>
    %cst_82 = arith.constant dense<0.000000e+00> : vector<32x128xf32>
    %108 = tpu.matmul %107, %105, %cst_82 {dimension_numbers = #tpu.dot_dimension_numbers<[1], [0], [0], [1], [0, 0, 1, 1], [], []>} : vector<32x16xbf16>, vector<16x128xbf16>, vector<32x128xf32> -> vector<32x128xf32>
    %109 = arith.addf %101, %108 : vector<32x128xf32>
    %c10 = arith.constant 10 : index
    %c0_83 = arith.constant 0 : index
    %c0_84 = arith.constant 0 : index
    %110 = vector.load %arg2[%c10, %c0_83, %c0_84] : memref<16x512x128xbf16, #tpu.memory_space<vmem>>, vector<1x512x128xbf16>
    %111 = vector.shape_cast %110 : vector<1x512x128xbf16> to vector<512x128xbf16>
    %cst_85 = arith.constant dense<0.000000e+00> : vector<16x128xf32>
    %112 = tpu.matmul %28, %111, %cst_85 {dimension_numbers = #tpu.dot_dimension_numbers<[1], [0], [0], [1], [0, 0, 1, 1], [], []>} : vector<16x512xbf16>, vector<512x128xbf16>, vector<16x128xf32> -> vector<16x128xf32>
    %113 = arith.truncf %112 : vector<16x128xf32> to vector<16x128xbf16>
    %c10_86 = arith.constant 10 : index
    %c0_87 = arith.constant 0 : index
    %c0_88 = arith.constant 0 : index
    %114 = vector.load %arg3[%c10_86, %c0_87, %c0_88] : memref<16x32x16xbf16, #tpu.memory_space<vmem>>, vector<1x32x16xbf16>
    %115 = vector.shape_cast %114 : vector<1x32x16xbf16> to vector<32x16xbf16>
    %cst_89 = arith.constant dense<0.000000e+00> : vector<32x128xf32>
    %116 = tpu.matmul %115, %113, %cst_89 {dimension_numbers = #tpu.dot_dimension_numbers<[1], [0], [0], [1], [0, 0, 1, 1], [], []>} : vector<32x16xbf16>, vector<16x128xbf16>, vector<32x128xf32> -> vector<32x128xf32>
    %117 = arith.addf %109, %116 : vector<32x128xf32>
    %c11 = arith.constant 11 : index
    %c0_90 = arith.constant 0 : index
    %c0_91 = arith.constant 0 : index
    %118 = vector.load %arg2[%c11, %c0_90, %c0_91] : memref<16x512x128xbf16, #tpu.memory_space<vmem>>, vector<1x512x128xbf16>
    %119 = vector.shape_cast %118 : vector<1x512x128xbf16> to vector<512x128xbf16>
    %cst_92 = arith.constant dense<0.000000e+00> : vector<16x128xf32>
    %120 = tpu.matmul %28, %119, %cst_92 {dimension_numbers = #tpu.dot_dimension_numbers<[1], [0], [0], [1], [0, 0, 1, 1], [], []>} : vector<16x512xbf16>, vector<512x128xbf16>, vector<16x128xf32> -> vector<16x128xf32>
    %121 = arith.truncf %120 : vector<16x128xf32> to vector<16x128xbf16>
    %c11_93 = arith.constant 11 : index
    %c0_94 = arith.constant 0 : index
    %c0_95 = arith.constant 0 : index
    %122 = vector.load %arg3[%c11_93, %c0_94, %c0_95] : memref<16x32x16xbf16, #tpu.memory_space<vmem>>, vector<1x32x16xbf16>
    %123 = vector.shape_cast %122 : vector<1x32x16xbf16> to vector<32x16xbf16>
    %cst_96 = arith.constant dense<0.000000e+00> : vector<32x128xf32>
    %124 = tpu.matmul %123, %121, %cst_96 {dimension_numbers = #tpu.dot_dimension_numbers<[1], [0], [0], [1], [0, 0, 1, 1], [], []>} : vector<32x16xbf16>, vector<16x128xbf16>, vector<32x128xf32> -> vector<32x128xf32>
    %125 = arith.addf %117, %124 : vector<32x128xf32>
    %c12 = arith.constant 12 : index
    %c0_97 = arith.constant 0 : index
    %c0_98 = arith.constant 0 : index
    %126 = vector.load %arg2[%c12, %c0_97, %c0_98] : memref<16x512x128xbf16, #tpu.memory_space<vmem>>, vector<1x512x128xbf16>
    %127 = vector.shape_cast %126 : vector<1x512x128xbf16> to vector<512x128xbf16>
    %cst_99 = arith.constant dense<0.000000e+00> : vector<16x128xf32>
    %128 = tpu.matmul %28, %127, %cst_99 {dimension_numbers = #tpu.dot_dimension_numbers<[1], [0], [0], [1], [0, 0, 1, 1], [], []>} : vector<16x512xbf16>, vector<512x128xbf16>, vector<16x128xf32> -> vector<16x128xf32>
    %129 = arith.truncf %128 : vector<16x128xf32> to vector<16x128xbf16>
    %c12_100 = arith.constant 12 : index
    %c0_101 = arith.constant 0 : index
    %c0_102 = arith.constant 0 : index
    %130 = vector.load %arg3[%c12_100, %c0_101, %c0_102] : memref<16x32x16xbf16, #tpu.memory_space<vmem>>, vector<1x32x16xbf16>
    %131 = vector.shape_cast %130 : vector<1x32x16xbf16> to vector<32x16xbf16>
    %cst_103 = arith.constant dense<0.000000e+00> : vector<32x128xf32>
    %132 = tpu.matmul %131, %129, %cst_103 {dimension_numbers = #tpu.dot_dimension_numbers<[1], [0], [0], [1], [0, 0, 1, 1], [], []>} : vector<32x16xbf16>, vector<16x128xbf16>, vector<32x128xf32> -> vector<32x128xf32>
    %133 = arith.addf %125, %132 : vector<32x128xf32>
    %c13 = arith.constant 13 : index
    %c0_104 = arith.constant 0 : index
    %c0_105 = arith.constant 0 : index
    %134 = vector.load %arg2[%c13, %c0_104, %c0_105] : memref<16x512x128xbf16, #tpu.memory_space<vmem>>, vector<1x512x128xbf16>
    %135 = vector.shape_cast %134 : vector<1x512x128xbf16> to vector<512x128xbf16>
    %cst_106 = arith.constant dense<0.000000e+00> : vector<16x128xf32>
    %136 = tpu.matmul %28, %135, %cst_106 {dimension_numbers = #tpu.dot_dimension_numbers<[1], [0], [0], [1], [0, 0, 1, 1], [], []>} : vector<16x512xbf16>, vector<512x128xbf16>, vector<16x128xf32> -> vector<16x128xf32>
    %137 = arith.truncf %136 : vector<16x128xf32> to vector<16x128xbf16>
    %c13_107 = arith.constant 13 : index
    %c0_108 = arith.constant 0 : index
    %c0_109 = arith.constant 0 : index
    %138 = vector.load %arg3[%c13_107, %c0_108, %c0_109] : memref<16x32x16xbf16, #tpu.memory_space<vmem>>, vector<1x32x16xbf16>
    %139 = vector.shape_cast %138 : vector<1x32x16xbf16> to vector<32x16xbf16>
    %cst_110 = arith.constant dense<0.000000e+00> : vector<32x128xf32>
    %140 = tpu.matmul %139, %137, %cst_110 {dimension_numbers = #tpu.dot_dimension_numbers<[1], [0], [0], [1], [0, 0, 1, 1], [], []>} : vector<32x16xbf16>, vector<16x128xbf16>, vector<32x128xf32> -> vector<32x128xf32>
    %141 = arith.addf %133, %140 : vector<32x128xf32>
    %c14 = arith.constant 14 : index
    %c0_111 = arith.constant 0 : index
    %c0_112 = arith.constant 0 : index
    %142 = vector.load %arg2[%c14, %c0_111, %c0_112] : memref<16x512x128xbf16, #tpu.memory_space<vmem>>, vector<1x512x128xbf16>
    %143 = vector.shape_cast %142 : vector<1x512x128xbf16> to vector<512x128xbf16>
    %cst_113 = arith.constant dense<0.000000e+00> : vector<16x128xf32>
    %144 = tpu.matmul %28, %143, %cst_113 {dimension_numbers = #tpu.dot_dimension_numbers<[1], [0], [0], [1], [0, 0, 1, 1], [], []>} : vector<16x512xbf16>, vector<512x128xbf16>, vector<16x128xf32> -> vector<16x128xf32>
    %145 = arith.truncf %144 : vector<16x128xf32> to vector<16x128xbf16>
    %c14_114 = arith.constant 14 : index
    %c0_115 = arith.constant 0 : index
    %c0_116 = arith.constant 0 : index
    %146 = vector.load %arg3[%c14_114, %c0_115, %c0_116] : memref<16x32x16xbf16, #tpu.memory_space<vmem>>, vector<1x32x16xbf16>
    %147 = vector.shape_cast %146 : vector<1x32x16xbf16> to vector<32x16xbf16>
    %cst_117 = arith.constant dense<0.000000e+00> : vector<32x128xf32>
    %148 = tpu.matmul %147, %145, %cst_117 {dimension_numbers = #tpu.dot_dimension_numbers<[1], [0], [0], [1], [0, 0, 1, 1], [], []>} : vector<32x16xbf16>, vector<16x128xbf16>, vector<32x128xf32> -> vector<32x128xf32>
    %149 = arith.addf %141, %148 : vector<32x128xf32>
    %c15 = arith.constant 15 : index
    %c0_118 = arith.constant 0 : index
    %c0_119 = arith.constant 0 : index
    %150 = vector.load %arg2[%c15, %c0_118, %c0_119] : memref<16x512x128xbf16, #tpu.memory_space<vmem>>, vector<1x512x128xbf16>
    %151 = vector.shape_cast %150 : vector<1x512x128xbf16> to vector<512x128xbf16>
    %cst_120 = arith.constant dense<0.000000e+00> : vector<16x128xf32>
    %152 = tpu.matmul %28, %151, %cst_120 {dimension_numbers = #tpu.dot_dimension_numbers<[1], [0], [0], [1], [0, 0, 1, 1], [], []>} : vector<16x512xbf16>, vector<512x128xbf16>, vector<16x128xf32> -> vector<16x128xf32>
    %153 = arith.truncf %152 : vector<16x128xf32> to vector<16x128xbf16>
    %c15_121 = arith.constant 15 : index
    %c0_122 = arith.constant 0 : index
    %c0_123 = arith.constant 0 : index
    %154 = vector.load %arg3[%c15_121, %c0_122, %c0_123] : memref<16x32x16xbf16, #tpu.memory_space<vmem>>, vector<1x32x16xbf16>
    %155 = vector.shape_cast %154 : vector<1x32x16xbf16> to vector<32x16xbf16>
    %cst_124 = arith.constant dense<0.000000e+00> : vector<32x128xf32>
    %156 = tpu.matmul %155, %153, %cst_124 {dimension_numbers = #tpu.dot_dimension_numbers<[1], [0], [0], [1], [0, 0, 1, 1], [], []>} : vector<32x16xbf16>, vector<16x128xbf16>, vector<32x128xf32> -> vector<32x128xf32>
    %157 = arith.addf %149, %156 : vector<32x128xf32>
    %cst_125 = arith.constant dense<0.000000e+00> : vector<32xf32>
    %158 = vector.multi_reduction <add>, %157, %cst_125 [1] : vector<32x128xf32> to vector<32xf32>
    %159 = vector.shape_cast %158 : vector<32xf32> to vector<32x1xf32>
    %160 = arith.mulf %157, %157 : vector<32x128xf32>
    %cst_126 = arith.constant dense<0.000000e+00> : vector<32xf32>
    %161 = vector.multi_reduction <add>, %160, %cst_126 [1] : vector<32x128xf32> to vector<32xf32>
    %162 = vector.shape_cast %161 : vector<32xf32> to vector<32x1xf32>
    %cst_127 = arith.constant 7.812500e-03 : f32
    %163 = vector.broadcast %cst_127 : f32 to vector<32x1xf32>
    %164 = arith.mulf %159, %163 : vector<32x1xf32>
    %cst_128 = arith.constant 7.812500e-03 : f32
    %165 = vector.broadcast %cst_128 : f32 to vector<32x1xf32>
    %166 = arith.mulf %162, %165 : vector<32x1xf32>
    %167 = arith.mulf %164, %164 : vector<32x1xf32>
    %168 = arith.subf %166, %167 : vector<32x1xf32>
    %cst_129 = arith.constant 0.000000e+00 : f32
    %169 = vector.broadcast %cst_129 : f32 to vector<32x1xf32>
    %170 = arith.maximumf %168, %169 : vector<32x1xf32>
    %171 = vector.broadcast %164 : vector<32x1xf32> to vector<32x128xf32>
    %172 = arith.subf %157, %171 : vector<32x128xf32>
    %cst_130 = arith.constant 9.99999974E-6 : f32
    %173 = vector.broadcast %cst_130 : f32 to vector<32x1xf32>
    %174 = arith.addf %170, %173 : vector<32x1xf32>
    %175 = math.rsqrt %174 : vector<32x1xf32>
    %176 = vector.broadcast %175 : vector<32x1xf32> to vector<32x128xf32>
    %177 = arith.mulf %172, %176 : vector<32x128xf32>
    %cst_131 = arith.constant 0.000000e+00 : f32
    %178 = vector.broadcast %cst_131 : f32 to vector<32x128xf32>
    %179 = arith.cmpf oge, %177, %178 : vector<32x128xf32>
    %cst_132 = arith.constant 0.00999999977 : f32
    %180 = vector.broadcast %cst_132 : f32 to vector<32x128xf32>
    %181 = arith.mulf %180, %177 : vector<32x128xf32>
    %182 = arith.select %179, %177, %181 : vector<32x128xi1>, vector<32x128xf32>
    %183 = arith.truncf %182 : vector<32x128xf32> to vector<32x128xbf16>
    %cst_133 = arith.constant 0.000000e+00 : f32
    %184 = vector.broadcast %cst_133 : f32 to vector<64x32xf32>
    %c0_134 = arith.constant 0 : index
    %c0_135 = arith.constant 0 : index
    %c0_136 = arith.constant 0 : index
    %185 = vector.load %arg4[%c0_134, %c0_135, %c0_136] : memref<16x128x32xbf16, #tpu.memory_space<vmem>>, vector<1x128x32xbf16>
    %186 = vector.shape_cast %185 : vector<1x128x32xbf16> to vector<128x32xbf16>
    %cst_137 = arith.constant dense<0.000000e+00> : vector<32x32xf32>
    %187 = tpu.matmul %183, %186, %cst_137 {dimension_numbers = #tpu.dot_dimension_numbers<[1], [0], [0], [1], [0, 0, 1, 1], [], []>} : vector<32x128xbf16>, vector<128x32xbf16>, vector<32x32xf32> -> vector<32x32xf32>
    %188 = arith.truncf %187 : vector<32x32xf32> to vector<32x32xbf16>
    %c0_138 = arith.constant 0 : index
    %c0_139 = arith.constant 0 : index
    %c0_140 = arith.constant 0 : index
    %189 = vector.load %arg5[%c0_138, %c0_139, %c0_140] : memref<16x64x32xbf16, #tpu.memory_space<vmem>>, vector<1x64x32xbf16>
    %190 = vector.shape_cast %189 : vector<1x64x32xbf16> to vector<64x32xbf16>
    %cst_141 = arith.constant dense<0.000000e+00> : vector<64x32xf32>
    %191 = tpu.matmul %190, %188, %cst_141 {dimension_numbers = #tpu.dot_dimension_numbers<[1], [0], [0], [1], [0, 0, 1, 1], [], []>} : vector<64x32xbf16>, vector<32x32xbf16>, vector<64x32xf32> -> vector<64x32xf32>
    %192 = arith.addf %184, %191 : vector<64x32xf32>
    %c1_142 = arith.constant 1 : index
    %c0_143 = arith.constant 0 : index
    %c0_144 = arith.constant 0 : index
    %193 = vector.load %arg4[%c1_142, %c0_143, %c0_144] : memref<16x128x32xbf16, #tpu.memory_space<vmem>>, vector<1x128x32xbf16>
    %194 = vector.shape_cast %193 : vector<1x128x32xbf16> to vector<128x32xbf16>
    %cst_145 = arith.constant dense<0.000000e+00> : vector<32x32xf32>
    %195 = tpu.matmul %183, %194, %cst_145 {dimension_numbers = #tpu.dot_dimension_numbers<[1], [0], [0], [1], [0, 0, 1, 1], [], []>} : vector<32x128xbf16>, vector<128x32xbf16>, vector<32x32xf32> -> vector<32x32xf32>
    %196 = arith.truncf %195 : vector<32x32xf32> to vector<32x32xbf16>
    %c1_146 = arith.constant 1 : index
    %c0_147 = arith.constant 0 : index
    %c0_148 = arith.constant 0 : index
    %197 = vector.load %arg5[%c1_146, %c0_147, %c0_148] : memref<16x64x32xbf16, #tpu.memory_space<vmem>>, vector<1x64x32xbf16>
    %198 = vector.shape_cast %197 : vector<1x64x32xbf16> to vector<64x32xbf16>
    %cst_149 = arith.constant dense<0.000000e+00> : vector<64x32xf32>
    %199 = tpu.matmul %198, %196, %cst_149 {dimension_numbers = #tpu.dot_dimension_numbers<[1], [0], [0], [1], [0, 0, 1, 1], [], []>} : vector<64x32xbf16>, vector<32x32xbf16>, vector<64x32xf32> -> vector<64x32xf32>
    %200 = arith.addf %192, %199 : vector<64x32xf32>
    %c2_150 = arith.constant 2 : index
    %c0_151 = arith.constant 0 : index
    %c0_152 = arith.constant 0 : index
    %201 = vector.load %arg4[%c2_150, %c0_151, %c0_152] : memref<16x128x32xbf16, #tpu.memory_space<vmem>>, vector<1x128x32xbf16>
    %202 = vector.shape_cast %201 : vector<1x128x32xbf16> to vector<128x32xbf16>
    %cst_153 = arith.constant dense<0.000000e+00> : vector<32x32xf32>
    %203 = tpu.matmul %183, %202, %cst_153 {dimension_numbers = #tpu.dot_dimension_numbers<[1], [0], [0], [1], [0, 0, 1, 1], [], []>} : vector<32x128xbf16>, vector<128x32xbf16>, vector<32x32xf32> -> vector<32x32xf32>
    %204 = arith.truncf %203 : vector<32x32xf32> to vector<32x32xbf16>
    %c2_154 = arith.constant 2 : index
    %c0_155 = arith.constant 0 : index
    %c0_156 = arith.constant 0 : index
    %205 = vector.load %arg5[%c2_154, %c0_155, %c0_156] : memref<16x64x32xbf16, #tpu.memory_space<vmem>>, vector<1x64x32xbf16>
    %206 = vector.shape_cast %205 : vector<1x64x32xbf16> to vector<64x32xbf16>
    %cst_157 = arith.constant dense<0.000000e+00> : vector<64x32xf32>
    %207 = tpu.matmul %206, %204, %cst_157 {dimension_numbers = #tpu.dot_dimension_numbers<[1], [0], [0], [1], [0, 0, 1, 1], [], []>} : vector<64x32xbf16>, vector<32x32xbf16>, vector<64x32xf32> -> vector<64x32xf32>
    %208 = arith.addf %200, %207 : vector<64x32xf32>
    %c3_158 = arith.constant 3 : index
    %c0_159 = arith.constant 0 : index
    %c0_160 = arith.constant 0 : index
    %209 = vector.load %arg4[%c3_158, %c0_159, %c0_160] : memref<16x128x32xbf16, #tpu.memory_space<vmem>>, vector<1x128x32xbf16>
    %210 = vector.shape_cast %209 : vector<1x128x32xbf16> to vector<128x32xbf16>
    %cst_161 = arith.constant dense<0.000000e+00> : vector<32x32xf32>
    %211 = tpu.matmul %183, %210, %cst_161 {dimension_numbers = #tpu.dot_dimension_numbers<[1], [0], [0], [1], [0, 0, 1, 1], [], []>} : vector<32x128xbf16>, vector<128x32xbf16>, vector<32x32xf32> -> vector<32x32xf32>
    %212 = arith.truncf %211 : vector<32x32xf32> to vector<32x32xbf16>
    %c3_162 = arith.constant 3 : index
    %c0_163 = arith.constant 0 : index
    %c0_164 = arith.constant 0 : index
    %213 = vector.load %arg5[%c3_162, %c0_163, %c0_164] : memref<16x64x32xbf16, #tpu.memory_space<vmem>>, vector<1x64x32xbf16>
    %214 = vector.shape_cast %213 : vector<1x64x32xbf16> to vector<64x32xbf16>
    %cst_165 = arith.constant dense<0.000000e+00> : vector<64x32xf32>
    %215 = tpu.matmul %214, %212, %cst_165 {dimension_numbers = #tpu.dot_dimension_numbers<[1], [0], [0], [1], [0, 0, 1, 1], [], []>} : vector<64x32xbf16>, vector<32x32xbf16>, vector<64x32xf32> -> vector<64x32xf32>
    %216 = arith.addf %208, %215 : vector<64x32xf32>
    %c4_166 = arith.constant 4 : index
    %c0_167 = arith.constant 0 : index
    %c0_168 = arith.constant 0 : index
    %217 = vector.load %arg4[%c4_166, %c0_167, %c0_168] : memref<16x128x32xbf16, #tpu.memory_space<vmem>>, vector<1x128x32xbf16>
    %218 = vector.shape_cast %217 : vector<1x128x32xbf16> to vector<128x32xbf16>
    %cst_169 = arith.constant dense<0.000000e+00> : vector<32x32xf32>
    %219 = tpu.matmul %183, %218, %cst_169 {dimension_numbers = #tpu.dot_dimension_numbers<[1], [0], [0], [1], [0, 0, 1, 1], [], []>} : vector<32x128xbf16>, vector<128x32xbf16>, vector<32x32xf32> -> vector<32x32xf32>
    %220 = arith.truncf %219 : vector<32x32xf32> to vector<32x32xbf16>
    %c4_170 = arith.constant 4 : index
    %c0_171 = arith.constant 0 : index
    %c0_172 = arith.constant 0 : index
    %221 = vector.load %arg5[%c4_170, %c0_171, %c0_172] : memref<16x64x32xbf16, #tpu.memory_space<vmem>>, vector<1x64x32xbf16>
    %222 = vector.shape_cast %221 : vector<1x64x32xbf16> to vector<64x32xbf16>
    %cst_173 = arith.constant dense<0.000000e+00> : vector<64x32xf32>
    %223 = tpu.matmul %222, %220, %cst_173 {dimension_numbers = #tpu.dot_dimension_numbers<[1], [0], [0], [1], [0, 0, 1, 1], [], []>} : vector<64x32xbf16>, vector<32x32xbf16>, vector<64x32xf32> -> vector<64x32xf32>
    %224 = arith.addf %216, %223 : vector<64x32xf32>
    %c5_174 = arith.constant 5 : index
    %c0_175 = arith.constant 0 : index
    %c0_176 = arith.constant 0 : index
    %225 = vector.load %arg4[%c5_174, %c0_175, %c0_176] : memref<16x128x32xbf16, #tpu.memory_space<vmem>>, vector<1x128x32xbf16>
    %226 = vector.shape_cast %225 : vector<1x128x32xbf16> to vector<128x32xbf16>
    %cst_177 = arith.constant dense<0.000000e+00> : vector<32x32xf32>
    %227 = tpu.matmul %183, %226, %cst_177 {dimension_numbers = #tpu.dot_dimension_numbers<[1], [0], [0], [1], [0, 0, 1, 1], [], []>} : vector<32x128xbf16>, vector<128x32xbf16>, vector<32x32xf32> -> vector<32x32xf32>
    %228 = arith.truncf %227 : vector<32x32xf32> to vector<32x32xbf16>
    %c5_178 = arith.constant 5 : index
    %c0_179 = arith.constant 0 : index
    %c0_180 = arith.constant 0 : index
    %229 = vector.load %arg5[%c5_178, %c0_179, %c0_180] : memref<16x64x32xbf16, #tpu.memory_space<vmem>>, vector<1x64x32xbf16>
    %230 = vector.shape_cast %229 : vector<1x64x32xbf16> to vector<64x32xbf16>
    %cst_181 = arith.constant dense<0.000000e+00> : vector<64x32xf32>
    %231 = tpu.matmul %230, %228, %cst_181 {dimension_numbers = #tpu.dot_dimension_numbers<[1], [0], [0], [1], [0, 0, 1, 1], [], []>} : vector<64x32xbf16>, vector<32x32xbf16>, vector<64x32xf32> -> vector<64x32xf32>
    %232 = arith.addf %224, %231 : vector<64x32xf32>
    %c6_182 = arith.constant 6 : index
    %c0_183 = arith.constant 0 : index
    %c0_184 = arith.constant 0 : index
    %233 = vector.load %arg4[%c6_182, %c0_183, %c0_184] : memref<16x128x32xbf16, #tpu.memory_space<vmem>>, vector<1x128x32xbf16>
    %234 = vector.shape_cast %233 : vector<1x128x32xbf16> to vector<128x32xbf16>
    %cst_185 = arith.constant dense<0.000000e+00> : vector<32x32xf32>
    %235 = tpu.matmul %183, %234, %cst_185 {dimension_numbers = #tpu.dot_dimension_numbers<[1], [0], [0], [1], [0, 0, 1, 1], [], []>} : vector<32x128xbf16>, vector<128x32xbf16>, vector<32x32xf32> -> vector<32x32xf32>
    %236 = arith.truncf %235 : vector<32x32xf32> to vector<32x32xbf16>
    %c6_186 = arith.constant 6 : index
    %c0_187 = arith.constant 0 : index
    %c0_188 = arith.constant 0 : index
    %237 = vector.load %arg5[%c6_186, %c0_187, %c0_188] : memref<16x64x32xbf16, #tpu.memory_space<vmem>>, vector<1x64x32xbf16>
    %238 = vector.shape_cast %237 : vector<1x64x32xbf16> to vector<64x32xbf16>
    %cst_189 = arith.constant dense<0.000000e+00> : vector<64x32xf32>
    %239 = tpu.matmul %238, %236, %cst_189 {dimension_numbers = #tpu.dot_dimension_numbers<[1], [0], [0], [1], [0, 0, 1, 1], [], []>} : vector<64x32xbf16>, vector<32x32xbf16>, vector<64x32xf32> -> vector<64x32xf32>
    %240 = arith.addf %232, %239 : vector<64x32xf32>
    %c7_190 = arith.constant 7 : index
    %c0_191 = arith.constant 0 : index
    %c0_192 = arith.constant 0 : index
    %241 = vector.load %arg4[%c7_190, %c0_191, %c0_192] : memref<16x128x32xbf16, #tpu.memory_space<vmem>>, vector<1x128x32xbf16>
    %242 = vector.shape_cast %241 : vector<1x128x32xbf16> to vector<128x32xbf16>
    %cst_193 = arith.constant dense<0.000000e+00> : vector<32x32xf32>
    %243 = tpu.matmul %183, %242, %cst_193 {dimension_numbers = #tpu.dot_dimension_numbers<[1], [0], [0], [1], [0, 0, 1, 1], [], []>} : vector<32x128xbf16>, vector<128x32xbf16>, vector<32x32xf32> -> vector<32x32xf32>
    %244 = arith.truncf %243 : vector<32x32xf32> to vector<32x32xbf16>
    %c7_194 = arith.constant 7 : index
    %c0_195 = arith.constant 0 : index
    %c0_196 = arith.constant 0 : index
    %245 = vector.load %arg5[%c7_194, %c0_195, %c0_196] : memref<16x64x32xbf16, #tpu.memory_space<vmem>>, vector<1x64x32xbf16>
    %246 = vector.shape_cast %245 : vector<1x64x32xbf16> to vector<64x32xbf16>
    %cst_197 = arith.constant dense<0.000000e+00> : vector<64x32xf32>
    %247 = tpu.matmul %246, %244, %cst_197 {dimension_numbers = #tpu.dot_dimension_numbers<[1], [0], [0], [1], [0, 0, 1, 1], [], []>} : vector<64x32xbf16>, vector<32x32xbf16>, vector<64x32xf32> -> vector<64x32xf32>
    %248 = arith.addf %240, %247 : vector<64x32xf32>
    %c8_198 = arith.constant 8 : index
    %c0_199 = arith.constant 0 : index
    %c0_200 = arith.constant 0 : index
    %249 = vector.load %arg4[%c8_198, %c0_199, %c0_200] : memref<16x128x32xbf16, #tpu.memory_space<vmem>>, vector<1x128x32xbf16>
    %250 = vector.shape_cast %249 : vector<1x128x32xbf16> to vector<128x32xbf16>
    %cst_201 = arith.constant dense<0.000000e+00> : vector<32x32xf32>
    %251 = tpu.matmul %183, %250, %cst_201 {dimension_numbers = #tpu.dot_dimension_numbers<[1], [0], [0], [1], [0, 0, 1, 1], [], []>} : vector<32x128xbf16>, vector<128x32xbf16>, vector<32x32xf32> -> vector<32x32xf32>
    %252 = arith.truncf %251 : vector<32x32xf32> to vector<32x32xbf16>
    %c8_202 = arith.constant 8 : index
    %c0_203 = arith.constant 0 : index
    %c0_204 = arith.constant 0 : index
    %253 = vector.load %arg5[%c8_202, %c0_203, %c0_204] : memref<16x64x32xbf16, #tpu.memory_space<vmem>>, vector<1x64x32xbf16>
    %254 = vector.shape_cast %253 : vector<1x64x32xbf16> to vector<64x32xbf16>
    %cst_205 = arith.constant dense<0.000000e+00> : vector<64x32xf32>
    %255 = tpu.matmul %254, %252, %cst_205 {dimension_numbers = #tpu.dot_dimension_numbers<[1], [0], [0], [1], [0, 0, 1, 1], [], []>} : vector<64x32xbf16>, vector<32x32xbf16>, vector<64x32xf32> -> vector<64x32xf32>
    %256 = arith.addf %248, %255 : vector<64x32xf32>
    %c9_206 = arith.constant 9 : index
    %c0_207 = arith.constant 0 : index
    %c0_208 = arith.constant 0 : index
    %257 = vector.load %arg4[%c9_206, %c0_207, %c0_208] : memref<16x128x32xbf16, #tpu.memory_space<vmem>>, vector<1x128x32xbf16>
    %258 = vector.shape_cast %257 : vector<1x128x32xbf16> to vector<128x32xbf16>
    %cst_209 = arith.constant dense<0.000000e+00> : vector<32x32xf32>
    %259 = tpu.matmul %183, %258, %cst_209 {dimension_numbers = #tpu.dot_dimension_numbers<[1], [0], [0], [1], [0, 0, 1, 1], [], []>} : vector<32x128xbf16>, vector<128x32xbf16>, vector<32x32xf32> -> vector<32x32xf32>
    %260 = arith.truncf %259 : vector<32x32xf32> to vector<32x32xbf16>
    %c9_210 = arith.constant 9 : index
    %c0_211 = arith.constant 0 : index
    %c0_212 = arith.constant 0 : index
    %261 = vector.load %arg5[%c9_210, %c0_211, %c0_212] : memref<16x64x32xbf16, #tpu.memory_space<vmem>>, vector<1x64x32xbf16>
    %262 = vector.shape_cast %261 : vector<1x64x32xbf16> to vector<64x32xbf16>
    %cst_213 = arith.constant dense<0.000000e+00> : vector<64x32xf32>
    %263 = tpu.matmul %262, %260, %cst_213 {dimension_numbers = #tpu.dot_dimension_numbers<[1], [0], [0], [1], [0, 0, 1, 1], [], []>} : vector<64x32xbf16>, vector<32x32xbf16>, vector<64x32xf32> -> vector<64x32xf32>
    %264 = arith.addf %256, %263 : vector<64x32xf32>
    %c10_214 = arith.constant 10 : index
    %c0_215 = arith.constant 0 : index
    %c0_216 = arith.constant 0 : index
    %265 = vector.load %arg4[%c10_214, %c0_215, %c0_216] : memref<16x128x32xbf16, #tpu.memory_space<vmem>>, vector<1x128x32xbf16>
    %266 = vector.shape_cast %265 : vector<1x128x32xbf16> to vector<128x32xbf16>
    %cst_217 = arith.constant dense<0.000000e+00> : vector<32x32xf32>
    %267 = tpu.matmul %183, %266, %cst_217 {dimension_numbers = #tpu.dot_dimension_numbers<[1], [0], [0], [1], [0, 0, 1, 1], [], []>} : vector<32x128xbf16>, vector<128x32xbf16>, vector<32x32xf32> -> vector<32x32xf32>
    %268 = arith.truncf %267 : vector<32x32xf32> to vector<32x32xbf16>
    %c10_218 = arith.constant 10 : index
    %c0_219 = arith.constant 0 : index
    %c0_220 = arith.constant 0 : index
    %269 = vector.load %arg5[%c10_218, %c0_219, %c0_220] : memref<16x64x32xbf16, #tpu.memory_space<vmem>>, vector<1x64x32xbf16>
    %270 = vector.shape_cast %269 : vector<1x64x32xbf16> to vector<64x32xbf16>
    %cst_221 = arith.constant dense<0.000000e+00> : vector<64x32xf32>
    %271 = tpu.matmul %270, %268, %cst_221 {dimension_numbers = #tpu.dot_dimension_numbers<[1], [0], [0], [1], [0, 0, 1, 1], [], []>} : vector<64x32xbf16>, vector<32x32xbf16>, vector<64x32xf32> -> vector<64x32xf32>
    %272 = arith.addf %264, %271 : vector<64x32xf32>
    %c11_222 = arith.constant 11 : index
    %c0_223 = arith.constant 0 : index
    %c0_224 = arith.constant 0 : index
    %273 = vector.load %arg4[%c11_222, %c0_223, %c0_224] : memref<16x128x32xbf16, #tpu.memory_space<vmem>>, vector<1x128x32xbf16>
    %274 = vector.shape_cast %273 : vector<1x128x32xbf16> to vector<128x32xbf16>
    %cst_225 = arith.constant dense<0.000000e+00> : vector<32x32xf32>
    %275 = tpu.matmul %183, %274, %cst_225 {dimension_numbers = #tpu.dot_dimension_numbers<[1], [0], [0], [1], [0, 0, 1, 1], [], []>} : vector<32x128xbf16>, vector<128x32xbf16>, vector<32x32xf32> -> vector<32x32xf32>
    %276 = arith.truncf %275 : vector<32x32xf32> to vector<32x32xbf16>
    %c11_226 = arith.constant 11 : index
    %c0_227 = arith.constant 0 : index
    %c0_228 = arith.constant 0 : index
    %277 = vector.load %arg5[%c11_226, %c0_227, %c0_228] : memref<16x64x32xbf16, #tpu.memory_space<vmem>>, vector<1x64x32xbf16>
    %278 = vector.shape_cast %277 : vector<1x64x32xbf16> to vector<64x32xbf16>
    %cst_229 = arith.constant dense<0.000000e+00> : vector<64x32xf32>
    %279 = tpu.matmul %278, %276, %cst_229 {dimension_numbers = #tpu.dot_dimension_numbers<[1], [0], [0], [1], [0, 0, 1, 1], [], []>} : vector<64x32xbf16>, vector<32x32xbf16>, vector<64x32xf32> -> vector<64x32xf32>
    %280 = arith.addf %272, %279 : vector<64x32xf32>
    %c12_230 = arith.constant 12 : index
    %c0_231 = arith.constant 0 : index
    %c0_232 = arith.constant 0 : index
    %281 = vector.load %arg4[%c12_230, %c0_231, %c0_232] : memref<16x128x32xbf16, #tpu.memory_space<vmem>>, vector<1x128x32xbf16>
    %282 = vector.shape_cast %281 : vector<1x128x32xbf16> to vector<128x32xbf16>
    %cst_233 = arith.constant dense<0.000000e+00> : vector<32x32xf32>
    %283 = tpu.matmul %183, %282, %cst_233 {dimension_numbers = #tpu.dot_dimension_numbers<[1], [0], [0], [1], [0, 0, 1, 1], [], []>} : vector<32x128xbf16>, vector<128x32xbf16>, vector<32x32xf32> -> vector<32x32xf32>
    %284 = arith.truncf %283 : vector<32x32xf32> to vector<32x32xbf16>
    %c12_234 = arith.constant 12 : index
    %c0_235 = arith.constant 0 : index
    %c0_236 = arith.constant 0 : index
    %285 = vector.load %arg5[%c12_234, %c0_235, %c0_236] : memref<16x64x32xbf16, #tpu.memory_space<vmem>>, vector<1x64x32xbf16>
    %286 = vector.shape_cast %285 : vector<1x64x32xbf16> to vector<64x32xbf16>
    %cst_237 = arith.constant dense<0.000000e+00> : vector<64x32xf32>
    %287 = tpu.matmul %286, %284, %cst_237 {dimension_numbers = #tpu.dot_dimension_numbers<[1], [0], [0], [1], [0, 0, 1, 1], [], []>} : vector<64x32xbf16>, vector<32x32xbf16>, vector<64x32xf32> -> vector<64x32xf32>
    %288 = arith.addf %280, %287 : vector<64x32xf32>
    %c13_238 = arith.constant 13 : index
    %c0_239 = arith.constant 0 : index
    %c0_240 = arith.constant 0 : index
    %289 = vector.load %arg4[%c13_238, %c0_239, %c0_240] : memref<16x128x32xbf16, #tpu.memory_space<vmem>>, vector<1x128x32xbf16>
    %290 = vector.shape_cast %289 : vector<1x128x32xbf16> to vector<128x32xbf16>
    %cst_241 = arith.constant dense<0.000000e+00> : vector<32x32xf32>
    %291 = tpu.matmul %183, %290, %cst_241 {dimension_numbers = #tpu.dot_dimension_numbers<[1], [0], [0], [1], [0, 0, 1, 1], [], []>} : vector<32x128xbf16>, vector<128x32xbf16>, vector<32x32xf32> -> vector<32x32xf32>
    %292 = arith.truncf %291 : vector<32x32xf32> to vector<32x32xbf16>
    %c13_242 = arith.constant 13 : index
    %c0_243 = arith.constant 0 : index
    %c0_244 = arith.constant 0 : index
    %293 = vector.load %arg5[%c13_242, %c0_243, %c0_244] : memref<16x64x32xbf16, #tpu.memory_space<vmem>>, vector<1x64x32xbf16>
    %294 = vector.shape_cast %293 : vector<1x64x32xbf16> to vector<64x32xbf16>
    %cst_245 = arith.constant dense<0.000000e+00> : vector<64x32xf32>
    %295 = tpu.matmul %294, %292, %cst_245 {dimension_numbers = #tpu.dot_dimension_numbers<[1], [0], [0], [1], [0, 0, 1, 1], [], []>} : vector<64x32xbf16>, vector<32x32xbf16>, vector<64x32xf32> -> vector<64x32xf32>
    %296 = arith.addf %288, %295 : vector<64x32xf32>
    %c14_246 = arith.constant 14 : index
    %c0_247 = arith.constant 0 : index
    %c0_248 = arith.constant 0 : index
    %297 = vector.load %arg4[%c14_246, %c0_247, %c0_248] : memref<16x128x32xbf16, #tpu.memory_space<vmem>>, vector<1x128x32xbf16>
    %298 = vector.shape_cast %297 : vector<1x128x32xbf16> to vector<128x32xbf16>
    %cst_249 = arith.constant dense<0.000000e+00> : vector<32x32xf32>
    %299 = tpu.matmul %183, %298, %cst_249 {dimension_numbers = #tpu.dot_dimension_numbers<[1], [0], [0], [1], [0, 0, 1, 1], [], []>} : vector<32x128xbf16>, vector<128x32xbf16>, vector<32x32xf32> -> vector<32x32xf32>
    %300 = arith.truncf %299 : vector<32x32xf32> to vector<32x32xbf16>
    %c14_250 = arith.constant 14 : index
    %c0_251 = arith.constant 0 : index
    %c0_252 = arith.constant 0 : index
    %301 = vector.load %arg5[%c14_250, %c0_251, %c0_252] : memref<16x64x32xbf16, #tpu.memory_space<vmem>>, vector<1x64x32xbf16>
    %302 = vector.shape_cast %301 : vector<1x64x32xbf16> to vector<64x32xbf16>
    %cst_253 = arith.constant dense<0.000000e+00> : vector<64x32xf32>
    %303 = tpu.matmul %302, %300, %cst_253 {dimension_numbers = #tpu.dot_dimension_numbers<[1], [0], [0], [1], [0, 0, 1, 1], [], []>} : vector<64x32xbf16>, vector<32x32xbf16>, vector<64x32xf32> -> vector<64x32xf32>
    %304 = arith.addf %296, %303 : vector<64x32xf32>
    %c15_254 = arith.constant 15 : index
    %c0_255 = arith.constant 0 : index
    %c0_256 = arith.constant 0 : index
    %305 = vector.load %arg4[%c15_254, %c0_255, %c0_256] : memref<16x128x32xbf16, #tpu.memory_space<vmem>>, vector<1x128x32xbf16>
    %306 = vector.shape_cast %305 : vector<1x128x32xbf16> to vector<128x32xbf16>
    %cst_257 = arith.constant dense<0.000000e+00> : vector<32x32xf32>
    %307 = tpu.matmul %183, %306, %cst_257 {dimension_numbers = #tpu.dot_dimension_numbers<[1], [0], [0], [1], [0, 0, 1, 1], [], []>} : vector<32x128xbf16>, vector<128x32xbf16>, vector<32x32xf32> -> vector<32x32xf32>
    %308 = arith.truncf %307 : vector<32x32xf32> to vector<32x32xbf16>
    %c15_258 = arith.constant 15 : index
    %c0_259 = arith.constant 0 : index
    %c0_260 = arith.constant 0 : index
    %309 = vector.load %arg5[%c15_258, %c0_259, %c0_260] : memref<16x64x32xbf16, #tpu.memory_space<vmem>>, vector<1x64x32xbf16>
    %310 = vector.shape_cast %309 : vector<1x64x32xbf16> to vector<64x32xbf16>
    %cst_261 = arith.constant dense<0.000000e+00> : vector<64x32xf32>
    %311 = tpu.matmul %310, %308, %cst_261 {dimension_numbers = #tpu.dot_dimension_numbers<[1], [0], [0], [1], [0, 0, 1, 1], [], []>} : vector<64x32xbf16>, vector<32x32xbf16>, vector<64x32xf32> -> vector<64x32xf32>
    %312 = arith.addf %304, %311 : vector<64x32xf32>
    %cst_262 = arith.constant dense<0.000000e+00> : vector<64xf32>
    %313 = vector.multi_reduction <add>, %312, %cst_262 [1] : vector<64x32xf32> to vector<64xf32>
    %314 = vector.shape_cast %313 : vector<64xf32> to vector<64x1xf32>
    %315 = arith.mulf %312, %312 : vector<64x32xf32>
    %cst_263 = arith.constant dense<0.000000e+00> : vector<64xf32>
    %316 = vector.multi_reduction <add>, %315, %cst_263 [1] : vector<64x32xf32> to vector<64xf32>
    %317 = vector.shape_cast %316 : vector<64xf32> to vector<64x1xf32>
    %cst_264 = arith.constant 3.125000e-02 : f32
    %318 = vector.broadcast %cst_264 : f32 to vector<64x1xf32>
    %319 = arith.mulf %314, %318 : vector<64x1xf32>
    %cst_265 = arith.constant 3.125000e-02 : f32
    %320 = vector.broadcast %cst_265 : f32 to vector<64x1xf32>
    %321 = arith.mulf %317, %320 : vector<64x1xf32>
    %322 = arith.mulf %319, %319 : vector<64x1xf32>
    %323 = arith.subf %321, %322 : vector<64x1xf32>
    %cst_266 = arith.constant 0.000000e+00 : f32
    %324 = vector.broadcast %cst_266 : f32 to vector<64x1xf32>
    %325 = arith.maximumf %323, %324 : vector<64x1xf32>
    %326 = vector.broadcast %319 : vector<64x1xf32> to vector<64x32xf32>
    %327 = arith.subf %312, %326 : vector<64x32xf32>
    %cst_267 = arith.constant 9.99999974E-6 : f32
    %328 = vector.broadcast %cst_267 : f32 to vector<64x1xf32>
    %329 = arith.addf %325, %328 : vector<64x1xf32>
    %330 = math.rsqrt %329 : vector<64x1xf32>
    %331 = vector.broadcast %330 : vector<64x1xf32> to vector<64x32xf32>
    %332 = arith.mulf %327, %331 : vector<64x32xf32>
    %cst_268 = arith.constant 0.000000e+00 : f32
    %333 = vector.broadcast %cst_268 : f32 to vector<64x32xf32>
    %334 = arith.cmpf oge, %332, %333 : vector<64x32xf32>
    %cst_269 = arith.constant 0.00999999977 : f32
    %335 = vector.broadcast %cst_269 : f32 to vector<64x32xf32>
    %336 = arith.mulf %335, %332 : vector<64x32xf32>
    %337 = arith.select %334, %332, %336 : vector<64x32xi1>, vector<64x32xf32>
    %338 = arith.truncf %337 : vector<64x32xf32> to vector<64x32xbf16>
    %cst_270 = arith.constant 0.000000e+00 : f32
    %339 = vector.broadcast %cst_270 : f32 to vector<128x8xf32>
    %c0_271 = arith.constant 0 : index
    %c0_272 = arith.constant 0 : index
    %c0_273 = arith.constant 0 : index
    %340 = vector.load %arg6[%c0_271, %c0_272, %c0_273] : memref<16x32x8xbf16, #tpu.memory_space<vmem>>, vector<1x32x8xbf16>
    %341 = vector.shape_cast %340 : vector<1x32x8xbf16> to vector<32x8xbf16>
    %cst_274 = arith.constant dense<0.000000e+00> : vector<64x8xf32>
    %342 = tpu.matmul %338, %341, %cst_274 {dimension_numbers = #tpu.dot_dimension_numbers<[1], [0], [0], [1], [0, 0, 1, 1], [], []>} : vector<64x32xbf16>, vector<32x8xbf16>, vector<64x8xf32> -> vector<64x8xf32>
    %343 = arith.truncf %342 : vector<64x8xf32> to vector<64x8xbf16>
    %c0_275 = arith.constant 0 : index
    %c0_276 = arith.constant 0 : index
    %c0_277 = arith.constant 0 : index
    %344 = vector.load %arg7[%c0_275, %c0_276, %c0_277] : memref<16x128x64xbf16, #tpu.memory_space<vmem>>, vector<1x128x64xbf16>
    %345 = vector.shape_cast %344 : vector<1x128x64xbf16> to vector<128x64xbf16>
    %cst_278 = arith.constant dense<0.000000e+00> : vector<128x8xf32>
    %346 = tpu.matmul %345, %343, %cst_278 {dimension_numbers = #tpu.dot_dimension_numbers<[1], [0], [0], [1], [0, 0, 1, 1], [], []>} : vector<128x64xbf16>, vector<64x8xbf16>, vector<128x8xf32> -> vector<128x8xf32>
    %347 = arith.addf %339, %346 : vector<128x8xf32>
    %c1_279 = arith.constant 1 : index
    %c0_280 = arith.constant 0 : index
    %c0_281 = arith.constant 0 : index
    %348 = vector.load %arg6[%c1_279, %c0_280, %c0_281] : memref<16x32x8xbf16, #tpu.memory_space<vmem>>, vector<1x32x8xbf16>
    %349 = vector.shape_cast %348 : vector<1x32x8xbf16> to vector<32x8xbf16>
    %cst_282 = arith.constant dense<0.000000e+00> : vector<64x8xf32>
    %350 = tpu.matmul %338, %349, %cst_282 {dimension_numbers = #tpu.dot_dimension_numbers<[1], [0], [0], [1], [0, 0, 1, 1], [], []>} : vector<64x32xbf16>, vector<32x8xbf16>, vector<64x8xf32> -> vector<64x8xf32>
    %351 = arith.truncf %350 : vector<64x8xf32> to vector<64x8xbf16>
    %c1_283 = arith.constant 1 : index
    %c0_284 = arith.constant 0 : index
    %c0_285 = arith.constant 0 : index
    %352 = vector.load %arg7[%c1_283, %c0_284, %c0_285] : memref<16x128x64xbf16, #tpu.memory_space<vmem>>, vector<1x128x64xbf16>
    %353 = vector.shape_cast %352 : vector<1x128x64xbf16> to vector<128x64xbf16>
    %cst_286 = arith.constant dense<0.000000e+00> : vector<128x8xf32>
    %354 = tpu.matmul %353, %351, %cst_286 {dimension_numbers = #tpu.dot_dimension_numbers<[1], [0], [0], [1], [0, 0, 1, 1], [], []>} : vector<128x64xbf16>, vector<64x8xbf16>, vector<128x8xf32> -> vector<128x8xf32>
    %355 = arith.addf %347, %354 : vector<128x8xf32>
    %c2_287 = arith.constant 2 : index
    %c0_288 = arith.constant 0 : index
    %c0_289 = arith.constant 0 : index
    %356 = vector.load %arg6[%c2_287, %c0_288, %c0_289] : memref<16x32x8xbf16, #tpu.memory_space<vmem>>, vector<1x32x8xbf16>
    %357 = vector.shape_cast %356 : vector<1x32x8xbf16> to vector<32x8xbf16>
    %cst_290 = arith.constant dense<0.000000e+00> : vector<64x8xf32>
    %358 = tpu.matmul %338, %357, %cst_290 {dimension_numbers = #tpu.dot_dimension_numbers<[1], [0], [0], [1], [0, 0, 1, 1], [], []>} : vector<64x32xbf16>, vector<32x8xbf16>, vector<64x8xf32> -> vector<64x8xf32>
    %359 = arith.truncf %358 : vector<64x8xf32> to vector<64x8xbf16>
    %c2_291 = arith.constant 2 : index
    %c0_292 = arith.constant 0 : index
    %c0_293 = arith.constant 0 : index
    %360 = vector.load %arg7[%c2_291, %c0_292, %c0_293] : memref<16x128x64xbf16, #tpu.memory_space<vmem>>, vector<1x128x64xbf16>
    %361 = vector.shape_cast %360 : vector<1x128x64xbf16> to vector<128x64xbf16>
    %cst_294 = arith.constant dense<0.000000e+00> : vector<128x8xf32>
    %362 = tpu.matmul %361, %359, %cst_294 {dimension_numbers = #tpu.dot_dimension_numbers<[1], [0], [0], [1], [0, 0, 1, 1], [], []>} : vector<128x64xbf16>, vector<64x8xbf16>, vector<128x8xf32> -> vector<128x8xf32>
    %363 = arith.addf %355, %362 : vector<128x8xf32>
    %c3_295 = arith.constant 3 : index
    %c0_296 = arith.constant 0 : index
    %c0_297 = arith.constant 0 : index
    %364 = vector.load %arg6[%c3_295, %c0_296, %c0_297] : memref<16x32x8xbf16, #tpu.memory_space<vmem>>, vector<1x32x8xbf16>
    %365 = vector.shape_cast %364 : vector<1x32x8xbf16> to vector<32x8xbf16>
    %cst_298 = arith.constant dense<0.000000e+00> : vector<64x8xf32>
    %366 = tpu.matmul %338, %365, %cst_298 {dimension_numbers = #tpu.dot_dimension_numbers<[1], [0], [0], [1], [0, 0, 1, 1], [], []>} : vector<64x32xbf16>, vector<32x8xbf16>, vector<64x8xf32> -> vector<64x8xf32>
    %367 = arith.truncf %366 : vector<64x8xf32> to vector<64x8xbf16>
    %c3_299 = arith.constant 3 : index
    %c0_300 = arith.constant 0 : index
    %c0_301 = arith.constant 0 : index
    %368 = vector.load %arg7[%c3_299, %c0_300, %c0_301] : memref<16x128x64xbf16, #tpu.memory_space<vmem>>, vector<1x128x64xbf16>
    %369 = vector.shape_cast %368 : vector<1x128x64xbf16> to vector<128x64xbf16>
    %cst_302 = arith.constant dense<0.000000e+00> : vector<128x8xf32>
    %370 = tpu.matmul %369, %367, %cst_302 {dimension_numbers = #tpu.dot_dimension_numbers<[1], [0], [0], [1], [0, 0, 1, 1], [], []>} : vector<128x64xbf16>, vector<64x8xbf16>, vector<128x8xf32> -> vector<128x8xf32>
    %371 = arith.addf %363, %370 : vector<128x8xf32>
    %c4_303 = arith.constant 4 : index
    %c0_304 = arith.constant 0 : index
    %c0_305 = arith.constant 0 : index
    %372 = vector.load %arg6[%c4_303, %c0_304, %c0_305] : memref<16x32x8xbf16, #tpu.memory_space<vmem>>, vector<1x32x8xbf16>
    %373 = vector.shape_cast %372 : vector<1x32x8xbf16> to vector<32x8xbf16>
    %cst_306 = arith.constant dense<0.000000e+00> : vector<64x8xf32>
    %374 = tpu.matmul %338, %373, %cst_306 {dimension_numbers = #tpu.dot_dimension_numbers<[1], [0], [0], [1], [0, 0, 1, 1], [], []>} : vector<64x32xbf16>, vector<32x8xbf16>, vector<64x8xf32> -> vector<64x8xf32>
    %375 = arith.truncf %374 : vector<64x8xf32> to vector<64x8xbf16>
    %c4_307 = arith.constant 4 : index
    %c0_308 = arith.constant 0 : index
    %c0_309 = arith.constant 0 : index
    %376 = vector.load %arg7[%c4_307, %c0_308, %c0_309] : memref<16x128x64xbf16, #tpu.memory_space<vmem>>, vector<1x128x64xbf16>
    %377 = vector.shape_cast %376 : vector<1x128x64xbf16> to vector<128x64xbf16>
    %cst_310 = arith.constant dense<0.000000e+00> : vector<128x8xf32>
    %378 = tpu.matmul %377, %375, %cst_310 {dimension_numbers = #tpu.dot_dimension_numbers<[1], [0], [0], [1], [0, 0, 1, 1], [], []>} : vector<128x64xbf16>, vector<64x8xbf16>, vector<128x8xf32> -> vector<128x8xf32>
    %379 = arith.addf %371, %378 : vector<128x8xf32>
    %c5_311 = arith.constant 5 : index
    %c0_312 = arith.constant 0 : index
    %c0_313 = arith.constant 0 : index
    %380 = vector.load %arg6[%c5_311, %c0_312, %c0_313] : memref<16x32x8xbf16, #tpu.memory_space<vmem>>, vector<1x32x8xbf16>
    %381 = vector.shape_cast %380 : vector<1x32x8xbf16> to vector<32x8xbf16>
    %cst_314 = arith.constant dense<0.000000e+00> : vector<64x8xf32>
    %382 = tpu.matmul %338, %381, %cst_314 {dimension_numbers = #tpu.dot_dimension_numbers<[1], [0], [0], [1], [0, 0, 1, 1], [], []>} : vector<64x32xbf16>, vector<32x8xbf16>, vector<64x8xf32> -> vector<64x8xf32>
    %383 = arith.truncf %382 : vector<64x8xf32> to vector<64x8xbf16>
    %c5_315 = arith.constant 5 : index
    %c0_316 = arith.constant 0 : index
    %c0_317 = arith.constant 0 : index
    %384 = vector.load %arg7[%c5_315, %c0_316, %c0_317] : memref<16x128x64xbf16, #tpu.memory_space<vmem>>, vector<1x128x64xbf16>
    %385 = vector.shape_cast %384 : vector<1x128x64xbf16> to vector<128x64xbf16>
    %cst_318 = arith.constant dense<0.000000e+00> : vector<128x8xf32>
    %386 = tpu.matmul %385, %383, %cst_318 {dimension_numbers = #tpu.dot_dimension_numbers<[1], [0], [0], [1], [0, 0, 1, 1], [], []>} : vector<128x64xbf16>, vector<64x8xbf16>, vector<128x8xf32> -> vector<128x8xf32>
    %387 = arith.addf %379, %386 : vector<128x8xf32>
    %c6_319 = arith.constant 6 : index
    %c0_320 = arith.constant 0 : index
    %c0_321 = arith.constant 0 : index
    %388 = vector.load %arg6[%c6_319, %c0_320, %c0_321] : memref<16x32x8xbf16, #tpu.memory_space<vmem>>, vector<1x32x8xbf16>
    %389 = vector.shape_cast %388 : vector<1x32x8xbf16> to vector<32x8xbf16>
    %cst_322 = arith.constant dense<0.000000e+00> : vector<64x8xf32>
    %390 = tpu.matmul %338, %389, %cst_322 {dimension_numbers = #tpu.dot_dimension_numbers<[1], [0], [0], [1], [0, 0, 1, 1], [], []>} : vector<64x32xbf16>, vector<32x8xbf16>, vector<64x8xf32> -> vector<64x8xf32>
    %391 = arith.truncf %390 : vector<64x8xf32> to vector<64x8xbf16>
    %c6_323 = arith.constant 6 : index
    %c0_324 = arith.constant 0 : index
    %c0_325 = arith.constant 0 : index
    %392 = vector.load %arg7[%c6_323, %c0_324, %c0_325] : memref<16x128x64xbf16, #tpu.memory_space<vmem>>, vector<1x128x64xbf16>
    %393 = vector.shape_cast %392 : vector<1x128x64xbf16> to vector<128x64xbf16>
    %cst_326 = arith.constant dense<0.000000e+00> : vector<128x8xf32>
    %394 = tpu.matmul %393, %391, %cst_326 {dimension_numbers = #tpu.dot_dimension_numbers<[1], [0], [0], [1], [0, 0, 1, 1], [], []>} : vector<128x64xbf16>, vector<64x8xbf16>, vector<128x8xf32> -> vector<128x8xf32>
    %395 = arith.addf %387, %394 : vector<128x8xf32>
    %c7_327 = arith.constant 7 : index
    %c0_328 = arith.constant 0 : index
    %c0_329 = arith.constant 0 : index
    %396 = vector.load %arg6[%c7_327, %c0_328, %c0_329] : memref<16x32x8xbf16, #tpu.memory_space<vmem>>, vector<1x32x8xbf16>
    %397 = vector.shape_cast %396 : vector<1x32x8xbf16> to vector<32x8xbf16>
    %cst_330 = arith.constant dense<0.000000e+00> : vector<64x8xf32>
    %398 = tpu.matmul %338, %397, %cst_330 {dimension_numbers = #tpu.dot_dimension_numbers<[1], [0], [0], [1], [0, 0, 1, 1], [], []>} : vector<64x32xbf16>, vector<32x8xbf16>, vector<64x8xf32> -> vector<64x8xf32>
    %399 = arith.truncf %398 : vector<64x8xf32> to vector<64x8xbf16>
    %c7_331 = arith.constant 7 : index
    %c0_332 = arith.constant 0 : index
    %c0_333 = arith.constant 0 : index
    %400 = vector.load %arg7[%c7_331, %c0_332, %c0_333] : memref<16x128x64xbf16, #tpu.memory_space<vmem>>, vector<1x128x64xbf16>
    %401 = vector.shape_cast %400 : vector<1x128x64xbf16> to vector<128x64xbf16>
    %cst_334 = arith.constant dense<0.000000e+00> : vector<128x8xf32>
    %402 = tpu.matmul %401, %399, %cst_334 {dimension_numbers = #tpu.dot_dimension_numbers<[1], [0], [0], [1], [0, 0, 1, 1], [], []>} : vector<128x64xbf16>, vector<64x8xbf16>, vector<128x8xf32> -> vector<128x8xf32>
    %403 = arith.addf %395, %402 : vector<128x8xf32>
    %c8_335 = arith.constant 8 : index
    %c0_336 = arith.constant 0 : index
    %c0_337 = arith.constant 0 : index
    %404 = vector.load %arg6[%c8_335, %c0_336, %c0_337] : memref<16x32x8xbf16, #tpu.memory_space<vmem>>, vector<1x32x8xbf16>
    %405 = vector.shape_cast %404 : vector<1x32x8xbf16> to vector<32x8xbf16>
    %cst_338 = arith.constant dense<0.000000e+00> : vector<64x8xf32>
    %406 = tpu.matmul %338, %405, %cst_338 {dimension_numbers = #tpu.dot_dimension_numbers<[1], [0], [0], [1], [0, 0, 1, 1], [], []>} : vector<64x32xbf16>, vector<32x8xbf16>, vector<64x8xf32> -> vector<64x8xf32>
    %407 = arith.truncf %406 : vector<64x8xf32> to vector<64x8xbf16>
    %c8_339 = arith.constant 8 : index
    %c0_340 = arith.constant 0 : index
    %c0_341 = arith.constant 0 : index
    %408 = vector.load %arg7[%c8_339, %c0_340, %c0_341] : memref<16x128x64xbf16, #tpu.memory_space<vmem>>, vector<1x128x64xbf16>
    %409 = vector.shape_cast %408 : vector<1x128x64xbf16> to vector<128x64xbf16>
    %cst_342 = arith.constant dense<0.000000e+00> : vector<128x8xf32>
    %410 = tpu.matmul %409, %407, %cst_342 {dimension_numbers = #tpu.dot_dimension_numbers<[1], [0], [0], [1], [0, 0, 1, 1], [], []>} : vector<128x64xbf16>, vector<64x8xbf16>, vector<128x8xf32> -> vector<128x8xf32>
    %411 = arith.addf %403, %410 : vector<128x8xf32>
    %c9_343 = arith.constant 9 : index
    %c0_344 = arith.constant 0 : index
    %c0_345 = arith.constant 0 : index
    %412 = vector.load %arg6[%c9_343, %c0_344, %c0_345] : memref<16x32x8xbf16, #tpu.memory_space<vmem>>, vector<1x32x8xbf16>
    %413 = vector.shape_cast %412 : vector<1x32x8xbf16> to vector<32x8xbf16>
    %cst_346 = arith.constant dense<0.000000e+00> : vector<64x8xf32>
    %414 = tpu.matmul %338, %413, %cst_346 {dimension_numbers = #tpu.dot_dimension_numbers<[1], [0], [0], [1], [0, 0, 1, 1], [], []>} : vector<64x32xbf16>, vector<32x8xbf16>, vector<64x8xf32> -> vector<64x8xf32>
    %415 = arith.truncf %414 : vector<64x8xf32> to vector<64x8xbf16>
    %c9_347 = arith.constant 9 : index
    %c0_348 = arith.constant 0 : index
    %c0_349 = arith.constant 0 : index
    %416 = vector.load %arg7[%c9_347, %c0_348, %c0_349] : memref<16x128x64xbf16, #tpu.memory_space<vmem>>, vector<1x128x64xbf16>
    %417 = vector.shape_cast %416 : vector<1x128x64xbf16> to vector<128x64xbf16>
    %cst_350 = arith.constant dense<0.000000e+00> : vector<128x8xf32>
    %418 = tpu.matmul %417, %415, %cst_350 {dimension_numbers = #tpu.dot_dimension_numbers<[1], [0], [0], [1], [0, 0, 1, 1], [], []>} : vector<128x64xbf16>, vector<64x8xbf16>, vector<128x8xf32> -> vector<128x8xf32>
    %419 = arith.addf %411, %418 : vector<128x8xf32>
    %c10_351 = arith.constant 10 : index
    %c0_352 = arith.constant 0 : index
    %c0_353 = arith.constant 0 : index
    %420 = vector.load %arg6[%c10_351, %c0_352, %c0_353] : memref<16x32x8xbf16, #tpu.memory_space<vmem>>, vector<1x32x8xbf16>
    %421 = vector.shape_cast %420 : vector<1x32x8xbf16> to vector<32x8xbf16>
    %cst_354 = arith.constant dense<0.000000e+00> : vector<64x8xf32>
    %422 = tpu.matmul %338, %421, %cst_354 {dimension_numbers = #tpu.dot_dimension_numbers<[1], [0], [0], [1], [0, 0, 1, 1], [], []>} : vector<64x32xbf16>, vector<32x8xbf16>, vector<64x8xf32> -> vector<64x8xf32>
    %423 = arith.truncf %422 : vector<64x8xf32> to vector<64x8xbf16>
    %c10_355 = arith.constant 10 : index
    %c0_356 = arith.constant 0 : index
    %c0_357 = arith.constant 0 : index
    %424 = vector.load %arg7[%c10_355, %c0_356, %c0_357] : memref<16x128x64xbf16, #tpu.memory_space<vmem>>, vector<1x128x64xbf16>
    %425 = vector.shape_cast %424 : vector<1x128x64xbf16> to vector<128x64xbf16>
    %cst_358 = arith.constant dense<0.000000e+00> : vector<128x8xf32>
    %426 = tpu.matmul %425, %423, %cst_358 {dimension_numbers = #tpu.dot_dimension_numbers<[1], [0], [0], [1], [0, 0, 1, 1], [], []>} : vector<128x64xbf16>, vector<64x8xbf16>, vector<128x8xf32> -> vector<128x8xf32>
    %427 = arith.addf %419, %426 : vector<128x8xf32>
    %c11_359 = arith.constant 11 : index
    %c0_360 = arith.constant 0 : index
    %c0_361 = arith.constant 0 : index
    %428 = vector.load %arg6[%c11_359, %c0_360, %c0_361] : memref<16x32x8xbf16, #tpu.memory_space<vmem>>, vector<1x32x8xbf16>
    %429 = vector.shape_cast %428 : vector<1x32x8xbf16> to vector<32x8xbf16>
    %cst_362 = arith.constant dense<0.000000e+00> : vector<64x8xf32>
    %430 = tpu.matmul %338, %429, %cst_362 {dimension_numbers = #tpu.dot_dimension_numbers<[1], [0], [0], [1], [0, 0, 1, 1], [], []>} : vector<64x32xbf16>, vector<32x8xbf16>, vector<64x8xf32> -> vector<64x8xf32>
    %431 = arith.truncf %430 : vector<64x8xf32> to vector<64x8xbf16>
    %c11_363 = arith.constant 11 : index
    %c0_364 = arith.constant 0 : index
    %c0_365 = arith.constant 0 : index
    %432 = vector.load %arg7[%c11_363, %c0_364, %c0_365] : memref<16x128x64xbf16, #tpu.memory_space<vmem>>, vector<1x128x64xbf16>
    %433 = vector.shape_cast %432 : vector<1x128x64xbf16> to vector<128x64xbf16>
    %cst_366 = arith.constant dense<0.000000e+00> : vector<128x8xf32>
    %434 = tpu.matmul %433, %431, %cst_366 {dimension_numbers = #tpu.dot_dimension_numbers<[1], [0], [0], [1], [0, 0, 1, 1], [], []>} : vector<128x64xbf16>, vector<64x8xbf16>, vector<128x8xf32> -> vector<128x8xf32>
    %435 = arith.addf %427, %434 : vector<128x8xf32>
    %c12_367 = arith.constant 12 : index
    %c0_368 = arith.constant 0 : index
    %c0_369 = arith.constant 0 : index
    %436 = vector.load %arg6[%c12_367, %c0_368, %c0_369] : memref<16x32x8xbf16, #tpu.memory_space<vmem>>, vector<1x32x8xbf16>
    %437 = vector.shape_cast %436 : vector<1x32x8xbf16> to vector<32x8xbf16>
    %cst_370 = arith.constant dense<0.000000e+00> : vector<64x8xf32>
    %438 = tpu.matmul %338, %437, %cst_370 {dimension_numbers = #tpu.dot_dimension_numbers<[1], [0], [0], [1], [0, 0, 1, 1], [], []>} : vector<64x32xbf16>, vector<32x8xbf16>, vector<64x8xf32> -> vector<64x8xf32>
    %439 = arith.truncf %438 : vector<64x8xf32> to vector<64x8xbf16>
    %c12_371 = arith.constant 12 : index
    %c0_372 = arith.constant 0 : index
    %c0_373 = arith.constant 0 : index
    %440 = vector.load %arg7[%c12_371, %c0_372, %c0_373] : memref<16x128x64xbf16, #tpu.memory_space<vmem>>, vector<1x128x64xbf16>
    %441 = vector.shape_cast %440 : vector<1x128x64xbf16> to vector<128x64xbf16>
    %cst_374 = arith.constant dense<0.000000e+00> : vector<128x8xf32>
    %442 = tpu.matmul %441, %439, %cst_374 {dimension_numbers = #tpu.dot_dimension_numbers<[1], [0], [0], [1], [0, 0, 1, 1], [], []>} : vector<128x64xbf16>, vector<64x8xbf16>, vector<128x8xf32> -> vector<128x8xf32>
    %443 = arith.addf %435, %442 : vector<128x8xf32>
    %c13_375 = arith.constant 13 : index
    %c0_376 = arith.constant 0 : index
    %c0_377 = arith.constant 0 : index
    %444 = vector.load %arg6[%c13_375, %c0_376, %c0_377] : memref<16x32x8xbf16, #tpu.memory_space<vmem>>, vector<1x32x8xbf16>
    %445 = vector.shape_cast %444 : vector<1x32x8xbf16> to vector<32x8xbf16>
    %cst_378 = arith.constant dense<0.000000e+00> : vector<64x8xf32>
    %446 = tpu.matmul %338, %445, %cst_378 {dimension_numbers = #tpu.dot_dimension_numbers<[1], [0], [0], [1], [0, 0, 1, 1], [], []>} : vector<64x32xbf16>, vector<32x8xbf16>, vector<64x8xf32> -> vector<64x8xf32>
    %447 = arith.truncf %446 : vector<64x8xf32> to vector<64x8xbf16>
    %c13_379 = arith.constant 13 : index
    %c0_380 = arith.constant 0 : index
    %c0_381 = arith.constant 0 : index
    %448 = vector.load %arg7[%c13_379, %c0_380, %c0_381] : memref<16x128x64xbf16, #tpu.memory_space<vmem>>, vector<1x128x64xbf16>
    %449 = vector.shape_cast %448 : vector<1x128x64xbf16> to vector<128x64xbf16>
    %cst_382 = arith.constant dense<0.000000e+00> : vector<128x8xf32>
    %450 = tpu.matmul %449, %447, %cst_382 {dimension_numbers = #tpu.dot_dimension_numbers<[1], [0], [0], [1], [0, 0, 1, 1], [], []>} : vector<128x64xbf16>, vector<64x8xbf16>, vector<128x8xf32> -> vector<128x8xf32>
    %451 = arith.addf %443, %450 : vector<128x8xf32>
    %c14_383 = arith.constant 14 : index
    %c0_384 = arith.constant 0 : index
    %c0_385 = arith.constant 0 : index
    %452 = vector.load %arg6[%c14_383, %c0_384, %c0_385] : memref<16x32x8xbf16, #tpu.memory_space<vmem>>, vector<1x32x8xbf16>
    %453 = vector.shape_cast %452 : vector<1x32x8xbf16> to vector<32x8xbf16>
    %cst_386 = arith.constant dense<0.000000e+00> : vector<64x8xf32>
    %454 = tpu.matmul %338, %453, %cst_386 {dimension_numbers = #tpu.dot_dimension_numbers<[1], [0], [0], [1], [0, 0, 1, 1], [], []>} : vector<64x32xbf16>, vector<32x8xbf16>, vector<64x8xf32> -> vector<64x8xf32>
    %455 = arith.truncf %454 : vector<64x8xf32> to vector<64x8xbf16>
    %c14_387 = arith.constant 14 : index
    %c0_388 = arith.constant 0 : index
    %c0_389 = arith.constant 0 : index
    %456 = vector.load %arg7[%c14_387, %c0_388, %c0_389] : memref<16x128x64xbf16, #tpu.memory_space<vmem>>, vector<1x128x64xbf16>
    %457 = vector.shape_cast %456 : vector<1x128x64xbf16> to vector<128x64xbf16>
    %cst_390 = arith.constant dense<0.000000e+00> : vector<128x8xf32>
    %458 = tpu.matmul %457, %455, %cst_390 {dimension_numbers = #tpu.dot_dimension_numbers<[1], [0], [0], [1], [0, 0, 1, 1], [], []>} : vector<128x64xbf16>, vector<64x8xbf16>, vector<128x8xf32> -> vector<128x8xf32>
    %459 = arith.addf %451, %458 : vector<128x8xf32>
    %c15_391 = arith.constant 15 : index
    %c0_392 = arith.constant 0 : index
    %c0_393 = arith.constant 0 : index
    %460 = vector.load %arg6[%c15_391, %c0_392, %c0_393] : memref<16x32x8xbf16, #tpu.memory_space<vmem>>, vector<1x32x8xbf16>
    %461 = vector.shape_cast %460 : vector<1x32x8xbf16> to vector<32x8xbf16>
    %cst_394 = arith.constant dense<0.000000e+00> : vector<64x8xf32>
    %462 = tpu.matmul %338, %461, %cst_394 {dimension_numbers = #tpu.dot_dimension_numbers<[1], [0], [0], [1], [0, 0, 1, 1], [], []>} : vector<64x32xbf16>, vector<32x8xbf16>, vector<64x8xf32> -> vector<64x8xf32>
    %463 = arith.truncf %462 : vector<64x8xf32> to vector<64x8xbf16>
    %c15_395 = arith.constant 15 : index
    %c0_396 = arith.constant 0 : index
    %c0_397 = arith.constant 0 : index
    %464 = vector.load %arg7[%c15_395, %c0_396, %c0_397] : memref<16x128x64xbf16, #tpu.memory_space<vmem>>, vector<1x128x64xbf16>
    %465 = vector.shape_cast %464 : vector<1x128x64xbf16> to vector<128x64xbf16>
    %cst_398 = arith.constant dense<0.000000e+00> : vector<128x8xf32>
    %466 = tpu.matmul %465, %463, %cst_398 {dimension_numbers = #tpu.dot_dimension_numbers<[1], [0], [0], [1], [0, 0, 1, 1], [], []>} : vector<128x64xbf16>, vector<64x8xbf16>, vector<128x8xf32> -> vector<128x8xf32>
    %467 = arith.addf %459, %466 : vector<128x8xf32>
    %cst_399 = arith.constant dense<0.000000e+00> : vector<128xf32>
    %468 = vector.multi_reduction <add>, %467, %cst_399 [1] : vector<128x8xf32> to vector<128xf32>
    %469 = vector.shape_cast %468 : vector<128xf32> to vector<128x1xf32>
    %470 = arith.mulf %467, %467 : vector<128x8xf32>
    %cst_400 = arith.constant dense<0.000000e+00> : vector<128xf32>
    %471 = vector.multi_reduction <add>, %470, %cst_400 [1] : vector<128x8xf32> to vector<128xf32>
    %472 = vector.shape_cast %471 : vector<128xf32> to vector<128x1xf32>
    %cst_401 = arith.constant 1.250000e-01 : f32
    %473 = vector.broadcast %cst_401 : f32 to vector<128x1xf32>
    %474 = arith.mulf %469, %473 : vector<128x1xf32>
    %cst_402 = arith.constant 1.250000e-01 : f32
    %475 = vector.broadcast %cst_402 : f32 to vector<128x1xf32>
    %476 = arith.mulf %472, %475 : vector<128x1xf32>
    %477 = arith.mulf %474, %474 : vector<128x1xf32>
    %478 = arith.subf %476, %477 : vector<128x1xf32>
    %cst_403 = arith.constant 0.000000e+00 : f32
    %479 = vector.broadcast %cst_403 : f32 to vector<128x1xf32>
    %480 = arith.maximumf %478, %479 : vector<128x1xf32>
    %481 = vector.broadcast %474 : vector<128x1xf32> to vector<128x8xf32>
    %482 = arith.subf %467, %481 : vector<128x8xf32>
    %cst_404 = arith.constant 9.99999974E-6 : f32
    %483 = vector.broadcast %cst_404 : f32 to vector<128x1xf32>
    %484 = arith.addf %480, %483 : vector<128x1xf32>
    %485 = math.rsqrt %484 : vector<128x1xf32>
    %486 = vector.broadcast %485 : vector<128x1xf32> to vector<128x8xf32>
    %487 = arith.mulf %482, %486 : vector<128x8xf32>
    %cst_405 = arith.constant 0.000000e+00 : f32
    %488 = vector.broadcast %cst_405 : f32 to vector<128x8xf32>
    %489 = arith.cmpf oge, %487, %488 : vector<128x8xf32>
    %cst_406 = arith.constant 0.00999999977 : f32
    %490 = vector.broadcast %cst_406 : f32 to vector<128x8xf32>
    %491 = arith.mulf %490, %487 : vector<128x8xf32>
    %492 = arith.select %489, %487, %491 : vector<128x8xi1>, vector<128x8xf32>
    %493 = arith.truncf %492 : vector<128x8xf32> to vector<128x8xbf16>
    %cst_407 = arith.constant 0.000000e+00 : f32
    %494 = vector.broadcast %cst_407 : f32 to vector<1x2xf32>
    %c0_408 = arith.constant 0 : index
    %c0_409 = arith.constant 0 : index
    %c0_410 = arith.constant 0 : index
    %495 = vector.load %arg8[%c0_408, %c0_409, %c0_410] : memref<4x8x2xbf16, #tpu.memory_space<vmem>>, vector<1x8x2xbf16>
    %496 = vector.shape_cast %495 : vector<1x8x2xbf16> to vector<8x2xbf16>
    %cst_411 = arith.constant dense<0.000000e+00> : vector<128x2xf32>
    %497 = tpu.matmul %493, %496, %cst_411 {dimension_numbers = #tpu.dot_dimension_numbers<[1], [0], [0], [1], [0, 0, 1, 1], [], []>} : vector<128x8xbf16>, vector<8x2xbf16>, vector<128x2xf32> -> vector<128x2xf32>
    %498 = arith.truncf %497 : vector<128x2xf32> to vector<128x2xbf16>
    %c0_412 = arith.constant 0 : index
    %c0_413 = arith.constant 0 : index
    %c0_414 = arith.constant 0 : index
    %499 = vector.load %arg9[%c0_412, %c0_413, %c0_414] : memref<4x1x128xbf16, #tpu.memory_space<vmem>>, vector<1x1x128xbf16>
    %500 = vector.shape_cast %499 : vector<1x1x128xbf16> to vector<1x128xbf16>
    %cst_415 = arith.constant dense<0.000000e+00> : vector<1x2xf32>
    %501 = tpu.matmul %500, %498, %cst_415 {dimension_numbers = #tpu.dot_dimension_numbers<[1], [0], [0], [1], [0, 0, 1, 1], [], []>} : vector<1x128xbf16>, vector<128x2xbf16>, vector<1x2xf32> -> vector<1x2xf32>
    %502 = arith.addf %494, %501 : vector<1x2xf32>
    %c1_416 = arith.constant 1 : index
    %c0_417 = arith.constant 0 : index
    %c0_418 = arith.constant 0 : index
    %503 = vector.load %arg8[%c1_416, %c0_417, %c0_418] : memref<4x8x2xbf16, #tpu.memory_space<vmem>>, vector<1x8x2xbf16>
    %504 = vector.shape_cast %503 : vector<1x8x2xbf16> to vector<8x2xbf16>
    %cst_419 = arith.constant dense<0.000000e+00> : vector<128x2xf32>
    %505 = tpu.matmul %493, %504, %cst_419 {dimension_numbers = #tpu.dot_dimension_numbers<[1], [0], [0], [1], [0, 0, 1, 1], [], []>} : vector<128x8xbf16>, vector<8x2xbf16>, vector<128x2xf32> -> vector<128x2xf32>
    %506 = arith.truncf %505 : vector<128x2xf32> to vector<128x2xbf16>
    %c1_420 = arith.constant 1 : index
    %c0_421 = arith.constant 0 : index
    %c0_422 = arith.constant 0 : index
    %507 = vector.load %arg9[%c1_420, %c0_421, %c0_422] : memref<4x1x128xbf16, #tpu.memory_space<vmem>>, vector<1x1x128xbf16>
    %508 = vector.shape_cast %507 : vector<1x1x128xbf16> to vector<1x128xbf16>
    %cst_423 = arith.constant dense<0.000000e+00> : vector<1x2xf32>
    %509 = tpu.matmul %508, %506, %cst_423 {dimension_numbers = #tpu.dot_dimension_numbers<[1], [0], [0], [1], [0, 0, 1, 1], [], []>} : vector<1x128xbf16>, vector<128x2xbf16>, vector<1x2xf32> -> vector<1x2xf32>
    %510 = arith.addf %502, %509 : vector<1x2xf32>
    %c2_424 = arith.constant 2 : index
    %c0_425 = arith.constant 0 : index
    %c0_426 = arith.constant 0 : index
    %511 = vector.load %arg8[%c2_424, %c0_425, %c0_426] : memref<4x8x2xbf16, #tpu.memory_space<vmem>>, vector<1x8x2xbf16>
    %512 = vector.shape_cast %511 : vector<1x8x2xbf16> to vector<8x2xbf16>
    %cst_427 = arith.constant dense<0.000000e+00> : vector<128x2xf32>
    %513 = tpu.matmul %493, %512, %cst_427 {dimension_numbers = #tpu.dot_dimension_numbers<[1], [0], [0], [1], [0, 0, 1, 1], [], []>} : vector<128x8xbf16>, vector<8x2xbf16>, vector<128x2xf32> -> vector<128x2xf32>
    %514 = arith.truncf %513 : vector<128x2xf32> to vector<128x2xbf16>
    %c2_428 = arith.constant 2 : index
    %c0_429 = arith.constant 0 : index
    %c0_430 = arith.constant 0 : index
    %515 = vector.load %arg9[%c2_428, %c0_429, %c0_430] : memref<4x1x128xbf16, #tpu.memory_space<vmem>>, vector<1x1x128xbf16>
    %516 = vector.shape_cast %515 : vector<1x1x128xbf16> to vector<1x128xbf16>
    %cst_431 = arith.constant dense<0.000000e+00> : vector<1x2xf32>
    %517 = tpu.matmul %516, %514, %cst_431 {dimension_numbers = #tpu.dot_dimension_numbers<[1], [0], [0], [1], [0, 0, 1, 1], [], []>} : vector<1x128xbf16>, vector<128x2xbf16>, vector<1x2xf32> -> vector<1x2xf32>
    %518 = arith.addf %510, %517 : vector<1x2xf32>
    %c3_432 = arith.constant 3 : index
    %c0_433 = arith.constant 0 : index
    %c0_434 = arith.constant 0 : index
    %519 = vector.load %arg8[%c3_432, %c0_433, %c0_434] : memref<4x8x2xbf16, #tpu.memory_space<vmem>>, vector<1x8x2xbf16>
    %520 = vector.shape_cast %519 : vector<1x8x2xbf16> to vector<8x2xbf16>
    %cst_435 = arith.constant dense<0.000000e+00> : vector<128x2xf32>
    %521 = tpu.matmul %493, %520, %cst_435 {dimension_numbers = #tpu.dot_dimension_numbers<[1], [0], [0], [1], [0, 0, 1, 1], [], []>} : vector<128x8xbf16>, vector<8x2xbf16>, vector<128x2xf32> -> vector<128x2xf32>
    %522 = arith.truncf %521 : vector<128x2xf32> to vector<128x2xbf16>
    %c3_436 = arith.constant 3 : index
    %c0_437 = arith.constant 0 : index
    %c0_438 = arith.constant 0 : index
    %523 = vector.load %arg9[%c3_436, %c0_437, %c0_438] : memref<4x1x128xbf16, #tpu.memory_space<vmem>>, vector<1x1x128xbf16>
    %524 = vector.shape_cast %523 : vector<1x1x128xbf16> to vector<1x128xbf16>
    %cst_439 = arith.constant dense<0.000000e+00> : vector<1x2xf32>
    %525 = tpu.matmul %524, %522, %cst_439 {dimension_numbers = #tpu.dot_dimension_numbers<[1], [0], [0], [1], [0, 0, 1, 1], [], []>} : vector<1x128xbf16>, vector<128x2xbf16>, vector<1x2xf32> -> vector<1x2xf32>
    %526 = arith.addf %518, %525 : vector<1x2xf32>
    %c0_440 = arith.constant 0 : index
    %c0_441 = arith.constant 0 : index
    %527 = vector.load %arg10[%c0_440, %c0_441] : memref<1x1xf32, #tpu.memory_space<vmem>>, vector<1x1xf32>
    %528 = vector.broadcast %527 : vector<1x1xf32> to vector<1x2xf32>
    %529 = arith.addf %526, %528 : vector<1x2xf32>
    %530 = arith.negf %529 : vector<1x2xf32>
    %531 = math.exp %530 : vector<1x2xf32>
    %cst_442 = arith.constant 1.000000e+00 : f32
    %532 = vector.broadcast %cst_442 : f32 to vector<1x2xf32>
    %533 = arith.addf %532, %531 : vector<1x2xf32>
    %534 = arith.divf %532, %533 : vector<1x2xf32>
    %c0_443 = arith.constant 0 : index
    %c0_444 = arith.constant 0 : index
    %535 = vector.load %arg11[%c0_443, %c0_444] : memref<1x2xf32, #tpu.memory_space<vmem>>, vector<1x2xf32>
    tpu.vector_store %arg11[%c0_443, %c0_444], %534 {strides = array<i32>} : memref<1x2xf32, #tpu.memory_space<vmem>>, vector<1x2xf32>,
    return
  }
}

</mosaic_0001>

<bundles_post_ra>
// kernel: discriminator_forward.1
= control target key start
LH: loop header
LB: loop body
LE: loop exit
PB: predicated region body
PF: predicated region fallthrough
CT: control target
= control target key end

     0   :  { %s27427_s0 = inlined_call_operand.vmem [shape: bf16[16,512], index: 0, kind: input, shape index: {}]   ;;  %s27428_s1 = inlined_call_operand.vmem [shape: bf16[16,16], index: 1, kind: input, shape index: {}]   ;;  %s27429_s2 = inlined_call_operand.vmem [shape: bf16[16,512,128], index: 2, kind: input, shape index: {}]   ;;  %s27430_s3 = inlined_call_operand.vmem [shape: bf16[16,32,16], index: 3, kind: input, shape index: {}]   ;;  %s27431_s4 = inlined_call_operand.vmem [shape: bf16[16,128,32], index: 4, kind: input, shape index: {}]   ;;  %s27432_s5 = inlined_call_operand.vmem [shape: bf16[16,64,32], index: 5, kind: input, shape index: {}]   ;;  %s27433_s6 = inlined_call_operand.vmem [shape: bf16[16,32,8], index: 6, kind: input, shape index: {}]   ;;  %s27434_s7 = inlined_call_operand.vmem [shape: bf16[16,128,64], index: 7, kind: input, shape index: {}]   ;;  %s27435_s8 = inlined_call_operand.vmem [shape: bf16[4,8,2], index: 8, kind: input, shape index: {}]   ;;  %s27436_s9 = inlined_call_operand.vmem [shape: bf16[4,1,128], index: 9, kind: input, shape index: {}]   ;;  %s27437_s10 = inlined_call_operand.<no memory space> [shape: f32[1,1], index: 10, kind: input, shape index: {}]   ;;  %s27438_s11 = inlined_call_operand.hbm [shape: f32[1,2], index: 11, kind: output, shape index: {}]  }
   0x1   :  { %v16_v0 = vstv %s27437_s10 }
   0x2   :  { %17 = vst [vmem:[#allocation2] sm:$0x1] %v16_v0 }
   0x3   :  { %v22233_v1 = vld [vmem:[%s27427_s0 + $0x4] ss:$16 sps:$4 sm:$0xff]   ;;  %v22235_v2 = vld [vmem:[%s27427_s0 + $0xc] ss:$16 sps:$4 sm:$0xff]   ;;  %v23224_v3 = vmov 0   ;;  %vm73_vm0 = vcmask 130048  }
   0x4   :  { %109 = vmatprep.mubr.bf16.mxu0 %v23224_v3  ;;  %152 = vmatprep.mubr.bf16.mxu1 %v23224_v3  ;;  %v22237_v4 = vld [vmem:[%s27427_s0] ss:$16 sps:$4 sm:$0xff]   ;;  %v22238_v5 = vld [vmem:[%s27427_s0 + $0x8] ss:$16 sps:$4 sm:$0xff]  }
   0x5   :  { %77 = vmatprep.subr.bf16.mxu0 %v22233_v1  ;;  %22232 = vset.pattern.permute.xlu0 %v23224_v3  ;;  %v22239_v6 = vld [vmem:[%s27428_s1] sm:$0xff]   ;;  %v22244_v39 = vld [vmem:[%s27429_s2 + $0x48] sm:$0xff]   ;;  %v22248_v43 = vld [vmem:[%s27429_s2 + $0x50] sm:$0xff]  }
   0x6   :  { %120 = vmatprep.subr.bf16.mxu1 %v22235_v2  ;;  %78 = vmatpush1.bf16.msra.mxu0 %v22237_v4  ;;  %v22240_v35 = vld [vmem:[%s27429_s2 + $0x40] sm:$0xff]   ;;  %v22245_v40 = vld [vmem:[%s27429_s2 + $0x8] sm:$0xff]   ;;  %v22249_v44 = vld [vmem:[%s27429_s2 + $0x10] sm:$0xff]  }
   0x7   :  { %121 = vmatpush1.bf16.msra.mxu1 %v22238_v5  ;;  %v22241_v36 = vld [vmem:[%s27429_s2] sm:$0xff]   ;;  %v22246_v41 = vld [vmem:[%s27429_s2 + $0x148] sm:$0xff]   ;;  %v22250_v45 = vld [vmem:[%s27429_s2 + $0x150] sm:$0xff]  }
   0x8   :  { %v22242_v37 = vld [vmem:[%s27429_s2 + $0x140] sm:$0xff]   ;;  %19100 = vmatprep.subr.bf16.mxu1 %v22240_v35  ;;  %v22247_v42 = vld [vmem:[%s27429_s2 + $0x108] sm:$0xff]   ;;  %v22251_v46 = vld [vmem:[%s27429_s2 + $0x110] sm:$0xff]  }
   0x9   :  { %16195 = vmatmul.mubr.msk.bf16.vlgmr.msra.gmra.mrb[0].mxu0 %vm73_vm0, %v22239_v6  ;;  %19144 = vmatprep.subr.bf16.mxu0 %v22242_v37  ;;  %v22243_v38 = vld [vmem:[%s27429_s2 + $0x100] sm:$0xff]   ;;  %v22252_v47 = vld [vmem:[%s27429_s2 + $0x58] sm:$0xff]   ;;  %v22260_v55 = vld [vmem:[%s27429_s2 + $0x68] sm:$0xff]  }
   0xa   :  { %16196 = vmatmul.mubr.msk.bf16.vlgmr.msra.gmra.mrb[0].mxu1 %vm73_vm0, %v22239_v6  ;;  %19145 = vmatpush3.bf16.msra.mxu0 %v22243_v38  ;;  %v22253_v48 = vld [vmem:[%s27429_s2 + $0x18] sm:$0xff]   ;;  %v22256_v51 = vld [vmem:[%s27429_s2 + $0x60] sm:$0xff]   ;;  %v22261_v56 = vld [vmem:[%s27429_s2 + $0x28] sm:$0xff]  }
   0xb   :  { %19101 = vmatpush3.bf16.msra.mxu1 %v22241_v36  ;;  %19146 = vmatprep.subr.bf16.mxu0 %v22246_v41  ;;  %v22254_v49 = vld [vmem:[%s27429_s2 + $0x158] sm:$0xff]   ;;  %v22257_v52 = vld [vmem:[%s27429_s2 + $0x20] sm:$0xff]   ;;  %v22262_v57 = vld [vmem:[%s27429_s2 + $0x168] sm:$0xff]  }
   0xc   :  { %19102 = vmatprep.subr.bf16.mxu1 %v22244_v39  ;;  %v22255_v50 = vld [vmem:[%s27429_s2 + $0x118] sm:$0xff]   ;;  %v22258_v53 = vld [vmem:[%s27429_s2 + $0x160] sm:$0xff]   ;;  %v22263_v58 = vld [vmem:[%s27429_s2 + $0x128] sm:$0xff]  }
   0xd   :  { %v22259_v54 = vld [vmem:[%s27429_s2 + $0x120] sm:$0xff]   ;;  %v22264_v59 = vld [vmem:[%s27429_s2 + $0x70] sm:$0xff]   ;;  %v22268_v63 = vld [vmem:[%s27429_s2 + $0x78] sm:$0xff]  }
   0xe   :  { %19147 = vmatpush3.bf16.msra.mxu0 %v22247_v42  ;;  %v22265_v60 = vld [vmem:[%s27429_s2 + $0x30] sm:$0xff]   ;;  %v22269_v0 = vld [vmem:[%s27429_s2 + $0x38] sm:$0xff]   ;;  %v22272_v3 = vld [vmem:[%s27429_s2 + $0xc0] sm:$0xff]  }
   0xf   :  { %19103 = vmatpush3.bf16.msra.mxu1 %v22245_v40  ;;  %19148 = vmatprep.subr.bf16.mxu0 %v22250_v45  ;;  %v22266_v61 = vld [vmem:[%s27429_s2 + $0x170] sm:$0xff]   ;;  %v22270_v1 = vld [vmem:[%s27429_s2 + $0x178] sm:$0xff]  }
  0x10   :  { %19104 = vmatprep.subr.bf16.mxu1 %v22248_v43  ;;  %v22267_v62 = vld [vmem:[%s27429_s2 + $0x130] sm:$0xff]   ;;  %v22271_v2 = vld [vmem:[%s27429_s2 + $0x138] sm:$0xff]  }
  0x12   :  { %19149 = vmatpush3.bf16.msra.mxu0 %v22251_v46 }
  0x13   :  { %19105 = vmatpush3.bf16.msra.mxu1 %v22249_v44  ;;  %19150 = vmatprep.subr.bf16.mxu0 %v22254_v49 }
  0x14   :  { %19106 = vmatprep.subr.bf16.mxu1 %v22252_v47 }
  0x16   :  { %19151 = vmatpush3.bf16.msra.mxu0 %v22255_v50 }
  0x17   :  { %19107 = vmatpush3.bf16.msra.mxu1 %v22253_v48  ;;  %19152 = vmatprep.subr.bf16.mxu0 %v22258_v53  ;;  %v22274_v53 = vld [vmem:[%s27429_s2 + $0xc8] sm:$0xff]  }
  0x18   :  { %19108 = vmatprep.subr.bf16.mxu1 %v22256_v51 }
  0x1a   :  { %19153 = vmatpush3.bf16.msra.mxu0 %v22259_v54 }
  0x1b   :  { %19109 = vmatpush3.bf16.msra.mxu1 %v22257_v52  ;;  %19154 = vmatprep.subr.bf16.mxu0 %v22262_v57 }
  0x1c   :  { %19110 = vmatprep.subr.bf16.mxu1 %v22260_v55 }
  0x1e   :  { %19155 = vmatpush3.bf16.msra.mxu0 %v22263_v58 }
  0x1f   :  { %19111 = vmatpush3.bf16.msra.mxu1 %v22261_v56  ;;  %19156 = vmatprep.subr.bf16.mxu0 %v22266_v61  ;;  %v22276_v61 = vld [vmem:[%s27429_s2 + $0xd0] sm:$0xff]  }
  0x20   :  { %19112 = vmatprep.subr.bf16.mxu1 %v22264_v59 }
  0x22   :  { %19157 = vmatpush3.bf16.msra.mxu0 %v22267_v62  ;;  %v22277_v62 = vld [vmem:[%s27429_s2 + $0x90] sm:$0xff]  }
  0x23   :  { %19113 = vmatpush3.bf16.msra.mxu1 %v22265_v60  ;;  %19158 = vmatprep.subr.bf16.mxu0 %v22270_v1  ;;  %v22275_v60 = vld [vmem:[%s27429_s2 + $0x88] sm:$0xff]   ;;  %v22280_v1 = vld [vmem:[%s27429_s2 + $0xe0] sm:$0xff]  }
  0x24   :  { %19114 = vmatprep.subr.bf16.mxu1 %v22268_v63  ;;  %v22278_v63 = vld [vmem:[%s27429_s2 + $0xd8] sm:$0xff]  }
  0x26   :  { %19159 = vmatpush3.bf16.msra.mxu0 %v22271_v2  ;;  %v22281_v2 = vld [vmem:[%s27429_s2 + $0xa0] sm:$0xff]  }
  0x27   :  { %19115 = vmatpush3.bf16.msra.mxu1 %v22269_v0  ;;  %v22279_v0 = vld [vmem:[%s27429_s2 + $0x98] sm:$0xff]  }
  0x28   :  { %19122 = vmatprep.subr.bf16.mxu1 %v22272_v3  ;;  %v22282_v3 = vld [vmem:[%s27429_s2 + $0xe8] sm:$0xff]  }
  0xdc   :  { %v23308_v7 = vpop.f32.mrb[0].mxu0 }
  0xdd   :  { %v23310_v8 = vpop.f32.mrb[0].mxu1  ;;  %v173_v9 = vmul.f32 %v23308_v7, %v23308_v7  ;;  %v23314_v10 = vpop.f32.mrb[1].mxu0 }
  0xde   :  { %v23316_v11 = vpop.f32.mrb[1].mxu1  ;;  %v163_v12 = vadd.f32 %v23314_v10, %v23308_v7  ;;  %v174_v13 = vmul.f32 %v23314_v10, %v23314_v10  ;;  %v23322_v14 = vpop.f32.mrb[2].mxu0  ;;  %v175_v16 = vmul.f32 %v23310_v8, %v23310_v8 }
  0xdf   :  { %v23324_v15 = vpop.f32.mrb[2].mxu1  ;;  %v177_v17 = vmul.f32 %v23322_v14, %v23322_v14  ;;  %v23330_v18 = vpop.f32.mrb[3].mxu0  ;;  %v176_v24 = vmul.f32 %v23316_v11, %v23316_v11 }
  0xe0   :  { %v23332_v19 = vpop.f32.mrb[3].mxu1  ;;  %v168_v20 = vadd.f32 %v23330_v18, %v23322_v14  ;;  %v178_v21 = vmul.f32 %v23330_v18, %v23330_v18  ;;  %v164_v22 = vadd.f32 %v163_v12, %v23310_v8  ;;  %v181_v23 = vadd.f32 %v174_v13, %v173_v9 }
  0xe1   :  { %v179_v25 = vmul.f32 %v23324_v15, %v23324_v15  ;;  %v180_v32 = vmul.f32 %v23332_v19, %v23332_v19 }
  0xe2   :  { %v165_v26 = vadd.f32 %v164_v22, %v23316_v11  ;;  %v182_v27 = vadd.f32 %v181_v23, %v175_v16  ;;  %v169_v28 = vadd.f32 %v168_v20, %v23324_v15  ;;  %v186_v29 = vadd.f32 %v178_v21, %v177_v17 }
  0xe4   :  { %166 = vadd.xlane.f32.xlu0 %v165_v26  ;;  %v183_v30 = vadd.f32 %v182_v27, %v176_v24  ;;  %v170_v31 = vadd.f32 %v169_v28, %v23332_v19  ;;  %v187_v33 = vadd.f32 %v186_v29, %v179_v25 }
  0xe6   :  { %184 = vadd.xlane.f32.xlu1 %v183_v30  ;;  %v188_v34 = vadd.f32 %v187_v33, %v180_v32 }
  0xe8   :  { %171 = vadd.xlane.f32.xlu0 %v170_v31 }
  0xea   :  { %189 = vadd.xlane.f32.xlu1 %v188_v34 }
 0x171   :  { %v167_v4 = vpop.xlane.xlu0 %166 }
 0x172   :  { %v191_v5 = vmul.f32 0.001953125, %v167_v4  ;;  %v22283_v4 = vld [vmem:[%s27429_s2 + $0xa8] sm:$0xff]  }
 0x173   :  { %v185_v6 = vpop.xlane.xlu1 %184 }
 0x174   :  { %v193_v9 = vmul.f32 0.001953125, %v185_v6  ;;  %v195_v12 = vmul.f32 %v191_v5, %v191_v5  ;;  %v201_v28 = vsub.f32 %v23308_v7, %v191_v5  ;;  %v202_v29 = vsub.f32 %v23314_v10, %v191_v5  ;;  %v22285_v6 = vld [vmem:[%s27429_s2 + $0xb0] sm:$0xff]  }
 0x175   :  { %v172_v13 = vpop.xlane.xlu0 %171  ;;  %v203_v30 = vsub.f32 %v23310_v8, %v191_v5  ;;  %v204_v31 = vsub.f32 %v23316_v11, %v191_v5  ;;  %v22284_v5 = vld [vmem:[%s27429_s2 + $0xf0] sm:$0xff]  }
 0x176   :  { %v192_v16 = vmul.f32 0.001953125, %v172_v13  ;;  %v197_v17 = vsub.f32 %v193_v9, %v195_v12  ;;  %v22286_v9 = vld [vmem:[%s27429_s2 + $0xf8] sm:$0xff]   ;;  %v22288_v13 = vld [vmem:[%s27429_s2 + $0x1c0] sm:$0xff]  }
 0x177   :  { %v190_v20 = vpop.xlane.xlu1 %189  ;;  %v22287_v12 = vld [vmem:[%s27429_s2 + $0xb8] sm:$0xff]  }
 0x178   :  { %v199_v21 = vmax.f32 %v197_v17, 0.0  ;;  %v194_v22 = vmul.f32 0.001953125, %v190_v20  ;;  %v196_v23 = vmul.f32 %v192_v16, %v192_v16  ;;  %v205_v37 = vsub.f32 %v23322_v14, %v192_v16  ;;  %v22290_v17 = vld [vmem:[%s27429_s2 + $0x1c8] sm:$0xff]  }
 0x179   :  { %v206_v38 = vsub.f32 %v23330_v18, %v192_v16  ;;  %v207_v39 = vsub.f32 %v23324_v15, %v192_v16  ;;  %v208_v8 = vsub.f32 %v23332_v19, %v192_v16  ;;  %v22273_v19 = vld [vmem:[%s27429_s2 + $0x80] sm:$0xff]   ;;  %v22291_v20 = vld [vmem:[%s27429_s2 + $0x188] sm:$0xff]  }
 0x17a   :  { %v209_v24 = vadd.f32 1e-05, %v199_v21  ;;  %v198_v25 = vsub.f32 %v194_v22, %v196_v23  ;;  %v22289_v16 = vld [vmem:[%s27429_s2 + $0x180] sm:$0xff]   ;;  %v22292_v21 = vld [vmem:[%s27429_s2 + $0x1d0] sm:$0xff]   ;;  %v22294_v23 = vld [vmem:[%s27429_s2 + $0x1d8] sm:$0xff]  }
 0x17b   :  { %v22293_v22 = vld [vmem:[%s27429_s2 + $0x190] sm:$0xff]  }
 0x17c   :  { %23136 = vrsqrt.f32 %v209_v24  ;;  %v200_v26 = vmax.f32 %v198_v25, 0.0  ;;  %v22295_v24 = vld [vmem:[%s27429_s2 + $0x198] sm:$0xff]   ;;  %v22296_v25 = vld [vmem:[%s27429_s2 + $0x1e0] sm:$0xff]  }
 0x17e   :  { %v210_v27 = vadd.f32 1e-05, %v200_v26  ;;  %v22297_v26 = vld [vmem:[%s27429_s2 + $0x1a0] sm:$0xff]  }
 0x180   :  { %23138 = vrsqrt.f32 %v210_v27  ;;  %v22298_v27 = vld [vmem:[%s27429_s2 + $0x1e8] sm:$0xff]  }
 0x186   :  { %v23137_v32 = vpop.eup %23136 }
 0x187   :  { %v213_v33 = vmul.f32 %v23137_v32, %v201_v28  ;;  %v214_v34 = vmul.f32 %v23137_v32, %v202_v29  ;;  %v215_v35 = vmul.f32 %v23137_v32, %v203_v30  ;;  %v216_v36 = vmul.f32 %v23137_v32, %v204_v31  ;;  %v22299_v28 = vld [vmem:[%s27429_s2 + $0x1a8] sm:$0xff]   ;;  %v22300_v29 = vld [vmem:[%s27429_s2 + $0x1f0] sm:$0xff]   ;;  %v22302_v31 = vld [vmem:[%s27429_s2 + $0x1f8] sm:$0xff]  }
 0x188   :  { %v22301_v30 = vld [vmem:[%s27429_s2 + $0x1b0] sm:$0xff]   ;;  %v22303_v32 = vld [vmem:[%s27429_s2 + $0x1b8] sm:$0xff]  }
 0x189   :  { %vm221_vm1 = vcmp.ge.f32.partialorder %v213_v33, 0.0  ;;  %vm222_vm2 = vcmp.ge.f32.partialorder %v214_v34, 0.0  ;;  %v229_v40 = vmul.f32 0.01, %v213_v33  ;;  %v230_v10 = vmul.f32 0.01, %v214_v34 }
 0x18a   :  { %v23139_v7 = vpop.eup %23138  ;;  %v231_v41 = vmul.f32 0.01, %v215_v35  ;;  %v232_v11 = vmul.f32 0.01, %v216_v36  ;;  %vm223_vm3 = vcmp.ge.f32.partialorder %v215_v35, 0.0  ;;  %vm224_vm4 = vcmp.ge.f32.partialorder %v216_v36, 0.0 }
 0x18b   :  { %v217_v42 = vmul.f32 %v23139_v7, %v205_v37  ;;  %v218_v43 = vmul.f32 %v23139_v7, %v206_v38  ;;  %v219_v44 = vmul.f32 %v23139_v7, %v207_v39  ;;  %v220_v45 = vmul.f32 %v23139_v7, %v208_v8 }
 0x18c   :  { %v237_v15 = vsel %vm221_vm1, %v213_v33, %v229_v40  ;;  %v238_v46 = vsel %vm222_vm2, %v214_v34, %v230_v10  ;;  %v239_v49 = vsel %vm223_vm3, %v215_v35, %v231_v41  ;;  %v240_v50 = vsel %vm224_vm4, %v216_v36, %v232_v11  ;;  %v22304_v33 = vld [vmem:[%s27430_s3] sm:$0xff]   ;;  %v22322_v34 = vld [vmem:[%s27430_s3 + $0x10] sm:$0xff]  }
 0x18d   :  { %vm225_vm5 = vcmp.ge.f32.partialorder %v217_v42, 0.0  ;;  %vm226_vm6 = vcmp.ge.f32.partialorder %v218_v43, 0.0  ;;  %vm227_vm7 = vcmp.ge.f32.partialorder %v219_v44, 0.0  ;;  %vm228_vm8 = vcmp.ge.f32.partialorder %v220_v45, 0.0 }
 0x18e   :  { %v233_v14 = vmul.f32 0.01, %v217_v42  ;;  %v234_v18 = vmul.f32 0.01, %v218_v43  ;;  %v235_v47 = vmul.f32 0.01, %v219_v44 }
 0x18f   :  { %v236_v48 = vmul.f32 0.01, %v220_v45 }
 0x190   :  { %v241_v51 = vsel %vm225_vm5, %v217_v42, %v233_v14  ;;  %v242_v52 = vsel %vm226_vm6, %v218_v43, %v234_v18  ;;  %v243_v54 = vsel %vm227_vm7, %v219_v44, %v235_v47 }
 0x191   :  { %v244_v55 = vsel %vm228_vm8, %v220_v45, %v236_v48  ;;  %v23463_v56 = vpack.c.bf16 %v241_v51, %v237_v15  ;;  %v23465_v57 = vpack.c.bf16 %v242_v52, %v238_v46  ;;  %v23467_v58 = vpack.c.bf16 %v243_v54, %v239_v49 }
 0x192   :  { %v23469_v59 = vpack.c.bf16 %v244_v55, %v240_v50 }
 0x193   :  { %537 = vmatprep.mubr.bf16.mxu1 %v23465_v57  ;;  %881 = vmatprep.mubr.bf16.mxu0 %v23465_v57 }
 0x194   :  { %538 = vmatmul.mubr.bf16.vlgmr.msra.gmra.mrb[4].mxu1 %v23463_v56  ;;  %882 = vmatmul.mubr.bf16.vlgmr.msra.gmra.mrb[4].mxu0 %v23463_v56 }
 0x195   :  { %19123 = vmatpush3.bf16.msra.mxu1 %v22273_v19  ;;  %578 = vmatprep.mubr.bf16.mxu1 %v23469_v59  ;;  %v22306_v19 = vld [vmem:[%s27429_s2 + $0x2c0] sm:$0xff]  }
 0x196   :  { %19124 = vmatprep.subr.bf16.mxu1 %v22274_v53  ;;  %20476 = vmatprep.mubr.msk.bf16.mxu0 %vm73_vm0, %v22304_v33 }
 0x199   :  { %19125 = vmatpush3.bf16.msra.mxu1 %v22275_v60 }
 0x19a   :  { %19126 = vmatprep.subr.bf16.mxu1 %v22276_v61 }
 0x19d   :  { %19127 = vmatpush3.bf16.msra.mxu1 %v22277_v62 }
 0x19e   :  { %19128 = vmatprep.subr.bf16.mxu1 %v22278_v63 }
 0x1a1   :  { %19129 = vmatpush3.bf16.msra.mxu1 %v22279_v0 }
 0x1a2   :  { %19130 = vmatprep.subr.bf16.mxu1 %v22280_v1 }
 0x1a5   :  { %19131 = vmatpush3.bf16.msra.mxu1 %v22281_v2 }
 0x1a6   :  { %19132 = vmatprep.subr.bf16.mxu1 %v22282_v3 }
 0x1a9   :  { %19133 = vmatpush3.bf16.msra.mxu1 %v22283_v4 }
 0x1aa   :  { %19134 = vmatprep.subr.bf16.mxu1 %v22284_v5 }
 0x1ad   :  { %19135 = vmatpush3.bf16.msra.mxu1 %v22285_v6 }
 0x1ae   :  { %19136 = vmatprep.subr.bf16.mxu1 %v22286_v9 }
 0x1b1   :  { %19137 = vmatpush3.bf16.msra.mxu1 %v22287_v12 }
 0x1b2   :  { %19166 = vmatprep.subr.bf16.mxu1 %v22288_v13 }
 0x1b4   :  { %579 = vmatmul.mubr.bf16.vlgmr.msra.gmra.mrb[8].mxu1 %v23467_v58 }
 0x1b5   :  { %19167 = vmatpush3.bf16.msra.mxu1 %v22289_v16  ;;  %922 = vmatprep.mubr.bf16.mxu1 %v23469_v59 }
 0x1b6   :  { %19168 = vmatprep.subr.bf16.mxu1 %v22290_v17 }
 0x1b9   :  { %19169 = vmatpush3.bf16.msra.mxu1 %v22291_v20 }
 0x1ba   :  { %19170 = vmatprep.subr.bf16.mxu1 %v22292_v21 }
 0x1bd   :  { %19171 = vmatpush3.bf16.msra.mxu1 %v22293_v22 }
 0x1be   :  { %19172 = vmatprep.subr.bf16.mxu1 %v22294_v23 }
 0x1c1   :  { %19173 = vmatpush3.bf16.msra.mxu1 %v22295_v24 }
 0x1c2   :  { %19174 = vmatprep.subr.bf16.mxu1 %v22296_v25 }
 0x1c5   :  { %19175 = vmatpush3.bf16.msra.mxu1 %v22297_v26 }
 0x1c6   :  { %19176 = vmatprep.subr.bf16.mxu1 %v22298_v27 }
 0x1c9   :  { %19177 = vmatpush3.bf16.msra.mxu1 %v22299_v28 }
 0x1ca   :  { %19178 = vmatprep.subr.bf16.mxu1 %v22300_v29 }
 0x1cd   :  { %19179 = vmatpush3.bf16.msra.mxu1 %v22301_v30 }
 0x1ce   :  { %19180 = vmatprep.subr.bf16.mxu1 %v22302_v31 }
 0x1d1   :  { %19181 = vmatpush3.bf16.msra.mxu1 %v22303_v32 }
 0x1d4   :  { %923 = vmatmul.mubr.bf16.vlgmr.msra.gmra.mrb[12].mxu1 %v23467_v58 }
 0x1d5   :  { %20470 = vmatprep.mubr.msk.bf16.mxu1 %vm73_vm0, %v22322_v34 }
 0x267   :  { %v19116_v35 = vpop.f32.mrb[4].mxu1  ;;  %v19160_v36 = vpop.f32.mrb[4].mxu0 }
 0x268   :  { %v19117_v37 = vpop.f32.mrb[5].mxu1  ;;  %v19161_v38 = vpop.f32.mrb[5].mxu0 }
 0x269   :  { %v19118_v39 = vadd.f32 %v19117_v37, %v19116_v35  ;;  %v19162_v7 = vadd.f32 %v19161_v38, %v19160_v36  ;;  %v19119_v40 = vpop.f32.mrb[6].mxu1  ;;  %v19163_v10 = vpop.f32.mrb[6].mxu0 }
 0x26a   :  { %v19120_v41 = vpop.f32.mrb[7].mxu1  ;;  %v19164_v8 = vpop.f32.mrb[7].mxu0 }
 0x26b   :  { %v19121_v11 = vadd.f32 %v19120_v41, %v19119_v40  ;;  %v19165_v42 = vadd.f32 %v19164_v8, %v19163_v10 }
 0x287   :  { %v19138_v43 = vpop.f32.mrb[8].mxu1 }
 0x288   :  { %v19139_v44 = vpop.f32.mrb[9].mxu1 }
 0x289   :  { %v19140_v45 = vadd.f32 %v19139_v44, %v19138_v43  ;;  %v19141_v14 = vpop.f32.mrb[10].mxu1 }
 0x28a   :  { %v19142_v18 = vpop.f32.mrb[11].mxu1 }
 0x28b   :  { %v581_v15 = vadd.f32 %v19140_v45, %v19118_v39  ;;  %v19143_v46 = vadd.f32 %v19142_v18, %v19141_v14 }
 0x28d   :  { %v584_v47 = vadd.f32 %v19143_v46, %v19121_v11 }
 0x28f   :  { %v587_v48 = vpack.c.bf16 %v584_v47, %v581_v15 }
 0x290   :  { %18 = vsyncpa [#allocation4], 0  ;;  %v22305_v49 = vld [vmem:[%s27430_s3 + $0x8] sm:$0xff]   ;;  %v22307_v50 = vld [vmem:[%s27429_s2 + $0x280] sm:$0xff]   ;;  %vm7201_vm13 = vcmask 261120   ;;  %vm11008_vm6 = vcmask 523264  }
 0x291   :  { %20474 = vmatprep.subr.bf16.mxu0 %v587_v48  ;;  %v22308_v51 = vld [vmem:[%s27429_s2 + $0x2c8] sm:$0xff]   ;;  %v22310_v53 = vld [vmem:[%s27429_s2 + $0x2d0] sm:$0xff]   ;;  %v22312_v55 = vld [vmem:[%s27429_s2 + $0x2d8] sm:$0xff]   ;;  %vm15211_vm7 = vcmask 64512   ;;  %vm15549_vm8 = vcmask 1043456  }
 0x292   :  { %20475 = vmatpush3.bf16.msra.mxu0 %v587_v48  ;;  %v22309_v52 = vld [vmem:[%s27429_s2 + $0x288] sm:$0xff]   ;;  %v22311_v54 = vld [vmem:[%s27429_s2 + $0x290] sm:$0xff]   ;;  %v22313_v60 = vld [vmem:[%s27429_s2 + $0x298] sm:$0xff]  }
 0x293   :  { %19216 = vmatprep.subr.bf16.mxu0 %v22306_v19  ;;  %v22314_v61 = vld [vmem:[%s27429_s2 + $0x2e0] sm:$0xff]   ;;  %v22316_v63 = vld [vmem:[%s27429_s2 + $0x2e8] sm:$0xff]   ;;  %v22318_v2 = vld [vmem:[%s27429_s2 + $0x2f0] sm:$0xff]  }
 0x294   :  { %v22315_v62 = vld [vmem:[%s27429_s2 + $0x2a0] sm:$0xff]   ;;  %v22317_v0 = vld [vmem:[%s27429_s2 + $0x2a8] sm:$0xff]   ;;  %v22319_v9 = vld [vmem:[%s27429_s2 + $0x2b0] sm:$0xff]  }
 0x295   :  { %20477 = vmatmul.mubr.msk.bf16.vlgmr.msra.gmra.mrb[8].mxu0 %vm73_vm0, %v22305_v49  ;;  %v22320_v16 = vld [vmem:[%s27429_s2 + $0x2f8] sm:$0xff]   ;;  %v22324_v22 = vld [vmem:[%s27429_s2 + $0x240] sm:$0xff]   ;;  %v22326_v25 = vld [vmem:[%s27429_s2 + $0x248] sm:$0xff]  }
 0x296   :  { %19217 = vmatpush3.bf16.msra.mxu0 %v22307_v50  ;;  %1397 = vmatprep.mubr.bf16.mxu0 %v23469_v59  ;;  %v22321_v20 = vld [vmem:[%s27429_s2 + $0x2b8] sm:$0xff]   ;;  %v22325_v24 = vld [vmem:[%s27429_s2 + $0x200] sm:$0xff]   ;;  %v22327_v26 = vld [vmem:[%s27429_s2 + $0x208] sm:$0xff]  }
 0x297   :  { %19218 = vmatprep.subr.bf16.mxu0 %v22308_v51  ;;  %v22323_v23 = vld [vmem:[%s27430_s3 + $0x18] sm:$0xff]   ;;  %v22328_v27 = vld [vmem:[%s27429_s2 + $0x250] sm:$0xff]   ;;  %v22332_v31 = vld [vmem:[%s27429_s2 + $0x260] sm:$0xff]  }
 0x298   :  { %v22329_v28 = vld [vmem:[%s27429_s2 + $0x210] sm:$0xff]   ;;  %v22330_v29 = vld [vmem:[%s27429_s2 + $0x258] sm:$0xff]   ;;  %v22333_v32 = vld [vmem:[%s27429_s2 + $0x220] sm:$0xff]  }
 0x299   :  { %v22331_v30 = vld [vmem:[%s27429_s2 + $0x218] sm:$0xff]   ;;  %v22334_v33 = vld [vmem:[%s27429_s2 + $0x268] sm:$0xff]   ;;  %v22336_v35 = vld [vmem:[%s27429_s2 + $0x270] sm:$0xff]  }
 0x29a   :  { %19219 = vmatpush3.bf16.msra.mxu0 %v22309_v52  ;;  %v22335_v34 = vld [vmem:[%s27429_s2 + $0x228] sm:$0xff]   ;;  %v22337_v36 = vld [vmem:[%s27429_s2 + $0x230] sm:$0xff]   ;;  %v22338_v37 = vld [vmem:[%s27429_s2 + $0x278] sm:$0xff]  }
 0x29b   :  { %19220 = vmatprep.subr.bf16.mxu0 %v22310_v53  ;;  %v22339_v38 = vld [vmem:[%s27429_s2 + $0x238] sm:$0xff]   ;;  %v22340_v39 = vld [vmem:[%s27429_s2 + $0x340] sm:$0xff]   ;;  %v22342_v40 = vld [vmem:[%s27429_s2 + $0x348] sm:$0xff]  }
 0x29c   :  { %v22343_v10 = vld [vmem:[%s27429_s2 + $0x308] sm:$0xff]   ;;  %v22344_v41 = vld [vmem:[%s27429_s2 + $0x350] sm:$0xff]   ;;  %v22346_v11 = vld [vmem:[%s27429_s2 + $0x358] sm:$0xff]  }
 0x29d   :  { %v22345_v8 = vld [vmem:[%s27429_s2 + $0x310] sm:$0xff]   ;;  %v22348_v43 = vld [vmem:[%s27429_s2 + $0x360] sm:$0xff]   ;;  %v22350_v45 = vld [vmem:[%s27429_s2 + $0x368] sm:$0xff]  }
 0x29e   :  { %19221 = vmatpush3.bf16.msra.mxu0 %v22311_v54  ;;  %v22349_v44 = vld [vmem:[%s27429_s2 + $0x320] sm:$0xff]   ;;  %v22351_v14 = vld [vmem:[%s27429_s2 + $0x328] sm:$0xff]   ;;  %v22352_v18 = vld [vmem:[%s27429_s2 + $0x370] sm:$0xff]  }
 0x29f   :  { %19222 = vmatprep.subr.bf16.mxu0 %v22312_v55  ;;  %v22353_v15 = vld [vmem:[%s27429_s2 + $0x330] sm:$0xff]   ;;  %v22354_v46 = vld [vmem:[%s27429_s2 + $0x378] sm:$0xff]   ;;  %v22356_v48 = vld [vmem:[%s27429_s2 + $0x440] sm:$0xff]  }
 0x2a0   :  { %v22355_v47 = vld [vmem:[%s27429_s2 + $0x338] sm:$0xff]   ;;  %v22357_v19 = vld [vmem:[%s27429_s2 + $0x400] sm:$0xff]   ;;  %v22358_v49 = vld [vmem:[%s27429_s2 + $0x448] sm:$0xff]  }
 0x2a1   :  { %v22359_v50 = vld [vmem:[%s27429_s2 + $0x408] sm:$0xff]   ;;  %v22360_v51 = vld [vmem:[%s27429_s2 + $0x450] sm:$0xff]   ;;  %v22362_v53 = vld [vmem:[%s27429_s2 + $0x458] sm:$0xff]  }
 0x2a2   :  { %19223 = vmatpush3.bf16.msra.mxu0 %v22313_v60  ;;  %v22361_v52 = vld [vmem:[%s27429_s2 + $0x410] sm:$0xff]   ;;  %v22363_v54 = vld [vmem:[%s27429_s2 + $0x418] sm:$0xff]   ;;  %v22364_v55 = vld [vmem:[%s27429_s2 + $0x460] sm:$0xff]  }
 0x2a3   :  { %19224 = vmatprep.subr.bf16.mxu0 %v22314_v61  ;;  %v22365_v60 = vld [vmem:[%s27429_s2 + $0x420] sm:$0xff]   ;;  %v22366_v61 = vld [vmem:[%s27429_s2 + $0x468] sm:$0xff]  }
 0x2a6   :  { %19225 = vmatpush3.bf16.msra.mxu0 %v22315_v62  ;;  %v22367_v62 = vld [vmem:[%s27429_s2 + $0x428] sm:$0xff]  }
 0x2a7   :  { %v19182_v1 = vpop.f32.mrb[12].mxu1  ;;  %19226 = vmatprep.subr.bf16.mxu0 %v22316_v63  ;;  %v22368_v63 = vld [vmem:[%s27429_s2 + $0x470] sm:$0xff]  }
 0x2a8   :  { %v19183_v3 = vpop.f32.mrb[13].mxu1 }
 0x2a9   :  { %v19184_v4 = vadd.f32 %v19183_v3, %v19182_v1  ;;  %v19185_v5 = vpop.f32.mrb[14].mxu1  ;;  %v22370_v1 = vld [vmem:[%s27429_s2 + $0x478] sm:$0xff]   ;;  %v22372_v3 = vld [vmem:[%s27429_s2 + $0x540] sm:$0xff]  }
 0x2aa   :  { %v19186_v6 = vpop.f32.mrb[15].mxu1  ;;  %19227 = vmatpush3.bf16.msra.mxu0 %v22317_v0  ;;  %v22369_v0 = vld [vmem:[%s27429_s2 + $0x430] sm:$0xff]  }
 0x2ab   :  { %v925_v12 = vadd.f32 %v19184_v4, %v19162_v7  ;;  %v19187_v13 = vadd.f32 %v19186_v6, %v19185_v5  ;;  %19228 = vmatprep.subr.bf16.mxu0 %v22318_v2  ;;  %v22341_v7 = vld [vmem:[%s27429_s2 + $0x300] sm:$0xff]   ;;  %v22371_v2 = vld [vmem:[%s27429_s2 + $0x438] sm:$0xff]   ;;  %v22374_v5 = vld [vmem:[%s27429_s2 + $0x548] sm:$0xff]  }
 0x2ac   :  { %v22373_v4 = vld [vmem:[%s27429_s2 + $0x500] sm:$0xff]   ;;  %v22375_v6 = vld [vmem:[%s27429_s2 + $0x508] sm:$0xff]  }
 0x2ad   :  { %v928_v17 = vadd.f32 %v19187_v13, %v19165_v42  ;;  %v22347_v42 = vld [vmem:[%s27429_s2 + $0x318] sm:$0xff]  }
 0x2ae   :  { %19229 = vmatpush3.bf16.msra.mxu0 %v22319_v9  ;;  %v22376_v9 = vld [vmem:[%s27429_s2 + $0x550] sm:$0xff]   ;;  %v22378_v13 = vld [vmem:[%s27429_s2 + $0x558] sm:$0xff]  }
 0x2af   :  { %v931_v21 = vpack.c.bf16 %v928_v17, %v925_v12  ;;  %19230 = vmatprep.subr.bf16.mxu0 %v22320_v16  ;;  %v22377_v12 = vld [vmem:[%s27429_s2 + $0x510] sm:$0xff]   ;;  %v22379_v16 = vld [vmem:[%s27429_s2 + $0x518] sm:$0xff]   ;;  %v22380_v17 = vld [vmem:[%s27429_s2 + $0x560] sm:$0xff]  }
 0x2b1   :  { %20468 = vmatprep.subr.bf16.mxu1 %v931_v21 }
 0x2b2   :  { %20469 = vmatpush3.bf16.msra.mxu1 %v931_v21  ;;  %19231 = vmatpush3.bf16.msra.mxu0 %v22321_v20  ;;  %v22381_v20 = vld [vmem:[%s27429_s2 + $0x520] sm:$0xff]   ;;  %v22382_v21 = vld [vmem:[%s27429_s2 + $0x568] sm:$0xff]  }
 0x2b3   :  { %19194 = vmatprep.subr.bf16.mxu1 %v22324_v22  ;;  %v22383_v22 = vld [vmem:[%s27429_s2 + $0x528] sm:$0xff]  }
 0x2b5   :  { %20471 = vmatmul.mubr.msk.bf16.vlgmr.msra.gmra.mrb[16].mxu1 %vm73_vm0, %v22323_v23  ;;  %1398 = vmatmul.mubr.bf16.vlgmr.msra.gmra.mrb[12].mxu0 %v23467_v58  ;;  %v22384_v23 = vld [vmem:[%s27429_s2 + $0x570] sm:$0xff]  }
 0x2b6   :  { %19195 = vmatpush3.bf16.msra.mxu1 %v22325_v24  ;;  %1356 = vmatprep.mubr.bf16.mxu1 %v23465_v57  ;;  %v22385_v24 = vld [vmem:[%s27429_s2 + $0x530] sm:$0xff]  }
 0x2b7   :  { %19196 = vmatprep.subr.bf16.mxu1 %v22326_v25  ;;  %v22386_v25 = vld [vmem:[%s27429_s2 + $0x578] sm:$0xff]  }
 0x2ba   :  { %19197 = vmatpush3.bf16.msra.mxu1 %v22327_v26  ;;  %v22387_v26 = vld [vmem:[%s27429_s2 + $0x538] sm:$0xff]  }
 0x2bb   :  { %19198 = vmatprep.subr.bf16.mxu1 %v22328_v27  ;;  %v22388_v27 = vld [vmem:[%s27429_s2 + $0x5c0] sm:$0xff]  }
 0x2be   :  { %19199 = vmatpush3.bf16.msra.mxu1 %v22329_v28  ;;  %v22389_v28 = vld [vmem:[%s27429_s2 + $0x580] sm:$0xff]  }
 0x2bf   :  { %19200 = vmatprep.subr.bf16.mxu1 %v22330_v29  ;;  %v22390_v29 = vld [vmem:[%s27429_s2 + $0x5c8] sm:$0xff]  }
 0x2c2   :  { %19201 = vmatpush3.bf16.msra.mxu1 %v22331_v30  ;;  %v22452_v30 = vld [vmem:[%s27430_s3 + $0x20] sm:$0xff]  }
 0x2c3   :  { %19202 = vmatprep.subr.bf16.mxu1 %v22332_v31  ;;  %20482 = vmatprep.mubr.msk.bf16.mxu0 %vm73_vm0, %v22452_v30  ;;  %v22391_v31 = vld [vmem:[%s27429_s2 + $0x588] sm:$0xff]   ;;  %v22440_v30 = vld [vmem:[%s27429_s2 + $0x8d0] sm:$0xff]  }
 0x2c6   :  { %19203 = vmatpush3.bf16.msra.mxu1 %v22333_v32  ;;  %v22392_v32 = vld [vmem:[%s27429_s2 + $0x5d0] sm:$0xff]  }
 0x2c7   :  { %19204 = vmatprep.subr.bf16.mxu1 %v22334_v33  ;;  %v22393_v33 = vld [vmem:[%s27429_s2 + $0x590] sm:$0xff]  }
 0x2ca   :  { %19205 = vmatpush3.bf16.msra.mxu1 %v22335_v34  ;;  %v22394_v34 = vld [vmem:[%s27429_s2 + $0x5d8] sm:$0xff]  }
 0x2cb   :  { %19206 = vmatprep.subr.bf16.mxu1 %v22336_v35  ;;  %v22395_v35 = vld [vmem:[%s27429_s2 + $0x598] sm:$0xff]  }
 0x2ce   :  { %19207 = vmatpush3.bf16.msra.mxu1 %v22337_v36  ;;  %v22396_v36 = vld [vmem:[%s27429_s2 + $0x5e0] sm:$0xff]  }
 0x2cf   :  { %19208 = vmatprep.subr.bf16.mxu1 %v22338_v37  ;;  %v22397_v37 = vld [vmem:[%s27429_s2 + $0x5a0] sm:$0xff]  }
 0x2d2   :  { %19209 = vmatpush3.bf16.msra.mxu1 %v22339_v38  ;;  %v22398_v38 = vld [vmem:[%s27429_s2 + $0x5e8] sm:$0xff]  }
 0x2d3   :  { %19241 = vmatprep.subr.bf16.mxu1 %v22340_v39  ;;  %v22399_v39 = vld [vmem:[%s27429_s2 + $0x5a8] sm:$0xff]  }
 0x2d5   :  { %1357 = vmatmul.mubr.bf16.vlgmr.msra.gmra.mrb[20].mxu1 %v23463_v56 }
 0x2d6   :  { %19242 = vmatpush3.bf16.msra.mxu1 %v22341_v7  ;;  %1770 = vmatprep.mubr.bf16.mxu1 %v23465_v57  ;;  %v22400_v7 = vld [vmem:[%s27429_s2 + $0x5f0] sm:$0xff]  }
 0x2d7   :  { %19243 = vmatprep.subr.bf16.mxu1 %v22342_v40  ;;  %v22401_v40 = vld [vmem:[%s27429_s2 + $0x5b0] sm:$0xff]  }
 0x2da   :  { %19244 = vmatpush3.bf16.msra.mxu1 %v22343_v10  ;;  %v22402_v10 = vld [vmem:[%s27429_s2 + $0x5f8] sm:$0xff]  }
 0x2db   :  { %19245 = vmatprep.subr.bf16.mxu1 %v22344_v41  ;;  %v22403_v41 = vld [vmem:[%s27429_s2 + $0x5b8] sm:$0xff]  }
 0x2de   :  { %19246 = vmatpush3.bf16.msra.mxu1 %v22345_v8  ;;  %v22404_v8 = vld [vmem:[%s27429_s2 + $0x6c0] sm:$0xff]  }
 0x2df   :  { %19247 = vmatprep.subr.bf16.mxu1 %v22346_v11  ;;  %v22405_v11 = vld [vmem:[%s27429_s2 + $0x680] sm:$0xff]  }
 0x2e2   :  { %19248 = vmatpush3.bf16.msra.mxu1 %v22347_v42  ;;  %v22406_v42 = vld [vmem:[%s27429_s2 + $0x6c8] sm:$0xff]  }
 0x2e3   :  { %19249 = vmatprep.subr.bf16.mxu1 %v22348_v43  ;;  %v22407_v43 = vld [vmem:[%s27429_s2 + $0x688] sm:$0xff]  }
 0x2e6   :  { %19250 = vmatpush3.bf16.msra.mxu1 %v22349_v44  ;;  %v22408_v44 = vld [vmem:[%s27429_s2 + $0x6d0] sm:$0xff]  }
 0x2e7   :  { %19251 = vmatprep.subr.bf16.mxu1 %v22350_v45  ;;  %v22409_v45 = vld [vmem:[%s27429_s2 + $0x690] sm:$0xff]  }
 0x2ea   :  { %19252 = vmatpush3.bf16.msra.mxu1 %v22351_v14  ;;  %v22410_v14 = vld [vmem:[%s27429_s2 + $0x6d8] sm:$0xff]  }
 0x2eb   :  { %19253 = vmatprep.subr.bf16.mxu1 %v22352_v18  ;;  %v22411_v18 = vld [vmem:[%s27429_s2 + $0x698] sm:$0xff]  }
 0x2ee   :  { %19254 = vmatpush3.bf16.msra.mxu1 %v22353_v15  ;;  %v22412_v15 = vld [vmem:[%s27429_s2 + $0x6e0] sm:$0xff]  }
 0x2ef   :  { %19255 = vmatprep.subr.bf16.mxu1 %v22354_v46  ;;  %v22413_v46 = vld [vmem:[%s27429_s2 + $0x6a0] sm:$0xff]  }
 0x2f2   :  { %19256 = vmatpush3.bf16.msra.mxu1 %v22355_v47  ;;  %v22414_v47 = vld [vmem:[%s27429_s2 + $0x6e8] sm:$0xff]  }
 0x2f3   :  { %19288 = vmatprep.subr.bf16.mxu1 %v22356_v48  ;;  %v22415_v48 = vld [vmem:[%s27429_s2 + $0x6a8] sm:$0xff]  }
 0x2f5   :  { %1771 = vmatmul.mubr.bf16.vlgmr.msra.gmra.mrb[24].mxu1 %v23463_v56 }
 0x2f6   :  { %19289 = vmatpush3.bf16.msra.mxu1 %v22357_v19  ;;  %2184 = vmatprep.mubr.bf16.mxu1 %v23465_v57  ;;  %v22416_v19 = vld [vmem:[%s27429_s2 + $0x6f0] sm:$0xff]  }
 0x2f7   :  { %19290 = vmatprep.subr.bf16.mxu1 %v22358_v49  ;;  %v22417_v49 = vld [vmem:[%s27429_s2 + $0x6b0] sm:$0xff]  }
 0x2fa   :  { %19291 = vmatpush3.bf16.msra.mxu1 %v22359_v50  ;;  %v22418_v50 = vld [vmem:[%s27429_s2 + $0x6f8] sm:$0xff]  }
 0x2fb   :  { %19292 = vmatprep.subr.bf16.mxu1 %v22360_v51  ;;  %v22419_v51 = vld [vmem:[%s27429_s2 + $0x6b8] sm:$0xff]  }
 0x2fe   :  { %19293 = vmatpush3.bf16.msra.mxu1 %v22361_v52  ;;  %v22420_v52 = vld [vmem:[%s27429_s2 + $0x7c0] sm:$0xff]  }
 0x2ff   :  { %19294 = vmatprep.subr.bf16.mxu1 %v22362_v53  ;;  %v22421_v53 = vld [vmem:[%s27429_s2 + $0x780] sm:$0xff]  }
 0x302   :  { %19295 = vmatpush3.bf16.msra.mxu1 %v22363_v54  ;;  %v22422_v54 = vld [vmem:[%s27429_s2 + $0x7c8] sm:$0xff]  }
 0x303   :  { %19296 = vmatprep.subr.bf16.mxu1 %v22364_v55  ;;  %v22423_v55 = vld [vmem:[%s27429_s2 + $0x788] sm:$0xff]  }
 0x306   :  { %19297 = vmatpush3.bf16.msra.mxu1 %v22365_v60  ;;  %v22424_v60 = vld [vmem:[%s27429_s2 + $0x7d0] sm:$0xff]  }
 0x307   :  { %19298 = vmatprep.subr.bf16.mxu1 %v22366_v61  ;;  %v22425_v61 = vld [vmem:[%s27429_s2 + $0x790] sm:$0xff]  }
 0x30a   :  { %19299 = vmatpush3.bf16.msra.mxu1 %v22367_v62  ;;  %v22426_v62 = vld [vmem:[%s27429_s2 + $0x7d8] sm:$0xff]  }
 0x30b   :  { %19300 = vmatprep.subr.bf16.mxu1 %v22368_v63  ;;  %v22427_v63 = vld [vmem:[%s27429_s2 + $0x798] sm:$0xff]  }
 0x30e   :  { %19301 = vmatpush3.bf16.msra.mxu1 %v22369_v0  ;;  %v22428_v0 = vld [vmem:[%s27429_s2 + $0x7e0] sm:$0xff]  }
 0x30f   :  { %19302 = vmatprep.subr.bf16.mxu1 %v22370_v1  ;;  %v22429_v1 = vld [vmem:[%s27429_s2 + $0x7a0] sm:$0xff]  }
 0x312   :  { %19303 = vmatpush3.bf16.msra.mxu1 %v22371_v2  ;;  %v22430_v2 = vld [vmem:[%s27429_s2 + $0x7e8] sm:$0xff]  }
 0x313   :  { %19335 = vmatprep.subr.bf16.mxu1 %v22372_v3  ;;  %v22431_v3 = vld [vmem:[%s27429_s2 + $0x7a8] sm:$0xff]  }
 0x315   :  { %2185 = vmatmul.mubr.bf16.vlgmr.msra.gmra.mrb[28].mxu1 %v23463_v56 }
 0x316   :  { %19336 = vmatpush3.bf16.msra.mxu1 %v22373_v4  ;;  %2598 = vmatprep.mubr.bf16.mxu1 %v23465_v57  ;;  %v22432_v4 = vld [vmem:[%s27429_s2 + $0x7f0] sm:$0xff]  }
 0x317   :  { %19337 = vmatprep.subr.bf16.mxu1 %v22374_v5 }
 0x31a   :  { %19338 = vmatpush3.bf16.msra.mxu1 %v22375_v6 }
 0x31b   :  { %19339 = vmatprep.subr.bf16.mxu1 %v22376_v9 }
 0x31e   :  { %19340 = vmatpush3.bf16.msra.mxu1 %v22377_v12 }
 0x31f   :  { %19341 = vmatprep.subr.bf16.mxu1 %v22378_v13 }
 0x322   :  { %19342 = vmatpush3.bf16.msra.mxu1 %v22379_v16 }
 0x323   :  { %19343 = vmatprep.subr.bf16.mxu1 %v22380_v17 }
 0x326   :  { %19344 = vmatpush3.bf16.msra.mxu1 %v22381_v20  ;;  %v22433_v20 = vld [vmem:[%s27429_s2 + $0x7b0] sm:$0xff]  }
 0x327   :  { %19345 = vmatprep.subr.bf16.mxu1 %v22382_v21 }
 0x32a   :  { %19346 = vmatpush3.bf16.msra.mxu1 %v22383_v22 }
 0x32b   :  { %19347 = vmatprep.subr.bf16.mxu1 %v22384_v23  ;;  %v22434_v23 = vld [vmem:[%s27429_s2 + $0x7f8] sm:$0xff]  }
 0x32e   :  { %19348 = vmatpush3.bf16.msra.mxu1 %v22385_v24 }
 0x32f   :  { %19349 = vmatprep.subr.bf16.mxu1 %v22386_v25  ;;  %v22435_v25 = vld [vmem:[%s27429_s2 + $0x7b8] sm:$0xff]  }
 0x332   :  { %19350 = vmatpush3.bf16.msra.mxu1 %v22387_v26  ;;  %v22436_v26 = vld [vmem:[%s27429_s2 + $0x8c0] sm:$0xff]  }
 0x333   :  { %19357 = vmatprep.subr.bf16.mxu1 %v22388_v27  ;;  %v22437_v27 = vld [vmem:[%s27429_s2 + $0x880] sm:$0xff]  }
 0x335   :  { %2599 = vmatmul.mubr.bf16.vlgmr.msra.gmra.mrb[32].mxu1 %v23463_v56 }
 0x336   :  { %19358 = vmatpush3.bf16.msra.mxu1 %v22389_v28  ;;  %2639 = vmatprep.mubr.bf16.mxu1 %v23469_v59  ;;  %v22438_v28 = vld [vmem:[%s27429_s2 + $0x8c8] sm:$0xff]  }
 0x337   :  { %19359 = vmatprep.subr.bf16.mxu1 %v22390_v29  ;;  %v22439_v29 = vld [vmem:[%s27429_s2 + $0x888] sm:$0xff]  }
 0x33a   :  { %19360 = vmatpush3.bf16.msra.mxu1 %v22391_v31  ;;  %v22441_v31 = vld [vmem:[%s27429_s2 + $0x890] sm:$0xff]  }
 0x33b   :  { %19361 = vmatprep.subr.bf16.mxu1 %v22392_v32  ;;  %v22442_v32 = vld [vmem:[%s27429_s2 + $0x8d8] sm:$0xff]  }
 0x33e   :  { %19362 = vmatpush3.bf16.msra.mxu1 %v22393_v33  ;;  %v22443_v33 = vld [vmem:[%s27429_s2 + $0x898] sm:$0xff]  }
 0x33f   :  { %19363 = vmatprep.subr.bf16.mxu1 %v22394_v34  ;;  %v22444_v34 = vld [vmem:[%s27429_s2 + $0x8e0] sm:$0xff]  }
 0x342   :  { %19364 = vmatpush3.bf16.msra.mxu1 %v22395_v35  ;;  %v22445_v35 = vld [vmem:[%s27429_s2 + $0x8a0] sm:$0xff]  }
 0x343   :  { %19365 = vmatprep.subr.bf16.mxu1 %v22396_v36  ;;  %v22446_v36 = vld [vmem:[%s27429_s2 + $0x8e8] sm:$0xff]  }
 0x346   :  { %19366 = vmatpush3.bf16.msra.mxu1 %v22397_v37  ;;  %v22447_v37 = vld [vmem:[%s27429_s2 + $0x8a8] sm:$0xff]  }
 0x347   :  { %19367 = vmatprep.subr.bf16.mxu1 %v22398_v38  ;;  %v22448_v38 = vld [vmem:[%s27429_s2 + $0x8f0] sm:$0xff]  }
 0x34a   :  { %19368 = vmatpush3.bf16.msra.mxu1 %v22399_v39 }
 0x34b   :  { %19369 = vmatprep.subr.bf16.mxu1 %v22400_v7 }
 0x34e   :  { %19370 = vmatpush3.bf16.msra.mxu1 %v22401_v40 }
 0x34f   :  { %19371 = vmatprep.subr.bf16.mxu1 %v22402_v10 }
 0x352   :  { %19372 = vmatpush3.bf16.msra.mxu1 %v22403_v41  ;;  %v22449_v41 = vld [vmem:[%s27429_s2 + $0x8b0] sm:$0xff]  }
 0x353   :  { %19404 = vmatprep.subr.bf16.mxu1 %v22404_v8 }
 0x355   :  { %2640 = vmatmul.mubr.bf16.vlgmr.msra.gmra.mrb[36].mxu1 %v23467_v58 }
 0x356   :  { %19405 = vmatpush3.bf16.msra.mxu1 %v22405_v11  ;;  %3053 = vmatprep.mubr.bf16.mxu1 %v23469_v59  ;;  %v22450_v11 = vld [vmem:[%s27429_s2 + $0x8f8] sm:$0xff]  }
 0x357   :  { %19406 = vmatprep.subr.bf16.mxu1 %v22406_v42 }
 0x35a   :  { %19407 = vmatpush3.bf16.msra.mxu1 %v22407_v43 }
 0x35b   :  { %19408 = vmatprep.subr.bf16.mxu1 %v22408_v44 }
 0x35e   :  { %19409 = vmatpush3.bf16.msra.mxu1 %v22409_v45  ;;  %v22451_v45 = vld [vmem:[%s27429_s2 + $0x8b8] sm:$0xff]  }
 0x35f   :  { %19410 = vmatprep.subr.bf16.mxu1 %v22410_v14  ;;  %v22453_v14 = vld [vmem:[%s27429_s2 + $0x940] sm:$0xff]  }
 0x362   :  { %19411 = vmatpush3.bf16.msra.mxu1 %v22411_v18 }
 0x363   :  { %19412 = vmatprep.subr.bf16.mxu1 %v22412_v15  ;;  %v22455_v15 = vld [vmem:[%s27429_s2 + $0x3c0] sm:$0xff]  }
 0x366   :  { %19413 = vmatpush3.bf16.msra.mxu1 %v22413_v46  ;;  %v22454_v46 = vld [vmem:[%s27430_s3 + $0x28] sm:$0xff]  }
 0x367   :  { %19414 = vmatprep.subr.bf16.mxu1 %v22414_v47  ;;  %v22456_v47 = vld [vmem:[%s27429_s2 + $0x900] sm:$0xff]  }
 0x36a   :  { %19415 = vmatpush3.bf16.msra.mxu1 %v22415_v48  ;;  %v22457_v48 = vld [vmem:[%s27429_s2 + $0x380] sm:$0xff]  }
 0x36b   :  { %19416 = vmatprep.subr.bf16.mxu1 %v22416_v19  ;;  %v22458_v19 = vld [vmem:[%s27429_s2 + $0x948] sm:$0xff]  }
 0x36e   :  { %19417 = vmatpush3.bf16.msra.mxu1 %v22417_v49  ;;  %v22459_v49 = vld [vmem:[%s27429_s2 + $0x3c8] sm:$0xff]  }
 0x36f   :  { %19418 = vmatprep.subr.bf16.mxu1 %v22418_v50  ;;  %v22460_v50 = vld [vmem:[%s27429_s2 + $0x908] sm:$0xff]  }
 0x372   :  { %19419 = vmatpush3.bf16.msra.mxu1 %v22419_v51  ;;  %v22461_v51 = vld [vmem:[%s27429_s2 + $0x388] sm:$0xff]  }
 0x373   :  { %19451 = vmatprep.subr.bf16.mxu1 %v22420_v52  ;;  %v22462_v52 = vld [vmem:[%s27429_s2 + $0x950] sm:$0xff]  }
 0x375   :  { %3054 = vmatmul.mubr.bf16.vlgmr.msra.gmra.mrb[40].mxu1 %v23467_v58 }
 0x376   :  { %19452 = vmatpush3.bf16.msra.mxu1 %v22421_v53  ;;  %3467 = vmatprep.mubr.bf16.mxu1 %v23469_v59  ;;  %v22463_v53 = vld [vmem:[%s27429_s2 + $0x3d0] sm:$0xff]  }
 0x377   :  { %19453 = vmatprep.subr.bf16.mxu1 %v22422_v54  ;;  %v22464_v54 = vld [vmem:[%s27429_s2 + $0x910] sm:$0xff]  }
 0x37a   :  { %19454 = vmatpush3.bf16.msra.mxu1 %v22423_v55  ;;  %v22465_v55 = vld [vmem:[%s27429_s2 + $0x390] sm:$0xff]  }
 0x37b   :  { %19455 = vmatprep.subr.bf16.mxu1 %v22424_v60  ;;  %v22466_v60 = vld [vmem:[%s27429_s2 + $0x958] sm:$0xff]  }
 0x37e   :  { %19456 = vmatpush3.bf16.msra.mxu1 %v22425_v61  ;;  %v22467_v61 = vld [vmem:[%s27429_s2 + $0x3d8] sm:$0xff]  }
 0x37f   :  { %19457 = vmatprep.subr.bf16.mxu1 %v22426_v62  ;;  %v22468_v62 = vld [vmem:[%s27429_s2 + $0x918] sm:$0xff]  }
 0x382   :  { %19458 = vmatpush3.bf16.msra.mxu1 %v22427_v63  ;;  %v22469_v63 = vld [vmem:[%s27429_s2 + $0x398] sm:$0xff]  }
 0x383   :  { %19459 = vmatprep.subr.bf16.mxu1 %v22428_v0  ;;  %v22470_v0 = vld [vmem:[%s27429_s2 + $0x960] sm:$0xff]  }
 0x386   :  { %19460 = vmatpush3.bf16.msra.mxu1 %v22429_v1  ;;  %v22471_v1 = vld [vmem:[%s27429_s2 + $0x3e0] sm:$0xff]  }
 0x387   :  { %19461 = vmatprep.subr.bf16.mxu1 %v22430_v2  ;;  %v22472_v2 = vld [vmem:[%s27429_s2 + $0x920] sm:$0xff]  }
 0x388   :  { %v23976_v5 = vpop.f32.mrb[16].mxu1  ;;  %v19232_v6 = vpop.f32.mrb[12].mxu0 }
 0x389   :  { %v23978_v9 = vpop.f32.mrb[17].mxu1  ;;  %v19233_v12 = vpop.f32.mrb[13].mxu0 }
 0x38a   :  { %v19234_v13 = vadd.f32 %v19233_v12, %v19232_v6  ;;  %v23980_v16 = vpop.f32.mrb[18].mxu1  ;;  %v19235_v17 = vpop.f32.mrb[14].mxu0  ;;  %19462 = vmatpush3.bf16.msra.mxu1 %v22431_v3  ;;  %v22473_v3 = vld [vmem:[%s27429_s2 + $0x3a0] sm:$0xff]   ;;  %v22475_v6 = vld [vmem:[%s27429_s2 + $0x3e8] sm:$0xff]  }
 0x38b   :  { %v23985_v21 = vpop.f32.mrb[19].mxu1  ;;  %v19236_v22 = vpop.f32.mrb[15].mxu0  ;;  %19463 = vmatprep.subr.bf16.mxu1 %v22432_v4  ;;  %v22474_v4 = vld [vmem:[%s27429_s2 + $0x968] sm:$0xff]  }
 0x38c   :  { %v19237_v24 = vadd.f32 %v19236_v22, %v19235_v17  ;;  %v22476_v12 = vld [vmem:[%s27429_s2 + $0x928] sm:$0xff]   ;;  %v22478_v17 = vld [vmem:[%s27429_s2 + $0x970] sm:$0xff]  }
 0x38d   :  { %v22479_v22 = vld [vmem:[%s27429_s2 + $0x3f0] sm:$0xff]  }
 0x38e   :  { %19464 = vmatpush3.bf16.msra.mxu1 %v22433_v20 }
 0x38f   :  { %19465 = vmatprep.subr.bf16.mxu1 %v22434_v23 }
 0x392   :  { %19466 = vmatpush3.bf16.msra.mxu1 %v22435_v25 }
 0x393   :  { %19498 = vmatprep.subr.bf16.mxu1 %v22436_v26  ;;  %v22480_v26 = vld [vmem:[%s27429_s2 + $0x930] sm:$0xff]  }
 0x395   :  { %3468 = vmatmul.mubr.bf16.vlgmr.msra.gmra.mrb[44].mxu1 %v23467_v58 }
 0x396   :  { %19499 = vmatpush3.bf16.msra.mxu1 %v22437_v27  ;;  %3881 = vmatprep.mubr.bf16.mxu1 %v23469_v59 }
 0x397   :  { %19500 = vmatprep.subr.bf16.mxu1 %v22438_v28  ;;  %v22481_v28 = vld [vmem:[%s27429_s2 + $0x3b0] sm:$0xff]  }
 0x39a   :  { %19501 = vmatpush3.bf16.msra.mxu1 %v22439_v29  ;;  %v22482_v29 = vld [vmem:[%s27429_s2 + $0x978] sm:$0xff]  }
 0x39b   :  { %19502 = vmatprep.subr.bf16.mxu1 %v22440_v30 }
 0x39e   :  { %19503 = vmatpush3.bf16.msra.mxu1 %v22441_v31  ;;  %v22483_v31 = vld [vmem:[%s27429_s2 + $0x3f8] sm:$0xff]  }
 0x39f   :  { %19504 = vmatprep.subr.bf16.mxu1 %v22442_v32  ;;  %v22484_v32 = vld [vmem:[%s27429_s2 + $0x938] sm:$0xff]  }
 0x3a2   :  { %19505 = vmatpush3.bf16.msra.mxu1 %v22443_v33  ;;  %v22485_v33 = vld [vmem:[%s27429_s2 + $0x3b8] sm:$0xff]  }
 0x3a3   :  { %19506 = vmatprep.subr.bf16.mxu1 %v22444_v34  ;;  %v22486_v34 = vld [vmem:[%s27429_s2 + $0xa40] sm:$0xff]  }
 0x3a6   :  { %19507 = vmatpush3.bf16.msra.mxu1 %v22445_v35  ;;  %v22487_v35 = vld [vmem:[%s27429_s2 + $0xa00] sm:$0xff]  }
 0x3a7   :  { %19508 = vmatprep.subr.bf16.mxu1 %v22446_v36  ;;  %v22488_v36 = vld [vmem:[%s27429_s2 + $0xa48] sm:$0xff]  }
 0x3a8   :  { %v19210_v39 = vpop.f32.mrb[20].mxu1 }
 0x3a9   :  { %v19211_v7 = vpop.f32.mrb[21].mxu1 }
 0x3aa   :  { %v19212_v40 = vadd.f32 %v19211_v7, %v19210_v39  ;;  %v19213_v10 = vpop.f32.mrb[22].mxu1  ;;  %19509 = vmatpush3.bf16.msra.mxu1 %v22447_v37  ;;  %v22489_v37 = vld [vmem:[%s27429_s2 + $0xa08] sm:$0xff]   ;;  %v22491_v39 = vld [vmem:[%s27429_s2 + $0xa10] sm:$0xff]   ;;  %v22492_v7 = vld [vmem:[%s27429_s2 + $0xa58] sm:$0xff]  }
 0x3ab   :  { %v19214_v8 = vpop.f32.mrb[23].mxu1  ;;  %19510 = vmatprep.subr.bf16.mxu1 %v22448_v38  ;;  %v22490_v38 = vld [vmem:[%s27429_s2 + $0xa50] sm:$0xff]  }
 0x3ac   :  { %v1400_v42 = vadd.f32 %v19234_v13, %v19212_v40  ;;  %v19215_v43 = vadd.f32 %v19214_v8, %v19213_v10  ;;  %v22477_v13 = vld [vmem:[%s27429_s2 + $0x3a8] sm:$0xff]   ;;  %v22493_v40 = vld [vmem:[%s27429_s2 + $0xa18] sm:$0xff]   ;;  %v22494_v10 = vld [vmem:[%s27429_s2 + $0xa60] sm:$0xff]  }
 0x3ad   :  { %v22496_v8 = vld [vmem:[%s27429_s2 + $0xa68] sm:$0xff]  }
 0x3ae   :  { %v1403_v44 = vadd.f32 %v19237_v24, %v19215_v43  ;;  %19511 = vmatpush3.bf16.msra.mxu1 %v22449_v41  ;;  %v22495_v41 = vld [vmem:[%s27429_s2 + $0xa20] sm:$0xff]  }
 0x3af   :  { %19512 = vmatprep.subr.bf16.mxu1 %v22450_v11  ;;  %v22497_v11 = vld [vmem:[%s27429_s2 + $0xa28] sm:$0xff]  }
 0x3b0   :  { %v1406_v18 = vpack.c.bf16 %v1403_v44, %v1400_v42  ;;  %v22498_v42 = vld [vmem:[%s27429_s2 + $0xa70] sm:$0xff]  }
 0x3b2   :  { %20480 = vmatprep.subr.bf16.mxu0 %v1406_v18  ;;  %19513 = vmatpush3.bf16.msra.mxu1 %v22451_v45 }
 0x3b3   :  { %20481 = vmatpush3.bf16.msra.mxu0 %v1406_v18  ;;  %19523 = vmatprep.subr.bf16.mxu1 %v22453_v14  ;;  %v22499_v18 = vld [vmem:[%s27429_s2 + $0xa30] sm:$0xff]  }
 0x3b4   :  { %19263 = vmatprep.subr.bf16.mxu0 %v22455_v15 }
 0x3b5   :  { %3882 = vmatmul.mubr.bf16.vlgmr.msra.gmra.mrb[48].mxu1 %v23467_v58 }
 0x3b6   :  { %20483 = vmatmul.mubr.msk.bf16.vlgmr.msra.gmra.mrb[8].mxu0 %vm73_vm0, %v22454_v46  ;;  %19524 = vmatpush3.bf16.msra.mxu1 %v22456_v47  ;;  %v22500_v46 = vld [vmem:[%s27429_s2 + $0xa78] sm:$0xff]  }
 0x3b7   :  { %4254 = vmatprep.mubr.bf16.mxu1 %v23465_v57  ;;  %19264 = vmatpush3.bf16.msra.mxu0 %v22457_v48  ;;  %v22501_v48 = vld [vmem:[%s27429_s2 + $0xa38] sm:$0xff]  }
 0x3b8   :  { %1811 = vmatprep.mubr.bf16.mxu0 %v23469_v59  ;;  %19525 = vmatprep.subr.bf16.mxu1 %v22458_v19  ;;  %v22502_v19 = vld [vmem:[%s27429_s2 + $0xb40] sm:$0xff]  }
 0x3b9   :  { %19265 = vmatprep.subr.bf16.mxu0 %v22459_v49  ;;  %v22503_v49 = vld [vmem:[%s27429_s2 + $0xb00] sm:$0xff]  }
 0x3ba   :  { %19526 = vmatpush3.bf16.msra.mxu1 %v22460_v50  ;;  %v22504_v50 = vld [vmem:[%s27429_s2 + $0xb48] sm:$0xff]  }
 0x3bb   :  { %19266 = vmatpush3.bf16.msra.mxu0 %v22461_v51  ;;  %19527 = vmatprep.subr.bf16.mxu1 %v22462_v52  ;;  %v22505_v51 = vld [vmem:[%s27429_s2 + $0xb08] sm:$0xff]   ;;  %v22506_v52 = vld [vmem:[%s27429_s2 + $0xb50] sm:$0xff]  }
 0x3bc   :  { %19267 = vmatprep.subr.bf16.mxu0 %v22463_v53  ;;  %v22507_v53 = vld [vmem:[%s27429_s2 + $0xb10] sm:$0xff]  }
 0x3be   :  { %19528 = vmatpush3.bf16.msra.mxu1 %v22464_v54  ;;  %v22508_v54 = vld [vmem:[%s27429_s2 + $0xb58] sm:$0xff]  }
 0x3bf   :  { %19268 = vmatpush3.bf16.msra.mxu0 %v22465_v55  ;;  %19529 = vmatprep.subr.bf16.mxu1 %v22466_v60  ;;  %v22509_v55 = vld [vmem:[%s27429_s2 + $0xb18] sm:$0xff]   ;;  %v22510_v60 = vld [vmem:[%s27429_s2 + $0xb60] sm:$0xff]  }
 0x3c0   :  { %19269 = vmatprep.subr.bf16.mxu0 %v22467_v61  ;;  %v22511_v61 = vld [vmem:[%s27429_s2 + $0xb20] sm:$0xff]  }
 0x3c2   :  { %19530 = vmatpush3.bf16.msra.mxu1 %v22468_v62  ;;  %v22512_v62 = vld [vmem:[%s27429_s2 + $0xb68] sm:$0xff]  }
 0x3c3   :  { %19270 = vmatpush3.bf16.msra.mxu0 %v22469_v63  ;;  %19531 = vmatprep.subr.bf16.mxu1 %v22470_v0  ;;  %v22513_v63 = vld [vmem:[%s27429_s2 + $0xb28] sm:$0xff]   ;;  %v22514_v0 = vld [vmem:[%s27429_s2 + $0xb70] sm:$0xff]  }
 0x3c4   :  { %19271 = vmatprep.subr.bf16.mxu0 %v22471_v1 }
 0x3c6   :  { %19532 = vmatpush3.bf16.msra.mxu1 %v22472_v2 }
 0x3c7   :  { %19272 = vmatpush3.bf16.msra.mxu0 %v22473_v3  ;;  %19533 = vmatprep.subr.bf16.mxu1 %v22474_v4 }
 0x3c8   :  { %v19257_v20 = vpop.f32.mrb[24].mxu1  ;;  %19273 = vmatprep.subr.bf16.mxu0 %v22475_v6  ;;  %v22515_v6 = vld [vmem:[%s27429_s2 + $0xb30] sm:$0xff]  }
 0x3c9   :  { %v19258_v23 = vpop.f32.mrb[25].mxu1 }
 0x3ca   :  { %v24128_v24 = vadd.f32 %v19258_v23, %v19257_v20  ;;  %v19260_v25 = vpop.f32.mrb[26].mxu1  ;;  %19534 = vmatpush3.bf16.msra.mxu1 %v22476_v12  ;;  %v22517_v20 = vld [vmem:[%s27429_s2 + $0xb38] sm:$0xff]   ;;  %v22519_v23 = vld [vmem:[%s27429_s2 + $0xc00] sm:$0xff]  }
 0x3cb   :  { %v19261_v27 = vpop.f32.mrb[27].mxu1  ;;  %19274 = vmatpush3.bf16.msra.mxu0 %v22477_v13  ;;  %19535 = vmatprep.subr.bf16.mxu1 %v22478_v17  ;;  %v22516_v13 = vld [vmem:[%s27429_s2 + $0xb78] sm:$0xff]  }
 0x3cc   :  { %v24139_v30 = vadd.f32 %v19261_v27, %v19260_v25  ;;  %19275 = vmatprep.subr.bf16.mxu0 %v22479_v22  ;;  %v22518_v22 = vld [vmem:[%s27429_s2 + $0xc40] sm:$0xff]   ;;  %v22520_v25 = vld [vmem:[%s27429_s2 + $0xc48] sm:$0xff]   ;;  %v22522_v27 = vld [vmem:[%s27429_s2 + $0xc50] sm:$0xff]  }
 0x3ce   :  { %19536 = vmatpush3.bf16.msra.mxu1 %v22480_v26  ;;  %v22521_v26 = vld [vmem:[%s27429_s2 + $0xc08] sm:$0xff]  }
 0x3cf   :  { %19276 = vmatpush3.bf16.msra.mxu0 %v22481_v28  ;;  %19537 = vmatprep.subr.bf16.mxu1 %v22482_v29  ;;  %v22523_v28 = vld [vmem:[%s27429_s2 + $0xc10] sm:$0xff]   ;;  %v22524_v29 = vld [vmem:[%s27429_s2 + $0xc58] sm:$0xff]  }
 0x3d0   :  { %19277 = vmatprep.subr.bf16.mxu0 %v22483_v31  ;;  %v22525_v31 = vld [vmem:[%s27429_s2 + $0xc18] sm:$0xff]  }
 0x3d2   :  { %19538 = vmatpush3.bf16.msra.mxu1 %v22484_v32  ;;  %v22526_v32 = vld [vmem:[%s27429_s2 + $0xc60] sm:$0xff]  }
 0x3d3   :  { %19278 = vmatpush3.bf16.msra.mxu0 %v22485_v33  ;;  %19570 = vmatprep.subr.bf16.mxu1 %v22486_v34  ;;  %v22527_v33 = vld [vmem:[%s27429_s2 + $0xc20] sm:$0xff]   ;;  %v22528_v34 = vld [vmem:[%s27429_s2 + $0xc68] sm:$0xff]  }
 0x3d5   :  { %4255 = vmatmul.mubr.bf16.vlgmr.msra.gmra.mrb[52].mxu1 %v23463_v56 }
 0x3d6   :  { %1812 = vmatmul.mubr.bf16.vlgmr.msra.gmra.mrb[16].mxu0 %v23467_v58  ;;  %19571 = vmatpush3.bf16.msra.mxu1 %v22487_v35  ;;  %v22529_v35 = vld [vmem:[%s27429_s2 + $0xc28] sm:$0xff]  }
 0x3d7   :  { %4668 = vmatprep.mubr.bf16.mxu1 %v23465_v57  ;;  %19572 = vmatprep.subr.bf16.mxu1 %v22488_v36  ;;  %v22530_v36 = vld [vmem:[%s27429_s2 + $0xc70] sm:$0xff]  }
 0x3da   :  { %19573 = vmatpush3.bf16.msra.mxu1 %v22489_v37 }
 0x3db   :  { %19574 = vmatprep.subr.bf16.mxu1 %v22490_v38 }
 0x3de   :  { %19575 = vmatpush3.bf16.msra.mxu1 %v22491_v39 }
 0x3df   :  { %19576 = vmatprep.subr.bf16.mxu1 %v22492_v7 }
 0x3e2   :  { %19577 = vmatpush3.bf16.msra.mxu1 %v22493_v40  ;;  %v22531_v40 = vld [vmem:[%s27429_s2 + $0xc30] sm:$0xff]  }
 0x3e3   :  { %19578 = vmatprep.subr.bf16.mxu1 %v22494_v10 }
 0x3e6   :  { %19579 = vmatpush3.bf16.msra.mxu1 %v22495_v41  ;;  %v22532_v41 = vld [vmem:[%s27429_s2 + $0xc78] sm:$0xff]  }
 0x3e7   :  { %19580 = vmatprep.subr.bf16.mxu1 %v22496_v8 }
 0x3e8   :  { %v19304_v43 = vpop.f32.mrb[28].mxu1 }
 0x3e9   :  { %v19305_v44 = vpop.f32.mrb[29].mxu1 }
 0x3ea   :  { %v24192_v45 = vadd.f32 %v19305_v44, %v19304_v43  ;;  %v19307_v14 = vpop.f32.mrb[30].mxu1  ;;  %19581 = vmatpush3.bf16.msra.mxu1 %v22497_v11  ;;  %v22533_v43 = vld [vmem:[%s27429_s2 + $0xc38] sm:$0xff]   ;;  %v22534_v44 = vld [vmem:[%s27429_s2 + $0xd40] sm:$0xff]  }
 0x3eb   :  { %v19308_v15 = vpop.f32.mrb[31].mxu1  ;;  %19582 = vmatprep.subr.bf16.mxu1 %v22498_v42 }
 0x3ec   :  { %v24200_v47 = vadd.f32 %v19308_v15, %v19307_v14  ;;  %v22536_v15 = vld [vmem:[%s27429_s2 + $0xd48] sm:$0xff]  }
 0x3ee   :  { %19583 = vmatpush3.bf16.msra.mxu1 %v22499_v18  ;;  %v22535_v18 = vld [vmem:[%s27429_s2 + $0xd00] sm:$0xff]  }
 0x3ef   :  { %19584 = vmatprep.subr.bf16.mxu1 %v22500_v46  ;;  %v22598_v46 = vld [vmem:[%s27430_s3 + $0x30] sm:$0xff]  }
 0x3f0   :  { %20488 = vmatprep.mubr.msk.bf16.mxu0 %vm73_vm0, %v22598_v46  ;;  %v22575_v46 = vld [vmem:[%s27429_s2 + $0xea0] sm:$0xff]  }
 0x3f2   :  { %19585 = vmatpush3.bf16.msra.mxu1 %v22501_v48  ;;  %v22537_v48 = vld [vmem:[%s27429_s2 + $0xd08] sm:$0xff]  }
 0x3f3   :  { %19617 = vmatprep.subr.bf16.mxu1 %v22502_v19  ;;  %v22538_v19 = vld [vmem:[%s27429_s2 + $0xd50] sm:$0xff]  }
 0x3f5   :  { %4669 = vmatmul.mubr.bf16.vlgmr.msra.gmra.mrb[56].mxu1 %v23463_v56 }
 0x3f6   :  { %19618 = vmatpush3.bf16.msra.mxu1 %v22503_v49  ;;  %5082 = vmatprep.mubr.bf16.mxu1 %v23465_v57  ;;  %v22539_v49 = vld [vmem:[%s27429_s2 + $0xd10] sm:$0xff]  }
 0x3f7   :  { %19619 = vmatprep.subr.bf16.mxu1 %v22504_v50  ;;  %v22540_v50 = vld [vmem:[%s27429_s2 + $0xd58] sm:$0xff]  }
 0x3fa   :  { %19620 = vmatpush3.bf16.msra.mxu1 %v22505_v51  ;;  %v22541_v51 = vld [vmem:[%s27429_s2 + $0xd18] sm:$0xff]  }
 0x3fb   :  { %19621 = vmatprep.subr.bf16.mxu1 %v22506_v52  ;;  %v22542_v52 = vld [vmem:[%s27429_s2 + $0xd60] sm:$0xff]  }
 0x3fe   :  { %19622 = vmatpush3.bf16.msra.mxu1 %v22507_v53  ;;  %v22543_v53 = vld [vmem:[%s27429_s2 + $0xd20] sm:$0xff]  }
 0x3ff   :  { %19623 = vmatprep.subr.bf16.mxu1 %v22508_v54  ;;  %v22544_v54 = vld [vmem:[%s27429_s2 + $0xd68] sm:$0xff]  }
 0x402   :  { %19624 = vmatpush3.bf16.msra.mxu1 %v22509_v55  ;;  %v22545_v55 = vld [vmem:[%s27429_s2 + $0xd28] sm:$0xff]  }
 0x403   :  { %19625 = vmatprep.subr.bf16.mxu1 %v22510_v60  ;;  %v22546_v60 = vld [vmem:[%s27429_s2 + $0xd70] sm:$0xff]  }
 0x406   :  { %19626 = vmatpush3.bf16.msra.mxu1 %v22511_v61 }
 0x407   :  { %19627 = vmatprep.subr.bf16.mxu1 %v22512_v62 }
 0x408   :  { %v19351_v1 = vpop.f32.mrb[32].mxu1 }
 0x409   :  { %v19352_v2 = vpop.f32.mrb[33].mxu1 }
 0x40a   :  { %v19353_v3 = vadd.f32 %v19352_v2, %v19351_v1  ;;  %v19354_v4 = vpop.f32.mrb[34].mxu1  ;;  %19628 = vmatpush3.bf16.msra.mxu1 %v22513_v63  ;;  %v22547_v1 = vld [vmem:[%s27429_s2 + $0xd30] sm:$0xff]  }
 0x40b   :  { %v19355_v12 = vpop.f32.mrb[35].mxu1  ;;  %19629 = vmatprep.subr.bf16.mxu1 %v22514_v0 }
 0x40c   :  { %v19356_v17 = vadd.f32 %v19355_v12, %v19354_v4  ;;  %v22550_v12 = vld [vmem:[%s27429_s2 + $0xdc0] sm:$0xff]  }
 0x40e   :  { %19630 = vmatpush3.bf16.msra.mxu1 %v22515_v6  ;;  %v22549_v6 = vld [vmem:[%s27429_s2 + $0xd38] sm:$0xff]  }
 0x40f   :  { %19631 = vmatprep.subr.bf16.mxu1 %v22516_v13  ;;  %v22551_v13 = vld [vmem:[%s27429_s2 + $0xd80] sm:$0xff]  }
 0x412   :  { %19632 = vmatpush3.bf16.msra.mxu1 %v22517_v20  ;;  %v22553_v20 = vld [vmem:[%s27429_s2 + $0xd88] sm:$0xff]  }
 0x413   :  { %19664 = vmatprep.subr.bf16.mxu1 %v22518_v22  ;;  %v22554_v22 = vld [vmem:[%s27429_s2 + $0xdd0] sm:$0xff]  }
 0x415   :  { %5083 = vmatmul.mubr.bf16.vlgmr.msra.gmra.mrb[60].mxu1 %v23463_v56 }
 0x416   :  { %19665 = vmatpush3.bf16.msra.mxu1 %v22519_v23  ;;  %5496 = vmatprep.mubr.bf16.mxu1 %v23465_v57  ;;  %v22555_v23 = vld [vmem:[%s27429_s2 + $0xd90] sm:$0xff]  }
 0x417   :  { %19666 = vmatprep.subr.bf16.mxu1 %v22520_v25  ;;  %v22556_v25 = vld [vmem:[%s27429_s2 + $0xdd8] sm:$0xff]  }
 0x41a   :  { %19667 = vmatpush3.bf16.msra.mxu1 %v22521_v26  ;;  %v22557_v26 = vld [vmem:[%s27429_s2 + $0xd98] sm:$0xff]  }
 0x41b   :  { %19668 = vmatprep.subr.bf16.mxu1 %v22522_v27  ;;  %v22558_v27 = vld [vmem:[%s27429_s2 + $0xde0] sm:$0xff]  }
 0x41e   :  { %19669 = vmatpush3.bf16.msra.mxu1 %v22523_v28  ;;  %v22559_v28 = vld [vmem:[%s27429_s2 + $0xda0] sm:$0xff]  }
 0x41f   :  { %19670 = vmatprep.subr.bf16.mxu1 %v22524_v29  ;;  %v22560_v29 = vld [vmem:[%s27429_s2 + $0xde8] sm:$0xff]  }
 0x422   :  { %19671 = vmatpush3.bf16.msra.mxu1 %v22525_v31  ;;  %v22561_v31 = vld [vmem:[%s27429_s2 + $0xda8] sm:$0xff]  }
 0x423   :  { %19672 = vmatprep.subr.bf16.mxu1 %v22526_v32  ;;  %v22562_v32 = vld [vmem:[%s27429_s2 + $0xdf0] sm:$0xff]  }
 0x426   :  { %19673 = vmatpush3.bf16.msra.mxu1 %v22527_v33 }
 0x427   :  { %19674 = vmatprep.subr.bf16.mxu1 %v22528_v34 }
 0x428   :  { %v19373_v37 = vpop.f32.mrb[36].mxu1 }
 0x429   :  { %v19374_v38 = vpop.f32.mrb[37].mxu1 }
 0x42a   :  { %v19375_v39 = vadd.f32 %v19374_v38, %v19373_v37  ;;  %v19376_v7 = vpop.f32.mrb[38].mxu1  ;;  %19675 = vmatpush3.bf16.msra.mxu1 %v22529_v35  ;;  %v22563_v37 = vld [vmem:[%s27429_s2 + $0xdb0] sm:$0xff]  }
 0x42b   :  { %v19377_v10 = vpop.f32.mrb[39].mxu1  ;;  %19676 = vmatprep.subr.bf16.mxu1 %v22530_v36 }
 0x42c   :  { %v2642_v8 = vadd.f32 %v19375_v39, %v19353_v3  ;;  %v19378_v11 = vadd.f32 %v19377_v10, %v19376_v7  ;;  %v22548_v3 = vld [vmem:[%s27429_s2 + $0xd78] sm:$0xff]   ;;  %v22566_v10 = vld [vmem:[%s27429_s2 + $0xec0] sm:$0xff]  }
 0x42d   :  { %v22564_v39 = vld [vmem:[%s27429_s2 + $0xdf8] sm:$0xff]  }
 0x42e   :  { %v2645_v42 = vadd.f32 %v19378_v11, %v19356_v17  ;;  %19677 = vmatpush3.bf16.msra.mxu1 %v22531_v40  ;;  %v22552_v17 = vld [vmem:[%s27429_s2 + $0xdc8] sm:$0xff]   ;;  %v22565_v40 = vld [vmem:[%s27429_s2 + $0xdb8] sm:$0xff]  }
 0x42f   :  { %19678 = vmatprep.subr.bf16.mxu1 %v22532_v41  ;;  %v22567_v41 = vld [vmem:[%s27429_s2 + $0xe80] sm:$0xff]   ;;  %v22569_v11 = vld [vmem:[%s27429_s2 + $0xe88] sm:$0xff]  }
 0x430   :  { %v24308_v14 = vpack.c.bf16 %v2645_v42, %v2642_v8  ;;  %v22568_v8 = vld [vmem:[%s27429_s2 + $0xec8] sm:$0xff]   ;;  %v22570_v42 = vld [vmem:[%s27429_s2 + $0xed0] sm:$0xff]  }
 0x432   :  { %19679 = vmatpush3.bf16.msra.mxu1 %v22533_v43  ;;  %v22571_v43 = vld [vmem:[%s27429_s2 + $0xe90] sm:$0xff]  }
 0x433   :  { %19711 = vmatprep.subr.bf16.mxu1 %v22534_v44  ;;  %v22572_v44 = vld [vmem:[%s27429_s2 + $0xed8] sm:$0xff]  }
 0x435   :  { %5497 = vmatmul.mubr.bf16.vlgmr.msra.gmra.mrb[64].mxu1 %v23463_v56 }
 0x436   :  { %19712 = vmatpush3.bf16.msra.mxu1 %v22535_v18  ;;  %5910 = vmatprep.mubr.bf16.mxu1 %v23465_v57  ;;  %v22573_v18 = vld [vmem:[%s27429_s2 + $0xe98] sm:$0xff]  }
 0x437   :  { %19713 = vmatprep.subr.bf16.mxu1 %v22536_v15  ;;  %v22574_v15 = vld [vmem:[%s27429_s2 + $0xee0] sm:$0xff]  }
 0x43a   :  { %19714 = vmatpush3.bf16.msra.mxu1 %v22537_v48  ;;  %v22576_v48 = vld [vmem:[%s27429_s2 + $0xee8] sm:$0xff]  }
 0x43b   :  { %19715 = vmatprep.subr.bf16.mxu1 %v22538_v19  ;;  %v22577_v19 = vld [vmem:[%s27429_s2 + $0xea8] sm:$0xff]  }
 0x43e   :  { %19716 = vmatpush3.bf16.msra.mxu1 %v22539_v49  ;;  %v22578_v49 = vld [vmem:[%s27429_s2 + $0xef0] sm:$0xff]  }
 0x43f   :  { %19717 = vmatprep.subr.bf16.mxu1 %v22540_v50 }
 0x442   :  { %19718 = vmatpush3.bf16.msra.mxu1 %v22541_v51 }
 0x443   :  { %19719 = vmatprep.subr.bf16.mxu1 %v22542_v52 }
 0x446   :  { %19720 = vmatpush3.bf16.msra.mxu1 %v22543_v53 }
 0x447   :  { %19721 = vmatprep.subr.bf16.mxu1 %v22544_v54  ;;  %v22579_v54 = vld [vmem:[%s27429_s2 + $0xeb0] sm:$0xff]  }
 0x448   :  { %v19420_v61 = vpop.f32.mrb[40].mxu1 }
 0x449   :  { %v19421_v62 = vpop.f32.mrb[41].mxu1 }
 0x44a   :  { %v24352_v63 = vadd.f32 %v19421_v62, %v19420_v61  ;;  %v19423_v0 = vpop.f32.mrb[42].mxu1  ;;  %19722 = vmatpush3.bf16.msra.mxu1 %v22545_v55  ;;  %v22581_v62 = vld [vmem:[%s27429_s2 + $0xeb8] sm:$0xff]  }
 0x44b   :  { %v19424_v2 = vpop.f32.mrb[43].mxu1  ;;  %19723 = vmatprep.subr.bf16.mxu1 %v22546_v60  ;;  %v22580_v60 = vld [vmem:[%s27429_s2 + $0xef8] sm:$0xff]  }
 0x44c   :  { %v24360_v4 = vadd.f32 %v19424_v2, %v19423_v0  ;;  %v22582_v0 = vld [vmem:[%s27429_s2 + $0xfc0] sm:$0xff]   ;;  %v22584_v2 = vld [vmem:[%s27429_s2 + $0xfc8] sm:$0xff]  }
 0x44e   :  { %19724 = vmatpush3.bf16.msra.mxu1 %v22547_v1  ;;  %v22583_v1 = vld [vmem:[%s27429_s2 + $0xf80] sm:$0xff]  }
 0x44f   :  { %19725 = vmatprep.subr.bf16.mxu1 %v22548_v3  ;;  %v22585_v3 = vld [vmem:[%s27429_s2 + $0xf88] sm:$0xff]  }
 0x452   :  { %19726 = vmatpush3.bf16.msra.mxu1 %v22549_v6  ;;  %v22586_v6 = vld [vmem:[%s27429_s2 + $0xfd0] sm:$0xff]  }
 0x453   :  { %19733 = vmatprep.subr.bf16.mxu1 %v22550_v12  ;;  %v22587_v12 = vld [vmem:[%s27429_s2 + $0xf90] sm:$0xff]  }
 0x455   :  { %5911 = vmatmul.mubr.bf16.vlgmr.msra.gmra.mrb[68].mxu1 %v23463_v56 }
 0x456   :  { %19734 = vmatpush3.bf16.msra.mxu1 %v22551_v13  ;;  %5951 = vmatprep.mubr.bf16.mxu1 %v23469_v59  ;;  %v22588_v13 = vld [vmem:[%s27429_s2 + $0xfd8] sm:$0xff]  }
 0x457   :  { %19735 = vmatprep.subr.bf16.mxu1 %v22552_v17  ;;  %v22589_v17 = vld [vmem:[%s27429_s2 + $0xf98] sm:$0xff]  }
 0x45a   :  { %19736 = vmatpush3.bf16.msra.mxu1 %v22553_v20  ;;  %v22590_v20 = vld [vmem:[%s27429_s2 + $0xfe0] sm:$0xff]  }
 0x45b   :  { %19737 = vmatprep.subr.bf16.mxu1 %v22554_v22  ;;  %v22591_v22 = vld [vmem:[%s27429_s2 + $0xfa0] sm:$0xff]  }
 0x45e   :  { %19738 = vmatpush3.bf16.msra.mxu1 %v22555_v23  ;;  %v22592_v23 = vld [vmem:[%s27429_s2 + $0xfe8] sm:$0xff]  }
 0x45f   :  { %19739 = vmatprep.subr.bf16.mxu1 %v22556_v25  ;;  %v22593_v25 = vld [vmem:[%s27429_s2 + $0xfa8] sm:$0xff]  }
 0x462   :  { %19740 = vmatpush3.bf16.msra.mxu1 %v22557_v26  ;;  %v22594_v26 = vld [vmem:[%s27429_s2 + $0xff0] sm:$0xff]  }
 0x463   :  { %19741 = vmatprep.subr.bf16.mxu1 %v22558_v27 }
 0x466   :  { %19742 = vmatpush3.bf16.msra.mxu1 %v22559_v28 }
 0x467   :  { %19743 = vmatprep.subr.bf16.mxu1 %v22560_v29 }
 0x468   :  { %v19467_v33 = vpop.f32.mrb[44].mxu1 }
 0x469   :  { %v19468_v34 = vpop.f32.mrb[45].mxu1 }
 0x46a   :  { %v24406_v35 = vadd.f32 %v19468_v34, %v19467_v33  ;;  %v19470_v36 = vpop.f32.mrb[46].mxu1  ;;  %19744 = vmatpush3.bf16.msra.mxu1 %v22561_v31  ;;  %v22595_v34 = vld [vmem:[%s27429_s2 + $0xfb0] sm:$0xff]  }
 0x46b   :  { %v19471_v38 = vpop.f32.mrb[47].mxu1  ;;  %19745 = vmatprep.subr.bf16.mxu1 %v22562_v32 }
 0x46c   :  { %v24414_v7 = vadd.f32 %v19471_v38, %v19470_v36 }
 0x46e   :  { %19746 = vmatpush3.bf16.msra.mxu1 %v22563_v37 }
 0x46f   :  { %19747 = vmatprep.subr.bf16.mxu1 %v22564_v39  ;;  %v22596_v39 = vld [vmem:[%s27429_s2 + $0xff8] sm:$0xff]  }
 0x472   :  { %19748 = vmatpush3.bf16.msra.mxu1 %v22565_v40 }
 0x473   :  { %19780 = vmatprep.subr.bf16.mxu1 %v22566_v10 }
 0x475   :  { %5952 = vmatmul.mubr.bf16.vlgmr.msra.gmra.mrb[72].mxu1 %v23467_v58 }
 0x476   :  { %19781 = vmatpush3.bf16.msra.mxu1 %v22567_v41  ;;  %6365 = vmatprep.mubr.bf16.mxu1 %v23469_v59 }
 0x477   :  { %19782 = vmatprep.subr.bf16.mxu1 %v22568_v8 }
 0x47a   :  { %19783 = vmatpush3.bf16.msra.mxu1 %v22569_v11  ;;  %v22597_v11 = vld [vmem:[%s27429_s2 + $0xfb8] sm:$0xff]  }
 0x47b   :  { %19784 = vmatprep.subr.bf16.mxu1 %v22570_v42 }
 0x47e   :  { %19785 = vmatpush3.bf16.msra.mxu1 %v22571_v43 }
 0x47f   :  { %19786 = vmatprep.subr.bf16.mxu1 %v22572_v44  ;;  %v22600_v44 = vld [vmem:[%s27429_s2 + $0x4c0] sm:$0xff]  }
 0x482   :  { %19787 = vmatpush3.bf16.msra.mxu1 %v22573_v18  ;;  %v22601_v18 = vld [vmem:[%s27429_s2 + $0x480] sm:$0xff]  }
 0x483   :  { %19788 = vmatprep.subr.bf16.mxu1 %v22574_v15  ;;  %v22603_v15 = vld [vmem:[%s27429_s2 + $0x488] sm:$0xff]  }
 0x486   :  { %19789 = vmatpush3.bf16.msra.mxu1 %v22575_v46  ;;  %v22604_v46 = vld [vmem:[%s27429_s2 + $0x4d0] sm:$0xff]  }
 0x487   :  { %19790 = vmatprep.subr.bf16.mxu1 %v22576_v48  ;;  %v22605_v48 = vld [vmem:[%s27429_s2 + $0x490] sm:$0xff]  }
 0x488   :  { %v19514_v50 = vpop.f32.mrb[48].mxu1 }
 0x489   :  { %v19515_v51 = vpop.f32.mrb[49].mxu1 }
 0x48a   :  { %v24460_v52 = vadd.f32 %v19515_v51, %v19514_v50  ;;  %v19517_v53 = vpop.f32.mrb[50].mxu1  ;;  %19791 = vmatpush3.bf16.msra.mxu1 %v22577_v19  ;;  %v22606_v19 = vld [vmem:[%s27429_s2 + $0x4d8] sm:$0xff]   ;;  %v22608_v50 = vld [vmem:[%s27429_s2 + $0x4e0] sm:$0xff]  }
 0x48b   :  { %v19518_v55 = vpop.f32.mrb[51].mxu1  ;;  %19792 = vmatprep.subr.bf16.mxu1 %v22578_v49  ;;  %v22607_v49 = vld [vmem:[%s27429_s2 + $0x498] sm:$0xff]   ;;  %v22609_v51 = vld [vmem:[%s27429_s2 + $0x4a0] sm:$0xff]  }
 0x48c   :  { %v24468_v61 = vadd.f32 %v19518_v55, %v19517_v53  ;;  %v22610_v53 = vld [vmem:[%s27429_s2 + $0x4e8] sm:$0xff]  }
 0x48d   :  { %v22611_v55 = vld [vmem:[%s27429_s2 + $0x4a8] sm:$0xff]  }
 0x48e   :  { %19793 = vmatpush3.bf16.msra.mxu1 %v22579_v54 }
 0x48f   :  { %19794 = vmatprep.subr.bf16.mxu1 %v22580_v60 }
 0x492   :  { %19795 = vmatpush3.bf16.msra.mxu1 %v22581_v62  ;;  %v22612_v62 = vld [vmem:[%s27429_s2 + $0x4f0] sm:$0xff]  }
 0x493   :  { %19827 = vmatprep.subr.bf16.mxu1 %v22582_v0 }
 0x495   :  { %6366 = vmatmul.mubr.bf16.vlgmr.msra.gmra.mrb[76].mxu1 %v23467_v58 }
 0x496   :  { %19828 = vmatpush3.bf16.msra.mxu1 %v22583_v1  ;;  %6779 = vmatprep.mubr.bf16.mxu1 %v23469_v59 }
 0x497   :  { %19829 = vmatprep.subr.bf16.mxu1 %v22584_v2 }
 0x49a   :  { %19830 = vmatpush3.bf16.msra.mxu1 %v22585_v3 }
 0x49b   :  { %19831 = vmatprep.subr.bf16.mxu1 %v22586_v6  ;;  %v22613_v6 = vld [vmem:[%s27429_s2 + $0x4b0] sm:$0xff]  }
 0x49e   :  { %19832 = vmatpush3.bf16.msra.mxu1 %v22587_v12  ;;  %v22614_v12 = vld [vmem:[%s27429_s2 + $0x4f8] sm:$0xff]  }
 0x49f   :  { %19833 = vmatprep.subr.bf16.mxu1 %v22588_v13  ;;  %v22615_v13 = vld [vmem:[%s27429_s2 + $0x4b8] sm:$0xff]  }
 0x4a2   :  { %19834 = vmatpush3.bf16.msra.mxu1 %v22589_v17 }
 0x4a3   :  { %19835 = vmatprep.subr.bf16.mxu1 %v22590_v20 }
 0x4a6   :  { %19836 = vmatpush3.bf16.msra.mxu1 %v22591_v22 }
 0x4a7   :  { %19837 = vmatprep.subr.bf16.mxu1 %v22592_v23 }
 0x4a8   :  { %v19539_v27 = vpop.f32.mrb[52].mxu1 }
 0x4a9   :  { %v19279_v28 = vpop.f32.mrb[16].mxu0  ;;  %v19540_v29 = vpop.f32.mrb[53].mxu1 }
 0x4aa   :  { %v24514_v31 = vadd.f32 %v19540_v29, %v19539_v27  ;;  %v19280_v32 = vpop.f32.mrb[17].mxu0  ;;  %v19542_v33 = vpop.f32.mrb[54].mxu1  ;;  %19838 = vmatpush3.bf16.msra.mxu1 %v22593_v25 }
 0x4ab   :  { %v19281_v36 = vadd.f32 %v19280_v32, %v19279_v28  ;;  %v19282_v37 = vpop.f32.mrb[18].mxu0  ;;  %v19543_v38 = vpop.f32.mrb[55].mxu1  ;;  %19839 = vmatprep.subr.bf16.mxu1 %v22594_v26 }
 0x4ac   :  { %v24522_v40 = vadd.f32 %v19543_v38, %v19542_v33  ;;  %v19283_v10 = vpop.f32.mrb[19].mxu0 }
 0x4ad   :  { %v1814_v41 = vadd.f32 %v19281_v36, %v24128_v24  ;;  %v19284_v8 = vadd.f32 %v19283_v10, %v19282_v37  ;;  %v22599_v24 = vld [vmem:[%s27430_s3 + $0x38] sm:$0xff]  }
 0x4ae   :  { %19840 = vmatpush3.bf16.msra.mxu1 %v22595_v34 }
 0x4af   :  { %v1817_v42 = vadd.f32 %v19284_v8, %v24139_v30  ;;  %19841 = vmatprep.subr.bf16.mxu1 %v22596_v39  ;;  %v22602_v30 = vld [vmem:[%s27429_s2 + $0x4c8] sm:$0xff]   ;;  %v22616_v8 = vld [vmem:[%s27430_s3 + $0x40] sm:$0xff]  }
 0x4b1   :  { %v1820_v43 = vpack.c.bf16 %v1817_v42, %v1814_v41 }
 0x4b2   :  { %19842 = vmatpush3.bf16.msra.mxu1 %v22597_v11 }
 0x4b3   :  { %20486 = vmatprep.subr.bf16.mxu0 %v1820_v43 }
 0x4b4   :  { %20487 = vmatpush3.bf16.msra.mxu0 %v1820_v43 }
 0x4b5   :  { %6780 = vmatmul.mubr.bf16.vlgmr.msra.gmra.mrb[80].mxu1 %v23467_v58  ;;  %19310 = vmatprep.subr.bf16.mxu0 %v22600_v44 }
 0x4b7   :  { %20489 = vmatmul.mubr.msk.bf16.vlgmr.msra.gmra.mrb[8].mxu0 %vm73_vm0, %v22599_v24 }
 0x4b8   :  { %19311 = vmatpush3.bf16.msra.mxu0 %v22601_v18  ;;  %2225 = vmatprep.mubr.bf16.mxu0 %v23469_v59 }
 0x4b9   :  { %19312 = vmatprep.subr.bf16.mxu0 %v22602_v30 }
 0x4bc   :  { %19313 = vmatpush3.bf16.msra.mxu0 %v22603_v15 }
 0x4bd   :  { %19314 = vmatprep.subr.bf16.mxu0 %v22604_v46 }
 0x4c0   :  { %19315 = vmatpush3.bf16.msra.mxu0 %v22605_v48 }
 0x4c1   :  { %19316 = vmatprep.subr.bf16.mxu0 %v22606_v19 }
 0x4c4   :  { %19317 = vmatpush3.bf16.msra.mxu0 %v22607_v49 }
 0x4c5   :  { %19318 = vmatprep.subr.bf16.mxu0 %v22608_v50 }
 0x4c8   :  { %19319 = vmatpush3.bf16.msra.mxu0 %v22609_v51  ;;  %v19586_v54 = vpop.f32.mrb[56].mxu1 }
 0x4c9   :  { %v19587_v60 = vpop.f32.mrb[57].mxu1  ;;  %19320 = vmatprep.subr.bf16.mxu0 %v22610_v53 }
 0x4ca   :  { %v24574_v0 = vadd.f32 %v19587_v60, %v19586_v54  ;;  %v19589_v1 = vpop.f32.mrb[58].mxu1 }
 0x4cb   :  { %v19590_v2 = vpop.f32.mrb[59].mxu1 }
 0x4cc   :  { %v24576_v3 = vadd.f32 %v19590_v2, %v19589_v1  ;;  %19321 = vmatpush3.bf16.msra.mxu0 %v22611_v55 }
 0x4cd   :  { %19322 = vmatprep.subr.bf16.mxu0 %v22612_v62 }
 0x4d0   :  { %19323 = vmatpush3.bf16.msra.mxu0 %v22613_v6 }
 0x4d1   :  { %19324 = vmatprep.subr.bf16.mxu0 %v22614_v12 }
 0x4d4   :  { %19325 = vmatpush3.bf16.msra.mxu0 %v22615_v13 }
 0x4d7   :  { %2226 = vmatmul.mubr.bf16.vlgmr.msra.gmra.mrb[20].mxu0 %v23467_v58 }
 0x4d8   :  { %20494 = vmatprep.mubr.msk.bf16.mxu0 %vm73_vm0, %v22616_v8  ;;  %v22628_v8 = vld [vmem:[%s27429_s2 + $0x660] sm:$0xff]  }
 0x4e8   :  { %v19633_v17 = vpop.f32.mrb[60].mxu1 }
 0x4e9   :  { %v19634_v20 = vpop.f32.mrb[61].mxu1 }
 0x4ea   :  { %v24588_v22 = vadd.f32 %v19634_v20, %v19633_v17  ;;  %v19636_v23 = vpop.f32.mrb[62].mxu1 }
 0x4eb   :  { %v19637_v25 = vpop.f32.mrb[63].mxu1 }
 0x4ec   :  { %v24590_v26 = vadd.f32 %v19637_v25, %v19636_v23 }
 0x508   :  { %v19680_v27 = vpop.f32.mrb[64].mxu1 }
 0x509   :  { %v19681_v28 = vpop.f32.mrb[65].mxu1 }
 0x50a   :  { %v24592_v29 = vadd.f32 %v19681_v28, %v19680_v27  ;;  %v19683_v32 = vpop.f32.mrb[66].mxu1 }
 0x50b   :  { %v19684_v33 = vpop.f32.mrb[67].mxu1 }
 0x50c   :  { %v24594_v34 = vadd.f32 %v19684_v33, %v19683_v32  ;;  %v22617_v32 = vld [vmem:[%s27430_s3 + $0x48] sm:$0xff]   ;;  %v22618_v33 = vld [vmem:[%s27430_s3 + $0x50] sm:$0xff]  }
 0x528   :  { %v19727_v36 = vpop.f32.mrb[68].mxu1 }
 0x529   :  { %v19728_v37 = vpop.f32.mrb[69].mxu1 }
 0x52a   :  { %v19729_v38 = vadd.f32 %v19728_v37, %v19727_v36  ;;  %v19730_v39 = vpop.f32.mrb[70].mxu1  ;;  %v22621_v36 = vld [vmem:[%s27429_s2 + $0x600] sm:$0xff]   ;;  %v22622_v37 = vld [vmem:[%s27429_s2 + $0x648] sm:$0xff]  }
 0x52b   :  { %v19731_v10 = vpop.f32.mrb[71].mxu1 }
 0x52c   :  { %v19732_v41 = vadd.f32 %v19731_v10, %v19730_v39  ;;  %v22625_v39 = vld [vmem:[%s27429_s2 + $0x610] sm:$0xff]   ;;  %v22626_v10 = vld [vmem:[%s27429_s2 + $0x658] sm:$0xff]  }
 0x548   :  { %v19749_v11 = vpop.f32.mrb[72].mxu1 }
 0x549   :  { %v19750_v42 = vpop.f32.mrb[73].mxu1 }
 0x54a   :  { %v19751_v43 = vadd.f32 %v19750_v42, %v19749_v11  ;;  %v19752_v44 = vpop.f32.mrb[74].mxu1  ;;  %v22629_v11 = vld [vmem:[%s27429_s2 + $0x620] sm:$0xff]   ;;  %v22630_v42 = vld [vmem:[%s27429_s2 + $0x668] sm:$0xff]  }
 0x54b   :  { %v19753_v24 = vpop.f32.mrb[75].mxu1 }
 0x54c   :  { %v5954_v18 = vadd.f32 %v19751_v43, %v19729_v38  ;;  %v19754_v30 = vadd.f32 %v19753_v24, %v19752_v44  ;;  %v22624_v38 = vld [vmem:[%s27429_s2 + $0x650] sm:$0xff]   ;;  %v22631_v43 = vld [vmem:[%s27429_s2 + $0x628] sm:$0xff]  }
 0x54d   :  { %v22632_v44 = vld [vmem:[%s27429_s2 + $0x670] sm:$0xff]  }
 0x54e   :  { %v5957_v15 = vadd.f32 %v19754_v30, %v19732_v41  ;;  %v22627_v41 = vld [vmem:[%s27429_s2 + $0x618] sm:$0xff]   ;;  %v22633_v24 = vld [vmem:[%s27429_s2 + $0x630] sm:$0xff]  }
 0x54f   :  { %v22635_v30 = vld [vmem:[%s27429_s2 + $0x638] sm:$0xff]  }
 0x550   :  { %v24600_v46 = vpack.c.bf16 %v5957_v15, %v5954_v18  ;;  %v22634_v18 = vld [vmem:[%s27429_s2 + $0x678] sm:$0xff]   ;;  %v22636_v15 = vld [vmem:[%s27430_s3 + $0x60] sm:$0xff]  }
 0x568   :  { %v19796_v48 = vpop.f32.mrb[76].mxu1 }
 0x569   :  { %v19797_v19 = vpop.f32.mrb[77].mxu1 }
 0x56a   :  { %v24602_v49 = vadd.f32 %v19797_v19, %v19796_v48  ;;  %v19799_v50 = vpop.f32.mrb[78].mxu1 }
 0x56b   :  { %v19800_v51 = vpop.f32.mrb[79].mxu1 }
 0x56c   :  { %v24604_v53 = vadd.f32 %v19800_v51, %v19799_v50 }
 0x588   :  { %v19843_v54 = vpop.f32.mrb[80].mxu1 }
 0x589   :  { %v19844_v55 = vpop.f32.mrb[81].mxu1 }
 0x58a   :  { %v24606_v60 = vadd.f32 %v19844_v55, %v19843_v54  ;;  %v19846_v62 = vpop.f32.mrb[82].mxu1 }
 0x58b   :  { %v19847_v1 = vpop.f32.mrb[83].mxu1 }
 0x58c   :  { %v24608_v2 = vadd.f32 %v19847_v1, %v19846_v62 }
 0x5aa   :  { %v19326_v6 = vpop.f32.mrb[20].mxu0 }
 0x5ab   :  { %v19327_v12 = vpop.f32.mrb[21].mxu0 }
 0x5ac   :  { %v19328_v13 = vadd.f32 %v19327_v12, %v19326_v6  ;;  %v19329_v17 = vpop.f32.mrb[22].mxu0  ;;  %v22638_v12 = vld [vmem:[%s27429_s2 + $0x740] sm:$0xff]  }
 0x5ad   :  { %v19330_v20 = vpop.f32.mrb[23].mxu0 }
 0x5ae   :  { %v2228_v23 = vadd.f32 %v19328_v13, %v24192_v45  ;;  %v19331_v25 = vadd.f32 %v19330_v20, %v19329_v17  ;;  %v22619_v45 = vld [vmem:[%s27429_s2 + $0x640] sm:$0xff]   ;;  %v22637_v13 = vld [vmem:[%s27430_s3 + $0x68] sm:$0xff]   ;;  %v22642_v20 = vld [vmem:[%s27429_s2 + $0x750] sm:$0xff]  }
 0x5af   :  { %v22639_v17 = vld [vmem:[%s27429_s2 + $0x700] sm:$0xff]  }
 0x5b0   :  { %v2231_v27 = vadd.f32 %v19331_v25, %v24200_v47  ;;  %v22620_v47 = vld [vmem:[%s27430_s3 + $0x58] sm:$0xff]  }
 0x5b1   :  { %v22644_v25 = vld [vmem:[%s27429_s2 + $0x758] sm:$0xff]  }
 0x5b2   :  { %v2234_v28 = vpack.c.bf16 %v2231_v27, %v2228_v23  ;;  %v22643_v23 = vld [vmem:[%s27429_s2 + $0x710] sm:$0xff]   ;;  %v22645_v27 = vld [vmem:[%s27429_s2 + $0x718] sm:$0xff]  }
 0x5b4   :  { %20492 = vmatprep.subr.bf16.mxu0 %v2234_v28 }
 0x5b5   :  { %20493 = vmatpush3.bf16.msra.mxu0 %v2234_v28  ;;  %v22646_v28 = vld [vmem:[%s27429_s2 + $0x760] sm:$0xff]  }
 0x5b6   :  { %20498 = vmatprep.subr.bf16.mxu0 %v24308_v14 }
 0x5b8   :  { %20495 = vmatmul.mubr.msk.bf16.vlgmr.msra.gmra.mrb[8].mxu0 %vm73_vm0, %v22617_v32  ;;  %v22647_v32 = vld [vmem:[%s27429_s2 + $0x720] sm:$0xff]  }
 0x5b9   :  { %20499 = vmatpush3.bf16.msra.mxu0 %v24308_v14  ;;  %20500 = vmatprep.mubr.msk.bf16.mxu0 %vm73_vm0, %v22618_v33  ;;  %v22623_v14 = vld [vmem:[%s27429_s2 + $0x608] sm:$0xff]  }
 0x5ba   :  { %19382 = vmatprep.subr.bf16.mxu0 %v22619_v45  ;;  %v22648_v33 = vld [vmem:[%s27429_s2 + $0x768] sm:$0xff]  }
 0x5bb   :  { %v22649_v45 = vld [vmem:[%s27429_s2 + $0x728] sm:$0xff]  }
 0x5c4   :  { %20501 = vmatmul.mubr.msk.bf16.vlgmr.msra.gmra.mrb[8].mxu0 %vm73_vm0, %v22620_v47  ;;  %v22650_v47 = vld [vmem:[%s27429_s2 + $0x770] sm:$0xff]  }
 0x5c5   :  { %19383 = vmatpush3.bf16.msra.mxu0 %v22621_v36  ;;  %3012 = vmatprep.mubr.bf16.mxu0 %v23465_v57  ;;  %v22651_v36 = vld [vmem:[%s27429_s2 + $0x730] sm:$0xff]  }
 0x5c6   :  { %19384 = vmatprep.subr.bf16.mxu0 %v22622_v37  ;;  %v22652_v37 = vld [vmem:[%s27429_s2 + $0x778] sm:$0xff]  }
 0x5c9   :  { %19385 = vmatpush3.bf16.msra.mxu0 %v22623_v14  ;;  %v22653_v14 = vld [vmem:[%s27429_s2 + $0x738] sm:$0xff]  }
 0x5ca   :  { %19386 = vmatprep.subr.bf16.mxu0 %v22624_v38  ;;  %v22654_v38 = vld [vmem:[%s27430_s3 + $0x70] sm:$0xff]  }
 0x5cd   :  { %19387 = vmatpush3.bf16.msra.mxu0 %v22625_v39 }
 0x5ce   :  { %19388 = vmatprep.subr.bf16.mxu0 %v22626_v10 }
 0x5d1   :  { %19389 = vmatpush3.bf16.msra.mxu0 %v22627_v41 }
 0x5d2   :  { %19390 = vmatprep.subr.bf16.mxu0 %v22628_v8 }
 0x5d5   :  { %19391 = vmatpush3.bf16.msra.mxu0 %v22629_v11 }
 0x5d6   :  { %19392 = vmatprep.subr.bf16.mxu0 %v22630_v42 }
 0x5d9   :  { %19393 = vmatpush3.bf16.msra.mxu0 %v22631_v43 }
 0x5da   :  { %19394 = vmatprep.subr.bf16.mxu0 %v22632_v44 }
 0x5dd   :  { %19395 = vmatpush3.bf16.msra.mxu0 %v22633_v24 }
 0x5de   :  { %19396 = vmatprep.subr.bf16.mxu0 %v22634_v18  ;;  %v22656_v18 = vld [vmem:[%s27429_s2 + $0x840] sm:$0xff]  }
 0x5e1   :  { %19397 = vmatpush3.bf16.msra.mxu0 %v22635_v30  ;;  %v22655_v30 = vld [vmem:[%s27430_s3 + $0x78] sm:$0xff]  }
 0x5e4   :  { %3013 = vmatmul.mubr.bf16.vlgmr.msra.gmra.mrb[24].mxu0 %v23463_v56 }
 0x5e5   :  { %20506 = vmatprep.mubr.msk.bf16.mxu0 %vm73_vm0, %v22636_v15  ;;  %v22657_v15 = vld [vmem:[%s27429_s2 + $0x800] sm:$0xff]  }
 0x6b7   :  { %v19398_v48 = vpop.f32.mrb[24].mxu0 }
 0x6b8   :  { %v19399_v19 = vpop.f32.mrb[25].mxu0 }
 0x6b9   :  { %v19400_v50 = vadd.f32 %v19399_v19, %v19398_v48  ;;  %v19401_v51 = vpop.f32.mrb[26].mxu0  ;;  %v22660_v48 = vld [vmem:[%s27429_s2 + $0x850] sm:$0xff]  }
 0x6ba   :  { %v19402_v54 = vpop.f32.mrb[27].mxu0  ;;  %v22661_v19 = vld [vmem:[%s27429_s2 + $0x810] sm:$0xff]  }
 0x6bb   :  { %v3056_v55 = vadd.f32 %v24352_v63, %v19400_v50  ;;  %v19403_v62 = vadd.f32 %v19402_v54, %v19401_v51  ;;  %v22640_v63 = vld [vmem:[%s27429_s2 + $0x748] sm:$0xff]   ;;  %v22662_v50 = vld [vmem:[%s27429_s2 + $0x858] sm:$0xff]   ;;  %v22664_v54 = vld [vmem:[%s27429_s2 + $0x860] sm:$0xff]  }
 0x6bc   :  { %v22663_v51 = vld [vmem:[%s27429_s2 + $0x818] sm:$0xff]  }
 0x6bd   :  { %v3059_v1 = vadd.f32 %v24360_v4, %v19403_v62  ;;  %v22641_v4 = vld [vmem:[%s27429_s2 + $0x708] sm:$0xff]  }
 0x6be   :  { %v22666_v62 = vld [vmem:[%s27429_s2 + $0x868] sm:$0xff]  }
 0x6bf   :  { %v3062_v6 = vpack.c.bf16 %v3059_v1, %v3056_v55  ;;  %v22665_v55 = vld [vmem:[%s27429_s2 + $0x820] sm:$0xff]   ;;  %v22667_v1 = vld [vmem:[%s27429_s2 + $0x828] sm:$0xff]  }
 0x6c1   :  { %20504 = vmatprep.subr.bf16.mxu0 %v3062_v6 }
 0x6c2   :  { %20505 = vmatpush3.bf16.msra.mxu0 %v3062_v6  ;;  %v22668_v6 = vld [vmem:[%s27429_s2 + $0x870] sm:$0xff]  }
 0x6c3   :  { %19429 = vmatprep.subr.bf16.mxu0 %v22638_v12  ;;  %v22669_v12 = vld [vmem:[%s27429_s2 + $0x830] sm:$0xff]  }
 0x6c5   :  { %20507 = vmatmul.mubr.msk.bf16.vlgmr.msra.gmra.mrb[8].mxu0 %vm73_vm0, %v22637_v13  ;;  %v22670_v13 = vld [vmem:[%s27429_s2 + $0x878] sm:$0xff]  }
 0x6c6   :  { %19430 = vmatpush3.bf16.msra.mxu0 %v22639_v17  ;;  %3426 = vmatprep.mubr.bf16.mxu0 %v23465_v57  ;;  %v22671_v17 = vld [vmem:[%s27429_s2 + $0x838] sm:$0xff]  }
 0x6c7   :  { %19431 = vmatprep.subr.bf16.mxu0 %v22640_v63  ;;  %v22672_v63 = vld [vmem:[%s27430_s3 + $0x80] sm:$0xff]  }
 0x6ca   :  { %19432 = vmatpush3.bf16.msra.mxu0 %v22641_v4 }
 0x6cb   :  { %19433 = vmatprep.subr.bf16.mxu0 %v22642_v20 }
 0x6ce   :  { %19434 = vmatpush3.bf16.msra.mxu0 %v22643_v23 }
 0x6cf   :  { %19435 = vmatprep.subr.bf16.mxu0 %v22644_v25 }
 0x6d2   :  { %19436 = vmatpush3.bf16.msra.mxu0 %v22645_v27 }
 0x6d3   :  { %19437 = vmatprep.subr.bf16.mxu0 %v22646_v28 }
 0x6d6   :  { %19438 = vmatpush3.bf16.msra.mxu0 %v22647_v32 }
 0x6d7   :  { %19439 = vmatprep.subr.bf16.mxu0 %v22648_v33 }
 0x6da   :  { %19440 = vmatpush3.bf16.msra.mxu0 %v22649_v45 }
 0x6db   :  { %19441 = vmatprep.subr.bf16.mxu0 %v22650_v47  ;;  %v22674_v47 = vld [vmem:[%s27429_s2 + $0x9c0] sm:$0xff]  }
 0x6de   :  { %19442 = vmatpush3.bf16.msra.mxu0 %v22651_v36  ;;  %v22673_v36 = vld [vmem:[%s27430_s3 + $0x88] sm:$0xff]  }
 0x6df   :  { %19443 = vmatprep.subr.bf16.mxu0 %v22652_v37  ;;  %v22675_v37 = vld [vmem:[%s27429_s2 + $0x980] sm:$0xff]  }
 0x6e2   :  { %19444 = vmatpush3.bf16.msra.mxu0 %v22653_v14  ;;  %v22678_v14 = vld [vmem:[%s27429_s2 + $0x9d0] sm:$0xff]  }
 0x6e5   :  { %3427 = vmatmul.mubr.bf16.vlgmr.msra.gmra.mrb[28].mxu0 %v23463_v56 }
 0x6e6   :  { %20512 = vmatprep.mubr.msk.bf16.mxu0 %vm73_vm0, %v22654_v38  ;;  %v22679_v38 = vld [vmem:[%s27429_s2 + $0x990] sm:$0xff]  }
 0x7b8   :  { %v19445_v39 = vpop.f32.mrb[28].mxu0 }
 0x7b9   :  { %v19446_v10 = vpop.f32.mrb[29].mxu0 }
 0x7ba   :  { %v19447_v41 = vadd.f32 %v19446_v10, %v19445_v39  ;;  %v19448_v8 = vpop.f32.mrb[30].mxu0  ;;  %v22680_v39 = vld [vmem:[%s27429_s2 + $0x9d8] sm:$0xff]  }
 0x7bb   :  { %v19449_v11 = vpop.f32.mrb[31].mxu0  ;;  %v22681_v10 = vld [vmem:[%s27429_s2 + $0x998] sm:$0xff]  }
 0x7bc   :  { %v3470_v42 = vadd.f32 %v24406_v35, %v19447_v41  ;;  %v19450_v43 = vadd.f32 %v19449_v11, %v19448_v8  ;;  %v22658_v35 = vld [vmem:[%s27429_s2 + $0x848] sm:$0xff]   ;;  %v22682_v41 = vld [vmem:[%s27429_s2 + $0x9e0] sm:$0xff]  }
 0x7bd   :  { %v22683_v8 = vld [vmem:[%s27429_s2 + $0x9a0] sm:$0xff]   ;;  %v22684_v11 = vld [vmem:[%s27429_s2 + $0x9e8] sm:$0xff]  }
 0x7be   :  { %v3473_v44 = vadd.f32 %v24414_v7, %v19450_v43  ;;  %v22659_v7 = vld [vmem:[%s27429_s2 + $0x808] sm:$0xff]   ;;  %v22686_v43 = vld [vmem:[%s27429_s2 + $0x9f0] sm:$0xff]  }
 0x7c0   :  { %v3476_v24 = vpack.c.bf16 %v3473_v44, %v3470_v42  ;;  %v22685_v42 = vld [vmem:[%s27429_s2 + $0x9a8] sm:$0xff]   ;;  %v22687_v44 = vld [vmem:[%s27429_s2 + $0x9b0] sm:$0xff]  }
 0x7c2   :  { %20510 = vmatprep.subr.bf16.mxu0 %v3476_v24 }
 0x7c3   :  { %20511 = vmatpush3.bf16.msra.mxu0 %v3476_v24  ;;  %v22688_v24 = vld [vmem:[%s27429_s2 + $0x9f8] sm:$0xff]  }
 0x7c4   :  { %19476 = vmatprep.subr.bf16.mxu0 %v22656_v18  ;;  %v22689_v18 = vld [vmem:[%s27429_s2 + $0x9b8] sm:$0xff]  }
 0x7c6   :  { %20513 = vmatmul.mubr.msk.bf16.vlgmr.msra.gmra.mrb[8].mxu0 %vm73_vm0, %v22655_v30  ;;  %v22690_v30 = vld [vmem:[%s27430_s3 + $0x90] sm:$0xff]  }
 0x7c7   :  { %19477 = vmatpush3.bf16.msra.mxu0 %v22657_v15  ;;  %3840 = vmatprep.mubr.bf16.mxu0 %v23465_v57 }
 0x7c8   :  { %19478 = vmatprep.subr.bf16.mxu0 %v22658_v35 }
 0x7cb   :  { %19479 = vmatpush3.bf16.msra.mxu0 %v22659_v7 }
 0x7cc   :  { %19480 = vmatprep.subr.bf16.mxu0 %v22660_v48 }
 0x7cf   :  { %19481 = vmatpush3.bf16.msra.mxu0 %v22661_v19 }
 0x7d0   :  { %19482 = vmatprep.subr.bf16.mxu0 %v22662_v50 }
 0x7d3   :  { %19483 = vmatpush3.bf16.msra.mxu0 %v22663_v51 }
 0x7d4   :  { %19484 = vmatprep.subr.bf16.mxu0 %v22664_v54 }
 0x7d7   :  { %19485 = vmatpush3.bf16.msra.mxu0 %v22665_v55 }
 0x7d8   :  { %19486 = vmatprep.subr.bf16.mxu0 %v22666_v62  ;;  %v22692_v62 = vld [vmem:[%s27429_s2 + $0xac0] sm:$0xff]  }
 0x7db   :  { %19487 = vmatpush3.bf16.msra.mxu0 %v22667_v1  ;;  %v22691_v1 = vld [vmem:[%s27430_s3 + $0x98] sm:$0xff]  }
 0x7dc   :  { %19488 = vmatprep.subr.bf16.mxu0 %v22668_v6  ;;  %v22693_v6 = vld [vmem:[%s27429_s2 + $0xa80] sm:$0xff]  }
 0x7df   :  { %19489 = vmatpush3.bf16.msra.mxu0 %v22669_v12  ;;  %v22696_v12 = vld [vmem:[%s27429_s2 + $0xad0] sm:$0xff]  }
 0x7e0   :  { %19490 = vmatprep.subr.bf16.mxu0 %v22670_v13  ;;  %v22697_v13 = vld [vmem:[%s27429_s2 + $0xa90] sm:$0xff]  }
 0x7e3   :  { %19491 = vmatpush3.bf16.msra.mxu0 %v22671_v17  ;;  %v22698_v17 = vld [vmem:[%s27429_s2 + $0xad8] sm:$0xff]  }
 0x7e6   :  { %3841 = vmatmul.mubr.bf16.vlgmr.msra.gmra.mrb[32].mxu0 %v23463_v56 }
 0x7e7   :  { %20518 = vmatprep.mubr.msk.bf16.mxu0 %vm73_vm0, %v22672_v63  ;;  %v22699_v63 = vld [vmem:[%s27429_s2 + $0xa98] sm:$0xff]  }
 0x8b9   :  { %v19492_v4 = vpop.f32.mrb[32].mxu0 }
 0x8ba   :  { %v19493_v20 = vpop.f32.mrb[33].mxu0 }
 0x8bb   :  { %v19494_v23 = vadd.f32 %v19493_v20, %v19492_v4  ;;  %v19495_v25 = vpop.f32.mrb[34].mxu0  ;;  %v22700_v4 = vld [vmem:[%s27429_s2 + $0xae0] sm:$0xff]  }
 0x8bc   :  { %v19496_v27 = vpop.f32.mrb[35].mxu0  ;;  %v22701_v20 = vld [vmem:[%s27429_s2 + $0xaa0] sm:$0xff]  }
 0x8bd   :  { %v3884_v28 = vadd.f32 %v24460_v52, %v19494_v23  ;;  %v19497_v32 = vadd.f32 %v19496_v27, %v19495_v25  ;;  %v22676_v52 = vld [vmem:[%s27429_s2 + $0x9c8] sm:$0xff]   ;;  %v22704_v27 = vld [vmem:[%s27429_s2 + $0xaf0] sm:$0xff]  }
 0x8be   :  { %v22702_v23 = vld [vmem:[%s27429_s2 + $0xae8] sm:$0xff]  }
 0x8bf   :  { %v3887_v33 = vadd.f32 %v24468_v61, %v19497_v32  ;;  %v22677_v61 = vld [vmem:[%s27429_s2 + $0x988] sm:$0xff]   ;;  %v22706_v32 = vld [vmem:[%s27429_s2 + $0xaf8] sm:$0xff]  }
 0x8c0   :  { %v22703_v25 = vld [vmem:[%s27429_s2 + $0xaa8] sm:$0xff]  }
 0x8c1   :  { %v3890_v45 = vpack.c.bf16 %v3887_v33, %v3884_v28  ;;  %v22705_v28 = vld [vmem:[%s27429_s2 + $0xab0] sm:$0xff]   ;;  %v22707_v33 = vld [vmem:[%s27429_s2 + $0xab8] sm:$0xff]  }
 0x8c3   :  { %20516 = vmatprep.subr.bf16.mxu0 %v3890_v45 }
 0x8c4   :  { %20517 = vmatpush3.bf16.msra.mxu0 %v3890_v45  ;;  %v22708_v45 = vld [vmem:[%s27430_s3 + $0xa0] sm:$0xff]  }
 0x8c5   :  { %19545 = vmatprep.subr.bf16.mxu0 %v22674_v47 }
 0x8c7   :  { %20519 = vmatmul.mubr.msk.bf16.vlgmr.msra.gmra.mrb[8].mxu0 %vm73_vm0, %v22673_v36 }
 0x8c8   :  { %19546 = vmatpush3.bf16.msra.mxu0 %v22675_v37  ;;  %4295 = vmatprep.mubr.bf16.mxu0 %v23469_v59 }
 0x8c9   :  { %19547 = vmatprep.subr.bf16.mxu0 %v22676_v52 }
 0x8cc   :  { %19548 = vmatpush3.bf16.msra.mxu0 %v22677_v61 }
 0x8cd   :  { %19549 = vmatprep.subr.bf16.mxu0 %v22678_v14 }
 0x8d0   :  { %19550 = vmatpush3.bf16.msra.mxu0 %v22679_v38 }
 0x8d1   :  { %19551 = vmatprep.subr.bf16.mxu0 %v22680_v39 }
 0x8d4   :  { %19552 = vmatpush3.bf16.msra.mxu0 %v22681_v10 }
 0x8d5   :  { %19553 = vmatprep.subr.bf16.mxu0 %v22682_v41  ;;  %v22710_v41 = vld [vmem:[%s27429_s2 + $0xbc0] sm:$0xff]  }
 0x8d8   :  { %19554 = vmatpush3.bf16.msra.mxu0 %v22683_v8  ;;  %v22709_v8 = vld [vmem:[%s27430_s3 + $0xa8] sm:$0xff]  }
 0x8d9   :  { %19555 = vmatprep.subr.bf16.mxu0 %v22684_v11  ;;  %v22711_v11 = vld [vmem:[%s27429_s2 + $0xb80] sm:$0xff]  }
 0x8dc   :  { %19556 = vmatpush3.bf16.msra.mxu0 %v22685_v42  ;;  %v22714_v42 = vld [vmem:[%s27429_s2 + $0xbd0] sm:$0xff]  }
 0x8dd   :  { %19557 = vmatprep.subr.bf16.mxu0 %v22686_v43  ;;  %v22715_v43 = vld [vmem:[%s27429_s2 + $0xb90] sm:$0xff]  }
 0x8e0   :  { %19558 = vmatpush3.bf16.msra.mxu0 %v22687_v44  ;;  %v22716_v44 = vld [vmem:[%s27429_s2 + $0xbd8] sm:$0xff]  }
 0x8e1   :  { %19559 = vmatprep.subr.bf16.mxu0 %v22688_v24  ;;  %v22717_v24 = vld [vmem:[%s27429_s2 + $0xb98] sm:$0xff]  }
 0x8e4   :  { %19560 = vmatpush3.bf16.msra.mxu0 %v22689_v18  ;;  %v22718_v18 = vld [vmem:[%s27429_s2 + $0xbe0] sm:$0xff]  }
 0x8e7   :  { %4296 = vmatmul.mubr.bf16.vlgmr.msra.gmra.mrb[36].mxu0 %v23467_v58 }
 0x8e8   :  { %20524 = vmatprep.mubr.msk.bf16.mxu0 %vm73_vm0, %v22690_v30  ;;  %v22719_v30 = vld [vmem:[%s27429_s2 + $0xba0] sm:$0xff]  }
 0x9ba   :  { %v19561_v15 = vpop.f32.mrb[36].mxu0 }
 0x9bb   :  { %v19562_v35 = vpop.f32.mrb[37].mxu0 }
 0x9bc   :  { %v19563_v7 = vadd.f32 %v19562_v35, %v19561_v15  ;;  %v19564_v48 = vpop.f32.mrb[38].mxu0  ;;  %v22720_v15 = vld [vmem:[%s27429_s2 + $0xbe8] sm:$0xff]  }
 0x9bd   :  { %v19565_v19 = vpop.f32.mrb[39].mxu0  ;;  %v22721_v35 = vld [vmem:[%s27429_s2 + $0xba8] sm:$0xff]  }
 0x9be   :  { %v4298_v50 = vadd.f32 %v19563_v7, %v24514_v31  ;;  %v19566_v51 = vadd.f32 %v19565_v19, %v19564_v48  ;;  %v22694_v31 = vld [vmem:[%s27429_s2 + $0xac8] sm:$0xff]   ;;  %v22722_v7 = vld [vmem:[%s27429_s2 + $0xbf0] sm:$0xff]   ;;  %v22724_v19 = vld [vmem:[%s27429_s2 + $0xbf8] sm:$0xff]  }
 0x9bf   :  { %v22723_v48 = vld [vmem:[%s27429_s2 + $0xbb0] sm:$0xff]  }
 0x9c0   :  { %v4301_v54 = vadd.f32 %v19566_v51, %v24522_v40  ;;  %v22695_v40 = vld [vmem:[%s27429_s2 + $0xa88] sm:$0xff]   ;;  %v22726_v51 = vld [vmem:[%s27430_s3 + $0xb0] sm:$0xff]  }
 0x9c2   :  { %v4304_v55 = vpack.c.bf16 %v4301_v54, %v4298_v50  ;;  %v22725_v50 = vld [vmem:[%s27429_s2 + $0xbb8] sm:$0xff]  }
 0x9c4   :  { %20522 = vmatprep.subr.bf16.mxu0 %v4304_v55 }
 0x9c5   :  { %20523 = vmatpush3.bf16.msra.mxu0 %v4304_v55 }
 0x9c6   :  { %19592 = vmatprep.subr.bf16.mxu0 %v22692_v62 }
 0x9c8   :  { %20525 = vmatmul.mubr.msk.bf16.vlgmr.msra.gmra.mrb[8].mxu0 %vm73_vm0, %v22691_v1 }
 0x9c9   :  { %19593 = vmatpush3.bf16.msra.mxu0 %v22693_v6  ;;  %4709 = vmatprep.mubr.bf16.mxu0 %v23469_v59 }
 0x9ca   :  { %19594 = vmatprep.subr.bf16.mxu0 %v22694_v31 }
 0x9cd   :  { %19595 = vmatpush3.bf16.msra.mxu0 %v22695_v40 }
 0x9ce   :  { %19596 = vmatprep.subr.bf16.mxu0 %v22696_v12 }
 0x9d1   :  { %19597 = vmatpush3.bf16.msra.mxu0 %v22697_v13 }
 0x9d2   :  { %19598 = vmatprep.subr.bf16.mxu0 %v22698_v17  ;;  %v22728_v17 = vld [vmem:[%s27429_s2 + $0xcc0] sm:$0xff]  }
 0x9d5   :  { %19599 = vmatpush3.bf16.msra.mxu0 %v22699_v63  ;;  %v22727_v63 = vld [vmem:[%s27430_s3 + $0xb8] sm:$0xff]  }
 0x9d6   :  { %19600 = vmatprep.subr.bf16.mxu0 %v22700_v4  ;;  %v22729_v4 = vld [vmem:[%s27429_s2 + $0xc80] sm:$0xff]  }
 0x9d9   :  { %19601 = vmatpush3.bf16.msra.mxu0 %v22701_v20  ;;  %v22732_v20 = vld [vmem:[%s27429_s2 + $0xcd0] sm:$0xff]  }
 0x9da   :  { %19602 = vmatprep.subr.bf16.mxu0 %v22702_v23  ;;  %v22733_v23 = vld [vmem:[%s27429_s2 + $0xc90] sm:$0xff]  }
 0x9dd   :  { %19603 = vmatpush3.bf16.msra.mxu0 %v22703_v25  ;;  %v22734_v25 = vld [vmem:[%s27429_s2 + $0xcd8] sm:$0xff]  }
 0x9de   :  { %19604 = vmatprep.subr.bf16.mxu0 %v22704_v27  ;;  %v22736_v27 = vld [vmem:[%s27429_s2 + $0xce0] sm:$0xff]  }
 0x9e1   :  { %19605 = vmatpush3.bf16.msra.mxu0 %v22705_v28  ;;  %v22737_v28 = vld [vmem:[%s27429_s2 + $0xca0] sm:$0xff]  }
 0x9e2   :  { %19606 = vmatprep.subr.bf16.mxu0 %v22706_v32  ;;  %v22738_v32 = vld [vmem:[%s27429_s2 + $0xce8] sm:$0xff]  }
 0x9e5   :  { %19607 = vmatpush3.bf16.msra.mxu0 %v22707_v33  ;;  %v22739_v33 = vld [vmem:[%s27429_s2 + $0xca8] sm:$0xff]  }
 0x9e8   :  { %4710 = vmatmul.mubr.bf16.vlgmr.msra.gmra.mrb[40].mxu0 %v23467_v58 }
 0x9e9   :  { %20530 = vmatprep.mubr.msk.bf16.mxu0 %vm73_vm0, %v22708_v45  ;;  %v22740_v45 = vld [vmem:[%s27429_s2 + $0xcf0] sm:$0xff]  }
 0xabb   :  { %v19608_v47 = vpop.f32.mrb[40].mxu0 }
 0xabc   :  { %v19609_v36 = vpop.f32.mrb[41].mxu0 }
 0xabd   :  { %v19610_v37 = vadd.f32 %v19609_v36, %v19608_v47  ;;  %v19611_v52 = vpop.f32.mrb[42].mxu0  ;;  %v22741_v47 = vld [vmem:[%s27429_s2 + $0xcb0] sm:$0xff]   ;;  %v22742_v36 = vld [vmem:[%s27429_s2 + $0xcf8] sm:$0xff]  }
 0xabe   :  { %v19612_v61 = vpop.f32.mrb[43].mxu0 }
 0xabf   :  { %v4712_v14 = vadd.f32 %v19610_v37, %v24574_v0  ;;  %v19613_v38 = vadd.f32 %v19612_v61, %v19611_v52  ;;  %v22712_v0 = vld [vmem:[%s27429_s2 + $0xbc8] sm:$0xff]   ;;  %v22743_v37 = vld [vmem:[%s27429_s2 + $0xcb8] sm:$0xff]   ;;  %v22744_v52 = vld [vmem:[%s27430_s3 + $0xc0] sm:$0xff]  }
 0xac1   :  { %v4715_v39 = vadd.f32 %v19613_v38, %v24576_v3  ;;  %v22713_v3 = vld [vmem:[%s27429_s2 + $0xb88] sm:$0xff]  }
 0xac3   :  { %v4718_v10 = vpack.c.bf16 %v4715_v39, %v4712_v14 }
 0xac5   :  { %20528 = vmatprep.subr.bf16.mxu0 %v4718_v10 }
 0xac6   :  { %20529 = vmatpush3.bf16.msra.mxu0 %v4718_v10 }
 0xac7   :  { %19639 = vmatprep.subr.bf16.mxu0 %v22710_v41 }
 0xac9   :  { %20531 = vmatmul.mubr.msk.bf16.vlgmr.msra.gmra.mrb[8].mxu0 %vm73_vm0, %v22709_v8 }
 0xaca   :  { %19640 = vmatpush3.bf16.msra.mxu0 %v22711_v11  ;;  %5123 = vmatprep.mubr.bf16.mxu0 %v23469_v59 }
 0xacb   :  { %19641 = vmatprep.subr.bf16.mxu0 %v22712_v0 }
 0xace   :  { %19642 = vmatpush3.bf16.msra.mxu0 %v22713_v3  ;;  %v22746_v3 = vld [vmem:[%s27430_s3 + $0xd0] sm:$0xff]  }
 0xacf   :  { %19643 = vmatprep.subr.bf16.mxu0 %v22714_v42  ;;  %v22749_v42 = vld [vmem:[%s27429_s2 + $0xe00] sm:$0xff]  }
 0xad2   :  { %19644 = vmatpush3.bf16.msra.mxu0 %v22715_v43  ;;  %v22750_v43 = vld [vmem:[%s27429_s2 + $0xe48] sm:$0xff]  }
 0xad3   :  { %19645 = vmatprep.subr.bf16.mxu0 %v22716_v44  ;;  %v22752_v44 = vld [vmem:[%s27429_s2 + $0xe50] sm:$0xff]  }
 0xad6   :  { %19646 = vmatpush3.bf16.msra.mxu0 %v22717_v24  ;;  %v22753_v24 = vld [vmem:[%s27429_s2 + $0xe10] sm:$0xff]  }
 0xad7   :  { %19647 = vmatprep.subr.bf16.mxu0 %v22718_v18  ;;  %v22754_v18 = vld [vmem:[%s27429_s2 + $0xe58] sm:$0xff]  }
 0xada   :  { %19648 = vmatpush3.bf16.msra.mxu0 %v22719_v30  ;;  %v22755_v30 = vld [vmem:[%s27429_s2 + $0xe18] sm:$0xff]  }
 0xadb   :  { %19649 = vmatprep.subr.bf16.mxu0 %v22720_v15  ;;  %v22756_v15 = vld [vmem:[%s27429_s2 + $0xe60] sm:$0xff]  }
 0xade   :  { %19650 = vmatpush3.bf16.msra.mxu0 %v22721_v35  ;;  %v22757_v35 = vld [vmem:[%s27429_s2 + $0xe20] sm:$0xff]  }
 0xadf   :  { %19651 = vmatprep.subr.bf16.mxu0 %v22722_v7  ;;  %v22758_v7 = vld [vmem:[%s27429_s2 + $0xe68] sm:$0xff]  }
 0xae2   :  { %19652 = vmatpush3.bf16.msra.mxu0 %v22723_v48  ;;  %v22759_v48 = vld [vmem:[%s27429_s2 + $0xe28] sm:$0xff]  }
 0xae3   :  { %19653 = vmatprep.subr.bf16.mxu0 %v22724_v19  ;;  %v22760_v19 = vld [vmem:[%s27429_s2 + $0xe70] sm:$0xff]  }
 0xae6   :  { %19654 = vmatpush3.bf16.msra.mxu0 %v22725_v50  ;;  %v22761_v50 = vld [vmem:[%s27429_s2 + $0xe30] sm:$0xff]  }
 0xae9   :  { %5124 = vmatmul.mubr.bf16.vlgmr.msra.gmra.mrb[44].mxu0 %v23467_v58 }
 0xaea   :  { %20536 = vmatprep.mubr.msk.bf16.mxu0 %vm73_vm0, %v22726_v51  ;;  %v22762_v51 = vld [vmem:[%s27429_s2 + $0xe78] sm:$0xff]  }
 0xbbc   :  { %v19655_v54 = vpop.f32.mrb[44].mxu0 }
 0xbbd   :  { %v19656_v55 = vpop.f32.mrb[45].mxu0 }
 0xbbe   :  { %v19657_v62 = vadd.f32 %v19656_v55, %v19655_v54  ;;  %v19658_v1 = vpop.f32.mrb[46].mxu0  ;;  %v22763_v54 = vld [vmem:[%s27429_s2 + $0xe38] sm:$0xff]   ;;  %v22764_v55 = vld [vmem:[%s27430_s3 + $0xe0] sm:$0xff]  }
 0xbbf   :  { %v19659_v6 = vpop.f32.mrb[47].mxu0 }
 0xbc0   :  { %v5126_v31 = vadd.f32 %v19657_v62, %v24588_v22  ;;  %v19660_v40 = vadd.f32 %v19659_v6, %v19658_v1  ;;  %v22730_v22 = vld [vmem:[%s27429_s2 + $0xcc8] sm:$0xff]  }
 0xbc2   :  { %v5129_v12 = vadd.f32 %v19660_v40, %v24590_v26  ;;  %v22731_v26 = vld [vmem:[%s27429_s2 + $0xc88] sm:$0xff]  }
 0xbc4   :  { %v5132_v13 = vpack.c.bf16 %v5129_v12, %v5126_v31 }
 0xbc6   :  { %20534 = vmatprep.subr.bf16.mxu0 %v5132_v13 }
 0xbc7   :  { %20535 = vmatpush3.bf16.msra.mxu0 %v5132_v13 }
 0xbc8   :  { %19686 = vmatprep.subr.bf16.mxu0 %v22728_v17 }
 0xbca   :  { %20537 = vmatmul.mubr.msk.bf16.vlgmr.msra.gmra.mrb[8].mxu0 %vm73_vm0, %v22727_v63 }
 0xbcb   :  { %19687 = vmatpush3.bf16.msra.mxu0 %v22729_v4  ;;  %5537 = vmatprep.mubr.bf16.mxu0 %v23469_v59  ;;  %v22735_v59 = vld [vmem:[%s27429_s2 + $0xc98] sm:$0xff]   ;;  %v22766_v4 = vld [vmem:[%s27429_s2 + $0xf40] sm:$0xff]  }
 0xbcc   :  { %19688 = vmatprep.subr.bf16.mxu0 %v22730_v22  ;;  %v22765_v22 = vld [vmem:[%s27430_s3 + $0xe8] sm:$0xff]  }
 0xbcf   :  { %19689 = vmatpush3.bf16.msra.mxu0 %v22731_v26  ;;  %v22767_v26 = vld [vmem:[%s27429_s2 + $0xf00] sm:$0xff]  }
 0xbd0   :  { %19690 = vmatprep.subr.bf16.mxu0 %v22732_v20  ;;  %v22770_v20 = vld [vmem:[%s27429_s2 + $0xf50] sm:$0xff]  }
 0xbd3   :  { %19691 = vmatpush3.bf16.msra.mxu0 %v22733_v23  ;;  %v22771_v23 = vld [vmem:[%s27429_s2 + $0xf10] sm:$0xff]  }
 0xbd4   :  { %19692 = vmatprep.subr.bf16.mxu0 %v22734_v25  ;;  %v22772_v25 = vld [vmem:[%s27429_s2 + $0xf58] sm:$0xff]  }
 0xbd7   :  { %19693 = vmatpush3.bf16.msra.mxu0 %v22735_v59  ;;  %v22774_v59 = vld [vmem:[%s27429_s2 + $0xf60] sm:$0xff]  }
 0xbd8   :  { %19694 = vmatprep.subr.bf16.mxu0 %v22736_v27  ;;  %v22775_v27 = vld [vmem:[%s27429_s2 + $0xf20] sm:$0xff]  }
 0xbdb   :  { %19695 = vmatpush3.bf16.msra.mxu0 %v22737_v28  ;;  %v22776_v28 = vld [vmem:[%s27429_s2 + $0xf68] sm:$0xff]  }
 0xbdc   :  { %19696 = vmatprep.subr.bf16.mxu0 %v22738_v32  ;;  %v22777_v32 = vld [vmem:[%s27429_s2 + $0xf28] sm:$0xff]  }
 0xbdf   :  { %19697 = vmatpush3.bf16.msra.mxu0 %v22739_v33  ;;  %v22778_v33 = vld [vmem:[%s27429_s2 + $0xf70] sm:$0xff]  }
 0xbe0   :  { %19698 = vmatprep.subr.bf16.mxu0 %v22740_v45  ;;  %v22779_v45 = vld [vmem:[%s27429_s2 + $0xf30] sm:$0xff]  }
 0xbe3   :  { %19699 = vmatpush3.bf16.msra.mxu0 %v22741_v47  ;;  %v22780_v47 = vld [vmem:[%s27429_s2 + $0xf78] sm:$0xff]  }
 0xbe4   :  { %19700 = vmatprep.subr.bf16.mxu0 %v22742_v36  ;;  %v22781_v36 = vld [vmem:[%s27429_s2 + $0xf38] sm:$0xff]  }
 0xbe7   :  { %19701 = vmatpush3.bf16.msra.mxu0 %v22743_v37  ;;  %v22782_v37 = vld [vmem:[%s27430_s3 + $0xf0] sm:$0xff]  }
 0xbea   :  { %5538 = vmatmul.mubr.bf16.vlgmr.msra.gmra.mrb[48].mxu0 %v23467_v58  ;;  %v22745_v58 = vld [vmem:[%s27430_s3 + $0xc8] sm:$0xff]  }
 0xbeb   :  { %20542 = vmatprep.mubr.msk.bf16.mxu0 %vm73_vm0, %v22744_v52 }
 0xcbd   :  { %v19702_v61 = vpop.f32.mrb[48].mxu0 }
 0xcbe   :  { %v19703_v14 = vpop.f32.mrb[49].mxu0 }
 0xcbf   :  { %v19704_v38 = vadd.f32 %v19703_v14, %v19702_v61  ;;  %v19705_v39 = vpop.f32.mrb[50].mxu0 }
 0xcc0   :  { %v19706_v10 = vpop.f32.mrb[51].mxu0 }
 0xcc1   :  { %v5540_v41 = vadd.f32 %v19704_v38, %v24592_v29  ;;  %v19707_v8 = vadd.f32 %v19706_v10, %v19705_v39  ;;  %v22747_v29 = vld [vmem:[%s27429_s2 + $0xe40] sm:$0xff]  }
 0xcc3   :  { %v5543_v11 = vadd.f32 %v19707_v8, %v24594_v34  ;;  %v22748_v34 = vld [vmem:[%s27430_s3 + $0xd8] sm:$0xff]  }
 0xcc5   :  { %v5546_v0 = vpack.c.bf16 %v5543_v11, %v5540_v41 }
 0xcc7   :  { %20540 = vmatprep.subr.bf16.mxu0 %v5546_v0 }
 0xcc8   :  { %20541 = vmatpush3.bf16.msra.mxu0 %v5546_v0 }
 0xcc9   :  { %20546 = vmatprep.subr.bf16.mxu0 %v24600_v46 }
 0xccb   :  { %20543 = vmatmul.mubr.msk.bf16.vlgmr.msra.gmra.mrb[8].mxu0 %vm73_vm0, %v22745_v58 }
 0xccc   :  { %20547 = vmatpush3.bf16.msra.mxu0 %v24600_v46  ;;  %20548 = vmatprep.mubr.msk.bf16.mxu0 %vm73_vm0, %v22746_v3  ;;  %v22751_v46 = vld [vmem:[%s27429_s2 + $0xe08] sm:$0xff]  }
 0xccd   :  { %19758 = vmatprep.subr.bf16.mxu0 %v22747_v29 }
 0xcd7   :  { %20549 = vmatmul.mubr.msk.bf16.vlgmr.msra.gmra.mrb[8].mxu0 %vm73_vm0, %v22748_v34 }
 0xcd8   :  { %19759 = vmatpush3.bf16.msra.mxu0 %v22749_v42  ;;  %6324 = vmatprep.mubr.bf16.mxu0 %v23465_v57 }
 0xcd9   :  { %19760 = vmatprep.subr.bf16.mxu0 %v22750_v43  ;;  %v22784_v43 = vld [vmem:[%s27431_s4] sm:$0xff]  }
 0xcdc   :  { %19761 = vmatpush3.bf16.msra.mxu0 %v22751_v46  ;;  %v22785_v46 = vld [vmem:[%s27431_s4 + $0x40] sm:$0xff]  }
 0xcdd   :  { %19762 = vmatprep.subr.bf16.mxu0 %v22752_v44  ;;  %20584 = vmatprep.subr.bf16.mxu1 %v22785_v46  ;;  %v22786_v44 = vld [vmem:[%s27431_s4 + $0x8] sm:$0xff]  }
 0xcde   :  { %20585 = vmatpush3.bf16.msra.mxu1 %v22785_v46 }
 0xce0   :  { %19763 = vmatpush3.bf16.msra.mxu0 %v22753_v24  ;;  %v22787_v24 = vld [vmem:[%s27431_s4 + $0x48] sm:$0xff]  }
 0xce1   :  { %19764 = vmatprep.subr.bf16.mxu0 %v22754_v18  ;;  %20586 = vmatprep.subr.bf16.mxu1 %v22787_v24  ;;  %v22788_v18 = vld [vmem:[%s27431_s4 + $0x10] sm:$0xff]  }
 0xce2   :  { %20587 = vmatpush3.bf16.msra.mxu1 %v22787_v24 }
 0xce4   :  { %19765 = vmatpush3.bf16.msra.mxu0 %v22755_v30  ;;  %v22789_v30 = vld [vmem:[%s27431_s4 + $0x50] sm:$0xff]  }
 0xce5   :  { %19766 = vmatprep.subr.bf16.mxu0 %v22756_v15  ;;  %20588 = vmatprep.subr.bf16.mxu1 %v22789_v30  ;;  %v22790_v15 = vld [vmem:[%s27431_s4 + $0x18] sm:$0xff]  }
 0xce6   :  { %20589 = vmatpush3.bf16.msra.mxu1 %v22789_v30 }
 0xce8   :  { %19767 = vmatpush3.bf16.msra.mxu0 %v22757_v35  ;;  %v22791_v35 = vld [vmem:[%s27431_s4 + $0x58] sm:$0xff]  }
 0xce9   :  { %19768 = vmatprep.subr.bf16.mxu0 %v22758_v7  ;;  %20590 = vmatprep.subr.bf16.mxu1 %v22791_v35  ;;  %v22792_v7 = vld [vmem:[%s27431_s4 + $0x20] sm:$0xff]  }
 0xcea   :  { %20591 = vmatpush3.bf16.msra.mxu1 %v22791_v35 }
 0xcec   :  { %19769 = vmatpush3.bf16.msra.mxu0 %v22759_v48  ;;  %v22793_v48 = vld [vmem:[%s27431_s4 + $0x60] sm:$0xff]  }
 0xced   :  { %19770 = vmatprep.subr.bf16.mxu0 %v22760_v19  ;;  %20592 = vmatprep.subr.bf16.mxu1 %v22793_v48  ;;  %v22794_v19 = vld [vmem:[%s27431_s4 + $0x28] sm:$0xff]  }
 0xcee   :  { %20593 = vmatpush3.bf16.msra.mxu1 %v22793_v48 }
 0xcf0   :  { %19771 = vmatpush3.bf16.msra.mxu0 %v22761_v50  ;;  %v22795_v50 = vld [vmem:[%s27431_s4 + $0x68] sm:$0xff]  }
 0xcf1   :  { %19772 = vmatprep.subr.bf16.mxu0 %v22762_v51  ;;  %20594 = vmatprep.subr.bf16.mxu1 %v22795_v50  ;;  %v22796_v51 = vld [vmem:[%s27431_s4 + $0x30] sm:$0xff]  }
 0xcf2   :  { %20595 = vmatpush3.bf16.msra.mxu1 %v22795_v50 }
 0xcf4   :  { %19773 = vmatpush3.bf16.msra.mxu0 %v22763_v54  ;;  %v22797_v54 = vld [vmem:[%s27431_s4 + $0x70] sm:$0xff]  }
 0xcf5   :  { %20596 = vmatprep.subr.bf16.mxu1 %v22797_v54 }
 0xcf6   :  { %20597 = vmatpush3.bf16.msra.mxu1 %v22797_v54 }
 0xcf7   :  { %6325 = vmatmul.mubr.bf16.vlgmr.msra.gmra.mrb[52].mxu0 %v23463_v56 }
 0xcf8   :  { %20554 = vmatprep.mubr.msk.bf16.mxu0 %vm73_vm0, %v22764_v55  ;;  %v22798_v55 = vld [vmem:[%s27431_s4 + $0x38] sm:$0xff]  }
 0xdca   :  { %v19774_v62 = vpop.f32.mrb[52].mxu0 }
 0xdcb   :  { %v19775_v1 = vpop.f32.mrb[53].mxu0 }
 0xdcc   :  { %v19776_v6 = vadd.f32 %v19775_v1, %v19774_v62  ;;  %v19777_v31 = vpop.f32.mrb[54].mxu0  ;;  %v22799_v62 = vld [vmem:[%s27431_s4 + $0x78] sm:$0xff]  }
 0xdcd   :  { %v19778_v40 = vpop.f32.mrb[55].mxu0  ;;  %20598 = vmatprep.subr.bf16.mxu1 %v22799_v62 }
 0xdce   :  { %v6368_v12 = vadd.f32 %v24602_v49, %v19776_v6  ;;  %v19779_v13 = vadd.f32 %v19778_v40, %v19777_v31  ;;  %v22768_v49 = vld [vmem:[%s27429_s2 + $0xf48] sm:$0xff]   ;;  %20599 = vmatpush3.bf16.msra.mxu1 %v22799_v62 }
 0xdd0   :  { %v6371_v17 = vadd.f32 %v24604_v53, %v19779_v13  ;;  %v22769_v53 = vld [vmem:[%s27429_s2 + $0xf08] sm:$0xff]  }
 0xdd2   :  { %v6374_v63 = vpack.c.bf16 %v6371_v17, %v6368_v12 }
 0xdd4   :  { %20552 = vmatprep.subr.bf16.mxu0 %v6374_v63 }
 0xdd5   :  { %20553 = vmatpush3.bf16.msra.mxu0 %v6374_v63 }
 0xdd6   :  { %19805 = vmatprep.subr.bf16.mxu0 %v22766_v4 }
 0xdd8   :  { %20555 = vmatmul.mubr.msk.bf16.vlgmr.msra.gmra.mrb[8].mxu0 %vm73_vm0, %v22765_v22 }
 0xdd9   :  { %19806 = vmatpush3.bf16.msra.mxu0 %v22767_v26  ;;  %6738 = vmatprep.mubr.bf16.mxu0 %v23465_v57  ;;  %v22773_v57 = vld [vmem:[%s27429_s2 + $0xf18] sm:$0xff]  }
 0xdda   :  { %19807 = vmatprep.subr.bf16.mxu0 %v22768_v49 }
 0xddd   :  { %19808 = vmatpush3.bf16.msra.mxu0 %v22769_v53 }
 0xdde   :  { %19809 = vmatprep.subr.bf16.mxu0 %v22770_v20 }
 0xde1   :  { %19810 = vmatpush3.bf16.msra.mxu0 %v22771_v23 }
 0xde2   :  { %19811 = vmatprep.subr.bf16.mxu0 %v22772_v25 }
 0xde5   :  { %19812 = vmatpush3.bf16.msra.mxu0 %v22773_v57 }
 0xde6   :  { %19813 = vmatprep.subr.bf16.mxu0 %v22774_v59 }
 0xde9   :  { %19814 = vmatpush3.bf16.msra.mxu0 %v22775_v27 }
 0xdea   :  { %19815 = vmatprep.subr.bf16.mxu0 %v22776_v28 }
 0xded   :  { %19816 = vmatpush3.bf16.msra.mxu0 %v22777_v32 }
 0xdee   :  { %19817 = vmatprep.subr.bf16.mxu0 %v22778_v33 }
 0xdf1   :  { %19818 = vmatpush3.bf16.msra.mxu0 %v22779_v45 }
 0xdf2   :  { %19819 = vmatprep.subr.bf16.mxu0 %v22780_v47 }
 0xdf5   :  { %19820 = vmatpush3.bf16.msra.mxu0 %v22781_v36 }
 0xdf8   :  { %6739 = vmatmul.mubr.bf16.vlgmr.msra.gmra.mrb[56].mxu0 %v23463_v56  ;;  %v22783_v56 = vld [vmem:[%s27430_s3 + $0xf8] sm:$0xff]  }
 0xdf9   :  { %20560 = vmatprep.mubr.msk.bf16.mxu0 %vm73_vm0, %v22782_v37 }
 0xecb   :  { %v19821_v52 = vpop.f32.mrb[56].mxu0 }
 0xecc   :  { %v19822_v61 = vpop.f32.mrb[57].mxu0 }
 0xecd   :  { %v19823_v14 = vadd.f32 %v19822_v61, %v19821_v52  ;;  %v19824_v38 = vpop.f32.mrb[58].mxu0 }
 0xece   :  { %v19825_v39 = vpop.f32.mrb[59].mxu0 }
 0xecf   :  { %v6782_v10 = vadd.f32 %v24606_v60, %v19823_v14  ;;  %v19826_v41 = vadd.f32 %v19825_v39, %v19824_v38 }
 0xed1   :  { %v6785_v8 = vadd.f32 %v24608_v2, %v19826_v41 }
 0xed3   :  { %v6788_v11 = vpack.c.bf16 %v6785_v8, %v6782_v10 }
 0xed5   :  { %20558 = vmatprep.subr.bf16.mxu0 %v6788_v11 }
 0xed6   :  { %20559 = vmatpush3.bf16.msra.mxu0 %v6788_v11 }
 0xed7   :  { %20564 = vmatprep.subr.bf16.mxu0 %v22784_v43 }
 0xed9   :  { %20561 = vmatmul.mubr.msk.bf16.vlgmr.msra.gmra.mrb[8].mxu0 %vm73_vm0, %v22783_v56 }
 0xeda   :  { %20565 = vmatpush3.bf16.msra.mxu0 %v22784_v43 }
 0xedb   :  { %20566 = vmatprep.subr.bf16.mxu0 %v22786_v44 }
 0xede   :  { %20567 = vmatpush3.bf16.msra.mxu0 %v22786_v44 }
 0xedf   :  { %20568 = vmatprep.subr.bf16.mxu0 %v22788_v18 }
 0xee2   :  { %20569 = vmatpush3.bf16.msra.mxu0 %v22788_v18 }
 0xee3   :  { %20570 = vmatprep.subr.bf16.mxu0 %v22790_v15 }
 0xee6   :  { %20571 = vmatpush3.bf16.msra.mxu0 %v22790_v15  ;;  %v22800_v15 = vld [vmem:[%s27432_s5 + $0x20] sm:$0xff]  }
 0xee7   :  { %20572 = vmatprep.subr.bf16.mxu0 %v22792_v7 }
 0xeea   :  { %20573 = vmatpush3.bf16.msra.mxu0 %v22792_v7 }
 0xeeb   :  { %20574 = vmatprep.subr.bf16.mxu0 %v22794_v19 }
 0xeee   :  { %20575 = vmatpush3.bf16.msra.mxu0 %v22794_v19 }
 0xeef   :  { %20576 = vmatprep.subr.bf16.mxu0 %v22796_v51 }
 0xef2   :  { %20577 = vmatpush3.bf16.msra.mxu0 %v22796_v51 }
 0xef3   :  { %20578 = vmatprep.subr.bf16.mxu0 %v22798_v55 }
 0xef6   :  { %20579 = vmatpush3.bf16.msra.mxu0 %v22798_v55 }
 0xfac   :  { %v20562_v0 = vpop.f32.mrb[8].mxu0 }
 0xfad   :  { %v25177_v58 = vadd.f32 %v20562_v0, %v23976_v5  ;;  %v6844_v3 = vpop.f32.mrb[9].mxu0 }
 0xfae   :  { %v25180_v29 = vadd.f32 %v6844_v3, %v23978_v9  ;;  %v20563_v60 = vpop.f32.mrb[10].mxu0 }
 0xfaf   :  { %v25183_v2 = vadd.f32 %v20563_v60, %v23980_v16  ;;  %6867 = vadd.xlane.f32.xlu0 %v25177_v58  ;;  %v6847_v34 = vpop.f32.mrb[11].mxu0  ;;  %v6873_v16 = vmul.f32 %v25177_v58, %v25177_v58 }
 0xfb0   :  { %v25187_v42 = vadd.f32 %v6847_v34, %v23985_v21  ;;  %v6871_v5 = vmul.f32 %v25180_v29, %v25180_v29 }
 0xfb1   :  { %6869 = vadd.xlane.f32.xlu1 %v25183_v2  ;;  %v6874_v21 = vmul.f32 %v25183_v2, %v25183_v2 }
 0xfb2   :  { %v6872_v9 = vmul.f32 %v25187_v42, %v25187_v42 }
 0xfb3   :  { %6863 = vadd.xlane.f32.xlu0 %v25180_v29 }
 0xfb5   :  { %6865 = vadd.xlane.f32.xlu1 %v25187_v42 }
 0xfb7   :  { %6875 = vadd.xlane.f32.xlu0 %v6871_v5 }
 0xfb9   :  { %6877 = vadd.xlane.f32.xlu1 %v6872_v9 }
 0xfbb   :  { %6879 = vadd.xlane.f32.xlu0 %v6873_v16 }
 0xfbd   :  { %6881 = vadd.xlane.f32.xlu1 %v6874_v21 }
0x103c   :  { %v6868_v1 = vpop.xlane.xlu0 %6867 }
0x103d   :  { %v6885_v63 = vmul.f32 0.0078125, %v6868_v1 }
0x103e   :  { %v6870_v6 = vpop.xlane.xlu1 %6869 }
0x103f   :  { %v6886_v26 = vmul.f32 0.0078125, %v6870_v6  ;;  %v6893_v57 = vmul.f32 %v6885_v63, %v6885_v63  ;;  %v6905_v3 = vsub.f32 %v25177_v58, %v6885_v63  ;;  %v22806_v63 = vld [vmem:[%s27431_s4 + $0x90] sm:$0xff]  }
0x1040   :  { %v6864_v31 = vpop.xlane.xlu0 %6863 }
0x1041   :  { %v6883_v40 = vmul.f32 0.0078125, %v6864_v31  ;;  %v6894_v32 = vmul.f32 %v6886_v26, %v6886_v26  ;;  %v6906_v9 = vsub.f32 %v25183_v2, %v6886_v26  ;;  %v22808_v26 = vld [vmem:[%s27431_s4 + $0xa0] sm:$0xff]  }
0x1042   :  { %v6866_v12 = vpop.xlane.xlu1 %6865 }
0x1043   :  { %v6884_v13 = vmul.f32 0.0078125, %v6866_v12  ;;  %v6891_v4 = vmul.f32 %v6883_v40, %v6883_v40  ;;  %v6903_v41 = vsub.f32 %v25180_v29, %v6883_v40  ;;  %v22802_v40 = vld [vmem:[%s27431_s4 + $0x80] sm:$0xff]   ;;  %v22801_v12 = vld [vmem:[%s27432_s5 + $0x28] sm:$0xff]  }
0x1044   :  { %v6876_v17 = vpop.xlane.xlu0 %6875 }
0x1045   :  { %v6887_v22 = vmul.f32 0.0078125, %v6876_v17  ;;  %v6892_v53 = vmul.f32 %v6884_v13, %v6884_v13  ;;  %v6904_v11 = vsub.f32 %v25187_v42, %v6884_v13  ;;  %v22804_v13 = vld [vmem:[%s27432_s5 + $0x30] sm:$0xff]   ;;  %v22803_v17 = vld [vmem:[%s27431_s4 + $0x88] sm:$0xff]  }
0x1046   :  { %v6878_v49 = vpop.xlane.xlu1 %6877 }
0x1047   :  { %v6895_v20 = vsub.f32 %v6887_v22, %v6891_v4  ;;  %v6888_v23 = vmul.f32 0.0078125, %v6878_v49  ;;  %v22805_v4 = vld [vmem:[%s27432_s5 + $0x38] sm:$0xff]   ;;  %v22809_v49 = vld [vmem:[%s27431_s4 + $0xa8] sm:$0xff]  }
0x1048   :  { %v6880_v25 = vpop.xlane.xlu0 %6879  ;;  %v22807_v22 = vld [vmem:[%s27431_s4 + $0x98] sm:$0xff]  }
0x1049   :  { %v6899_v59 = vmax.f32 %v6895_v20, 0.0  ;;  %v6896_v27 = vsub.f32 %v6888_v23, %v6892_v53  ;;  %v6889_v28 = vmul.f32 0.0078125, %v6880_v25  ;;  %v22810_v53 = vld [vmem:[%s27431_s4 + $0xb0] sm:$0xff]   ;;  %v22811_v20 = vld [vmem:[%s27431_s4 + $0xb8] sm:$0xff]   ;;  %v22812_v23 = vld [vmem:[%s27431_s4 + $0xc0] sm:$0xff]  }
0x104a   :  { %v6882_v33 = vpop.xlane.xlu1 %6881  ;;  %v22813_v25 = vld [vmem:[%s27431_s4 + $0xc8] sm:$0xff]  }
0x104b   :  { %v6907_v45 = vadd.f32 1e-05, %v6899_v59  ;;  %v6900_v47 = vmax.f32 %v6896_v27, 0.0  ;;  %v6897_v36 = vsub.f32 %v6889_v28, %v6893_v57  ;;  %v6890_v37 = vmul.f32 0.0078125, %v6882_v33  ;;  %v22814_v57 = vld [vmem:[%s27431_s4 + $0xd0] sm:$0xff]   ;;  %v22815_v59 = vld [vmem:[%s27431_s4 + $0xd8] sm:$0xff]  }
0x104c   :  { %v22816_v27 = vld [vmem:[%s27431_s4 + $0xe0] sm:$0xff]   ;;  %v22817_v28 = vld [vmem:[%s27431_s4 + $0xe8] sm:$0xff]   ;;  %v22819_v33 = vld [vmem:[%s27431_s4 + $0xf8] sm:$0xff]  }
0x104d   :  { %23140 = vrsqrt.f32 %v6907_v45  ;;  %v6908_v52 = vadd.f32 1e-05, %v6900_v47  ;;  %v6901_v61 = vmax.f32 %v6897_v36, 0.0  ;;  %v6898_v14 = vsub.f32 %v6890_v37, %v6894_v32  ;;  %v22818_v32 = vld [vmem:[%s27431_s4 + $0xf0] sm:$0xff]   ;;  %v22820_v45 = vld [vmem:[%s27431_s4 + $0x140] sm:$0xff]   ;;  %v22821_v47 = vld [vmem:[%s27431_s4 + $0x148] sm:$0xff]  }
0x104e   :  { %v22822_v36 = vld [vmem:[%s27431_s4 + $0x150] sm:$0xff]   ;;  %v22823_v37 = vld [vmem:[%s27431_s4 + $0x158] sm:$0xff]  }
0x104f   :  { %23142 = vrsqrt.f32 %v6908_v52  ;;  %v6909_v38 = vadd.f32 1e-05, %v6901_v61  ;;  %v6902_v39 = vmax.f32 %v6898_v14, 0.0  ;;  %v22824_v52 = vld [vmem:[%s27431_s4 + $0x160] sm:$0xff]   ;;  %v22825_v61 = vld [vmem:[%s27431_s4 + $0x168] sm:$0xff]   ;;  %v22826_v14 = vld [vmem:[%s27431_s4 + $0x170] sm:$0xff]  }
0x1051   :  { %23144 = vrsqrt.f32 %v6909_v38  ;;  %v6910_v10 = vadd.f32 1e-05, %v6902_v39  ;;  %v22827_v38 = vld [vmem:[%s27431_s4 + $0x178] sm:$0xff]   ;;  %v22828_v39 = vld [vmem:[%s27431_s4 + $0x180] sm:$0xff]  }
0x1053   :  { %23146 = vrsqrt.f32 %v6910_v10  ;;  %v22829_v10 = vld [vmem:[%s27431_s4 + $0x188] sm:$0xff]  }
0x1057   :  { %v23141_v8 = vpop.eup %23140 }
0x1058   :  { %v6915_v56 = vmul.f32 %v23141_v8, %v6903_v41  ;;  %v22830_v41 = vld [vmem:[%s27431_s4 + $0x190] sm:$0xff]   ;;  %v22831_v8 = vld [vmem:[%s27431_s4 + $0x198] sm:$0xff]  }
0x1059   :  { %v23143_v0 = vpop.eup %23142 }
0x105a   :  { %v6923_v60 = vmul.f32 0.01, %v6915_v56  ;;  %v6916_v34 = vmul.f32 %v23143_v0, %v6904_v11  ;;  %vm6919_vm9 = vcmp.ge.f32.partialorder %v6915_v56, 0.0  ;;  %v22832_v11 = vld [vmem:[%s27431_s4 + $0x1a0] sm:$0xff]   ;;  %v22834_v0 = vld [vmem:[%s27431_s4 + $0x1b0] sm:$0xff]  }
0x105b   :  { %v23145_v5 = vpop.eup %23144 }
0x105c   :  { %vm6920_vm10 = vcmp.ge.f32.partialorder %v6916_v34, 0.0  ;;  %v6924_v16 = vmul.f32 0.01, %v6916_v34  ;;  %v6917_v21 = vmul.f32 %v23145_v5, %v6905_v3  ;;  %v6927_v46 = vsel %vm6919_vm9, %v6915_v56, %v6923_v60  ;;  %v22833_v56 = vld [vmem:[%s27431_s4 + $0x1a8] sm:$0xff]   ;;  %v22835_v3 = vld [vmem:[%s27431_s4 + $0x1b8] sm:$0xff]   ;;  %v22867_v60 = vld [vmem:[%s27432_s5] sm:$0xff]  }
0x105d   :  { %v23147_v43 = vpop.eup %23146  ;;  %v22836_v5 = vld [vmem:[%s27431_s4 + $0x200] sm:$0xff]  }
0x105e   :  { %v6928_v44 = vsel %vm6920_vm10, %v6916_v34, %v6924_v16  ;;  %v6925_v29 = vmul.f32 0.01, %v6917_v21  ;;  %v6918_v24 = vmul.f32 %v23147_v43, %v6906_v9  ;;  %vm6921_vm11 = vcmp.ge.f32.partialorder %v6917_v21, 0.0  ;;  %v22868_v34 = vld [vmem:[%s27432_s5 + $0x8] sm:$0xff]   ;;  %v22838_v16 = vld [vmem:[%s27431_s4 + $0x210] sm:$0xff]   ;;  %v22839_v43 = vld [vmem:[%s27431_s4 + $0x218] sm:$0xff]  }
0x105f   :  { %v25252_v18 = vpack.c.bf16 %v6928_v44, %v6927_v46  ;;  %v22837_v9 = vld [vmem:[%s27431_s4 + $0x208] sm:$0xff]   ;;  %v22874_v46 = vld [vmem:[%s27432_s5 + $0x18] sm:$0xff]   ;;  %v22840_v44 = vld [vmem:[%s27431_s4 + $0x220] sm:$0xff]  }
0x1060   :  { %vm6922_vm12 = vcmp.ge.f32.partialorder %v6918_v24, 0.0  ;;  %v6926_v42 = vmul.f32 0.01, %v6918_v24  ;;  %v6929_v58 = vsel %vm6921_vm11, %v6917_v21, %v6925_v29  ;;  %v22872_v21 = vld [vmem:[%s27432_s5 + $0x10] sm:$0xff]   ;;  %v22876_v29 = vld [vmem:[%s27432_s5 + $0x40] sm:$0xff]  }
0x1061   :  { %20580 = vmatprep.mubr.bf16.mxu0 %v25252_v18  ;;  %20600 = vmatprep.mubr.bf16.mxu1 %v25252_v18 }
0x1062   :  { %v6930_v30 = vsel %vm6922_vm12, %v6918_v24, %v6926_v42  ;;  %v22841_v24 = vld [vmem:[%s27431_s4 + $0x228] sm:$0xff]   ;;  %v22842_v42 = vld [vmem:[%s27431_s4 + $0x230] sm:$0xff]  }
0x1063   :  { %v25256_v2 = vpack.c.bf16 %v6930_v30, %v6929_v58  ;;  %v22843_v58 = vld [vmem:[%s27431_s4 + $0x238] sm:$0xff]   ;;  %v22844_v30 = vld [vmem:[%s27431_s4 + $0x240] sm:$0xff]  }
0x1065   :  { %20581 = vmatmul.mubr.bf16.vlgmr.msra.gmra.mrb[60].mxu0 %v25256_v2  ;;  %20601 = vmatmul.mubr.bf16.vlgmr.msra.gmra.mrb[84].mxu1 %v25256_v2 }
0x1066   :  { %20608 = vmatprep.mubr.msk.bf16.mxu1 %vm7201_vm13, %v22800_v15  ;;  %20620 = vmatprep.mubr.msk.bf16.mxu0 %vm7201_vm13, %v22867_v60  ;;  %v22845_v15 = vld [vmem:[%s27431_s4 + $0x248] sm:$0xff]  }
0x1138   :  { %v20582_v35 = vpop.f32.mrb[60].mxu0  ;;  %v20602_v7 = vpop.f32.mrb[84].mxu1 }
0x1139   :  { %v7031_v48 = vpop.f32.mrb[61].mxu0  ;;  %v7155_v19 = vpop.f32.mrb[85].mxu1 }
0x113a   :  { %v20583_v50 = vpop.f32.mrb[62].mxu0  ;;  %v20603_v51 = vpop.f32.mrb[86].mxu1 }
0x113b   :  { %v7047_v54 = vpack.c.bf16 %v20583_v50, %v20582_v35  ;;  %v7171_v55 = vpack.c.bf16 %v20603_v51, %v20602_v7  ;;  %v7034_v62 = vpop.f32.mrb[63].mxu0  ;;  %v7158_v1 = vpop.f32.mrb[87].mxu1  ;;  %v22846_v35 = vld [vmem:[%s27431_s4 + $0x250] sm:$0xff]   ;;  %v22847_v7 = vld [vmem:[%s27431_s4 + $0x258] sm:$0xff]  }
0x113c   :  { %v7046_v6 = vpack.c.bf16 %v7034_v62, %v7031_v48  ;;  %v7170_v31 = vpack.c.bf16 %v7158_v1, %v7155_v19  ;;  %v22848_v48 = vld [vmem:[%s27431_s4 + $0x260] sm:$0xff]   ;;  %v22849_v19 = vld [vmem:[%s27431_s4 + $0x268] sm:$0xff]   ;;  %v22850_v50 = vld [vmem:[%s27431_s4 + $0x270] sm:$0xff]  }
0x113d   :  { %v22851_v51 = vld [vmem:[%s27431_s4 + $0x278] sm:$0xff]   ;;  %v22854_v62 = vld [vmem:[%s27431_s4 + $0x290] sm:$0xff]  }
0x113e   :  { %20604 = vmatprep.subr.bf16.mxu1 %v7170_v31  ;;  %20616 = vmatprep.subr.bf16.mxu0 %v7046_v6  ;;  %v22855_v1 = vld [vmem:[%s27431_s4 + $0x298] sm:$0xff]  }
0x113f   :  { %20605 = vmatpush3.bf16.msra.mxu1 %v7170_v31  ;;  %20617 = vmatpush3.bf16.msra.mxu0 %v7046_v6  ;;  %v22856_v6 = vld [vmem:[%s27431_s4 + $0x2a0] sm:$0xff]   ;;  %v22857_v31 = vld [vmem:[%s27431_s4 + $0x2a8] sm:$0xff]  }
0x1140   :  { %20606 = vmatprep.subr.bf16.mxu1 %v7171_v55  ;;  %20618 = vmatprep.subr.bf16.mxu0 %v7047_v54 }
0x1143   :  { %20607 = vmatpush3.bf16.msra.mxu1 %v7171_v55  ;;  %20619 = vmatpush3.bf16.msra.mxu0 %v7047_v54  ;;  %v22852_v54 = vld [vmem:[%s27431_s4 + $0x280] sm:$0xff]   ;;  %v22853_v55 = vld [vmem:[%s27431_s4 + $0x288] sm:$0xff]  }
0x1144   :  { %20628 = vmatprep.subr.bf16.mxu1 %v22802_v40 }
0x1146   :  { %20609 = vmatmul.mubr.msk.bf16.vlgmr.msra.gmra.mrb[88].mxu1 %vm7201_vm13, %v22801_v12  ;;  %20621 = vmatmul.mubr.msk.bf16.vlgmr.msra.gmra.mrb[64].mxu0 %vm7201_vm13, %v22868_v34 }
0x1147   :  { %20629 = vmatpush3.bf16.msra.mxu1 %v22802_v40  ;;  %20612 = vmatprep.mubr.msk.bf16.mxu1 %vm7201_vm13, %v22804_v13  ;;  %v22858_v40 = vld [vmem:[%s27431_s4 + $0x2b0] sm:$0xff]  }
0x1148   :  { %20630 = vmatprep.subr.bf16.mxu1 %v22803_v17  ;;  %20624 = vmatprep.mubr.msk.bf16.mxu0 %vm7201_vm13, %v22872_v21  ;;  %v22883_v21 = vld [vmem:[%s27431_s4 + $0x378] sm:$0xff]  }
0x114b   :  { %20631 = vmatpush3.bf16.msra.mxu1 %v22803_v17 }
0x114c   :  { %20632 = vmatprep.subr.bf16.mxu1 %v22806_v63 }
0x114e   :  { %20613 = vmatmul.mubr.msk.bf16.gmra.mrb[92].mxu1 %vm7201_vm13, %v22805_v4  ;;  %20625 = vmatmul.mubr.msk.bf16.gmra.mrb[68].mxu0 %vm7201_vm13, %v22874_v46  ;;  %v22859_v4 = vld [vmem:[%s27431_s4 + $0x2b8] sm:$0xff]   ;;  %v22885_v46 = vld [vmem:[%s27431_s4 + $0x3c0] sm:$0xff]  }
0x114f   :  { %20633 = vmatpush3.bf16.msra.mxu1 %v22806_v63  ;;  %20644 = vmatprep.mubr.bf16.mxu1 %v25252_v18 }
0x1150   :  { %20634 = vmatprep.subr.bf16.mxu1 %v22807_v22  ;;  %20652 = vmatprep.mubr.msk.bf16.mxu0 %vm7201_vm13, %v22876_v29  ;;  %v22886_v29 = vld [vmem:[%s27432_s5 + $0x68] sm:$0xff]  }
0x1153   :  { %20635 = vmatpush3.bf16.msra.mxu1 %v22807_v22  ;;  %v22860_v22 = vld [vmem:[%s27431_s4 + $0x300] sm:$0xff]  }
0x1154   :  { %20636 = vmatprep.subr.bf16.mxu1 %v22808_v26 }
0x1157   :  { %20637 = vmatpush3.bf16.msra.mxu1 %v22808_v26 }
0x1158   :  { %20638 = vmatprep.subr.bf16.mxu1 %v22809_v49 }
0x115b   :  { %20639 = vmatpush3.bf16.msra.mxu1 %v22809_v49 }
0x115c   :  { %20640 = vmatprep.subr.bf16.mxu1 %v22810_v53 }
0x115f   :  { %20641 = vmatpush3.bf16.msra.mxu1 %v22810_v53 }
0x1160   :  { %20642 = vmatprep.subr.bf16.mxu1 %v22811_v20 }
0x1163   :  { %20643 = vmatpush3.bf16.msra.mxu1 %v22811_v20  ;;  %v22861_v20 = vld [vmem:[%s27431_s4 + $0x308] sm:$0xff]  }
0x1164   :  { %20660 = vmatprep.subr.bf16.mxu1 %v22812_v23 }
0x1166   :  { %20645 = vmatmul.mubr.bf16.vlgmr.msra.gmra.mrb[96].mxu1 %v25256_v2 }
0x1167   :  { %20661 = vmatpush3.bf16.msra.mxu1 %v22812_v23  ;;  %20676 = vmatprep.mubr.bf16.mxu1 %v25252_v18 }
0x1168   :  { %20662 = vmatprep.subr.bf16.mxu1 %v22813_v25 }
0x116b   :  { %20663 = vmatpush3.bf16.msra.mxu1 %v22813_v25  ;;  %v22862_v25 = vld [vmem:[%s27431_s4 + $0x310] sm:$0xff]  }
0x116c   :  { %20664 = vmatprep.subr.bf16.mxu1 %v22814_v57 }
0x116f   :  { %20665 = vmatpush3.bf16.msra.mxu1 %v22814_v57  ;;  %v22863_v57 = vld [vmem:[%s27431_s4 + $0x318] sm:$0xff]  }
0x1170   :  { %20666 = vmatprep.subr.bf16.mxu1 %v22815_v59 }
0x1173   :  { %20667 = vmatpush3.bf16.msra.mxu1 %v22815_v59  ;;  %v22864_v59 = vld [vmem:[%s27431_s4 + $0x320] sm:$0xff]  }
0x1174   :  { %20668 = vmatprep.subr.bf16.mxu1 %v22816_v27 }
0x1177   :  { %20669 = vmatpush3.bf16.msra.mxu1 %v22816_v27  ;;  %v22865_v27 = vld [vmem:[%s27431_s4 + $0x328] sm:$0xff]  }
0x1178   :  { %20670 = vmatprep.subr.bf16.mxu1 %v22817_v28 }
0x117b   :  { %20671 = vmatpush3.bf16.msra.mxu1 %v22817_v28  ;;  %v22866_v28 = vld [vmem:[%s27431_s4 + $0x330] sm:$0xff]  }
0x117c   :  { %20672 = vmatprep.subr.bf16.mxu1 %v22818_v32 }
0x117f   :  { %20673 = vmatpush3.bf16.msra.mxu1 %v22818_v32 }
0x1180   :  { %20674 = vmatprep.subr.bf16.mxu1 %v22819_v33 }
0x1183   :  { %20675 = vmatpush3.bf16.msra.mxu1 %v22819_v33 }
0x1184   :  { %20724 = vmatprep.subr.bf16.mxu1 %v22820_v45 }
0x1186   :  { %20677 = vmatmul.mubr.bf16.vlgmr.msra.gmra.mrb[100].mxu1 %v25256_v2 }
0x1187   :  { %20725 = vmatpush3.bf16.msra.mxu1 %v22820_v45  ;;  %20740 = vmatprep.mubr.bf16.mxu1 %v25252_v18 }
0x1188   :  { %20726 = vmatprep.subr.bf16.mxu1 %v22821_v47 }
0x118b   :  { %20727 = vmatpush3.bf16.msra.mxu1 %v22821_v47 }
0x118c   :  { %20728 = vmatprep.subr.bf16.mxu1 %v22822_v36 }
0x118f   :  { %20729 = vmatpush3.bf16.msra.mxu1 %v22822_v36 }
0x1190   :  { %20730 = vmatprep.subr.bf16.mxu1 %v22823_v37 }
0x1193   :  { %20731 = vmatpush3.bf16.msra.mxu1 %v22823_v37  ;;  %v22869_v37 = vld [vmem:[%s27431_s4 + $0x338] sm:$0xff]  }
0x1194   :  { %20732 = vmatprep.subr.bf16.mxu1 %v22824_v52 }
0x1197   :  { %20733 = vmatpush3.bf16.msra.mxu1 %v22824_v52 }
0x1198   :  { %20734 = vmatprep.subr.bf16.mxu1 %v22825_v61 }
0x119b   :  { %20735 = vmatpush3.bf16.msra.mxu1 %v22825_v61  ;;  %v22870_v61 = vld [vmem:[%s27431_s4 + $0x340] sm:$0xff]  }
0x119c   :  { %20736 = vmatprep.subr.bf16.mxu1 %v22826_v14 }
0x119f   :  { %20737 = vmatpush3.bf16.msra.mxu1 %v22826_v14  ;;  %v22871_v14 = vld [vmem:[%s27431_s4 + $0x348] sm:$0xff]  }
0x11a0   :  { %20738 = vmatprep.subr.bf16.mxu1 %v22827_v38 }
0x11a3   :  { %20739 = vmatpush3.bf16.msra.mxu1 %v22827_v38  ;;  %v22878_v38 = vld [vmem:[%s27432_s5 + $0x48] sm:$0xff]  }
0x11a4   :  { %20756 = vmatprep.subr.bf16.mxu1 %v22828_v39 }
0x11a6   :  { %20741 = vmatmul.mubr.bf16.vlgmr.msra.gmra.mrb[104].mxu1 %v25256_v2 }
0x11a7   :  { %20757 = vmatpush3.bf16.msra.mxu1 %v22828_v39  ;;  %20772 = vmatprep.mubr.bf16.mxu1 %v25252_v18  ;;  %v22880_v39 = vld [vmem:[%s27432_s5 + $0x50] sm:$0xff]  }
0x11a8   :  { %20758 = vmatprep.subr.bf16.mxu1 %v22829_v10 }
0x11ab   :  { %20759 = vmatpush3.bf16.msra.mxu1 %v22829_v10  ;;  %v22873_v10 = vld [vmem:[%s27431_s4 + $0x350] sm:$0xff]  }
0x11ac   :  { %20760 = vmatprep.subr.bf16.mxu1 %v22830_v41 }
0x11af   :  { %20761 = vmatpush3.bf16.msra.mxu1 %v22830_v41  ;;  %v22875_v41 = vld [vmem:[%s27431_s4 + $0x358] sm:$0xff]  }
0x11b0   :  { %20762 = vmatprep.subr.bf16.mxu1 %v22831_v8 }
0x11b3   :  { %20763 = vmatpush3.bf16.msra.mxu1 %v22831_v8  ;;  %v22882_v8 = vld [vmem:[%s27432_s5 + $0x58] sm:$0xff]  }
0x11b4   :  { %20764 = vmatprep.subr.bf16.mxu1 %v22832_v11 }
0x11b7   :  { %20765 = vmatpush3.bf16.msra.mxu1 %v22832_v11  ;;  %v22884_v11 = vld [vmem:[%s27432_s5 + $0x60] sm:$0xff]  }
0x11b8   :  { %20766 = vmatprep.subr.bf16.mxu1 %v22833_v56 }
0x11bb   :  { %20767 = vmatpush3.bf16.msra.mxu1 %v22833_v56  ;;  %v22877_v56 = vld [vmem:[%s27431_s4 + $0x360] sm:$0xff]  }
0x11bc   :  { %20768 = vmatprep.subr.bf16.mxu1 %v22834_v0 }
0x11bf   :  { %20769 = vmatpush3.bf16.msra.mxu1 %v22834_v0  ;;  %v22879_v0 = vld [vmem:[%s27431_s4 + $0x368] sm:$0xff]  }
0x11c0   :  { %20770 = vmatprep.subr.bf16.mxu1 %v22835_v3 }
0x11c3   :  { %20771 = vmatpush3.bf16.msra.mxu1 %v22835_v3  ;;  %v22881_v3 = vld [vmem:[%s27431_s4 + $0x370] sm:$0xff]  }
0x11c4   :  { %20820 = vmatprep.subr.bf16.mxu1 %v22836_v5 }
0x11c6   :  { %20773 = vmatmul.mubr.bf16.vlgmr.msra.gmra.mrb[108].mxu1 %v25256_v2 }
0x11c7   :  { %20821 = vmatpush3.bf16.msra.mxu1 %v22836_v5  ;;  %20836 = vmatprep.mubr.bf16.mxu1 %v25252_v18 }
0x11c8   :  { %20822 = vmatprep.subr.bf16.mxu1 %v22837_v9 }
0x11cb   :  { %20823 = vmatpush3.bf16.msra.mxu1 %v22837_v9 }
0x11cc   :  { %20824 = vmatprep.subr.bf16.mxu1 %v22838_v16 }
0x11cf   :  { %20825 = vmatpush3.bf16.msra.mxu1 %v22838_v16 }
0x11d0   :  { %20826 = vmatprep.subr.bf16.mxu1 %v22839_v43 }
0x11d3   :  { %20827 = vmatpush3.bf16.msra.mxu1 %v22839_v43 }
0x11d4   :  { %20828 = vmatprep.subr.bf16.mxu1 %v22840_v44 }
0x11d7   :  { %20829 = vmatpush3.bf16.msra.mxu1 %v22840_v44  ;;  %v22887_v44 = vld [vmem:[%s27431_s4 + $0x100] sm:$0xff]  }
0x11d8   :  { %20830 = vmatprep.subr.bf16.mxu1 %v22841_v24 }
0x11db   :  { %20831 = vmatpush3.bf16.msra.mxu1 %v22841_v24  ;;  %v22888_v24 = vld [vmem:[%s27431_s4 + $0x3c8] sm:$0xff]  }
0x11dc   :  { %20832 = vmatprep.subr.bf16.mxu1 %v22842_v42 }
0x11df   :  { %20833 = vmatpush3.bf16.msra.mxu1 %v22842_v42  ;;  %v22889_v42 = vld [vmem:[%s27431_s4 + $0x108] sm:$0xff]  }
0x11e0   :  { %20834 = vmatprep.subr.bf16.mxu1 %v22843_v58 }
0x11e3   :  { %20835 = vmatpush3.bf16.msra.mxu1 %v22843_v58  ;;  %v22890_v58 = vld [vmem:[%s27432_s5 + $0x70] sm:$0xff]  }
0x11e4   :  { %20852 = vmatprep.subr.bf16.mxu1 %v22844_v30 }
0x11e6   :  { %20837 = vmatmul.mubr.bf16.vlgmr.msra.gmra.mrb[112].mxu1 %v25256_v2 }
0x11e7   :  { %20853 = vmatpush3.bf16.msra.mxu1 %v22844_v30  ;;  %20868 = vmatprep.mubr.bf16.mxu1 %v25252_v18  ;;  %v22891_v30 = vld [vmem:[%s27431_s4 + $0x3d0] sm:$0xff]  }
0x11e8   :  { %20854 = vmatprep.subr.bf16.mxu1 %v22845_v15 }
0x11eb   :  { %20855 = vmatpush3.bf16.msra.mxu1 %v22845_v15  ;;  %v22893_v15 = vld [vmem:[%s27431_s4 + $0x110] sm:$0xff]  }
0x11ec   :  { %20856 = vmatprep.subr.bf16.mxu1 %v22846_v35 }
0x11ef   :  { %20857 = vmatpush3.bf16.msra.mxu1 %v22846_v35  ;;  %v22892_v35 = vld [vmem:[%s27432_s5 + $0x78] sm:$0xff]  }
0x11f0   :  { %20858 = vmatprep.subr.bf16.mxu1 %v22847_v7 }
0x11f3   :  { %20859 = vmatpush3.bf16.msra.mxu1 %v22847_v7  ;;  %v22894_v7 = vld [vmem:[%s27431_s4 + $0x3d8] sm:$0xff]  }
0x11f4   :  { %20860 = vmatprep.subr.bf16.mxu1 %v22848_v48 }
0x11f7   :  { %20861 = vmatpush3.bf16.msra.mxu1 %v22848_v48  ;;  %v22895_v48 = vld [vmem:[%s27431_s4 + $0x118] sm:$0xff]  }
0x11f8   :  { %20862 = vmatprep.subr.bf16.mxu1 %v22849_v19 }
0x11fb   :  { %20863 = vmatpush3.bf16.msra.mxu1 %v22849_v19  ;;  %v22896_v19 = vld [vmem:[%s27431_s4 + $0x3e0] sm:$0xff]  }
0x11fc   :  { %20864 = vmatprep.subr.bf16.mxu1 %v22850_v50 }
0x11ff   :  { %20865 = vmatpush3.bf16.msra.mxu1 %v22850_v50  ;;  %v22897_v50 = vld [vmem:[%s27431_s4 + $0x120] sm:$0xff]  }
0x1200   :  { %20866 = vmatprep.subr.bf16.mxu1 %v22851_v51 }
0x1203   :  { %20867 = vmatpush3.bf16.msra.mxu1 %v22851_v51  ;;  %v22898_v51 = vld [vmem:[%s27431_s4 + $0x3e8] sm:$0xff]  }
0x1204   :  { %20884 = vmatprep.subr.bf16.mxu1 %v22852_v54 }
0x1206   :  { %20869 = vmatmul.mubr.bf16.vlgmr.msra.gmra.mrb[116].mxu1 %v25256_v2 }
0x1207   :  { %20885 = vmatpush3.bf16.msra.mxu1 %v22852_v54  ;;  %20900 = vmatprep.mubr.bf16.mxu1 %v25252_v18  ;;  %v22899_v54 = vld [vmem:[%s27431_s4 + $0x128] sm:$0xff]  }
0x1208   :  { %20886 = vmatprep.subr.bf16.mxu1 %v22853_v55 }
0x120b   :  { %20887 = vmatpush3.bf16.msra.mxu1 %v22853_v55  ;;  %v22900_v55 = vld [vmem:[%s27431_s4 + $0x3f0] sm:$0xff]  }
0x120c   :  { %20888 = vmatprep.subr.bf16.mxu1 %v22854_v62 }
0x120f   :  { %20889 = vmatpush3.bf16.msra.mxu1 %v22854_v62 }
0x1210   :  { %20890 = vmatprep.subr.bf16.mxu1 %v22855_v1 }
0x1213   :  { %20891 = vmatpush3.bf16.msra.mxu1 %v22855_v1  ;;  %v22901_v1 = vld [vmem:[%s27431_s4 + $0x130] sm:$0xff]  }
0x1214   :  { %20892 = vmatprep.subr.bf16.mxu1 %v22856_v6 }
0x1217   :  { %20893 = vmatpush3.bf16.msra.mxu1 %v22856_v6 }
0x1218   :  { %20894 = vmatprep.subr.bf16.mxu1 %v22857_v31 }
0x1219   :  { %v25474_v12 = vpop.f32.mrb[88].mxu1 }
0x121a   :  { %v25476_v13 = vpop.f32.mrb[89].mxu1 }
0x121b   :  { %v25478_v17 = vpop.f32.mrb[90].mxu1  ;;  %20895 = vmatpush3.bf16.msra.mxu1 %v22857_v31 }
0x121c   :  { %v25480_v63 = vpop.f32.mrb[91].mxu1  ;;  %20896 = vmatprep.subr.bf16.mxu1 %v22858_v40 }
0x121f   :  { %20897 = vmatpush3.bf16.msra.mxu1 %v22858_v40 }
0x1220   :  { %20898 = vmatprep.subr.bf16.mxu1 %v22859_v4 }
0x1221   :  { %v25488_v26 = vpop.f32.mrb[92].mxu1 }
0x1222   :  { %v25490_v49 = vpop.f32.mrb[93].mxu1 }
0x1223   :  { %20899 = vmatpush3.bf16.msra.mxu1 %v22859_v4  ;;  %v25492_v53 = vpop.f32.mrb[94].mxu1 }
0x1224   :  { %20948 = vmatprep.subr.bf16.mxu1 %v22860_v22  ;;  %v25497_v23 = vpop.f32.mrb[95].mxu1 }
0x1226   :  { %20901 = vmatmul.mubr.bf16.vlgmr.msra.gmra.mrb[120].mxu1 %v25256_v2 }
0x1227   :  { %20949 = vmatpush3.bf16.msra.mxu1 %v22860_v22  ;;  %20964 = vmatprep.mubr.bf16.mxu1 %v25252_v18  ;;  %v22902_v22 = vld [vmem:[%s27431_s4 + $0x3f8] sm:$0xff]  }
0x1228   :  { %20950 = vmatprep.subr.bf16.mxu1 %v22861_v20 }
0x122b   :  { %20951 = vmatpush3.bf16.msra.mxu1 %v22861_v20 }
0x122c   :  { %20952 = vmatprep.subr.bf16.mxu1 %v22862_v25 }
0x122f   :  { %20953 = vmatpush3.bf16.msra.mxu1 %v22862_v25  ;;  %v22903_v25 = vld [vmem:[%s27431_s4 + $0x138] sm:$0xff]  }
0x1230   :  { %20954 = vmatprep.subr.bf16.mxu1 %v22863_v57 }
0x1233   :  { %20955 = vmatpush3.bf16.msra.mxu1 %v22863_v57 }
0x1234   :  { %20956 = vmatprep.subr.bf16.mxu1 %v22864_v59 }
0x1237   :  { %20957 = vmatpush3.bf16.msra.mxu1 %v22864_v59 }
0x1238   :  { %20958 = vmatprep.subr.bf16.mxu1 %v22865_v27 }
0x1239   :  { %v20646_v32 = vpop.f32.mrb[96].mxu1 }
0x123a   :  { %v7475_v33 = vpop.f32.mrb[97].mxu1 }
0x123b   :  { %v20647_v45 = vpop.f32.mrb[98].mxu1  ;;  %20959 = vmatpush3.bf16.msra.mxu1 %v22865_v27 }
0x123c   :  { %v7491_v47 = vpack.c.bf16 %v20647_v45, %v20646_v32  ;;  %v7478_v36 = vpop.f32.mrb[99].mxu1  ;;  %20960 = vmatprep.subr.bf16.mxu1 %v22866_v28 }
0x123d   :  { %v7490_v52 = vpack.c.bf16 %v7478_v36, %v7475_v33 }
0x123f   :  { %20648 = vmatprep.subr.bf16.mxu0 %v7490_v52  ;;  %20961 = vmatpush3.bf16.msra.mxu1 %v22866_v28 }
0x1240   :  { %20649 = vmatpush3.bf16.msra.mxu0 %v7490_v52  ;;  %20962 = vmatprep.subr.bf16.mxu1 %v22869_v37 }
0x1241   :  { %20650 = vmatprep.subr.bf16.mxu0 %v7491_v47 }
0x1243   :  { %20963 = vmatpush3.bf16.msra.mxu1 %v22869_v37 }
0x1244   :  { %20651 = vmatpush3.bf16.msra.mxu0 %v7491_v47  ;;  %20980 = vmatprep.subr.bf16.mxu1 %v22870_v61 }
0x1246   :  { %20965 = vmatmul.mubr.bf16.vlgmr.msra.gmra.mrb[124].mxu1 %v25256_v2 }
0x1247   :  { %20981 = vmatpush3.bf16.msra.mxu1 %v22870_v61  ;;  %20996 = vmatprep.mubr.bf16.mxu1 %v25252_v18 }
0x1248   :  { %20982 = vmatprep.subr.bf16.mxu1 %v22871_v14  ;;  %20653 = vmatmul.mubr.msk.bf16.vlgmr.msra.gmra.mrb[64].mxu0 %vm7201_vm13, %v22878_v38 }
0x1249   :  { %20656 = vmatprep.mubr.msk.bf16.mxu0 %vm7201_vm13, %v22880_v39 }
0x124b   :  { %20983 = vmatpush3.bf16.msra.mxu1 %v22871_v14 }
0x124c   :  { %20984 = vmatprep.subr.bf16.mxu1 %v22873_v10 }
0x124f   :  { %20985 = vmatpush3.bf16.msra.mxu1 %v22873_v10 }
0x1250   :  { %20986 = vmatprep.subr.bf16.mxu1 %v22875_v41  ;;  %20657 = vmatmul.mubr.msk.bf16.gmra.mrb[68].mxu0 %vm7201_vm13, %v22882_v8 }
0x1251   :  { %20684 = vmatprep.mubr.msk.bf16.mxu0 %vm7201_vm13, %v22884_v11  ;;  %v22904_v11 = vld [vmem:[%s27432_s5 + $0x80] sm:$0xff]  }
0x1253   :  { %20987 = vmatpush3.bf16.msra.mxu1 %v22875_v41 }
0x1254   :  { %20988 = vmatprep.subr.bf16.mxu1 %v22877_v56 }
0x1257   :  { %20989 = vmatpush3.bf16.msra.mxu1 %v22877_v56 }
0x1258   :  { %20990 = vmatprep.subr.bf16.mxu1 %v22879_v0 }
0x1259   :  { %v20678_v60 = vpop.f32.mrb[100].mxu1 }
0x125a   :  { %v7705_v34 = vpop.f32.mrb[101].mxu1 }
0x125b   :  { %v20679_v5 = vpop.f32.mrb[102].mxu1  ;;  %20991 = vmatpush3.bf16.msra.mxu1 %v22879_v0 }
0x125c   :  { %v7721_v9 = vpack.c.bf16 %v20679_v5, %v20678_v60  ;;  %v7708_v16 = vpop.f32.mrb[103].mxu1  ;;  %20992 = vmatprep.subr.bf16.mxu1 %v22881_v3 }
0x125d   :  { %v7720_v43 = vpack.c.bf16 %v7708_v16, %v7705_v34 }
0x125f   :  { %20680 = vmatprep.subr.bf16.mxu0 %v7720_v43  ;;  %20993 = vmatpush3.bf16.msra.mxu1 %v22881_v3 }
0x1260   :  { %20681 = vmatpush3.bf16.msra.mxu0 %v7720_v43  ;;  %20994 = vmatprep.subr.bf16.mxu1 %v22883_v21 }
0x1261   :  { %20682 = vmatprep.subr.bf16.mxu0 %v7721_v9 }
0x1263   :  { %20995 = vmatpush3.bf16.msra.mxu1 %v22883_v21 }
0x1264   :  { %20683 = vmatpush3.bf16.msra.mxu0 %v7721_v9  ;;  %21044 = vmatprep.subr.bf16.mxu1 %v22885_v46 }
0x1265   :  { %20692 = vmatprep.subr.bf16.mxu0 %v22887_v44 }
0x1266   :  { %20997 = vmatmul.mubr.bf16.vlgmr.msra.gmra.mrb[128].mxu1 %v25256_v2 }
0x1267   :  { %20685 = vmatmul.mubr.msk.bf16.vlgmr.msra.gmra.mrb[64].mxu0 %vm7201_vm13, %v22886_v29  ;;  %21045 = vmatpush3.bf16.msra.mxu1 %v22885_v46 }
0x1268   :  { %21060 = vmatprep.mubr.bf16.mxu1 %v25252_v18  ;;  %20693 = vmatpush3.bf16.msra.mxu0 %v22887_v44 }
0x1269   :  { %21046 = vmatprep.subr.bf16.mxu1 %v22888_v24  ;;  %20694 = vmatprep.subr.bf16.mxu0 %v22889_v42 }
0x126a   :  { %20688 = vmatprep.mubr.msk.bf16.mxu0 %vm7201_vm13, %v22890_v58 }
0x126b   :  { %21047 = vmatpush3.bf16.msra.mxu1 %v22888_v24 }
0x126c   :  { %20695 = vmatpush3.bf16.msra.mxu0 %v22889_v42  ;;  %21048 = vmatprep.subr.bf16.mxu1 %v22891_v30 }
0x126d   :  { %20696 = vmatprep.subr.bf16.mxu0 %v22893_v15 }
0x126f   :  { %20689 = vmatmul.mubr.msk.bf16.gmra.mrb[68].mxu0 %vm7201_vm13, %v22892_v35  ;;  %21049 = vmatpush3.bf16.msra.mxu1 %v22891_v30 }
0x1270   :  { %20697 = vmatpush3.bf16.msra.mxu0 %v22893_v15  ;;  %20708 = vmatprep.mubr.bf16.mxu0 %v25252_v18 }
0x1271   :  { %21050 = vmatprep.subr.bf16.mxu1 %v22894_v7  ;;  %20698 = vmatprep.subr.bf16.mxu0 %v22895_v48 }
0x1273   :  { %21051 = vmatpush3.bf16.msra.mxu1 %v22894_v7 }
0x1274   :  { %20699 = vmatpush3.bf16.msra.mxu0 %v22895_v48  ;;  %21052 = vmatprep.subr.bf16.mxu1 %v22896_v19 }
0x1275   :  { %20700 = vmatprep.subr.bf16.mxu0 %v22897_v50 }
0x1277   :  { %21053 = vmatpush3.bf16.msra.mxu1 %v22896_v19 }
0x1278   :  { %20701 = vmatpush3.bf16.msra.mxu0 %v22897_v50  ;;  %21054 = vmatprep.subr.bf16.mxu1 %v22898_v51 }
0x1279   :  { %v20742_v62 = vpop.f32.mrb[104].mxu1  ;;  %20702 = vmatprep.subr.bf16.mxu0 %v22899_v54 }
0x127a   :  { %v8165_v6 = vpop.f32.mrb[105].mxu1 }
0x127b   :  { %v20743_v31 = vpop.f32.mrb[106].mxu1  ;;  %21055 = vmatpush3.bf16.msra.mxu1 %v22898_v51 }
0x127c   :  { %v25618_v40 = vpack.c.bf16 %v20743_v31, %v20742_v62  ;;  %20703 = vmatpush3.bf16.msra.mxu0 %v22899_v54  ;;  %v8168_v4 = vpop.f32.mrb[107].mxu1  ;;  %21056 = vmatprep.subr.bf16.mxu1 %v22900_v55 }
0x127d   :  { %v25623_v20 = vpack.c.bf16 %v8168_v4, %v8165_v6  ;;  %20704 = vmatprep.subr.bf16.mxu0 %v22901_v1  ;;  %v22905_v4 = vld [vmem:[%s27432_s5 + $0x88] sm:$0xff]  }
0x127f   :  { %21057 = vmatpush3.bf16.msra.mxu1 %v22900_v55 }
0x1280   :  { %20705 = vmatpush3.bf16.msra.mxu0 %v22901_v1  ;;  %21058 = vmatprep.subr.bf16.mxu1 %v22902_v22 }
0x1281   :  { %20706 = vmatprep.subr.bf16.mxu0 %v22903_v25 }
0x1283   :  { %21059 = vmatpush3.bf16.msra.mxu1 %v22902_v22  ;;  %v22906_v22 = vld [vmem:[%s27432_s5 + $0x90] sm:$0xff]  }
0x1284   :  { %20707 = vmatpush3.bf16.msra.mxu0 %v22903_v25  ;;  %v22907_v25 = vld [vmem:[%s27432_s5 + $0x98] sm:$0xff]  }
0x1286   :  { %21061 = vmatmul.mubr.bf16.vlgmr.msra.gmra.mrb[132].mxu1 %v25256_v2 }
0x1287   :  { %20709 = vmatmul.mubr.bf16.vlgmr.msra.gmra.mrb[72].mxu0 %v25256_v2 }
0x1288   :  { %20716 = vmatprep.mubr.msk.bf16.mxu0 %vm7201_vm13, %v22904_v11  ;;  %v22924_v11 = vld [vmem:[%s27432_s5 + $0xe0] sm:$0xff]  }
0x1299   :  { %v20774_v57 = vpop.f32.mrb[108].mxu1 }
0x129a   :  { %v8395_v59 = vpop.f32.mrb[109].mxu1 }
0x129b   :  { %v20775_v27 = vpop.f32.mrb[110].mxu1 }
0x129c   :  { %v25630_v28 = vpack.c.bf16 %v20775_v27, %v20774_v57  ;;  %v8398_v32 = vpop.f32.mrb[111].mxu1  ;;  %v22908_v57 = vld [vmem:[%s27432_s5 + $0xa0] sm:$0xff]   ;;  %v22911_v27 = vld [vmem:[%s27432_s5 + $0xb8] sm:$0xff]  }
0x129d   :  { %v25632_v33 = vpack.c.bf16 %v8398_v32, %v8395_v59  ;;  %v22910_v59 = vld [vmem:[%s27432_s5 + $0xb0] sm:$0xff]   ;;  %v22912_v32 = vld [vmem:[%s27432_s5 + $0xc0] sm:$0xff]  }
0x12b9   :  { %v20838_v45 = vpop.f32.mrb[112].mxu1 }
0x12ba   :  { %v8855_v47 = vpop.f32.mrb[113].mxu1 }
0x12bb   :  { %v20839_v36 = vpop.f32.mrb[114].mxu1 }
0x12bc   :  { %v25634_v37 = vpack.c.bf16 %v20839_v36, %v20838_v45  ;;  %v8858_v52 = vpop.f32.mrb[115].mxu1  ;;  %v22916_v45 = vld [vmem:[%s27432_s5 + $0xd0] sm:$0xff]   ;;  %v22918_v36 = vld [vmem:[%s27432_s5 + $0xd8] sm:$0xff]  }
0x12bd   :  { %v25636_v61 = vpack.c.bf16 %v8858_v52, %v8855_v47  ;;  %v22917_v47 = vld [vmem:[%s27431_s4 + $0x1d0] sm:$0xff]   ;;  %v22919_v52 = vld [vmem:[%s27431_s4 + $0x1d8] sm:$0xff]  }
0x12d9   :  { %v20870_v14 = vpop.f32.mrb[116].mxu1 }
0x12da   :  { %v9085_v38 = vpop.f32.mrb[117].mxu1 }
0x12db   :  { %v20871_v39 = vpop.f32.mrb[118].mxu1 }
0x12dc   :  { %v25638_v10 = vpack.c.bf16 %v20871_v39, %v20870_v14  ;;  %v9088_v41 = vpop.f32.mrb[119].mxu1  ;;  %v22920_v14 = vld [vmem:[%s27431_s4 + $0x1e0] sm:$0xff]   ;;  %v22922_v39 = vld [vmem:[%s27431_s4 + $0x1f0] sm:$0xff]  }
0x12dd   :  { %v25640_v8 = vpack.c.bf16 %v9088_v41, %v9085_v38  ;;  %v22921_v38 = vld [vmem:[%s27431_s4 + $0x1e8] sm:$0xff]   ;;  %v22923_v41 = vld [vmem:[%s27431_s4 + $0x1f8] sm:$0xff]  }
0x12f9   :  { %v20902_v56 = vpop.f32.mrb[120].mxu1 }
0x12fa   :  { %v9315_v0 = vpop.f32.mrb[121].mxu1 }
0x12fb   :  { %v20903_v3 = vpop.f32.mrb[122].mxu1 }
0x12fc   :  { %v25646_v60 = vpack.c.bf16 %v20903_v3, %v20902_v56  ;;  %v9318_v34 = vpop.f32.mrb[123].mxu1 }
0x12fd   :  { %v25648_v5 = vpack.c.bf16 %v9318_v34, %v9315_v0 }
0x1319   :  { %v20966_v9 = vpop.f32.mrb[124].mxu1 }
0x131a   :  { %v9775_v16 = vpop.f32.mrb[125].mxu1 }
0x131b   :  { %v20967_v21 = vpop.f32.mrb[126].mxu1 }
0x131c   :  { %v25650_v43 = vpack.c.bf16 %v20967_v21, %v20966_v9  ;;  %v9778_v46 = vpop.f32.mrb[127].mxu1  ;;  %v22925_v21 = vld [vmem:[%s27432_s5 + $0xe8] sm:$0xff]  }
0x131d   :  { %v25652_v44 = vpack.c.bf16 %v9778_v46, %v9775_v16  ;;  %v22926_v46 = vld [vmem:[%s27432_s5 + $0xf0] sm:$0xff]  }
0x1339   :  { %v20998_v29 = vpop.f32.mrb[128].mxu1 }
0x133a   :  { %v10005_v24 = vpop.f32.mrb[129].mxu1 }
0x133b   :  { %v20999_v42 = vpop.f32.mrb[130].mxu1 }
0x133c   :  { %v25654_v58 = vpack.c.bf16 %v20999_v42, %v20998_v29  ;;  %v10008_v30 = vpop.f32.mrb[131].mxu1  ;;  %v22927_v29 = vld [vmem:[%s27432_s5 + $0xf8] sm:$0xff]   ;;  %v22930_v42 = vld [vmem:[%s27432_s5 + $0x110] sm:$0xff]  }
0x133d   :  { %v25656_v15 = vpack.c.bf16 %v10008_v30, %v10005_v24  ;;  %v22928_v24 = vld [vmem:[%s27432_s5 + $0x100] sm:$0xff]  }
0x133e   :  { %v22932_v30 = vld [vmem:[%s27432_s5 + $0x120] sm:$0xff]  }
0x1359   :  { %v21062_v35 = vpop.f32.mrb[132].mxu1 }
0x135a   :  { %v20710_v7 = vpop.f32.mrb[72].mxu0  ;;  %v10465_v48 = vpop.f32.mrb[133].mxu1 }
0x135b   :  { %v7935_v19 = vpop.f32.mrb[73].mxu0  ;;  %v21063_v50 = vpop.f32.mrb[134].mxu1 }
0x135c   :  { %v25658_v51 = vpack.c.bf16 %v21063_v50, %v21062_v35  ;;  %v20711_v54 = vpop.f32.mrb[74].mxu0  ;;  %v10468_v55 = vpop.f32.mrb[135].mxu1  ;;  %v22934_v35 = vld [vmem:[%s27432_s5 + $0x130] sm:$0xff]  }
0x135d   :  { %v7951_v62 = vpack.c.bf16 %v20711_v54, %v20710_v7  ;;  %v25660_v1 = vpack.c.bf16 %v10468_v55, %v10465_v48  ;;  %v7938_v6 = vpop.f32.mrb[75].mxu0  ;;  %v22935_v7 = vld [vmem:[%s27432_s5 + $0x138] sm:$0xff]   ;;  %v22936_v48 = vld [vmem:[%s27432_s5 + $0x140] sm:$0xff]   ;;  %v22941_v50 = vld [vmem:[%s27431_s4 + $0x2d0] sm:$0xff]  }
0x135e   :  { %v7950_v31 = vpack.c.bf16 %v7938_v6, %v7935_v19  ;;  %v22940_v19 = vld [vmem:[%s27432_s5 + $0x150] sm:$0xff]   ;;  %v22942_v54 = vld [vmem:[%s27432_s5 + $0x158] sm:$0xff]   ;;  %v22945_v6 = vld [vmem:[%s27431_s4 + $0x2e8] sm:$0xff]  }
0x135f   :  { %v22943_v55 = vld [vmem:[%s27431_s4 + $0x2d8] sm:$0xff]  }
0x1360   :  { %20712 = vmatprep.subr.bf16.mxu0 %v7950_v31 }
0x1361   :  { %20713 = vmatpush3.bf16.msra.mxu0 %v7950_v31  ;;  %v22946_v31 = vld [vmem:[%s27431_s4 + $0x2f0] sm:$0xff]  }
0x1362   :  { %20714 = vmatprep.subr.bf16.mxu0 %v7951_v62 }
0x1365   :  { %20715 = vmatpush3.bf16.msra.mxu0 %v7951_v62  ;;  %v22944_v62 = vld [vmem:[%s27431_s4 + $0x2e0] sm:$0xff]  }
0x1366   :  { %20744 = vmatprep.subr.bf16.mxu0 %v25623_v20 }
0x1368   :  { %20717 = vmatmul.mubr.msk.bf16.vlgmr.msra.gmra.mrb[64].mxu0 %vm7201_vm13, %v22905_v4  ;;  %v22947_v4 = vld [vmem:[%s27431_s4 + $0x2f8] sm:$0xff]  }
0x1369   :  { %20745 = vmatpush3.bf16.msra.mxu0 %v25623_v20  ;;  %20720 = vmatprep.mubr.msk.bf16.mxu0 %vm7201_vm13, %v22906_v22  ;;  %v22909_v20 = vld [vmem:[%s27432_s5 + $0xa8] sm:$0xff]   ;;  %v22948_v22 = vld [vmem:[%s27432_s5 + $0x160] sm:$0xff]  }
0x136a   :  { %20746 = vmatprep.subr.bf16.mxu0 %v25618_v40 }
0x136d   :  { %20747 = vmatpush3.bf16.msra.mxu0 %v25618_v40  ;;  %v22913_v40 = vld [vmem:[%s27431_s4 + $0x1c0] sm:$0xff]  }
0x136e   :  { %20776 = vmatprep.subr.bf16.mxu0 %v25632_v33 }
0x1370   :  { %20721 = vmatmul.mubr.msk.bf16.gmra.mrb[68].mxu0 %vm7201_vm13, %v22907_v25 }
0x1371   :  { %20748 = vmatprep.mubr.msk.bf16.mxu0 %vm7201_vm13, %v22908_v57 }
0x1378   :  { %20749 = vmatmul.mubr.msk.bf16.vlgmr.msra.gmra.mrb[64].mxu0 %vm7201_vm13, %v22909_v20 }
0x1379   :  { %20777 = vmatpush3.bf16.msra.mxu0 %v25632_v33  ;;  %20752 = vmatprep.mubr.msk.bf16.mxu0 %vm7201_vm13, %v22910_v59  ;;  %v22914_v33 = vld [vmem:[%s27432_s5 + $0xc8] sm:$0xff]  }
0x137a   :  { %20778 = vmatprep.subr.bf16.mxu0 %v25630_v28 }
0x137d   :  { %20779 = vmatpush3.bf16.msra.mxu0 %v25630_v28  ;;  %v22915_v28 = vld [vmem:[%s27431_s4 + $0x1c8] sm:$0xff]  }
0x137e   :  { %20788 = vmatprep.subr.bf16.mxu0 %v22913_v40 }
0x1380   :  { %20753 = vmatmul.mubr.msk.bf16.gmra.mrb[68].mxu0 %vm7201_vm13, %v22911_v27 }
0x1381   :  { %20780 = vmatprep.mubr.msk.bf16.mxu0 %vm7201_vm13, %v22912_v32  ;;  %v22949_v32 = vld [vmem:[%s27432_s5 + $0x168] sm:$0xff]  }
0x1388   :  { %20781 = vmatmul.mubr.msk.bf16.vlgmr.msra.gmra.mrb[64].mxu0 %vm7201_vm13, %v22914_v33  ;;  %v22950_v33 = vld [vmem:[%s27432_s5 + $0x170] sm:$0xff]  }
0x1389   :  { %20789 = vmatpush3.bf16.msra.mxu0 %v22913_v40  ;;  %20784 = vmatprep.mubr.msk.bf16.mxu0 %vm7201_vm13, %v22916_v45  ;;  %v22951_v45 = vld [vmem:[%s27432_s5 + $0x178] sm:$0xff]  }
0x138a   :  { %20790 = vmatprep.subr.bf16.mxu0 %v22915_v28 }
0x138d   :  { %20791 = vmatpush3.bf16.msra.mxu0 %v22915_v28  ;;  %v22952_v28 = vld [vmem:[%s27432_s5 + $0x180] sm:$0xff]  }
0x138e   :  { %20792 = vmatprep.subr.bf16.mxu0 %v22917_v47 }
0x1390   :  { %20785 = vmatmul.mubr.msk.bf16.gmra.mrb[68].mxu0 %vm7201_vm13, %v22918_v36  ;;  %v22955_v36 = vld [vmem:[%s27432_s5 + $0x198] sm:$0xff]  }
0x1391   :  { %20793 = vmatpush3.bf16.msra.mxu0 %v22917_v47  ;;  %20804 = vmatprep.mubr.bf16.mxu0 %v25252_v18  ;;  %v22954_v47 = vld [vmem:[%s27432_s5 + $0x190] sm:$0xff]  }
0x1392   :  { %20794 = vmatprep.subr.bf16.mxu0 %v22919_v52 }
0x1395   :  { %20795 = vmatpush3.bf16.msra.mxu0 %v22919_v52  ;;  %v22956_v52 = vld [vmem:[%s27432_s5 + $0x1a0] sm:$0xff]  }
0x1396   :  { %20796 = vmatprep.subr.bf16.mxu0 %v22920_v14 }
0x1399   :  { %20797 = vmatpush3.bf16.msra.mxu0 %v22920_v14  ;;  %v22960_v14 = vld [vmem:[%s27432_s5 + $0x1b0] sm:$0xff]  }
0x139a   :  { %20798 = vmatprep.subr.bf16.mxu0 %v22921_v38 }
0x139d   :  { %20799 = vmatpush3.bf16.msra.mxu0 %v22921_v38  ;;  %v22961_v38 = vld [vmem:[%s27431_s4 + $0x390] sm:$0xff]  }
0x139e   :  { %20800 = vmatprep.subr.bf16.mxu0 %v22922_v39 }
0x13a1   :  { %20801 = vmatpush3.bf16.msra.mxu0 %v22922_v39  ;;  %v22962_v39 = vld [vmem:[%s27432_s5 + $0x1b8] sm:$0xff]  }
0x13a2   :  { %20802 = vmatprep.subr.bf16.mxu0 %v22923_v41 }
0x13a5   :  { %20803 = vmatpush3.bf16.msra.mxu0 %v22923_v41  ;;  %v22963_v41 = vld [vmem:[%s27431_s4 + $0x398] sm:$0xff]  }
0x13a8   :  { %20805 = vmatmul.mubr.bf16.vlgmr.msra.gmra.mrb[76].mxu0 %v25256_v2 }
0x13a9   :  { %20812 = vmatprep.mubr.msk.bf16.mxu0 %vm7201_vm13, %v22924_v11  ;;  %v22964_v11 = vld [vmem:[%s27431_s4 + $0x3a0] sm:$0xff]  }
0x147b   :  { %v20806_v56 = vpop.f32.mrb[76].mxu0 }
0x147c   :  { %v8625_v0 = vpop.f32.mrb[77].mxu0 }
0x147d   :  { %v20807_v3 = vpop.f32.mrb[78].mxu0 }
0x147e   :  { %v8641_v34 = vpack.c.bf16 %v20807_v3, %v20806_v56  ;;  %v8628_v9 = vpop.f32.mrb[79].mxu0  ;;  %v22965_v56 = vld [vmem:[%s27431_s4 + $0x3a8] sm:$0xff]   ;;  %v22968_v3 = vld [vmem:[%s27432_s5 + $0x1c0] sm:$0xff]  }
0x147f   :  { %v8640_v16 = vpack.c.bf16 %v8628_v9, %v8625_v0  ;;  %v22966_v0 = vld [vmem:[%s27431_s4 + $0x3b0] sm:$0xff]  }
0x1481   :  { %20808 = vmatprep.subr.bf16.mxu0 %v8640_v16 }
0x1482   :  { %20809 = vmatpush3.bf16.msra.mxu0 %v8640_v16 }
0x1483   :  { %20810 = vmatprep.subr.bf16.mxu0 %v8641_v34 }
0x1486   :  { %20811 = vmatpush3.bf16.msra.mxu0 %v8641_v34 }
0x1487   :  { %20840 = vmatprep.subr.bf16.mxu0 %v25636_v61 }
0x1489   :  { %20813 = vmatmul.mubr.msk.bf16.vlgmr.msra.gmra.mrb[64].mxu0 %vm7201_vm13, %v22925_v21 }
0x148a   :  { %20841 = vmatpush3.bf16.msra.mxu0 %v25636_v61  ;;  %20816 = vmatprep.mubr.msk.bf16.mxu0 %vm7201_vm13, %v22926_v46  ;;  %v22929_v61 = vld [vmem:[%s27432_s5 + $0x108] sm:$0xff]  }
0x148b   :  { %20842 = vmatprep.subr.bf16.mxu0 %v25634_v37 }
0x148e   :  { %20843 = vmatpush3.bf16.msra.mxu0 %v25634_v37  ;;  %v22931_v37 = vld [vmem:[%s27432_s5 + $0x118] sm:$0xff]  }
0x148f   :  { %20872 = vmatprep.subr.bf16.mxu0 %v25640_v8 }
0x1491   :  { %20817 = vmatmul.mubr.msk.bf16.gmra.mrb[68].mxu0 %vm7201_vm13, %v22927_v29 }
0x1492   :  { %20844 = vmatprep.mubr.msk.bf16.mxu0 %vm7201_vm13, %v22928_v24  ;;  %v22969_v24 = vld [vmem:[%s27432_s5 + $0x1c8] sm:$0xff]  }
0x1499   :  { %20845 = vmatmul.mubr.msk.bf16.vlgmr.msra.gmra.mrb[64].mxu0 %vm7201_vm13, %v22929_v61  ;;  %v22971_v61 = vld [vmem:[%s27432_s5 + $0x1d8] sm:$0xff]  }
0x149a   :  { %20873 = vmatpush3.bf16.msra.mxu0 %v25640_v8  ;;  %20848 = vmatprep.mubr.msk.bf16.mxu0 %vm7201_vm13, %v22930_v42  ;;  %v22933_v8 = vld [vmem:[%s27432_s5 + $0x128] sm:$0xff]   ;;  %v22972_v42 = vld [vmem:[%s27432_s5 + $0x1e0] sm:$0xff]  }
0x149b   :  { %20874 = vmatprep.subr.bf16.mxu0 %v25638_v10 }
0x149e   :  { %20875 = vmatpush3.bf16.msra.mxu0 %v25638_v10  ;;  %v22937_v10 = vld [vmem:[%s27431_s4 + $0x2c0] sm:$0xff]  }
0x149f   :  { %20904 = vmatprep.subr.bf16.mxu0 %v25648_v5 }
0x14a1   :  { %20849 = vmatmul.mubr.msk.bf16.gmra.mrb[68].mxu0 %vm7201_vm13, %v22931_v37  ;;  %v22974_v37 = vld [vmem:[%s27432_s5 + $0x1f0] sm:$0xff]  }
0x14a2   :  { %20876 = vmatprep.mubr.msk.bf16.mxu0 %vm7201_vm13, %v22932_v30 }
0x14a9   :  { %20877 = vmatmul.mubr.msk.bf16.vlgmr.msra.gmra.mrb[64].mxu0 %vm7201_vm13, %v22933_v8 }
0x14aa   :  { %20905 = vmatpush3.bf16.msra.mxu0 %v25648_v5  ;;  %20880 = vmatprep.mubr.msk.bf16.mxu0 %vm7201_vm13, %v22934_v35  ;;  %v22938_v5 = vld [vmem:[%s27432_s5 + $0x148] sm:$0xff]  }
0x14ab   :  { %20906 = vmatprep.subr.bf16.mxu0 %v25646_v60 }
0x14ae   :  { %20907 = vmatpush3.bf16.msra.mxu0 %v25646_v60  ;;  %v22939_v60 = vld [vmem:[%s27431_s4 + $0x2c8] sm:$0xff]  }
0x14af   :  { %20916 = vmatprep.subr.bf16.mxu0 %v22937_v10 }
0x14b1   :  { %20881 = vmatmul.mubr.msk.bf16.gmra.mrb[68].mxu0 %vm7201_vm13, %v22935_v7 }
0x14b2   :  { %20908 = vmatprep.mubr.msk.bf16.mxu0 %vm7201_vm13, %v22936_v48 }
0x14b9   :  { %20909 = vmatmul.mubr.msk.bf16.vlgmr.msra.gmra.mrb[64].mxu0 %vm7201_vm13, %v22938_v5 }
0x14ba   :  { %20917 = vmatpush3.bf16.msra.mxu0 %v22937_v10  ;;  %20912 = vmatprep.mubr.msk.bf16.mxu0 %vm7201_vm13, %v22940_v19 }
0x14bb   :  { %20918 = vmatprep.subr.bf16.mxu0 %v22939_v60 }
0x14be   :  { %20919 = vmatpush3.bf16.msra.mxu0 %v22939_v60 }
0x14bf   :  { %20920 = vmatprep.subr.bf16.mxu0 %v22941_v50 }
0x14c1   :  { %20913 = vmatmul.mubr.msk.bf16.gmra.mrb[68].mxu0 %vm7201_vm13, %v22942_v54 }
0x14c2   :  { %20921 = vmatpush3.bf16.msra.mxu0 %v22941_v50  ;;  %20932 = vmatprep.mubr.bf16.mxu0 %v25252_v18 }
0x14c3   :  { %20922 = vmatprep.subr.bf16.mxu0 %v22943_v55 }
0x14c6   :  { %20923 = vmatpush3.bf16.msra.mxu0 %v22943_v55 }
0x14c7   :  { %20924 = vmatprep.subr.bf16.mxu0 %v22944_v62 }
0x14ca   :  { %20925 = vmatpush3.bf16.msra.mxu0 %v22944_v62 }
0x14cb   :  { %20926 = vmatprep.subr.bf16.mxu0 %v22945_v6 }
0x14ce   :  { %20927 = vmatpush3.bf16.msra.mxu0 %v22945_v6 }
0x14cf   :  { %20928 = vmatprep.subr.bf16.mxu0 %v22946_v31 }
0x14d2   :  { %20929 = vmatpush3.bf16.msra.mxu0 %v22946_v31 }
0x14d3   :  { %20930 = vmatprep.subr.bf16.mxu0 %v22947_v4 }
0x14d6   :  { %20931 = vmatpush3.bf16.msra.mxu0 %v22947_v4 }
0x14d9   :  { %20933 = vmatmul.mubr.bf16.vlgmr.msra.gmra.mrb[80].mxu0 %v25256_v2 }
0x14da   :  { %20940 = vmatprep.mubr.msk.bf16.mxu0 %vm7201_vm13, %v22948_v22 }
0x15ac   :  { %v20934_v25 = vpop.f32.mrb[80].mxu0 }
0x15ad   :  { %v9545_v57 = vpop.f32.mrb[81].mxu0 }
0x15ae   :  { %v20935_v20 = vpop.f32.mrb[82].mxu0 }
0x15af   :  { %v9561_v59 = vpack.c.bf16 %v20935_v20, %v20934_v25  ;;  %v9548_v40 = vpop.f32.mrb[83].mxu0 }
0x15b0   :  { %v9560_v27 = vpack.c.bf16 %v9548_v40, %v9545_v57 }
0x15b2   :  { %20936 = vmatprep.subr.bf16.mxu0 %v9560_v27 }
0x15b3   :  { %20937 = vmatpush3.bf16.msra.mxu0 %v9560_v27 }
0x15b4   :  { %20938 = vmatprep.subr.bf16.mxu0 %v9561_v59 }
0x15b7   :  { %20939 = vmatpush3.bf16.msra.mxu0 %v9561_v59 }
0x15b8   :  { %20968 = vmatprep.subr.bf16.mxu0 %v25652_v44 }
0x15ba   :  { %20941 = vmatmul.mubr.msk.bf16.vlgmr.msra.gmra.mrb[64].mxu0 %vm7201_vm13, %v22949_v32 }
0x15bb   :  { %20969 = vmatpush3.bf16.msra.mxu0 %v25652_v44  ;;  %20944 = vmatprep.mubr.msk.bf16.mxu0 %vm7201_vm13, %v22950_v33  ;;  %v22953_v44 = vld [vmem:[%s27432_s5 + $0x188] sm:$0xff]  }
0x15bc   :  { %20970 = vmatprep.subr.bf16.mxu0 %v25650_v43 }
0x15bf   :  { %20971 = vmatpush3.bf16.msra.mxu0 %v25650_v43  ;;  %v22957_v43 = vld [vmem:[%s27431_s4 + $0x380] sm:$0xff]  }
0x15c0   :  { %21000 = vmatprep.subr.bf16.mxu0 %v25656_v15 }
0x15c2   :  { %20945 = vmatmul.mubr.msk.bf16.gmra.mrb[68].mxu0 %vm7201_vm13, %v22951_v45 }
0x15c3   :  { %20972 = vmatprep.mubr.msk.bf16.mxu0 %vm7201_vm13, %v22952_v28 }
0x15ca   :  { %20973 = vmatmul.mubr.msk.bf16.vlgmr.msra.gmra.mrb[64].mxu0 %vm7201_vm13, %v22953_v44 }
0x15cb   :  { %21001 = vmatpush3.bf16.msra.mxu0 %v25656_v15  ;;  %20976 = vmatprep.mubr.msk.bf16.mxu0 %vm7201_vm13, %v22954_v47  ;;  %v22958_v15 = vld [vmem:[%s27432_s5 + $0x1a8] sm:$0xff]  }
0x15cc   :  { %21002 = vmatprep.subr.bf16.mxu0 %v25654_v58 }
0x15cf   :  { %21003 = vmatpush3.bf16.msra.mxu0 %v25654_v58  ;;  %v22959_v58 = vld [vmem:[%s27431_s4 + $0x388] sm:$0xff]  }
0x15d0   :  { %21012 = vmatprep.subr.bf16.mxu0 %v22957_v43 }
0x15d2   :  { %20977 = vmatmul.mubr.msk.bf16.gmra.mrb[68].mxu0 %vm7201_vm13, %v22955_v36 }
0x15d3   :  { %21004 = vmatprep.mubr.msk.bf16.mxu0 %vm7201_vm13, %v22956_v52 }
0x15da   :  { %21005 = vmatmul.mubr.msk.bf16.vlgmr.msra.gmra.mrb[64].mxu0 %vm7201_vm13, %v22958_v15  ;;  %v22976_v15 = vld [vmem:[%s27433_s6] sm:$0xff]  }
0x15db   :  { %21013 = vmatpush3.bf16.msra.mxu0 %v22957_v43  ;;  %21008 = vmatprep.mubr.msk.bf16.mxu0 %vm7201_vm13, %v22960_v14  ;;  %v22977_v14 = vld [vmem:[%s27433_s6 + $0x8] sm:$0xff]  }
0x15dc   :  { %21014 = vmatprep.subr.bf16.mxu0 %v22959_v58  ;;  %21076 = vmatprep.subr.bf16.mxu1 %v22976_v15 }
0x15dd   :  { %21077 = vmatpush3.bf16.msra.mxu1 %v22976_v15 }
0x15de   :  { %21078 = vmatprep.subr.bf16.mxu1 %v22977_v14 }
0x15df   :  { %21015 = vmatpush3.bf16.msra.mxu0 %v22959_v58  ;;  %v26033_v58 = vld [vmem:[%s27433_s6 + $0x10] sm:$0xff]  }
0x15e0   :  { %21016 = vmatprep.subr.bf16.mxu0 %v22961_v38 }
0x15e1   :  { %21079 = vmatpush3.bf16.msra.mxu1 %v22977_v14 }
0x15e2   :  { %21009 = vmatmul.mubr.msk.bf16.gmra.mrb[68].mxu0 %vm7201_vm13, %v22962_v39  ;;  %21088 = vmatprep.subr.bf16.mxu1 %v26033_v58 }
0x15e3   :  { %21017 = vmatpush3.bf16.msra.mxu0 %v22961_v38  ;;  %21028 = vmatprep.mubr.bf16.mxu0 %v25252_v18  ;;  %v22967_v18 = vld [vmem:[%s27431_s4 + $0x3b8] sm:$0xff]   ;;  %s23227_s4 = smov [#allocation3]  }
0x15e4   :  { %21018 = vmatprep.subr.bf16.mxu0 %v22963_v41  ;;  %s16182_s25 = sshll.u32 %s23227_s4, 4  ;;  %s16183_s25 = int_to_ptr.vmem [resolvable:$true] %s16182_s25 }
0x15e5   :  { %p23205_p1 = scmp.lt.s32.totalorder %s16183_s25, %s16183_s25 }
0x15e7   :  { %21019 = vmatpush3.bf16.msra.mxu0 %v22963_v41 }
0x15e8   :  { %21020 = vmatprep.subr.bf16.mxu0 %v22964_v11 }
0x15eb   :  { %21021 = vmatpush3.bf16.msra.mxu0 %v22964_v11 }
0x15ec   :  { %21022 = vmatprep.subr.bf16.mxu0 %v22965_v56 }
0x15ef   :  { %21023 = vmatpush3.bf16.msra.mxu0 %v22965_v56 }
0x15f0   :  { %21024 = vmatprep.subr.bf16.mxu0 %v22966_v0 }
0x15f3   :  { %21025 = vmatpush3.bf16.msra.mxu0 %v22966_v0 }
0x15f4   :  { %21026 = vmatprep.subr.bf16.mxu0 %v22967_v18 }
0x15f7   :  { %21027 = vmatpush3.bf16.msra.mxu0 %v22967_v18 }
0x15fa   :  { %21029 = vmatmul.mubr.bf16.vlgmr.msra.gmra.mrb[84].mxu0 %v25256_v2  ;;  %v22970_v2 = vld [vmem:[%s27432_s5 + $0x1d0] sm:$0xff]  }
0x15fb   :  { %21036 = vmatprep.mubr.msk.bf16.mxu0 %vm7201_vm13, %v22968_v3 }
0x16cd   :  { %v21030_v34 = vpop.f32.mrb[84].mxu0 }
0x16ce   :  { %v10235_v9 = vpop.f32.mrb[85].mxu0 }
0x16cf   :  { %v21031_v16 = vpop.f32.mrb[86].mxu0 }
0x16d0   :  { %v10251_v21 = vpack.c.bf16 %v21031_v16, %v21030_v34  ;;  %v10238_v46 = vpop.f32.mrb[87].mxu0 }
0x16d1   :  { %v10250_v29 = vpack.c.bf16 %v10238_v46, %v10235_v9 }
0x16d3   :  { %21032 = vmatprep.subr.bf16.mxu0 %v10250_v29 }
0x16d4   :  { %21033 = vmatpush3.bf16.msra.mxu0 %v10250_v29 }
0x16d5   :  { %21034 = vmatprep.subr.bf16.mxu0 %v10251_v21 }
0x16d8   :  { %21035 = vmatpush3.bf16.msra.mxu0 %v10251_v21 }
0x16d9   :  { %21064 = vmatprep.subr.bf16.mxu0 %v25660_v1 }
0x16db   :  { %21037 = vmatmul.mubr.msk.bf16.vlgmr.msra.gmra.mrb[64].mxu0 %vm7201_vm13, %v22969_v24 }
0x16dc   :  { %21065 = vmatpush3.bf16.msra.mxu0 %v25660_v1  ;;  %21040 = vmatprep.mubr.msk.bf16.mxu0 %vm7201_vm13, %v22970_v2  ;;  %v22973_v1 = vld [vmem:[%s27432_s5 + $0x1e8] sm:$0xff]  }
0x16dd   :  { %21066 = vmatprep.subr.bf16.mxu0 %v25658_v51 }
0x16e0   :  { %21067 = vmatpush3.bf16.msra.mxu0 %v25658_v51  ;;  %v22975_v51 = vld [vmem:[%s27432_s5 + $0x1f8] sm:$0xff]  }
0x16e3   :  { %21041 = vmatmul.mubr.msk.bf16.gmra.mrb[68].mxu0 %vm7201_vm13, %v22971_v61 }
0x16e4   :  { %21068 = vmatprep.mubr.msk.bf16.mxu0 %vm7201_vm13, %v22972_v42 }
0x16eb   :  { %21069 = vmatmul.mubr.msk.bf16.vlgmr.msra.gmra.mrb[64].mxu0 %vm7201_vm13, %v22973_v1 }
0x16ec   :  { %21072 = vmatprep.mubr.msk.bf16.mxu0 %vm7201_vm13, %v22974_v37 }
0x16f3   :  { %21073 = vmatmul.mubr.msk.bf16.gmra.mrb[68].mxu0 %vm7201_vm13, %v22975_v51 }
0x17be   :  { %v21070_v30 = vpop.f32.mrb[64].mxu0 }
0x17bf   :  { %v25961_v8 = vadd.f32 %v21070_v30, %v25474_v12  ;;  %v10557_v35 = vpop.f32.mrb[65].mxu0 }
0x17c0   :  { %v25964_v10 = vadd.f32 %v10557_v35, %v25476_v13  ;;  %v21071_v7 = vpop.f32.mrb[66].mxu0 }
0x17c1   :  { %v25967_v48 = vadd.f32 %v21071_v7, %v25478_v17  ;;  %v10560_v5 = vpop.f32.mrb[67].mxu0  ;;  %v10602_v19 = vsel %vm7201_vm13, %v25961_v8, 0.0  ;;  %v10622_v50 = vmul.f32 %v25961_v8, %v25961_v8 }
0x17c2   :  { %v25972_v60 = vadd.f32 %v10560_v5, %v25480_v63  ;;  %10603 = vadd.xlane.f32.xlu0 %v10602_v19  ;;  %v10596_v13 = vsel %vm7201_vm13, %v25964_v10, 0.0 }
0x17c3   :  { %v10605_v12 = vsel %vm7201_vm13, %v25967_v48, 0.0  ;;  %v10623_v62 = vmul.f32 %v25967_v48, %v25967_v48  ;;  %v10634_v25 = vsel %vm7201_vm13, %v10622_v50, 0.0 }
0x17c4   :  { %10606 = vadd.xlane.f32.xlu1 %v10605_v12  ;;  %v10599_v63 = vsel %vm7201_vm13, %v25972_v60, 0.0 }
0x17c5   :  { %v10637_v20 = vsel %vm7201_vm13, %v10623_v62, 0.0 }
0x17c6   :  { %10597 = vadd.xlane.f32.xlu0 %v10596_v13  ;;  %v21074_v17 = vpop.f32.mrb[68].mxu0 }
0x17c7   :  { %v25981_v54 = vadd.f32 %v21074_v17, %v25488_v26  ;;  %v10573_v55 = vpop.f32.mrb[69].mxu0  ;;  %v10620_v26 = vmul.f32 %v25964_v10, %v25964_v10 }
0x17c8   :  { %v25988_v6 = vadd.f32 %v10573_v55, %v25490_v49  ;;  %10600 = vadd.xlane.f32.xlu1 %v10599_v63  ;;  %v21075_v31 = vpop.f32.mrb[70].mxu0  ;;  %v10621_v49 = vmul.f32 %v25972_v60, %v25972_v60 }
0x17c9   :  { %v25991_v4 = vadd.f32 %v21075_v31, %v25492_v53  ;;  %v10576_v22 = vpop.f32.mrb[71].mxu0  ;;  %v10628_v59 = vsel %vm7201_vm13, %v10620_v26, 0.0  ;;  %v10614_v40 = vsel %vm7201_vm13, %v25981_v54, 0.0  ;;  %v10626_v44 = vmul.f32 %v25981_v54, %v25981_v54 }
0x17ca   :  { %v25997_v57 = vadd.f32 %v10576_v22, %v25497_v23  ;;  %10635 = vadd.xlane.f32.xlu0 %v10634_v25  ;;  %v10631_v53 = vsel %vm7201_vm13, %v10621_v49, 0.0  ;;  %v10608_v27 = vsel %vm7201_vm13, %v25988_v6, 0.0  ;;  %v10624_v32 = vmul.f32 %v25988_v6, %v25988_v6 }
0x17cb   :  { %v10617_v23 = vsel %vm7201_vm13, %v25991_v4, 0.0  ;;  %v10627_v43 = vmul.f32 %v25991_v4, %v25991_v4  ;;  %v10646_v36 = vsel %vm7201_vm13, %v10626_v44, 0.0 }
0x17cc   :  { %10638 = vadd.xlane.f32.xlu1 %v10637_v20  ;;  %v10611_v33 = vsel %vm7201_vm13, %v25997_v57, 0.0  ;;  %v10625_v45 = vmul.f32 %v25997_v57, %v25997_v57  ;;  %v10640_v28 = vsel %vm7201_vm13, %v10624_v32, 0.0 }
0x17cd   :  { %v10649_v52 = vsel %vm7201_vm13, %v10627_v43, 0.0 }
0x17ce   :  { %10629 = vadd.xlane.f32.xlu0 %v10628_v59  ;;  %v10643_v47 = vsel %vm7201_vm13, %v10625_v45, 0.0 }
0x17d0   :  { %10632 = vadd.xlane.f32.xlu1 %v10631_v53 }
0x17d2   :  { %10615 = vadd.xlane.f32.xlu0 %v10614_v40 }
0x17d4   :  { %10618 = vadd.xlane.f32.xlu1 %v10617_v23 }
0x17d6   :  { %10609 = vadd.xlane.f32.xlu0 %v10608_v27 }
0x17d8   :  { %10612 = vadd.xlane.f32.xlu1 %v10611_v33 }
0x17da   :  { %10641 = vadd.xlane.f32.xlu0 %v10640_v28 }
0x17dc   :  { %10644 = vadd.xlane.f32.xlu1 %v10643_v47 }
0x17de   :  { %10647 = vadd.xlane.f32.xlu0 %v10646_v36 }
0x17e0   :  { %10650 = vadd.xlane.f32.xlu1 %v10649_v52 }
0x184f   :  { %v10604_v38 = vpop.xlane.xlu0 %10603 }
0x1850   :  { %v10654_v11 = vmul.f32 0.03125, %v10604_v38 }
0x1851   :  { %v10607_v39 = vpop.xlane.xlu1 %10606 }
0x1852   :  { %v10655_v0 = vmul.f32 0.03125, %v10607_v39  ;;  %v10670_v3 = vmul.f32 %v10654_v11, %v10654_v11  ;;  %v10694_v44 = vsub.f32 %v25961_v8, %v10654_v11 }
0x1853   :  { %v10598_v41 = vpop.xlane.xlu0 %10597 }
0x1854   :  { %v26036_v34 = vmul.f32 0.03125, %v10598_v41  ;;  %v10671_v46 = vmul.f32 %v10655_v0, %v10655_v0  ;;  %v10695_v47 = vsub.f32 %v25967_v48, %v10655_v0 }
0x1855   :  { %v10601_v56 = vpop.xlane.xlu1 %10600 }
0x1856   :  { %v26038_v16 = vmul.f32 0.03125, %v10601_v56  ;;  %v10668_v61 = vmul.f32 %v26036_v34, %v26036_v34  ;;  %v10692_v39 = vsub.f32 %v25964_v10, %v26036_v34 }
0x1857   :  { %v10636_v18 = vpop.xlane.xlu0 %10635 }
0x1858   :  { %v10662_v9 = vmul.f32 0.03125, %v10636_v18  ;;  %v10669_v51 = vmul.f32 %v26038_v16, %v26038_v16 }
0x1859   :  { %v10639_v21 = vpop.xlane.xlu1 %10638 }
0x185a   :  { %v10678_v29 = vsub.f32 %v10662_v9, %v10670_v3  ;;  %v10663_v24 = vmul.f32 0.03125, %v10639_v21  ;;  %v10693_v21 = vsub.f32 %v25972_v60, %v26038_v16 }
0x185b   :  { %v10630_v2 = vpop.xlane.xlu0 %10629 }
0x185c   :  { %v10686_v42 = vmax.f32 %v10678_v29, 0.0  ;;  %v10679_v1 = vsub.f32 %v10663_v24, %v10671_v46  ;;  %v10660_v37 = vmul.f32 0.03125, %v10630_v2 }
0x185d   :  { %v10633_v30 = vpop.xlane.xlu1 %10632 }
0x185e   :  { %v10702_v35 = vadd.f32 1e-05, %v10686_v42  ;;  %v10687_v7 = vmax.f32 %v10679_v1, 0.0  ;;  %v10676_v5 = vsub.f32 %v10660_v37, %v10668_v61  ;;  %v10661_v19 = vmul.f32 0.03125, %v10633_v30 }
0x185f   :  { %v10616_v12 = vpop.xlane.xlu0 %10615 }
0x1860   :  { %23148 = vrsqrt.f32 %v10702_v35  ;;  %v10703_v13 = vadd.f32 1e-05, %v10687_v7  ;;  %v10684_v50 = vmax.f32 %v10676_v5, 0.0  ;;  %v10677_v17 = vsub.f32 %v10661_v19, %v10669_v51 }
0x1861   :  { %v10619_v55 = vpop.xlane.xlu1 %10618  ;;  %v26048_v59 = vmul.f32 0.03125, %v10616_v12 }
0x1862   :  { %23150 = vrsqrt.f32 %v10703_v13  ;;  %v10700_v63 = vadd.f32 1e-05, %v10684_v50  ;;  %v10685_v62 = vmax.f32 %v10677_v17, 0.0  ;;  %v26052_v23 = vmul.f32 0.03125, %v10619_v55  ;;  %v22979_v13 = vld [vmem:[%s27433_s6 + $0x18] sm:$0xff]  }
0x1863   :  { %v10610_v31 = vpop.xlane.xlu0 %10609  ;;  %v10674_v52 = vmul.f32 %v26048_v59, %v26048_v59 }
0x1864   :  { %23152 = vrsqrt.f32 %v10700_v63  ;;  %v10701_v22 = vadd.f32 1e-05, %v10685_v62  ;;  %v26044_v25 = vmul.f32 0.03125, %v10610_v31  ;;  %v10675_v18 = vmul.f32 %v26052_v23, %v26052_v23  ;;  %v22980_v62 = vld [vmem:[%s27433_s6 + $0x20] sm:$0xff]  }
0x1865   :  { %v10613_v26 = vpop.xlane.xlu1 %10612 }
0x1866   :  { %23154 = vrsqrt.f32 %v10701_v22  ;;  %v26046_v20 = vmul.f32 0.03125, %v10613_v26  ;;  %v10672_v53 = vmul.f32 %v26044_v25, %v26044_v25  ;;  %v10696_v50 = vsub.f32 %v25988_v6, %v26044_v25 }
0x1867   :  { %v10642_v49 = vpop.xlane.xlu0 %10641  ;;  %v10698_v22 = vsub.f32 %v25981_v54, %v26048_v59 }
0x1868   :  { %v10664_v40 = vmul.f32 0.03125, %v10642_v49  ;;  %v10673_v33 = vmul.f32 %v26046_v20, %v26046_v20  ;;  %v10697_v55 = vsub.f32 %v25997_v57, %v26046_v20 }
0x1869   :  { %v10645_v27 = vpop.xlane.xlu1 %10644 }
0x186a   :  { %v23149_v32 = vpop.eup %23148  ;;  %v10680_v45 = vsub.f32 %v10664_v40, %v10672_v53  ;;  %v10665_v28 = vmul.f32 0.03125, %v10645_v27 }
0x186b   :  { %v10648_v43 = vpop.xlane.xlu0 %10647  ;;  %v10718_v41 = vmul.f32 %v23149_v32, %v10694_v44  ;;  %v22983_v44 = vld [vmem:[%s27433_s6 + $0x38] sm:$0xff]  }
0x186c   :  { %v23151_v36 = vpop.eup %23150  ;;  %v10688_v15 = vmax.f32 %v10680_v45, 0.0  ;;  %v10681_v14 = vsub.f32 %v10665_v28, %v10673_v33  ;;  %v10666_v38 = vmul.f32 0.03125, %v10648_v43  ;;  %v22982_v28 = vld [vmem:[%s27433_s6 + $0x30] sm:$0xff]   ;;  %v22985_v43 = vld [vmem:[%s27433_s6 + $0x48] sm:$0xff]  }
0x186d   :  { %v10719_v56 = vmul.f32 %v23151_v36, %v10695_v47  ;;  %v10651_v3 = vpop.xlane.xlu1 %10650  ;;  %v10734_v61 = vmul.f32 0.01, %v10718_v41  ;;  %vm10726_vm0 = vcmp.ge.f32.partialorder %v10718_v41, 0.0  ;;  %v22984_v47 = vld [vmem:[%s27433_s6 + $0x40] sm:$0xff]   ;;  %v22986_v36 = vld [vmem:[%s27433_s6 + $0x50] sm:$0xff]  }
0x186e   :  { %v23153_v8 = vpop.eup %23152  ;;  %v10704_v11 = vadd.f32 1e-05, %v10688_v15  ;;  %v10689_v48 = vmax.f32 %v10681_v14, 0.0  ;;  %v10682_v0 = vsub.f32 %v10666_v38, %v10674_v52  ;;  %v10667_v9 = vmul.f32 0.03125, %v10651_v3  ;;  %v22987_v52 = vld [vmem:[%s27433_s6 + $0x58] sm:$0xff]   ;;  %v22988_v15 = vld [vmem:[%s27433_s6 + $0x60] sm:$0xff]  }
0x186f   :  { %v10735_v46 = vmul.f32 0.01, %v10719_v56  ;;  %v10716_v29 = vmul.f32 %v23153_v8, %v10692_v39  ;;  %vm10727_vm14 = vcmp.ge.f32.partialorder %v10719_v56, 0.0  ;;  %v10742_v5 = vsel %vm10726_vm0, %v10718_v41, %v10734_v61  ;;  %v22989_v14 = vld [vmem:[%s27433_s6 + $0x68] sm:$0xff]   ;;  %v22990_v38 = vld [vmem:[%s27433_s6 + $0x70] sm:$0xff]   ;;  %v22991_v39 = vld [vmem:[%s27433_s6 + $0x78] sm:$0xff]  }
0x1870   :  { %v23155_v24 = vpop.eup %23154  ;;  %23156 = vrsqrt.f32 %v10704_v11  ;;  %v10705_v2 = vadd.f32 1e-05, %v10689_v48  ;;  %v10690_v10 = vmax.f32 %v10682_v0, 0.0  ;;  %v10683_v34 = vsub.f32 %v10667_v9, %v10675_v18  ;;  %v22992_v41 = vld [vmem:[%s27433_s6 + $0x80] sm:$0xff]   ;;  %v22994_v18 = vld [vmem:[%s27433_s6 + $0x90] sm:$0xff]   ;;  %v22995_v8 = vld [vmem:[%s27433_s6 + $0x98] sm:$0xff]  }
0x1871   :  { %v10732_v42 = vmul.f32 0.01, %v10716_v29  ;;  %v10717_v1 = vmul.f32 %v23155_v24, %v10693_v21  ;;  %vm10724_vm15 = vcmp.ge.f32.partialorder %v10716_v29, 0.0  ;;  %v10743_v35 = vsel %vm10727_vm14, %v10719_v56, %v10735_v46  ;;  %v22993_v56 = vld [vmem:[%s27433_s6 + $0x88] sm:$0xff]   ;;  %v23008_v3 = vld [vmem:[%s27434_s7 + $0x40] sm:$0xff]   ;;  %v22998_v0 = vld [vmem:[%s27433_s6 + $0xb0] sm:$0xff]  }
0x1872   :  { %23158 = vrsqrt.f32 %v10705_v2  ;;  %v10706_v37 = vadd.f32 1e-05, %v10690_v10  ;;  %v10691_v51 = vmax.f32 %v10683_v34, 0.0  ;;  %v26068_v12 = vpack.c.bf16 %v10743_v35, %v10742_v5  ;;  %21108 = vmatprep.mubr.msk.bf16.mxu0 %vm11008_vm6, %v23008_v3  ;;  %v22996_v11 = vld [vmem:[%s27433_s6 + $0xa0] sm:$0xff]   ;;  %v22997_v48 = vld [vmem:[%s27433_s6 + $0xa8] sm:$0xff]   ;;  %v22999_v9 = vld [vmem:[%s27433_s6 + $0xb8] sm:$0xff]  }
0x1873   :  { %vm10725_vm1 = vcmp.ge.f32.partialorder %v10717_v1, 0.0  ;;  %v10733_v30 = vmul.f32 0.01, %v10717_v1  ;;  %v10740_v16 = vsel %vm10724_vm15, %v10716_v29, %v10732_v42  ;;  %v23000_v21 = vld [vmem:[%s27433_s6 + $0xc0] sm:$0xff]   ;;  %v23001_v46 = vld [vmem:[%s27433_s6 + $0xc8] sm:$0xff]   ;;  %v23002_v29 = vld [vmem:[%s27433_s6 + $0xd0] sm:$0xff]  }
0x1874   :  { %23160 = vrsqrt.f32 %v10706_v37  ;;  %v10707_v60 = vadd.f32 1e-05, %v10691_v51  ;;  %v23003_v24 = vld [vmem:[%s27433_s6 + $0xd8] sm:$0xff]   ;;  %v23004_v2 = vld [vmem:[%s27433_s6 + $0xe0] sm:$0xff]   ;;  %v23005_v42 = vld [vmem:[%s27433_s6 + $0xe8] sm:$0xff]  }
0x1875   :  { %v10741_v7 = vsel %vm10725_vm1, %v10717_v1, %v10733_v30  ;;  %v23006_v30 = vld [vmem:[%s27433_s6 + $0xf0] sm:$0xff]  }
0x1876   :  { %v26066_v19 = vpack.c.bf16 %v10741_v7, %v10740_v16  ;;  %23162 = vrsqrt.f32 %v10707_v60 }
0x1878   :  { %21080 = vmatprep.mubr.msk.bf16.mxu1 %vm7201_vm13, %v26066_v19 }
0x1879   :  { %21081 = vmatmul.mubr.msk.bf16.vlgmr.msra.gmra.mrb[136].mxu1 %vm7201_vm13, %v26068_v12 }
0x187a   :  { %v23157_v17 = vpop.eup %23156  ;;  %21089 = vmatpush3.bf16.msra.mxu1 %v26033_v58  ;;  %v10699_v58 = vsub.f32 %v25991_v4, %v26052_v23  ;;  %v22981_v23 = vld [vmem:[%s27433_s6 + $0x28] sm:$0xff]  }
0x187b   :  { %v10720_v63 = vmul.f32 %v23157_v17, %v10696_v50  ;;  %21090 = vmatprep.subr.bf16.mxu1 %v22979_v13 }
0x187c   :  { %v23159_v31 = vpop.eup %23158 }
0x187d   :  { %v10736_v6 = vmul.f32 0.01, %v10720_v63  ;;  %v10721_v25 = vmul.f32 %v23159_v31, %v10697_v55  ;;  %vm10728_vm2 = vcmp.ge.f32.partialorder %v10720_v63, 0.0 }
0x187e   :  { %v23161_v26 = vpop.eup %23160  ;;  %21091 = vmatpush3.bf16.msra.mxu1 %v22979_v13  ;;  %v23007_v13 = vld [vmem:[%s27433_s6 + $0xf8] sm:$0xff]   ;;  %s23204_s6 = scalar_lea.vmem %s16183_s25, 32 }
0x187f   :  { %vm10729_vm3 = vcmp.ge.f32.partialorder %v10721_v25, 0.0  ;;  %v10737_v57 = vmul.f32 0.01, %v10721_v25  ;;  %v10722_v20 = vmul.f32 %v23161_v26, %v10698_v22  ;;  %21148 = vmatprep.subr.bf16.mxu1 %v22980_v62  ;;  %v10744_v53 = vsel %vm10728_vm2, %v10720_v63, %v10736_v6 }
0x1880   :  { %v23163_v49 = vpop.eup %23162 }
0x1881   :  { %v10745_v40 = vsel %vm10729_vm3, %v10721_v25, %v10737_v57  ;;  %v10738_v27 = vmul.f32 0.01, %v10722_v20  ;;  %v10723_v32 = vmul.f32 %v23163_v49, %v10699_v58  ;;  %vm10730_vm4 = vcmp.ge.f32.partialorder %v10722_v20, 0.0 }
0x1882   :  { %v26089_v33 = vpack.c.bf16 %v10745_v40, %v10744_v53  ;;  %v23009_v40 = vld [vmem:[%s27434_s7 + $0x48] sm:$0xff]  }
0x1883   :  { %vm10731_vm5 = vcmp.ge.f32.partialorder %v10723_v32, 0.0  ;;  %v10739_v54 = vmul.f32 0.01, %v10723_v32  ;;  %v10746_v59 = vsel %vm10730_vm4, %v10722_v20, %v10738_v27 }
0x1884   :  { %21084 = vmatprep.mubr.msk.bf16.mxu1 %vm7201_vm13, %v26089_v33 }
0x1885   :  { %v10747_v45 = vsel %vm10731_vm5, %v10723_v32, %v10739_v54 }
0x1886   :  { %v26093_v4 = vpack.c.bf16 %v10747_v45, %v10746_v59 }
0x1888   :  { %21085 = vmatmul.mubr.msk.bf16.gmra.mrb[140].mxu1 %vm7201_vm13, %v26093_v4 }
0x1889   :  { %21092 = vmatprep.mubr.msk.bf16.mxu1 %vm7201_vm13, %v26066_v19 }
0x1890   :  { %21093 = vmatmul.mubr.msk.bf16.vlgmr.msra.gmra.mrb[144].mxu1 %vm7201_vm13, %v26068_v12 }
0x1891   :  { %21096 = vmatprep.mubr.msk.bf16.mxu1 %vm7201_vm13, %v26089_v33  ;;  %21149 = vmatpush3.bf16.msra.mxu1 %v22980_v62 }
0x1892   :  { %21150 = vmatprep.subr.bf16.mxu1 %v22981_v23 }
0x1895   :  { %21151 = vmatpush3.bf16.msra.mxu1 %v22981_v23  ;;  %v23011_v23 = vld [vmem:[%s27434_s7 + $0x58] sm:$0xff]  }
0x1896   :  { %21184 = vmatprep.subr.bf16.mxu1 %v22982_v28 }
0x1898   :  { %21097 = vmatmul.mubr.msk.bf16.gmra.mrb[148].mxu1 %vm7201_vm13, %v26093_v4 }
0x1899   :  { %21152 = vmatprep.mubr.msk.bf16.mxu1 %vm7201_vm13, %v26066_v19 }
0x18a0   :  { %21153 = vmatmul.mubr.msk.bf16.vlgmr.msra.gmra.mrb[152].mxu1 %vm7201_vm13, %v26068_v12 }
0x18a1   :  { %21156 = vmatprep.mubr.msk.bf16.mxu1 %vm7201_vm13, %v26089_v33  ;;  %21185 = vmatpush3.bf16.msra.mxu1 %v22982_v28 }
0x18a2   :  { %21186 = vmatprep.subr.bf16.mxu1 %v22983_v44 }
0x18a5   :  { %21187 = vmatpush3.bf16.msra.mxu1 %v22983_v44 }
0x18a6   :  { %21220 = vmatprep.subr.bf16.mxu1 %v22984_v47 }
0x18a8   :  { %21157 = vmatmul.mubr.msk.bf16.gmra.mrb[156].mxu1 %vm7201_vm13, %v26093_v4 }
0x18a9   :  { %21188 = vmatprep.mubr.msk.bf16.mxu1 %vm7201_vm13, %v26066_v19 }
0x18b0   :  { %21189 = vmatmul.mubr.msk.bf16.vlgmr.msra.gmra.mrb[160].mxu1 %vm7201_vm13, %v26068_v12 }
0x18b1   :  { %21192 = vmatprep.mubr.msk.bf16.mxu1 %vm7201_vm13, %v26089_v33  ;;  %21221 = vmatpush3.bf16.msra.mxu1 %v22984_v47 }
0x18b2   :  { %21222 = vmatprep.subr.bf16.mxu1 %v22985_v43 }
0x18b5   :  { %21223 = vmatpush3.bf16.msra.mxu1 %v22985_v43 }
0x18b6   :  { %21256 = vmatprep.subr.bf16.mxu1 %v22986_v36 }
0x18b8   :  { %21193 = vmatmul.mubr.msk.bf16.gmra.mrb[164].mxu1 %vm7201_vm13, %v26093_v4 }
0x18b9   :  { %21224 = vmatprep.mubr.msk.bf16.mxu1 %vm7201_vm13, %v26066_v19 }
0x18c0   :  { %21225 = vmatmul.mubr.msk.bf16.vlgmr.msra.gmra.mrb[168].mxu1 %vm7201_vm13, %v26068_v12 }
0x18c1   :  { %21228 = vmatprep.mubr.msk.bf16.mxu1 %vm7201_vm13, %v26089_v33  ;;  %21257 = vmatpush3.bf16.msra.mxu1 %v22986_v36 }
0x18c2   :  { %21258 = vmatprep.subr.bf16.mxu1 %v22987_v52 }
0x18c5   :  { %21259 = vmatpush3.bf16.msra.mxu1 %v22987_v52 }
0x18c6   :  { %21292 = vmatprep.subr.bf16.mxu1 %v22988_v15 }
0x18c8   :  { %21229 = vmatmul.mubr.msk.bf16.gmra.mrb[172].mxu1 %vm7201_vm13, %v26093_v4 }
0x18c9   :  { %21260 = vmatprep.mubr.msk.bf16.mxu1 %vm7201_vm13, %v26066_v19 }
0x18d0   :  { %21261 = vmatmul.mubr.msk.bf16.vlgmr.msra.gmra.mrb[176].mxu1 %vm7201_vm13, %v26068_v12 }
0x18d1   :  { %21264 = vmatprep.mubr.msk.bf16.mxu1 %vm7201_vm13, %v26089_v33  ;;  %21293 = vmatpush3.bf16.msra.mxu1 %v22988_v15  ;;  %v23013_v15 = vld [vmem:[%s27434_s7 + $0x68] sm:$0xff]  }
0x18d2   :  { %21294 = vmatprep.subr.bf16.mxu1 %v22989_v14 }
0x18d5   :  { %21295 = vmatpush3.bf16.msra.mxu1 %v22989_v14 }
0x18d6   :  { %21328 = vmatprep.subr.bf16.mxu1 %v22990_v38 }
0x18d8   :  { %21265 = vmatmul.mubr.msk.bf16.gmra.mrb[180].mxu1 %vm7201_vm13, %v26093_v4 }
0x18d9   :  { %21296 = vmatprep.mubr.msk.bf16.mxu1 %vm7201_vm13, %v26066_v19 }
0x18e0   :  { %21297 = vmatmul.mubr.msk.bf16.vlgmr.msra.gmra.mrb[184].mxu1 %vm7201_vm13, %v26068_v12 }
0x18e1   :  { %21300 = vmatprep.mubr.msk.bf16.mxu1 %vm7201_vm13, %v26089_v33  ;;  %21329 = vmatpush3.bf16.msra.mxu1 %v22990_v38 }
0x18e2   :  { %21330 = vmatprep.subr.bf16.mxu1 %v22991_v39 }
0x18e5   :  { %21331 = vmatpush3.bf16.msra.mxu1 %v22991_v39  ;;  %v23014_v39 = vld [vmem:[%s27434_s7 + $0x70] sm:$0xff]  }
0x18e6   :  { %21364 = vmatprep.subr.bf16.mxu1 %v22992_v41 }
0x18e8   :  { %21301 = vmatmul.mubr.msk.bf16.gmra.mrb[188].mxu1 %vm7201_vm13, %v26093_v4 }
0x18e9   :  { %21332 = vmatprep.mubr.msk.bf16.mxu1 %vm7201_vm13, %v26066_v19 }
0x18f0   :  { %21333 = vmatmul.mubr.msk.bf16.vlgmr.msra.gmra.mrb[192].mxu1 %vm7201_vm13, %v26068_v12 }
0x18f1   :  { %21336 = vmatprep.mubr.msk.bf16.mxu1 %vm7201_vm13, %v26089_v33  ;;  %21365 = vmatpush3.bf16.msra.mxu1 %v22992_v41 }
0x18f2   :  { %21366 = vmatprep.subr.bf16.mxu1 %v22993_v56 }
0x18f5   :  { %21367 = vmatpush3.bf16.msra.mxu1 %v22993_v56 }
0x18f6   :  { %21400 = vmatprep.subr.bf16.mxu1 %v22994_v18 }
0x18f8   :  { %21337 = vmatmul.mubr.msk.bf16.gmra.mrb[196].mxu1 %vm7201_vm13, %v26093_v4 }
0x18f9   :  { %21368 = vmatprep.mubr.msk.bf16.mxu1 %vm7201_vm13, %v26066_v19 }
0x1900   :  { %21369 = vmatmul.mubr.msk.bf16.vlgmr.msra.gmra.mrb[200].mxu1 %vm7201_vm13, %v26068_v12 }
0x1901   :  { %21372 = vmatprep.mubr.msk.bf16.mxu1 %vm7201_vm13, %v26089_v33  ;;  %21401 = vmatpush3.bf16.msra.mxu1 %v22994_v18 }
0x1902   :  { %21402 = vmatprep.subr.bf16.mxu1 %v22995_v8 }
0x1905   :  { %21403 = vmatpush3.bf16.msra.mxu1 %v22995_v8  ;;  %v23015_v8 = vld [vmem:[%s27434_s7 + $0x78] sm:$0xff]  }
0x1906   :  { %21436 = vmatprep.subr.bf16.mxu1 %v22996_v11 }
0x1908   :  { %21373 = vmatmul.mubr.msk.bf16.gmra.mrb[204].mxu1 %vm7201_vm13, %v26093_v4 }
0x1909   :  { %21404 = vmatprep.mubr.msk.bf16.mxu1 %vm7201_vm13, %v26066_v19 }
0x1910   :  { %21405 = vmatmul.mubr.msk.bf16.vlgmr.msra.gmra.mrb[208].mxu1 %vm7201_vm13, %v26068_v12 }
0x1911   :  { %21408 = vmatprep.mubr.msk.bf16.mxu1 %vm7201_vm13, %v26089_v33  ;;  %21437 = vmatpush3.bf16.msra.mxu1 %v22996_v11 }
0x1912   :  { %21438 = vmatprep.subr.bf16.mxu1 %v22997_v48 }
0x1915   :  { %21439 = vmatpush3.bf16.msra.mxu1 %v22997_v48 }
0x1916   :  { %21472 = vmatprep.subr.bf16.mxu1 %v22998_v0 }
0x1918   :  { %21409 = vmatmul.mubr.msk.bf16.gmra.mrb[212].mxu1 %vm7201_vm13, %v26093_v4 }
0x1919   :  { %21440 = vmatprep.mubr.msk.bf16.mxu1 %vm7201_vm13, %v26066_v19 }
0x1920   :  { %21441 = vmatmul.mubr.msk.bf16.vlgmr.msra.gmra.mrb[216].mxu1 %vm7201_vm13, %v26068_v12 }
0x1921   :  { %21444 = vmatprep.mubr.msk.bf16.mxu1 %vm7201_vm13, %v26089_v33  ;;  %21473 = vmatpush3.bf16.msra.mxu1 %v22998_v0  ;;  %v23016_v0 = vld [vmem:[%s27434_s7] sm:$0xff]  }
0x1922   :  { %21474 = vmatprep.subr.bf16.mxu1 %v22999_v9 }
0x1925   :  { %21475 = vmatpush3.bf16.msra.mxu1 %v22999_v9 }
0x1926   :  { %21508 = vmatprep.subr.bf16.mxu1 %v23000_v21 }
0x1928   :  { %21445 = vmatmul.mubr.msk.bf16.gmra.mrb[220].mxu1 %vm7201_vm13, %v26093_v4 }
0x1929   :  { %21476 = vmatprep.mubr.msk.bf16.mxu1 %vm7201_vm13, %v26066_v19 }
0x1930   :  { %21477 = vmatmul.mubr.msk.bf16.vlgmr.msra.gmra.mrb[224].mxu1 %vm7201_vm13, %v26068_v12 }
0x1931   :  { %21480 = vmatprep.mubr.msk.bf16.mxu1 %vm7201_vm13, %v26089_v33  ;;  %21509 = vmatpush3.bf16.msra.mxu1 %v23000_v21 }
0x1932   :  { %21510 = vmatprep.subr.bf16.mxu1 %v23001_v46 }
0x1935   :  { %21511 = vmatpush3.bf16.msra.mxu1 %v23001_v46 }
0x1936   :  { %21544 = vmatprep.subr.bf16.mxu1 %v23002_v29 }
0x1938   :  { %21481 = vmatmul.mubr.msk.bf16.gmra.mrb[228].mxu1 %vm7201_vm13, %v26093_v4 }
0x1939   :  { %21512 = vmatprep.mubr.msk.bf16.mxu1 %vm7201_vm13, %v26066_v19 }
0x1940   :  { %21513 = vmatmul.mubr.msk.bf16.vlgmr.msra.gmra.mrb[232].mxu1 %vm7201_vm13, %v26068_v12 }
0x1941   :  { %21516 = vmatprep.mubr.msk.bf16.mxu1 %vm7201_vm13, %v26089_v33  ;;  %21545 = vmatpush3.bf16.msra.mxu1 %v23002_v29 }
0x1942   :  { %21546 = vmatprep.subr.bf16.mxu1 %v23003_v24 }
0x1945   :  { %21547 = vmatpush3.bf16.msra.mxu1 %v23003_v24  ;;  %v23017_v24 = vld [vmem:[%s27434_s7 + $0x8] sm:$0xff]  }
0x1946   :  { %21580 = vmatprep.subr.bf16.mxu1 %v23004_v2 }
0x1948   :  { %21517 = vmatmul.mubr.msk.bf16.gmra.mrb[236].mxu1 %vm7201_vm13, %v26093_v4 }
0x1949   :  { %21548 = vmatprep.mubr.msk.bf16.mxu1 %vm7201_vm13, %v26066_v19 }
0x194c   :  { %v21082_v10 = vpop.f32.mrb[136].mxu1 }
0x194d   :  { %v10814_v34 = vpop.f32.mrb[137].mxu1 }
0x194e   :  { %v21083_v61 = vpop.f32.mrb[138].mxu1 }
0x194f   :  { %v26274_v1 = vpack.c.bf16 %v21083_v61, %v21082_v10  ;;  %v10817_v37 = vpop.f32.mrb[139].mxu1 }
0x1950   :  { %v10845_v51 = vpack.c.bf16 %v10817_v37, %v10814_v34  ;;  %21549 = vmatmul.mubr.msk.bf16.vlgmr.msra.gmra.mrb[240].mxu1 %vm7201_vm13, %v26068_v12  ;;  %v23018_v34 = vld [vmem:[%s27434_s7 + $0x10] sm:$0xff]  }
0x1951   :  { %21552 = vmatprep.mubr.msk.bf16.mxu1 %vm7201_vm13, %v26089_v33  ;;  %21581 = vmatpush3.bf16.msra.mxu1 %v23004_v2 }
0x1952   :  { %21582 = vmatprep.subr.bf16.mxu1 %v23005_v42 }
0x1955   :  { %21583 = vmatpush3.bf16.msra.mxu1 %v23005_v42 }
0x1956   :  { %21616 = vmatprep.subr.bf16.mxu1 %v23006_v30 }
0x1958   :  { %21553 = vmatmul.mubr.msk.bf16.gmra.mrb[244].mxu1 %vm7201_vm13, %v26093_v4 }
0x1959   :  { %21584 = vmatprep.mubr.msk.bf16.mxu1 %vm7201_vm13, %v26066_v19 }
0x195b   :  { %v21086_v35 = vpop.f32.mrb[140].mxu1 }
0x195c   :  { %v10830_v60 = vpop.f32.mrb[141].mxu1 }
0x195d   :  { %v21087_v16 = vpop.f32.mrb[142].mxu1 }
0x195e   :  { %v26287_v7 = vpack.c.bf16 %v21087_v16, %v21086_v35  ;;  %v10833_v5 = vpop.f32.mrb[143].mxu1 }
0x195f   :  { %v10847_v50 = vpack.c.bf16 %v10833_v5, %v10830_v60  ;;  %v23020_v60 = vld [vmem:[%s27434_s7 + $0x20] sm:$0xff]  }
0x1960   :  { %21585 = vmatmul.mubr.msk.bf16.vlgmr.msra.gmra.mrb[248].mxu1 %vm7201_vm13, %v26068_v12 }
0x1961   :  { %21588 = vmatprep.mubr.msk.bf16.mxu1 %vm7201_vm13, %v26089_v33  ;;  %21617 = vmatpush3.bf16.msra.mxu1 %v23006_v30 }
0x1962   :  { %21618 = vmatprep.subr.bf16.mxu1 %v23007_v13 }
0x1963   :  { %v21094_v17 = vpop.f32.mrb[144].mxu1 }
0x1964   :  { %v10916_v55 = vpop.f32.mrb[145].mxu1 }
0x1965   :  { %v21095_v63 = vpop.f32.mrb[146].mxu1  ;;  %21619 = vmatpush3.bf16.msra.mxu1 %v23007_v13 }
0x1966   :  { %v10948_v62 = vpack.c.bf16 %v21095_v63, %v21094_v17  ;;  %v10919_v31 = vpop.f32.mrb[147].mxu1  ;;  %v23022_v63 = vld [vmem:[%s27434_s7 + $0x30] sm:$0xff]  }
0x1967   :  { %v10947_v22 = vpack.c.bf16 %v10919_v31, %v10916_v55 }
0x1968   :  { %21589 = vmatmul.mubr.msk.bf16.gmra.mrb[252].mxu1 %vm7201_vm13, %v26093_v4 }
0x1969   :  { %21100 = vmatprep.subr.bf16.mxu0 %v10947_v22  ;;  %21620 = vmatprep.mubr.msk.bf16.mxu1 %vm7201_vm13, %v26066_v19 }
0x196a   :  { %21101 = vmatpush3.bf16.msra.mxu0 %v10947_v22 }
0x196b   :  { %v21098_v6 = vpop.f32.mrb[148].mxu1  ;;  %21102 = vmatprep.subr.bf16.mxu0 %v10948_v62 }
0x196c   :  { %v10932_v25 = vpop.f32.mrb[149].mxu1 }
0x196d   :  { %v21099_v26 = vpop.f32.mrb[150].mxu1 }
0x196e   :  { %v10950_v58 = vpack.c.bf16 %v21099_v26, %v21098_v6  ;;  %v10935_v57 = vpop.f32.mrb[151].mxu1  ;;  %21103 = vmatpush3.bf16.msra.mxu0 %v10948_v62 }
0x196f   :  { %v10949_v20 = vpack.c.bf16 %v10935_v57, %v10932_v25  ;;  %v23023_v25 = vld [vmem:[%s27434_s7 + $0x38] sm:$0xff]   ;;  %v23024_v57 = vld [vmem:[%s27434_s7 + $0x80] sm:$0xff]  }
0x1970   :  { %21621 = vmatmul.mubr.msk.bf16.vlgmr.msra.gmra.mrb[0].mxu1 %vm7201_vm13, %v26068_v12  ;;  %v23010_v12 = vld [vmem:[%s27434_s7 + $0x50] sm:$0xff]  }
0x1971   :  { %21104 = vmatprep.subr.bf16.mxu0 %v10949_v20  ;;  %21624 = vmatprep.mubr.msk.bf16.mxu1 %vm7201_vm13, %v26089_v33 }
0x1972   :  { %21105 = vmatpush3.bf16.msra.mxu0 %v10949_v20 }
0x1973   :  { %21106 = vmatprep.subr.bf16.mxu0 %v10950_v58  ;;  %v21154_v49 = vpop.f32.mrb[152].mxu1 }
0x1974   :  { %v11342_v19 = vpop.f32.mrb[153].mxu1 }
0x1975   :  { %v21155_v53 = vpop.f32.mrb[154].mxu1 }
0x1976   :  { %v11374_v27 = vpack.c.bf16 %v21155_v53, %v21154_v49  ;;  %21107 = vmatpush3.bf16.msra.mxu0 %v10950_v58  ;;  %v11345_v32 = vpop.f32.mrb[155].mxu1 }
0x1977   :  { %v11373_v54 = vpack.c.bf16 %v11345_v32, %v11342_v19  ;;  %21124 = vmatprep.subr.bf16.mxu0 %v10845_v51 }
0x1978   :  { %21625 = vmatmul.mubr.msk.bf16.gmra.mrb[4].mxu1 %vm7201_vm13, %v26093_v4  ;;  %v23012_v4 = vld [vmem:[%s27434_s7 + $0x60] sm:$0xff]  }
0x1979   :  { %21109 = vmatmul.mubr.msk.bf16.vlgmr.msra.gmra.mrb[88].mxu0 %vm11008_vm6, %v23009_v40  ;;  %v23025_v40 = vld [vmem:[%s27434_s7 + $0x88] sm:$0xff]  }
0x197a   :  { %21125 = vmatpush3.bf16.msra.mxu0 %v10845_v51  ;;  %21112 = vmatprep.mubr.msk.bf16.mxu0 %vm11008_vm6, %v23010_v12  ;;  %v23019_v51 = vld [vmem:[%s27434_s7 + $0x18] sm:$0xff]   ;;  %v23026_v12 = vld [vmem:[%s27434_s7 + $0x90] sm:$0xff]  }
0x197b   :  { %21126 = vmatprep.subr.bf16.mxu0 %v26274_v1  ;;  %v21158_v33 = vpop.f32.mrb[156].mxu1 }
0x197c   :  { %v11358_v59 = vpop.f32.mrb[157].mxu1 }
0x197d   :  { %v21159_v45 = vpop.f32.mrb[158].mxu1 }
0x197e   :  { %v11376_v28 = vpack.c.bf16 %v21159_v45, %v21158_v33  ;;  %21127 = vmatpush3.bf16.msra.mxu0 %v26274_v1  ;;  %v11361_v44 = vpop.f32.mrb[159].mxu1 }
0x197f   :  { %v11375_v47 = vpack.c.bf16 %v11361_v44, %v11358_v59  ;;  %21128 = vmatprep.subr.bf16.mxu0 %v10847_v50 }
0x1981   :  { %21113 = vmatmul.mubr.msk.bf16.gmra.mrb[92].mxu0 %vm11008_vm6, %v23011_v23  ;;  %v23027_v23 = vld [vmem:[%s27434_s7 + $0x98] sm:$0xff]  }
0x1982   :  { %21129 = vmatpush3.bf16.msra.mxu0 %v10847_v50  ;;  %21116 = vmatprep.mubr.msk.bf16.mxu0 %vm11008_vm6, %v23012_v4  ;;  %v23021_v50 = vld [vmem:[%s27434_s7 + $0x28] sm:$0xff]   ;;  %v23028_v4 = vld [vmem:[%s27434_s7 + $0xa0] sm:$0xff]  }
0x1983   :  { %21130 = vmatprep.subr.bf16.mxu0 %v26287_v7  ;;  %v21190_v43 = vpop.f32.mrb[160].mxu1 }
0x1984   :  { %v11622_v36 = vpop.f32.mrb[161].mxu1 }
0x1985   :  { %v21191_v52 = vpop.f32.mrb[162].mxu1 }
0x1986   :  { %v26328_v14 = vpack.c.bf16 %v21191_v52, %v21190_v43  ;;  %21131 = vmatpush3.bf16.msra.mxu0 %v26287_v7  ;;  %v11625_v38 = vpop.f32.mrb[163].mxu1 }
0x1987   :  { %v26334_v41 = vpack.c.bf16 %v11625_v38, %v11622_v36  ;;  %21160 = vmatprep.subr.bf16.mxu0 %v11373_v54 }
0x1989   :  { %21117 = vmatmul.mubr.msk.bf16.gmra.mrb[96].mxu0 %vm11008_vm6, %v23013_v15  ;;  %v23029_v15 = vld [vmem:[%s27434_s7 + $0xa8] sm:$0xff]  }
0x198a   :  { %21120 = vmatprep.mubr.msk.bf16.mxu0 %vm11008_vm6, %v23014_v39  ;;  %v23030_v39 = vld [vmem:[%s27434_s7 + $0xb0] sm:$0xff]  }
0x198b   :  { %v21194_v56 = vpop.f32.mrb[164].mxu1 }
0x198c   :  { %v11638_v18 = vpop.f32.mrb[165].mxu1 }
0x198d   :  { %v21195_v3 = vpop.f32.mrb[166].mxu1 }
0x198e   :  { %v26341_v11 = vpack.c.bf16 %v21195_v3, %v21194_v56  ;;  %v11641_v48 = vpop.f32.mrb[167].mxu1 }
0x198f   :  { %v26346_v9 = vpack.c.bf16 %v11641_v48, %v11638_v18 }
0x1991   :  { %21121 = vmatmul.mubr.msk.bf16.gmra.mrb[100].mxu0 %vm11008_vm6, %v23015_v8  ;;  %v23031_v8 = vld [vmem:[%s27434_s7 + $0xb8] sm:$0xff]  }
0x1992   :  { %21132 = vmatprep.mubr.msk.bf16.mxu0 %vm11008_vm6, %v23016_v0  ;;  %v23032_v0 = vld [vmem:[%s27434_s7 + $0xc0] sm:$0xff]  }
0x1993   :  { %v21226_v21 = vpop.f32.mrb[168].mxu1 }
0x1994   :  { %v11902_v46 = vpop.f32.mrb[169].mxu1 }
0x1995   :  { %v21227_v29 = vpop.f32.mrb[170].mxu1 }
0x1996   :  { %v26353_v2 = vpack.c.bf16 %v21227_v29, %v21226_v21  ;;  %v11905_v10 = vpop.f32.mrb[171].mxu1 }
0x1997   :  { %v26358_v61 = vpack.c.bf16 %v11905_v10, %v11902_v46 }
0x1999   :  { %21133 = vmatmul.mubr.msk.bf16.vlgmr.msra.gmra.mrb[88].mxu0 %vm11008_vm6, %v23017_v24  ;;  %v23033_v24 = vld [vmem:[%s27434_s7 + $0xc8] sm:$0xff]  }
0x199a   :  { %21161 = vmatpush3.bf16.msra.mxu0 %v11373_v54  ;;  %21136 = vmatprep.mubr.msk.bf16.mxu0 %vm11008_vm6, %v23018_v34 }
0x199b   :  { %21162 = vmatprep.subr.bf16.mxu0 %v11374_v27  ;;  %v21230_v42 = vpop.f32.mrb[172].mxu1 }
0x199c   :  { %v11918_v1 = vpop.f32.mrb[173].mxu1 }
0x199d   :  { %v21231_v37 = vpop.f32.mrb[174].mxu1 }
0x199e   :  { %21163 = vmatpush3.bf16.msra.mxu0 %v11374_v27  ;;  %v26365_v30 = vpack.c.bf16 %v21231_v37, %v21230_v42  ;;  %v11921_v35 = vpop.f32.mrb[175].mxu1  ;;  %v23034_v42 = vld [vmem:[%s27434_s7 + $0xd0] sm:$0xff]  }
0x199f   :  { %21164 = vmatprep.subr.bf16.mxu0 %v11375_v47  ;;  %v26370_v16 = vpack.c.bf16 %v11921_v35, %v11918_v1 }
0x19a1   :  { %21137 = vmatmul.mubr.msk.bf16.gmra.mrb[92].mxu0 %vm11008_vm6, %v23019_v51 }
0x19a2   :  { %21165 = vmatpush3.bf16.msra.mxu0 %v11375_v47  ;;  %21140 = vmatprep.mubr.msk.bf16.mxu0 %vm11008_vm6, %v23020_v60  ;;  %v23035_v60 = vld [vmem:[%s27434_s7 + $0xd8] sm:$0xff]  }
0x19a3   :  { %21166 = vmatprep.subr.bf16.mxu0 %v11376_v28  ;;  %v21262_v7 = vpop.f32.mrb[176].mxu1 }
0x19a4   :  { %v12182_v5 = vpop.f32.mrb[177].mxu1 }
0x19a5   :  { %v21263_v13 = vpop.f32.mrb[178].mxu1 }
0x19a6   :  { %21167 = vmatpush3.bf16.msra.mxu0 %v11376_v28  ;;  %v26377_v17 = vpack.c.bf16 %v21263_v13, %v21262_v7  ;;  %v12185_v55 = vpop.f32.mrb[179].mxu1 }
0x19a7   :  { %21196 = vmatprep.subr.bf16.mxu0 %v26334_v41  ;;  %v26383_v62 = vpack.c.bf16 %v12185_v55, %v12182_v5 }
0x19a9   :  { %21141 = vmatmul.mubr.msk.bf16.gmra.mrb[96].mxu0 %vm11008_vm6, %v23021_v50 }
0x19aa   :  { %21144 = vmatprep.mubr.msk.bf16.mxu0 %vm11008_vm6, %v23022_v63  ;;  %v23037_v63 = vld [vmem:[%s27434_s7 + $0xe8] sm:$0xff]  }
0x19ab   :  { %v21266_v31 = vpop.f32.mrb[180].mxu1 }
0x19ac   :  { %v12198_v22 = vpop.f32.mrb[181].mxu1 }
0x19ad   :  { %v21267_v6 = vpop.f32.mrb[182].mxu1 }
0x19ae   :  { %v26390_v26 = vpack.c.bf16 %v21267_v6, %v21266_v31  ;;  %v12201_v58 = vpop.f32.mrb[183].mxu1 }
0x19af   :  { %v26395_v20 = vpack.c.bf16 %v12201_v58, %v12198_v22 }
0x19b1   :  { %21145 = vmatmul.mubr.msk.bf16.gmra.mrb[100].mxu0 %vm11008_vm6, %v23023_v25 }
0x19b2   :  { %21168 = vmatprep.mubr.msk.bf16.mxu0 %vm11008_vm6, %v23024_v57 }
0x19b3   :  { %v21298_v49 = vpop.f32.mrb[184].mxu1 }
0x19b4   :  { %v12462_v19 = vpop.f32.mrb[185].mxu1 }
0x19b5   :  { %v21299_v53 = vpop.f32.mrb[186].mxu1 }
0x19b6   :  { %v26402_v27 = vpack.c.bf16 %v21299_v53, %v21298_v49  ;;  %v12465_v32 = vpop.f32.mrb[187].mxu1  ;;  %v23040_v53 = vld [vmem:[%s27434_s7 + $0x100] sm:$0xff]  }
0x19b7   :  { %v26407_v54 = vpack.c.bf16 %v12465_v32, %v12462_v19 }
0x19b9   :  { %21169 = vmatmul.mubr.msk.bf16.vlgmr.msra.gmra.mrb[88].mxu0 %vm11008_vm6, %v23025_v40 }
0x19ba   :  { %21197 = vmatpush3.bf16.msra.mxu0 %v26334_v41  ;;  %21172 = vmatprep.mubr.msk.bf16.mxu0 %vm11008_vm6, %v23026_v12 }
0x19bb   :  { %21198 = vmatprep.subr.bf16.mxu0 %v26328_v14  ;;  %v21302_v33 = vpop.f32.mrb[188].mxu1 }
0x19bc   :  { %v12478_v59 = vpop.f32.mrb[189].mxu1 }
0x19bd   :  { %v21303_v45 = vpop.f32.mrb[190].mxu1 }
0x19be   :  { %21199 = vmatpush3.bf16.msra.mxu0 %v26328_v14  ;;  %v26417_v28 = vpack.c.bf16 %v21303_v45, %v21302_v33  ;;  %v12481_v44 = vpop.f32.mrb[191].mxu1 }
0x19bf   :  { %21200 = vmatprep.subr.bf16.mxu0 %v26346_v9  ;;  %v26423_v47 = vpack.c.bf16 %v12481_v44, %v12478_v59  ;;  %v23041_v59 = vld [vmem:[%s27434_s7 + $0x108] sm:$0xff]   ;;  %v23042_v44 = vld [vmem:[%s27434_s7 + $0x110] sm:$0xff]  }
0x19c1   :  { %21173 = vmatmul.mubr.msk.bf16.gmra.mrb[92].mxu0 %vm11008_vm6, %v23027_v23 }
0x19c2   :  { %21201 = vmatpush3.bf16.msra.mxu0 %v26346_v9  ;;  %21176 = vmatprep.mubr.msk.bf16.mxu0 %vm11008_vm6, %v23028_v4 }
0x19c3   :  { %21202 = vmatprep.subr.bf16.mxu0 %v26341_v11  ;;  %v21334_v43 = vpop.f32.mrb[192].mxu1 }
0x19c4   :  { %v12742_v36 = vpop.f32.mrb[193].mxu1 }
0x19c5   :  { %v21335_v52 = vpop.f32.mrb[194].mxu1 }
0x19c6   :  { %21203 = vmatpush3.bf16.msra.mxu0 %v26341_v11  ;;  %v26433_v14 = vpack.c.bf16 %v21335_v52, %v21334_v43  ;;  %v12745_v38 = vpop.f32.mrb[195].mxu1 }
0x19c7   :  { %21232 = vmatprep.subr.bf16.mxu0 %v26358_v61  ;;  %v26439_v41 = vpack.c.bf16 %v12745_v38, %v12742_v36 }
0x19c9   :  { %21177 = vmatmul.mubr.msk.bf16.gmra.mrb[96].mxu0 %vm11008_vm6, %v23029_v15  ;;  %v23043_v15 = vld [vmem:[%s27434_s7 + $0x118] sm:$0xff]  }
0x19ca   :  { %21180 = vmatprep.mubr.msk.bf16.mxu0 %vm11008_vm6, %v23030_v39 }
0x19cb   :  { %v21338_v56 = vpop.f32.mrb[196].mxu1 }
0x19cc   :  { %v12758_v18 = vpop.f32.mrb[197].mxu1 }
0x19cd   :  { %v21339_v3 = vpop.f32.mrb[198].mxu1 }
0x19ce   :  { %v26446_v11 = vpack.c.bf16 %v21339_v3, %v21338_v56  ;;  %v12761_v48 = vpop.f32.mrb[199].mxu1 }
0x19cf   :  { %v26451_v9 = vpack.c.bf16 %v12761_v48, %v12758_v18 }
0x19d1   :  { %21181 = vmatmul.mubr.msk.bf16.gmra.mrb[100].mxu0 %vm11008_vm6, %v23031_v8  ;;  %v23045_v8 = vld [vmem:[%s27434_s7 + $0x128] sm:$0xff]  }
0x19d2   :  { %21204 = vmatprep.mubr.msk.bf16.mxu0 %vm11008_vm6, %v23032_v0 }
0x19d3   :  { %v21370_v21 = vpop.f32.mrb[200].mxu1 }
0x19d4   :  { %v13022_v46 = vpop.f32.mrb[201].mxu1 }
0x19d5   :  { %v21371_v29 = vpop.f32.mrb[202].mxu1 }
0x19d6   :  { %v26458_v10 = vpack.c.bf16 %v21371_v29, %v21370_v21  ;;  %v13025_v34 = vpop.f32.mrb[203].mxu1 }
0x19d7   :  { %v26463_v1 = vpack.c.bf16 %v13025_v34, %v13022_v46 }
0x19d9   :  { %21205 = vmatmul.mubr.msk.bf16.vlgmr.msra.gmra.mrb[88].mxu0 %vm11008_vm6, %v23033_v24 }
0x19da   :  { %21233 = vmatpush3.bf16.msra.mxu0 %v26358_v61  ;;  %21208 = vmatprep.mubr.msk.bf16.mxu0 %vm11008_vm6, %v23034_v42  ;;  %v23036_v61 = vld [vmem:[%s27434_s7 + $0xe0] sm:$0xff]  }
0x19db   :  { %21234 = vmatprep.subr.bf16.mxu0 %v26353_v2  ;;  %v21374_v37 = vpop.f32.mrb[204].mxu1 }
0x19dc   :  { %v13038_v51 = vpop.f32.mrb[205].mxu1 }
0x19dd   :  { %v21375_v35 = vpop.f32.mrb[206].mxu1 }
0x19de   :  { %21235 = vmatpush3.bf16.msra.mxu0 %v26353_v2  ;;  %v26473_v7 = vpack.c.bf16 %v21375_v35, %v21374_v37  ;;  %v13041_v5 = vpop.f32.mrb[207].mxu1  ;;  %v23048_v37 = vld [vmem:[%s27434_s7 + $0x140] sm:$0xff]  }
0x19df   :  { %21236 = vmatprep.subr.bf16.mxu0 %v26370_v16  ;;  %v26479_v13 = vpack.c.bf16 %v13041_v5, %v13038_v51 }
0x19e1   :  { %21209 = vmatmul.mubr.msk.bf16.gmra.mrb[92].mxu0 %vm11008_vm6, %v23035_v60 }
0x19e2   :  { %21237 = vmatpush3.bf16.msra.mxu0 %v26370_v16  ;;  %21212 = vmatprep.mubr.msk.bf16.mxu0 %vm11008_vm6, %v23036_v61  ;;  %v23038_v16 = vld [vmem:[%s27434_s7 + $0xf0] sm:$0xff]   ;;  %v23049_v61 = vld [vmem:[%s27434_s7 + $0x148] sm:$0xff]  }
0x19e3   :  { %21238 = vmatprep.subr.bf16.mxu0 %v26365_v30  ;;  %v21406_v2 = vpop.f32.mrb[208].mxu1 }
0x19e4   :  { %v13302_v50 = vpop.f32.mrb[209].mxu1 }
0x19e5   :  { %v21407_v55 = vpop.f32.mrb[210].mxu1 }
0x19e6   :  { %21239 = vmatpush3.bf16.msra.mxu0 %v26365_v30  ;;  %v26489_v31 = vpack.c.bf16 %v21407_v55, %v21406_v2  ;;  %v13305_v22 = vpop.f32.mrb[211].mxu1  ;;  %v23039_v30 = vld [vmem:[%s27434_s7 + $0xf8] sm:$0xff]   ;;  %v23050_v55 = vld [vmem:[%s27434_s7 + $0x150] sm:$0xff]  }
0x19e7   :  { %21268 = vmatprep.subr.bf16.mxu0 %v26383_v62  ;;  %v26495_v6 = vpack.c.bf16 %v13305_v22, %v13302_v50 }
0x19e9   :  { %21213 = vmatmul.mubr.msk.bf16.gmra.mrb[96].mxu0 %vm11008_vm6, %v23037_v63 }
0x19ea   :  { %21216 = vmatprep.mubr.msk.bf16.mxu0 %vm11008_vm6, %v23038_v16 }
0x19eb   :  { %v21410_v25 = vpop.f32.mrb[212].mxu1 }
0x19ec   :  { %v13318_v58 = vpop.f32.mrb[213].mxu1 }
0x19ed   :  { %v21411_v57 = vpop.f32.mrb[214].mxu1 }
0x19ee   :  { %v26502_v49 = vpack.c.bf16 %v21411_v57, %v21410_v25  ;;  %v13321_v19 = vpop.f32.mrb[215].mxu1 }
0x19ef   :  { %v26507_v40 = vpack.c.bf16 %v13321_v19, %v13318_v58  ;;  %v23051_v58 = vld [vmem:[%s27434_s7 + $0x158] sm:$0xff]  }
0x19f1   :  { %21217 = vmatmul.mubr.msk.bf16.gmra.mrb[100].mxu0 %vm11008_vm6, %v23039_v30 }
0x19f2   :  { %21240 = vmatprep.mubr.msk.bf16.mxu0 %vm11008_vm6, %v23040_v53 }
0x19f3   :  { %v21442_v32 = vpop.f32.mrb[216].mxu1 }
0x19f4   :  { %v13582_v12 = vpop.f32.mrb[217].mxu1 }
0x19f5   :  { %v21443_v33 = vpop.f32.mrb[218].mxu1 }
0x19f6   :  { %v26514_v45 = vpack.c.bf16 %v21443_v33, %v21442_v32  ;;  %v13585_v23 = vpop.f32.mrb[219].mxu1 }
0x19f7   :  { %v26519_v4 = vpack.c.bf16 %v13585_v23, %v13582_v12  ;;  %v23053_v12 = vld [vmem:[%s27434_s7 + $0x168] sm:$0xff]  }
0x19f9   :  { %21241 = vmatmul.mubr.msk.bf16.vlgmr.msra.gmra.mrb[88].mxu0 %vm11008_vm6, %v23041_v59 }
0x19fa   :  { %21269 = vmatpush3.bf16.msra.mxu0 %v26383_v62  ;;  %21244 = vmatprep.mubr.msk.bf16.mxu0 %vm11008_vm6, %v23042_v44  ;;  %v23044_v62 = vld [vmem:[%s27434_s7 + $0x120] sm:$0xff]  }
0x19fb   :  { %21270 = vmatprep.subr.bf16.mxu0 %v26377_v17  ;;  %v21446_v43 = vpop.f32.mrb[220].mxu1 }
0x19fc   :  { %v13598_v36 = vpop.f32.mrb[221].mxu1 }
0x19fd   :  { %v21447_v52 = vpop.f32.mrb[222].mxu1 }
0x19fe   :  { %21271 = vmatpush3.bf16.msra.mxu0 %v26377_v17  ;;  %v26529_v38 = vpack.c.bf16 %v21447_v52, %v21446_v43  ;;  %v13601_v39 = vpop.f32.mrb[223].mxu1 }
0x19ff   :  { %21272 = vmatprep.subr.bf16.mxu0 %v26395_v20  ;;  %v26535_v56 = vpack.c.bf16 %v13601_v39, %v13598_v36  ;;  %v23056_v39 = vld [vmem:[%s27434_s7 + $0x180] sm:$0xff]  }
0x1a01   :  { %21245 = vmatmul.mubr.msk.bf16.gmra.mrb[92].mxu0 %vm11008_vm6, %v23043_v15 }
0x1a02   :  { %21273 = vmatpush3.bf16.msra.mxu0 %v26395_v20  ;;  %21248 = vmatprep.mubr.msk.bf16.mxu0 %vm11008_vm6, %v23044_v62  ;;  %v23046_v20 = vld [vmem:[%s27434_s7 + $0x130] sm:$0xff]  }
0x1a03   :  { %21274 = vmatprep.subr.bf16.mxu0 %v26390_v26  ;;  %v21478_v17 = vpop.f32.mrb[224].mxu1 }
0x1a04   :  { %v13862_v18 = vpop.f32.mrb[225].mxu1 }
0x1a05   :  { %v21479_v3 = vpop.f32.mrb[226].mxu1 }
0x1a06   :  { %21275 = vmatpush3.bf16.msra.mxu0 %v26390_v26  ;;  %v26545_v48 = vpack.c.bf16 %v21479_v3, %v21478_v17  ;;  %v13865_v0 = vpop.f32.mrb[227].mxu1  ;;  %v23047_v26 = vld [vmem:[%s27434_s7 + $0x138] sm:$0xff]  }
0x1a07   :  { %21304 = vmatprep.subr.bf16.mxu0 %v26407_v54  ;;  %v26551_v21 = vpack.c.bf16 %v13865_v0, %v13862_v18 }
0x1a09   :  { %21249 = vmatmul.mubr.msk.bf16.gmra.mrb[96].mxu0 %vm11008_vm6, %v23045_v8  ;;  %v23057_v8 = vld [vmem:[%s27434_s7 + $0x188] sm:$0xff]  }
0x1a0a   :  { %21252 = vmatprep.mubr.msk.bf16.mxu0 %vm11008_vm6, %v23046_v20 }
0x1a0b   :  { %v21482_v46 = vpop.f32.mrb[228].mxu1 }
0x1a0c   :  { %v13878_v29 = vpop.f32.mrb[229].mxu1 }
0x1a0d   :  { %v21483_v24 = vpop.f32.mrb[230].mxu1 }
0x1a0e   :  { %v26558_v34 = vpack.c.bf16 %v21483_v24, %v21482_v46  ;;  %v13881_v42 = vpop.f32.mrb[231].mxu1  ;;  %v23058_v46 = vld [vmem:[%s27434_s7 + $0x190] sm:$0xff]  }
0x1a0f   :  { %v26563_v51 = vpack.c.bf16 %v13881_v42, %v13878_v29 }
0x1a11   :  { %21253 = vmatmul.mubr.msk.bf16.gmra.mrb[100].mxu0 %vm11008_vm6, %v23047_v26 }
0x1a12   :  { %21276 = vmatprep.mubr.msk.bf16.mxu0 %vm11008_vm6, %v23048_v37  ;;  %v23059_v37 = vld [vmem:[%s27434_s7 + $0x198] sm:$0xff]  }
0x1a13   :  { %v21514_v35 = vpop.f32.mrb[232].mxu1 }
0x1a14   :  { %v14142_v60 = vpop.f32.mrb[233].mxu1 }
0x1a15   :  { %v21515_v5 = vpop.f32.mrb[234].mxu1 }
0x1a16   :  { %v26570_v2 = vpack.c.bf16 %v21515_v5, %v21514_v35  ;;  %v14145_v50 = vpop.f32.mrb[235].mxu1 }
0x1a17   :  { %v26575_v63 = vpack.c.bf16 %v14145_v50, %v14142_v60 }
0x1a19   :  { %21277 = vmatmul.mubr.msk.bf16.vlgmr.msra.gmra.mrb[88].mxu0 %vm11008_vm6, %v23049_v61 }
0x1a1a   :  { %21305 = vmatpush3.bf16.msra.mxu0 %v26407_v54  ;;  %21280 = vmatprep.mubr.msk.bf16.mxu0 %vm11008_vm6, %v23050_v55  ;;  %v23052_v54 = vld [vmem:[%s27434_s7 + $0x160] sm:$0xff]   ;;  %v23061_v55 = vld [vmem:[%s27434_s7 + $0x1a8] sm:$0xff]  }
0x1a1b   :  { %21306 = vmatprep.subr.bf16.mxu0 %v26402_v27  ;;  %v21518_v22 = vpop.f32.mrb[236].mxu1 }
0x1a1c   :  { %v14158_v16 = vpop.f32.mrb[237].mxu1 }
0x1a1d   :  { %v21519_v25 = vpop.f32.mrb[238].mxu1 }
0x1a1e   :  { %21307 = vmatpush3.bf16.msra.mxu0 %v26402_v27  ;;  %v26585_v57 = vpack.c.bf16 %v21519_v25, %v21518_v22  ;;  %v14161_v30 = vpop.f32.mrb[239].mxu1 }
0x1a1f   :  { %21308 = vmatprep.subr.bf16.mxu0 %v26423_v47  ;;  %v26591_v19 = vpack.c.bf16 %v14161_v30, %v14158_v16 }
0x1a21   :  { %21281 = vmatmul.mubr.msk.bf16.gmra.mrb[92].mxu0 %vm11008_vm6, %v23051_v58 }
0x1a22   :  { %21309 = vmatpush3.bf16.msra.mxu0 %v26423_v47  ;;  %21284 = vmatprep.mubr.msk.bf16.mxu0 %vm11008_vm6, %v23052_v54  ;;  %v23054_v47 = vld [vmem:[%s27434_s7 + $0x170] sm:$0xff]  }
0x1a23   :  { %21310 = vmatprep.subr.bf16.mxu0 %v26417_v28  ;;  %v21550_v27 = vpop.f32.mrb[240].mxu1 }
0x1a24   :  { %v14422_v53 = vpop.f32.mrb[241].mxu1 }
0x1a25   :  { %v21551_v32 = vpop.f32.mrb[242].mxu1 }
0x1a26   :  { %21311 = vmatpush3.bf16.msra.mxu0 %v26417_v28  ;;  %v26601_v33 = vpack.c.bf16 %v21551_v32, %v21550_v27  ;;  %v14425_v59 = vpop.f32.mrb[243].mxu1  ;;  %v23055_v28 = vld [vmem:[%s27434_s7 + $0x178] sm:$0xff]   ;;  %v23064_v32 = vld [vmem:[%s27434_s7 + $0x1c0] sm:$0xff]  }
0x1a27   :  { %21340 = vmatprep.subr.bf16.mxu0 %v26439_v41  ;;  %v26607_v23 = vpack.c.bf16 %v14425_v59, %v14422_v53  ;;  %v23065_v59 = vld [vmem:[%s27434_s7 + $0x1c8] sm:$0xff]  }
0x1a29   :  { %21285 = vmatmul.mubr.msk.bf16.gmra.mrb[96].mxu0 %vm11008_vm6, %v23053_v12 }
0x1a2a   :  { %21288 = vmatprep.mubr.msk.bf16.mxu0 %vm11008_vm6, %v23054_v47  ;;  %v23066_v47 = vld [vmem:[%s27434_s7 + $0x1d0] sm:$0xff]  }
0x1a2b   :  { %v21554_v44 = vpop.f32.mrb[244].mxu1 }
0x1a2c   :  { %v14438_v43 = vpop.f32.mrb[245].mxu1 }
0x1a2d   :  { %v21555_v36 = vpop.f32.mrb[246].mxu1 }
0x1a2e   :  { %v26614_v52 = vpack.c.bf16 %v21555_v36, %v21554_v44  ;;  %v14441_v15 = vpop.f32.mrb[247].mxu1  ;;  %v23067_v44 = vld [vmem:[%s27434_s7 + $0x1d8] sm:$0xff]   ;;  %v23072_v36 = vld [vmem:[%s27434_s7 + $0x200] sm:$0xff]  }
0x1a2f   :  { %v26619_v62 = vpack.c.bf16 %v14441_v15, %v14438_v43  ;;  %v23068_v43 = vld [vmem:[%s27434_s7 + $0x1e0] sm:$0xff]   ;;  %v23075_v15 = vld [vmem:[%s27434_s7 + $0x218] sm:$0xff]  }
0x1a31   :  { %21289 = vmatmul.mubr.msk.bf16.gmra.mrb[100].mxu0 %vm11008_vm6, %v23055_v28  ;;  %v23074_v28 = vld [vmem:[%s27434_s7 + $0x210] sm:$0xff]  }
0x1a32   :  { %21312 = vmatprep.mubr.msk.bf16.mxu0 %vm11008_vm6, %v23056_v39  ;;  %v23076_v39 = vld [vmem:[%s27434_s7 + $0x220] sm:$0xff]  }
0x1a33   :  { %v21586_v17 = vpop.f32.mrb[248].mxu1 }
0x1a34   :  { %v14702_v18 = vpop.f32.mrb[249].mxu1 }
0x1a35   :  { %v21587_v3 = vpop.f32.mrb[250].mxu1 }
0x1a36   :  { %v26626_v0 = vpack.c.bf16 %v21587_v3, %v21586_v17  ;;  %v14705_v20 = vpop.f32.mrb[251].mxu1  ;;  %v23080_v17 = vld [vmem:[%s27434_s7 + $0x240] sm:$0xff]   ;;  %v23083_v3 = vld [vmem:[%s27434_s7 + $0x258] sm:$0xff]  }
0x1a37   :  { %v26631_v29 = vpack.c.bf16 %v14705_v20, %v14702_v18  ;;  %v23082_v18 = vld [vmem:[%s27434_s7 + $0x250] sm:$0xff]   ;;  %v23088_v20 = vld [vmem:[%s27434_s7 + $0x280] sm:$0xff]  }
0x1a39   :  { %21313 = vmatmul.mubr.msk.bf16.vlgmr.msra.gmra.mrb[88].mxu0 %vm11008_vm6, %v23057_v8  ;;  %v23084_v8 = vld [vmem:[%s27434_s7 + $0x260] sm:$0xff]  }
0x1a3a   :  { %21341 = vmatpush3.bf16.msra.mxu0 %v26439_v41  ;;  %21316 = vmatprep.mubr.msk.bf16.mxu0 %vm11008_vm6, %v23058_v46  ;;  %v23060_v41 = vld [vmem:[%s27434_s7 + $0x1a0] sm:$0xff]   ;;  %v23090_v46 = vld [vmem:[%s27434_s7 + $0x290] sm:$0xff]  }
0x1a3b   :  { %21342 = vmatprep.subr.bf16.mxu0 %v26433_v14  ;;  %v21590_v24 = vpop.f32.mrb[252].mxu1 }
0x1a3c   :  { %v14718_v26 = vpop.f32.mrb[253].mxu1 }
0x1a3d   :  { %v21591_v42 = vpop.f32.mrb[254].mxu1 }
0x1a3e   :  { %21343 = vmatpush3.bf16.msra.mxu0 %v26433_v14  ;;  %v26641_v35 = vpack.c.bf16 %v21591_v42, %v21590_v24  ;;  %v14721_v60 = vpop.f32.mrb[255].mxu1  ;;  %v23091_v24 = vld [vmem:[%s27434_s7 + $0x298] sm:$0xff]   ;;  %v23096_v42 = vld [vmem:[%s27434_s7 + $0x2c0] sm:$0xff]  }
0x1a3f   :  { %21344 = vmatprep.subr.bf16.mxu0 %v26451_v9  ;;  %v26647_v5 = vpack.c.bf16 %v14721_v60, %v14718_v26  ;;  %v23092_v26 = vld [vmem:[%s27434_s7 + $0x2a0] sm:$0xff]   ;;  %v23099_v60 = vld [vmem:[%s27434_s7 + $0x2d8] sm:$0xff]  }
0x1a41   :  { %21317 = vmatmul.mubr.msk.bf16.gmra.mrb[92].mxu0 %vm11008_vm6, %v23059_v37  ;;  %v23098_v37 = vld [vmem:[%s27434_s7 + $0x2d0] sm:$0xff]  }
0x1a42   :  { %21345 = vmatpush3.bf16.msra.mxu0 %v26451_v9  ;;  %21320 = vmatprep.mubr.msk.bf16.mxu0 %vm11008_vm6, %v23060_v41  ;;  %v23062_v9 = vld [vmem:[%s27434_s7 + $0x1b0] sm:$0xff]   ;;  %v23100_v41 = vld [vmem:[%s27434_s7 + $0x2e0] sm:$0xff]  }
0x1a43   :  { %21346 = vmatprep.subr.bf16.mxu0 %v26446_v11  ;;  %v21622_v14 = vpop.f32.mrb[0].mxu1 }
0x1a44   :  { %v14982_v61 = vpop.f32.mrb[1].mxu1 }
0x1a45   :  { %v21623_v50 = vpop.f32.mrb[2].mxu1 }
0x1a46   :  { %21347 = vmatpush3.bf16.msra.mxu0 %v26446_v11  ;;  %v26657_v22 = vpack.c.bf16 %v21623_v50, %v21622_v14  ;;  %v14985_v16 = vpop.f32.mrb[3].mxu1  ;;  %v23063_v11 = vld [vmem:[%s27434_s7 + $0x1b8] sm:$0xff]   ;;  %v23104_v14 = vld [vmem:[%s27434_s7 + $0x300] sm:$0xff]  }
0x1a47   :  { %21376 = vmatprep.subr.bf16.mxu0 %v26463_v1  ;;  %v26663_v25 = vpack.c.bf16 %v14985_v16, %v14982_v61  ;;  %v23106_v61 = vld [vmem:[%s27434_s7 + $0x310] sm:$0xff]   ;;  %v23107_v50 = vld [vmem:[%s27434_s7 + $0x318] sm:$0xff]   ;;  %v23112_v16 = vld [vmem:[%s27434_s7 + $0x340] sm:$0xff]  }
0x1a49   :  { %21321 = vmatmul.mubr.msk.bf16.gmra.mrb[96].mxu0 %vm11008_vm6, %v23061_v55  ;;  %v23108_v55 = vld [vmem:[%s27434_s7 + $0x320] sm:$0xff]  }
0x1a4a   :  { %21324 = vmatprep.mubr.msk.bf16.mxu0 %vm11008_vm6, %v23062_v9  ;;  %v23114_v9 = vld [vmem:[%s27434_s7 + $0x350] sm:$0xff]  }
0x1a4b   :  { %v21626_v58 = vpop.f32.mrb[4].mxu1 }
0x1a4c   :  { %v14998_v30 = vpop.f32.mrb[5].mxu1 }
0x1a4d   :  { %v21627_v54 = vpop.f32.mrb[6].mxu1 }
0x1a4e   :  { %v26670_v27 = vpack.c.bf16 %v21627_v54, %v21626_v58  ;;  %v15001_v53 = vpop.f32.mrb[7].mxu1  ;;  %v23115_v58 = vld [vmem:[%s27434_s7 + $0x358] sm:$0xff]   ;;  %v23120_v54 = vld [vmem:[%s27434_s7 + $0x380] sm:$0xff]  }
0x1a4f   :  { %v26675_v12 = vpack.c.bf16 %v15001_v53, %v14998_v30  ;;  %v23116_v30 = vld [vmem:[%s27434_s7 + $0x360] sm:$0xff]   ;;  %v23123_v53 = vld [vmem:[%s27434_s7 + $0x398] sm:$0xff]  }
0x1a51   :  { %21325 = vmatmul.mubr.msk.bf16.gmra.mrb[100].mxu0 %vm11008_vm6, %v23063_v11  ;;  %v23122_v11 = vld [vmem:[%s27434_s7 + $0x390] sm:$0xff]  }
0x1a52   :  { %21348 = vmatprep.mubr.msk.bf16.mxu0 %vm11008_vm6, %v23064_v32  ;;  %v23124_v32 = vld [vmem:[%s27434_s7 + $0x3a0] sm:$0xff]  }
0x1a59   :  { %21349 = vmatmul.mubr.msk.bf16.vlgmr.msra.gmra.mrb[88].mxu0 %vm11008_vm6, %v23065_v59  ;;  %v23128_v59 = vld [vmem:[%s27434_s7 + $0x3c0] sm:$0xff]  }
0x1a5a   :  { %21377 = vmatpush3.bf16.msra.mxu0 %v26463_v1  ;;  %21352 = vmatprep.mubr.msk.bf16.mxu0 %vm11008_vm6, %v23066_v47  ;;  %v23069_v1 = vld [vmem:[%s27434_s7 + $0x1e8] sm:$0xff]   ;;  %v23130_v47 = vld [vmem:[%s27434_s7 + $0x3d0] sm:$0xff]  }
0x1a5b   :  { %21378 = vmatprep.subr.bf16.mxu0 %v26458_v10 }
0x1a5e   :  { %21379 = vmatpush3.bf16.msra.mxu0 %v26458_v10  ;;  %v23070_v10 = vld [vmem:[%s27434_s7 + $0x1f0] sm:$0xff]  }
0x1a5f   :  { %21380 = vmatprep.subr.bf16.mxu0 %v26479_v13 }
0x1a61   :  { %21353 = vmatmul.mubr.msk.bf16.gmra.mrb[92].mxu0 %vm11008_vm6, %v23067_v44  ;;  %v23131_v44 = vld [vmem:[%s27434_s7 + $0x3d8] sm:$0xff]  }
0x1a62   :  { %21381 = vmatpush3.bf16.msra.mxu0 %v26479_v13  ;;  %21356 = vmatprep.mubr.msk.bf16.mxu0 %vm11008_vm6, %v23068_v43  ;;  %v23071_v13 = vld [vmem:[%s27434_s7 + $0x1f8] sm:$0xff]   ;;  %v23132_v43 = vld [vmem:[%s27434_s7 + $0x3e0] sm:$0xff]  }
0x1a63   :  { %21382 = vmatprep.subr.bf16.mxu0 %v26473_v7 }
0x1a66   :  { %21383 = vmatpush3.bf16.msra.mxu0 %v26473_v7  ;;  %v23073_v7 = vld [vmem:[%s27434_s7 + $0x208] sm:$0xff]  }
0x1a67   :  { %21412 = vmatprep.subr.bf16.mxu0 %v26495_v6 }
0x1a69   :  { %21357 = vmatmul.mubr.msk.bf16.gmra.mrb[96].mxu0 %vm11008_vm6, %v23069_v1  ;;  %v23133_v1 = vld [vmem:[%s27434_s7 + $0x3e8] sm:$0xff]  }
0x1a6a   :  { %21360 = vmatprep.mubr.msk.bf16.mxu0 %vm11008_vm6, %v23070_v10  ;;  %v23134_v10 = vld [vmem:[%s27434_s7 + $0x3f0] sm:$0xff]  }
0x1a71   :  { %21361 = vmatmul.mubr.msk.bf16.gmra.mrb[100].mxu0 %vm11008_vm6, %v23071_v13  ;;  %v23135_v13 = vld [vmem:[%s27434_s7 + $0x3f8] sm:$0xff]  }
0x1a72   :  { %21384 = vmatprep.mubr.msk.bf16.mxu0 %vm11008_vm6, %v23072_v36 }
0x1a79   :  { %21385 = vmatmul.mubr.msk.bf16.vlgmr.msra.gmra.mrb[88].mxu0 %vm11008_vm6, %v23073_v7 }
0x1a7a   :  { %21413 = vmatpush3.bf16.msra.mxu0 %v26495_v6  ;;  %21388 = vmatprep.mubr.msk.bf16.mxu0 %vm11008_vm6, %v23074_v28  ;;  %v23077_v6 = vld [vmem:[%s27434_s7 + $0x228] sm:$0xff]  }
0x1a7b   :  { %21414 = vmatprep.subr.bf16.mxu0 %v26489_v31 }
0x1a7e   :  { %21415 = vmatpush3.bf16.msra.mxu0 %v26489_v31  ;;  %v23078_v31 = vld [vmem:[%s27434_s7 + $0x230] sm:$0xff]  }
0x1a7f   :  { %21416 = vmatprep.subr.bf16.mxu0 %v26507_v40 }
0x1a81   :  { %21389 = vmatmul.mubr.msk.bf16.gmra.mrb[92].mxu0 %vm11008_vm6, %v23075_v15 }
0x1a82   :  { %21417 = vmatpush3.bf16.msra.mxu0 %v26507_v40  ;;  %21392 = vmatprep.mubr.msk.bf16.mxu0 %vm11008_vm6, %v23076_v39  ;;  %v23079_v40 = vld [vmem:[%s27434_s7 + $0x238] sm:$0xff]  }
0x1a83   :  { %21418 = vmatprep.subr.bf16.mxu0 %v26502_v49 }
0x1a86   :  { %21419 = vmatpush3.bf16.msra.mxu0 %v26502_v49  ;;  %v23081_v49 = vld [vmem:[%s27434_s7 + $0x248] sm:$0xff]  }
0x1a87   :  { %21448 = vmatprep.subr.bf16.mxu0 %v26519_v4 }
0x1a89   :  { %21393 = vmatmul.mubr.msk.bf16.gmra.mrb[96].mxu0 %vm11008_vm6, %v23077_v6 }
0x1a8a   :  { %21396 = vmatprep.mubr.msk.bf16.mxu0 %vm11008_vm6, %v23078_v31 }
0x1a91   :  { %21397 = vmatmul.mubr.msk.bf16.gmra.mrb[100].mxu0 %vm11008_vm6, %v23079_v40 }
0x1a92   :  { %21420 = vmatprep.mubr.msk.bf16.mxu0 %vm11008_vm6, %v23080_v17 }
0x1a99   :  { %21421 = vmatmul.mubr.msk.bf16.vlgmr.msra.gmra.mrb[88].mxu0 %vm11008_vm6, %v23081_v49 }
0x1a9a   :  { %21449 = vmatpush3.bf16.msra.mxu0 %v26519_v4  ;;  %21424 = vmatprep.mubr.msk.bf16.mxu0 %vm11008_vm6, %v23082_v18  ;;  %v23085_v4 = vld [vmem:[%s27434_s7 + $0x268] sm:$0xff]  }
0x1a9b   :  { %21450 = vmatprep.subr.bf16.mxu0 %v26514_v45 }
0x1a9e   :  { %21451 = vmatpush3.bf16.msra.mxu0 %v26514_v45  ;;  %v23086_v45 = vld [vmem:[%s27434_s7 + $0x270] sm:$0xff]  }
0x1a9f   :  { %21452 = vmatprep.subr.bf16.mxu0 %v26535_v56 }
0x1aa1   :  { %21425 = vmatmul.mubr.msk.bf16.gmra.mrb[92].mxu0 %vm11008_vm6, %v23083_v3 }
0x1aa2   :  { %21453 = vmatpush3.bf16.msra.mxu0 %v26535_v56  ;;  %21428 = vmatprep.mubr.msk.bf16.mxu0 %vm11008_vm6, %v23084_v8  ;;  %v23087_v56 = vld [vmem:[%s27434_s7 + $0x278] sm:$0xff]  }
0x1aa3   :  { %21454 = vmatprep.subr.bf16.mxu0 %v26529_v38 }
0x1aa6   :  { %21455 = vmatpush3.bf16.msra.mxu0 %v26529_v38  ;;  %v23089_v38 = vld [vmem:[%s27434_s7 + $0x288] sm:$0xff]  }
0x1aa7   :  { %21484 = vmatprep.subr.bf16.mxu0 %v26551_v21 }
0x1aa9   :  { %21429 = vmatmul.mubr.msk.bf16.gmra.mrb[96].mxu0 %vm11008_vm6, %v23085_v4 }
0x1aaa   :  { %21432 = vmatprep.mubr.msk.bf16.mxu0 %vm11008_vm6, %v23086_v45 }
0x1ab1   :  { %21433 = vmatmul.mubr.msk.bf16.gmra.mrb[100].mxu0 %vm11008_vm6, %v23087_v56 }
0x1ab2   :  { %21456 = vmatprep.mubr.msk.bf16.mxu0 %vm11008_vm6, %v23088_v20 }
0x1ab9   :  { %21457 = vmatmul.mubr.msk.bf16.vlgmr.msra.gmra.mrb[88].mxu0 %vm11008_vm6, %v23089_v38 }
0x1aba   :  { %21485 = vmatpush3.bf16.msra.mxu0 %v26551_v21  ;;  %21460 = vmatprep.mubr.msk.bf16.mxu0 %vm11008_vm6, %v23090_v46  ;;  %v23093_v21 = vld [vmem:[%s27434_s7 + $0x2a8] sm:$0xff]  }
0x1abb   :  { %21486 = vmatprep.subr.bf16.mxu0 %v26545_v48 }
0x1abe   :  { %21487 = vmatpush3.bf16.msra.mxu0 %v26545_v48  ;;  %v23094_v48 = vld [vmem:[%s27434_s7 + $0x2b0] sm:$0xff]  }
0x1abf   :  { %21488 = vmatprep.subr.bf16.mxu0 %v26563_v51 }
0x1ac1   :  { %21461 = vmatmul.mubr.msk.bf16.gmra.mrb[92].mxu0 %vm11008_vm6, %v23091_v24 }
0x1ac2   :  { %21489 = vmatpush3.bf16.msra.mxu0 %v26563_v51  ;;  %21464 = vmatprep.mubr.msk.bf16.mxu0 %vm11008_vm6, %v23092_v26  ;;  %v23095_v51 = vld [vmem:[%s27434_s7 + $0x2b8] sm:$0xff]  }
0x1ac3   :  { %21490 = vmatprep.subr.bf16.mxu0 %v26558_v34 }
0x1ac6   :  { %21491 = vmatpush3.bf16.msra.mxu0 %v26558_v34  ;;  %v23097_v34 = vld [vmem:[%s27434_s7 + $0x2c8] sm:$0xff]  }
0x1ac7   :  { %21520 = vmatprep.subr.bf16.mxu0 %v26575_v63 }
0x1ac9   :  { %21465 = vmatmul.mubr.msk.bf16.gmra.mrb[96].mxu0 %vm11008_vm6, %v23093_v21 }
0x1aca   :  { %21468 = vmatprep.mubr.msk.bf16.mxu0 %vm11008_vm6, %v23094_v48 }
0x1ad1   :  { %21469 = vmatmul.mubr.msk.bf16.gmra.mrb[100].mxu0 %vm11008_vm6, %v23095_v51 }
0x1ad2   :  { %21492 = vmatprep.mubr.msk.bf16.mxu0 %vm11008_vm6, %v23096_v42 }
0x1ad9   :  { %21493 = vmatmul.mubr.msk.bf16.vlgmr.msra.gmra.mrb[88].mxu0 %vm11008_vm6, %v23097_v34 }
0x1ada   :  { %21521 = vmatpush3.bf16.msra.mxu0 %v26575_v63  ;;  %21496 = vmatprep.mubr.msk.bf16.mxu0 %vm11008_vm6, %v23098_v37  ;;  %v23101_v63 = vld [vmem:[%s27434_s7 + $0x2e8] sm:$0xff]  }
0x1adb   :  { %21522 = vmatprep.subr.bf16.mxu0 %v26570_v2 }
0x1ade   :  { %21523 = vmatpush3.bf16.msra.mxu0 %v26570_v2  ;;  %v23102_v2 = vld [vmem:[%s27434_s7 + $0x2f0] sm:$0xff]  }
0x1adf   :  { %21524 = vmatprep.subr.bf16.mxu0 %v26591_v19 }
0x1ae1   :  { %21497 = vmatmul.mubr.msk.bf16.gmra.mrb[92].mxu0 %vm11008_vm6, %v23099_v60 }
0x1ae2   :  { %21525 = vmatpush3.bf16.msra.mxu0 %v26591_v19  ;;  %21500 = vmatprep.mubr.msk.bf16.mxu0 %vm11008_vm6, %v23100_v41  ;;  %v23103_v19 = vld [vmem:[%s27434_s7 + $0x2f8] sm:$0xff]  }
0x1ae3   :  { %21526 = vmatprep.subr.bf16.mxu0 %v26585_v57 }
0x1ae6   :  { %21527 = vmatpush3.bf16.msra.mxu0 %v26585_v57  ;;  %v23105_v57 = vld [vmem:[%s27434_s7 + $0x308] sm:$0xff]  }
0x1ae7   :  { %21556 = vmatprep.subr.bf16.mxu0 %v26607_v23 }
0x1ae9   :  { %21501 = vmatmul.mubr.msk.bf16.gmra.mrb[96].mxu0 %vm11008_vm6, %v23101_v63 }
0x1aea   :  { %21504 = vmatprep.mubr.msk.bf16.mxu0 %vm11008_vm6, %v23102_v2 }
0x1af1   :  { %21505 = vmatmul.mubr.msk.bf16.gmra.mrb[100].mxu0 %vm11008_vm6, %v23103_v19 }
0x1af2   :  { %21528 = vmatprep.mubr.msk.bf16.mxu0 %vm11008_vm6, %v23104_v14 }
0x1af9   :  { %21529 = vmatmul.mubr.msk.bf16.vlgmr.msra.gmra.mrb[88].mxu0 %vm11008_vm6, %v23105_v57 }
0x1afa   :  { %21557 = vmatpush3.bf16.msra.mxu0 %v26607_v23  ;;  %21532 = vmatprep.mubr.msk.bf16.mxu0 %vm11008_vm6, %v23106_v61  ;;  %v23109_v23 = vld [vmem:[%s27434_s7 + $0x328] sm:$0xff]  }
0x1afb   :  { %21558 = vmatprep.subr.bf16.mxu0 %v26601_v33 }
0x1afe   :  { %21559 = vmatpush3.bf16.msra.mxu0 %v26601_v33  ;;  %v23110_v33 = vld [vmem:[%s27434_s7 + $0x330] sm:$0xff]  }
0x1aff   :  { %21560 = vmatprep.subr.bf16.mxu0 %v26619_v62 }
0x1b01   :  { %21533 = vmatmul.mubr.msk.bf16.gmra.mrb[92].mxu0 %vm11008_vm6, %v23107_v50 }
0x1b02   :  { %21561 = vmatpush3.bf16.msra.mxu0 %v26619_v62  ;;  %21536 = vmatprep.mubr.msk.bf16.mxu0 %vm11008_vm6, %v23108_v55  ;;  %v23111_v62 = vld [vmem:[%s27434_s7 + $0x338] sm:$0xff]  }
0x1b03   :  { %21562 = vmatprep.subr.bf16.mxu0 %v26614_v52 }
0x1b06   :  { %21563 = vmatpush3.bf16.msra.mxu0 %v26614_v52  ;;  %v23113_v52 = vld [vmem:[%s27434_s7 + $0x348] sm:$0xff]  }
0x1b07   :  { %21592 = vmatprep.subr.bf16.mxu0 %v26631_v29 }
0x1b09   :  { %21537 = vmatmul.mubr.msk.bf16.gmra.mrb[96].mxu0 %vm11008_vm6, %v23109_v23 }
0x1b0a   :  { %21540 = vmatprep.mubr.msk.bf16.mxu0 %vm11008_vm6, %v23110_v33 }
0x1b11   :  { %21541 = vmatmul.mubr.msk.bf16.gmra.mrb[100].mxu0 %vm11008_vm6, %v23111_v62 }
0x1b12   :  { %21564 = vmatprep.mubr.msk.bf16.mxu0 %vm11008_vm6, %v23112_v16 }
0x1b19   :  { %21565 = vmatmul.mubr.msk.bf16.vlgmr.msra.gmra.mrb[88].mxu0 %vm11008_vm6, %v23113_v52 }
0x1b1a   :  { %21593 = vmatpush3.bf16.msra.mxu0 %v26631_v29  ;;  %21568 = vmatprep.mubr.msk.bf16.mxu0 %vm11008_vm6, %v23114_v9  ;;  %v23117_v29 = vld [vmem:[%s27434_s7 + $0x368] sm:$0xff]  }
0x1b1b   :  { %21594 = vmatprep.subr.bf16.mxu0 %v26626_v0 }
0x1b1e   :  { %21595 = vmatpush3.bf16.msra.mxu0 %v26626_v0  ;;  %v23118_v0 = vld [vmem:[%s27434_s7 + $0x370] sm:$0xff]  }
0x1b1f   :  { %21596 = vmatprep.subr.bf16.mxu0 %v26647_v5 }
0x1b21   :  { %21569 = vmatmul.mubr.msk.bf16.gmra.mrb[92].mxu0 %vm11008_vm6, %v23115_v58 }
0x1b22   :  { %21597 = vmatpush3.bf16.msra.mxu0 %v26647_v5  ;;  %21572 = vmatprep.mubr.msk.bf16.mxu0 %vm11008_vm6, %v23116_v30  ;;  %v23119_v5 = vld [vmem:[%s27434_s7 + $0x378] sm:$0xff]  }
0x1b23   :  { %21598 = vmatprep.subr.bf16.mxu0 %v26641_v35 }
0x1b26   :  { %21599 = vmatpush3.bf16.msra.mxu0 %v26641_v35  ;;  %v23121_v35 = vld [vmem:[%s27434_s7 + $0x388] sm:$0xff]  }
0x1b27   :  { %21628 = vmatprep.subr.bf16.mxu0 %v26663_v25 }
0x1b29   :  { %21573 = vmatmul.mubr.msk.bf16.gmra.mrb[96].mxu0 %vm11008_vm6, %v23117_v29 }
0x1b2a   :  { %21576 = vmatprep.mubr.msk.bf16.mxu0 %vm11008_vm6, %v23118_v0 }
0x1b31   :  { %21577 = vmatmul.mubr.msk.bf16.gmra.mrb[100].mxu0 %vm11008_vm6, %v23119_v5 }
0x1b32   :  { %21600 = vmatprep.mubr.msk.bf16.mxu0 %vm11008_vm6, %v23120_v54 }
0x1b39   :  { %21601 = vmatmul.mubr.msk.bf16.vlgmr.msra.gmra.mrb[88].mxu0 %vm11008_vm6, %v23121_v35 }
0x1b3a   :  { %21629 = vmatpush3.bf16.msra.mxu0 %v26663_v25  ;;  %21604 = vmatprep.mubr.msk.bf16.mxu0 %vm11008_vm6, %v23122_v11  ;;  %v23125_v25 = vld [vmem:[%s27434_s7 + $0x3a8] sm:$0xff]  }
0x1b3b   :  { %21630 = vmatprep.subr.bf16.mxu0 %v26657_v22 }
0x1b3e   :  { %21631 = vmatpush3.bf16.msra.mxu0 %v26657_v22  ;;  %v23126_v22 = vld [vmem:[%s27434_s7 + $0x3b0] sm:$0xff]  }
0x1b3f   :  { %21632 = vmatprep.subr.bf16.mxu0 %v26675_v12 }
0x1b41   :  { %21605 = vmatmul.mubr.msk.bf16.gmra.mrb[92].mxu0 %vm11008_vm6, %v23123_v53 }
0x1b42   :  { %21633 = vmatpush3.bf16.msra.mxu0 %v26675_v12  ;;  %21608 = vmatprep.mubr.msk.bf16.mxu0 %vm11008_vm6, %v23124_v32  ;;  %v23127_v12 = vld [vmem:[%s27434_s7 + $0x3b8] sm:$0xff]  }
0x1b43   :  { %21634 = vmatprep.subr.bf16.mxu0 %v26670_v27 }
0x1b46   :  { %21635 = vmatpush3.bf16.msra.mxu0 %v26670_v27  ;;  %v23129_v27 = vld [vmem:[%s27434_s7 + $0x3c8] sm:$0xff]  }
0x1b49   :  { %21609 = vmatmul.mubr.msk.bf16.gmra.mrb[96].mxu0 %vm11008_vm6, %v23125_v25 }
0x1b4a   :  { %21612 = vmatprep.mubr.msk.bf16.mxu0 %vm11008_vm6, %v23126_v22 }
0x1b51   :  { %21613 = vmatmul.mubr.msk.bf16.gmra.mrb[100].mxu0 %vm11008_vm6, %v23127_v12 }
0x1b52   :  { %21636 = vmatprep.mubr.msk.bf16.mxu0 %vm11008_vm6, %v23128_v59  ;;  %v15524_v59 = vld [vmem:[%s27435_s8] sm:$0xf] }
0x1b53   :  { %22224 = vmatprep.subr.msk.bf16.mxu1 %vm15549_vm8, %v15524_v59 }
0x1b59   :  { %21637 = vmatmul.mubr.msk.bf16.vlgmr.msra.gmra.mrb[88].mxu0 %vm11008_vm6, %v23129_v27  ;;  %v15551_v27 = vsel %vm15549_vm8, %v15524_v59, 0 }
0x1b5a   :  { %21640 = vmatprep.mubr.msk.bf16.mxu0 %vm11008_vm6, %v23130_v47  ;;  %21653 = vmatpush3.bf16.msra.mxu1 %v15551_v27 }
0x1b61   :  { %21641 = vmatmul.mubr.msk.bf16.gmra.mrb[92].mxu0 %vm11008_vm6, %v23131_v44 }
0x1b62   :  { %21644 = vmatprep.mubr.msk.bf16.mxu0 %vm11008_vm6, %v23132_v43 }
0x1b69   :  { %21645 = vmatmul.mubr.msk.bf16.gmra.mrb[96].mxu0 %vm11008_vm6, %v23133_v1 }
0x1b6a   :  { %21648 = vmatprep.mubr.msk.bf16.mxu0 %vm11008_vm6, %v23134_v10 }
0x1b71   :  { %21649 = vmatmul.mubr.msk.bf16.gmra.mrb[100].mxu0 %vm11008_vm6, %v23135_v13 }
0x1c2c   :  { %v27026_v36 = vpop.f32.mrb[88].mxu0 }
0x1c2d   :  { %v27028_v7 = vpop.f32.mrb[89].mxu0  ;;  %v15218_v28 = vsel %vm15211_vm7, %v27026_v36, 0.0  ;;  %v15262_v40 = vmul.f32 %v27026_v36, %v27026_v36 }
0x1c2e   :  { %15219 = vadd.xlane.f32.xlu0 %v15218_v28  ;;  %v27032_v15 = vpop.f32.mrb[90].mxu0  ;;  %v15212_v31 = vsel %vm15211_vm7, %v27028_v7, 0.0  ;;  %v15260_v4 = vmul.f32 %v27028_v7, %v27028_v7 }
0x1c2f   :  { %v27034_v39 = vpop.f32.mrb[91].mxu0  ;;  %v15221_v6 = vsel %vm15211_vm7, %v27032_v15, 0.0  ;;  %v15263_v49 = vmul.f32 %v27032_v15, %v27032_v15  ;;  %v15282_v8 = vsel %vm15211_vm7, %v15262_v40, 0.0 }
0x1c30   :  { %15222 = vadd.xlane.f32.xlu1 %v15221_v6  ;;  %v15215_v17 = vsel %vm15211_vm7, %v27034_v39, 0.0  ;;  %v15261_v38 = vmul.f32 %v27034_v39, %v27034_v39  ;;  %v15276_v46 = vsel %vm15211_vm7, %v15260_v4, 0.0 }
0x1c31   :  { %v15285_v20 = vsel %vm15211_vm7, %v15263_v49, 0.0 }
0x1c32   :  { %15213 = vadd.xlane.f32.xlu0 %v15212_v31  ;;  %v15279_v24 = vsel %vm15211_vm7, %v15261_v38, 0.0  ;;  %v27146_v31 = vld [vmem:[%s27435_s8 + $0x4] sm:$0xf] }
0x1c33   :  { %22225 = vmatprep.subr.msk.bf16.mxu1 %vm15549_vm8, %v27146_v31 }
0x1c34   :  { %15216 = vadd.xlane.f32.xlu1 %v15215_v17  ;;  %v27046_v18 = vpop.f32.mrb[92].mxu0 }
0x1c35   :  { %v27048_v3 = vpop.f32.mrb[93].mxu0  ;;  %v15230_v48 = vsel %vm15211_vm7, %v27046_v18, 0.0  ;;  %v15266_v60 = vmul.f32 %v27046_v18, %v27046_v18 }
0x1c36   :  { %15283 = vadd.xlane.f32.xlu0 %v15282_v8  ;;  %v27053_v45 = vpop.f32.mrb[94].mxu0  ;;  %v15224_v37 = vsel %vm15211_vm7, %v27048_v3, 0.0  ;;  %v15264_v57 = vmul.f32 %v27048_v3, %v27048_v3 }
0x1c37   :  { %v27055_v56 = vpop.f32.mrb[95].mxu0  ;;  %v15233_v34 = vsel %vm15211_vm7, %v27053_v45, 0.0  ;;  %v15267_v63 = vmul.f32 %v27053_v45, %v27053_v45  ;;  %v15294_v14 = vsel %vm15211_vm7, %v15266_v60, 0.0 }
0x1c38   :  { %15286 = vadd.xlane.f32.xlu1 %v15285_v20  ;;  %v15227_v41 = vsel %vm15211_vm7, %v27055_v56, 0.0  ;;  %v15265_v23 = vmul.f32 %v27055_v56, %v27055_v56  ;;  %v15288_v33 = vsel %vm15211_vm7, %v15264_v57, 0.0 }
0x1c39   :  { %v15297_v55 = vsel %vm15211_vm7, %v15267_v63, 0.0 }
0x1c3a   :  { %15277 = vadd.xlane.f32.xlu0 %v15276_v46  ;;  %v15291_v62 = vsel %vm15211_vm7, %v15265_v23, 0.0 }
0x1c3c   :  { %15280 = vadd.xlane.f32.xlu1 %v15279_v24  ;;  %v27062_v26 = vpop.f32.mrb[96].mxu0 }
0x1c3d   :  { %v27064_v21 = vpop.f32.mrb[97].mxu0  ;;  %v15242_v16 = vsel %vm15211_vm7, %v27062_v26, 0.0  ;;  %v15270_v58 = vmul.f32 %v27062_v26, %v27062_v26 }
0x1c3e   :  { %15231 = vadd.xlane.f32.xlu0 %v15230_v48  ;;  %v27068_v51 = vpop.f32.mrb[98].mxu0  ;;  %v15236_v9 = vsel %vm15211_vm7, %v27064_v21, 0.0  ;;  %v15268_v5 = vmul.f32 %v27064_v21, %v27064_v21 }
0x1c3f   :  { %v27070_v42 = vpop.f32.mrb[99].mxu0  ;;  %v15245_v52 = vsel %vm15211_vm7, %v27068_v51, 0.0  ;;  %v15271_v29 = vmul.f32 %v27068_v51, %v27068_v51  ;;  %v15306_v0 = vsel %vm15211_vm7, %v15270_v58, 0.0 }
0x1c40   :  { %15234 = vadd.xlane.f32.xlu1 %v15233_v34  ;;  %v15239_v30 = vsel %vm15211_vm7, %v27070_v42, 0.0  ;;  %v15269_v35 = vmul.f32 %v27070_v42, %v27070_v42  ;;  %v15300_v11 = vsel %vm15211_vm7, %v15268_v5, 0.0 }
0x1c41   :  { %v15309_v54 = vsel %vm15211_vm7, %v15271_v29, 0.0 }
0x1c42   :  { %15225 = vadd.xlane.f32.xlu0 %v15224_v37  ;;  %v15303_v53 = vsel %vm15211_vm7, %v15269_v35, 0.0 }
0x1c44   :  { %15228 = vadd.xlane.f32.xlu1 %v15227_v41  ;;  %v27082_v2 = vpop.f32.mrb[100].mxu0 }
0x1c45   :  { %v27084_v19 = vpop.f32.mrb[101].mxu0  ;;  %v15254_v32 = vsel %vm15211_vm7, %v27082_v2, 0.0  ;;  %v15274_v1 = vmul.f32 %v27082_v2, %v27082_v2 }
0x1c46   :  { %15295 = vadd.xlane.f32.xlu0 %v15294_v14  ;;  %v27089_v61 = vpop.f32.mrb[102].mxu0  ;;  %v15248_v22 = vsel %vm15211_vm7, %v27084_v19, 0.0  ;;  %v15272_v12 = vmul.f32 %v27084_v19, %v27084_v19 }
0x1c47   :  { %v27091_v50 = vpop.f32.mrb[103].mxu0  ;;  %v15257_v25 = vsel %vm15211_vm7, %v27089_v61, 0.0  ;;  %v15275_v13 = vmul.f32 %v27089_v61, %v27089_v61  ;;  %v15318_v28 = vsel %vm15211_vm7, %v15274_v1, 0.0 }
0x1c48   :  { %15298 = vadd.xlane.f32.xlu1 %v15297_v55  ;;  %v15273_v47 = vmul.f32 %v27091_v50, %v27091_v50  ;;  %v15251_v44 = vsel %vm15211_vm7, %v27091_v50, 0.0  ;;  %v15312_v43 = vsel %vm15211_vm7, %v15272_v12, 0.0 }
0x1c49   :  { %v15321_v6 = vsel %vm15211_vm7, %v15275_v13, 0.0 }
0x1c4a   :  { %15289 = vadd.xlane.f32.xlu0 %v15288_v33  ;;  %v15315_v10 = vsel %vm15211_vm7, %v15273_v47, 0.0 }
0x1c4c   :  { %15292 = vadd.xlane.f32.xlu1 %v15291_v62 }
0x1c4e   :  { %15243 = vadd.xlane.f32.xlu0 %v15242_v16 }
0x1c50   :  { %15246 = vadd.xlane.f32.xlu1 %v15245_v52 }
0x1c52   :  { %15237 = vadd.xlane.f32.xlu0 %v15236_v9 }
0x1c54   :  { %15240 = vadd.xlane.f32.xlu1 %v15239_v30 }
0x1c56   :  { %15307 = vadd.xlane.f32.xlu0 %v15306_v0 }
0x1c58   :  { %15310 = vadd.xlane.f32.xlu1 %v15309_v54 }
0x1c5a   :  { %15301 = vadd.xlane.f32.xlu0 %v15300_v11 }
0x1c5c   :  { %15304 = vadd.xlane.f32.xlu1 %v15303_v53 }
0x1c5e   :  { %15255 = vadd.xlane.f32.xlu0 %v15254_v32 }
0x1c60   :  { %15258 = vadd.xlane.f32.xlu1 %v15257_v25 }
0x1c62   :  { %15249 = vadd.xlane.f32.xlu0 %v15248_v22 }
0x1c64   :  { %15252 = vadd.xlane.f32.xlu1 %v15251_v44 }
0x1c66   :  { %15313 = vadd.xlane.f32.xlu0 %v15312_v43 }
0x1c68   :  { %15316 = vadd.xlane.f32.xlu1 %v15315_v10 }
0x1c6a   :  { %15319 = vadd.xlane.f32.xlu0 %v15318_v28 }
0x1c6c   :  { %15322 = vadd.xlane.f32.xlu1 %v15321_v6 }
0x1cbb   :  { %v15220_v40 = vpop.xlane.xlu0 %15219 }
0x1cbc   :  { %v15326_v8 = vmul.f32 0.125, %v15220_v40 }
0x1cbd   :  { %v15223_v17 = vpop.xlane.xlu1 %15222 }
0x1cbe   :  { %v15327_v20 = vmul.f32 0.125, %v15223_v17  ;;  %v15358_v46 = vmul.f32 %v15326_v8, %v15326_v8  ;;  %v15406_v1 = vsub.f32 %v27026_v36, %v15326_v8 }
0x1cbf   :  { %v15214_v49 = vpop.xlane.xlu0 %15213 }
0x1cc0   :  { %v27150_v24 = vmul.f32 0.125, %v15214_v49  ;;  %v15359_v60 = vmul.f32 %v15327_v20, %v15327_v20  ;;  %v15407_v49 = vsub.f32 %v27032_v15, %v15327_v20 }
0x1cc1   :  { %v15217_v4 = vpop.xlane.xlu1 %15216 }
0x1cc2   :  { %v27152_v34 = vmul.f32 0.125, %v15217_v4  ;;  %v15356_v57 = vmul.f32 %v27150_v24, %v27150_v24  ;;  %v15404_v4 = vsub.f32 %v27028_v7, %v27150_v24 }
0x1cc3   :  { %v15284_v38 = vpop.xlane.xlu0 %15283 }
0x1cc4   :  { %v15342_v48 = vmul.f32 0.125, %v15284_v38  ;;  %v15357_v62 = vmul.f32 %v27152_v34, %v27152_v34 }
0x1cc5   :  { %v15287_v37 = vpop.xlane.xlu1 %15286 }
0x1cc6   :  { %v15374_v41 = vsub.f32 %v15342_v48, %v15358_v46  ;;  %v15343_v63 = vmul.f32 0.125, %v15287_v37 }
0x1cc7   :  { %v15278_v14 = vpop.xlane.xlu0 %15277 }
0x1cc8   :  { %v15390_v55 = vmax.f32 %v15374_v41, 0.0  ;;  %v15375_v23 = vsub.f32 %v15343_v63, %v15359_v60  ;;  %v15340_v33 = vmul.f32 0.125, %v15278_v14 }
0x1cc9   :  { %v15281_v16 = vpop.xlane.xlu1 %15280 }
0x1cca   :  { %v15422_v52 = vadd.f32 1e-05, %v15390_v55  ;;  %v15391_v9 = vmax.f32 %v15375_v23, 0.0  ;;  %v15372_v58 = vsub.f32 %v15340_v33, %v15356_v57  ;;  %v15341_v30 = vmul.f32 0.125, %v15281_v16 }
0x1ccb   :  { %v15232_v29 = vpop.xlane.xlu0 %15231  ;;  %v15405_v23 = vsub.f32 %v27034_v39, %v27152_v34 }
0x1ccc   :  { %23164 = vrsqrt.f32 %v15422_v52  ;;  %v15423_v0 = vadd.f32 1e-05, %v15391_v9  ;;  %v15388_v5 = vmax.f32 %v15372_v58, 0.0  ;;  %v15373_v54 = vsub.f32 %v15341_v30, %v15357_v62 }
0x1ccd   :  { %v15235_v35 = vpop.xlane.xlu1 %15234  ;;  %v27158_v22 = vmul.f32 0.125, %v15232_v29 }
0x1cce   :  { %23166 = vrsqrt.f32 %v15423_v0  ;;  %v15420_v11 = vadd.f32 1e-05, %v15388_v5  ;;  %v15389_v53 = vmax.f32 %v15373_v54, 0.0  ;;  %v27160_v59 = vmul.f32 0.125, %v15235_v35 }
0x1ccf   :  { %v15226_v32 = vpop.xlane.xlu0 %15225  ;;  %v15362_v47 = vmul.f32 %v27158_v22, %v27158_v22 }
0x1cd0   :  { %23168 = vrsqrt.f32 %v15420_v11  ;;  %v15421_v25 = vadd.f32 1e-05, %v15389_v53  ;;  %v27164_v44 = vmul.f32 0.125, %v15226_v32  ;;  %v15363_v6 = vmul.f32 %v27160_v59, %v27160_v59 }
0x1cd1   :  { %v15229_v12 = vpop.xlane.xlu1 %15228 }
0x1cd2   :  { %23170 = vrsqrt.f32 %v15421_v25  ;;  %v27167_v10 = vmul.f32 0.125, %v15229_v12  ;;  %v15360_v36 = vmul.f32 %v27164_v44, %v27164_v44 }
0x1cd3   :  { %v15296_v27 = vpop.xlane.xlu0 %15295 }
0x1cd4   :  { %v15346_v43 = vmul.f32 0.125, %v15296_v27  ;;  %v15361_v14 = vmul.f32 %v27167_v10, %v27167_v10 }
0x1cd5   :  { %v15299_v13 = vpop.xlane.xlu1 %15298 }
0x1cd6   :  { %v23165_v28 = vpop.eup %23164  ;;  %v15378_v40 = vsub.f32 %v15346_v43, %v15362_v47  ;;  %v15347_v17 = vmul.f32 0.125, %v15299_v13 }
0x1cd7   :  { %v15454_v38 = vmul.f32 %v23165_v28, %v15406_v1  ;;  %v15290_v46 = vpop.xlane.xlu0 %15289 }
0x1cd8   :  { %v23167_v48 = vpop.eup %23166  ;;  %v15394_v8 = vmax.f32 %v15378_v40, 0.0  ;;  %v15379_v37 = vsub.f32 %v15347_v17, %v15363_v6  ;;  %v15344_v60 = vmul.f32 0.125, %v15290_v46  ;;  %v15662_v46 = vsel %vm15549_vm8, %v27146_v31, 0 }
0x1cd9   :  { %vm15470_vm9 = vcmp.ge.f32.partialorder %v15454_v38, 0.0  ;;  %v15486_v41 = vmul.f32 0.01, %v15454_v38  ;;  %v15455_v63 = vmul.f32 %v23167_v48, %v15407_v49  ;;  %v15293_v57 = vpop.xlane.xlu1 %15292  ;;  %v15410_v49 = vsub.f32 %v27046_v18, %v27158_v22 }
0x1cda   :  { %v23169_v15 = vpop.eup %23168  ;;  %v15426_v20 = vadd.f32 1e-05, %v15394_v8  ;;  %v15395_v55 = vmax.f32 %v15379_v37, 0.0  ;;  %v15376_v7 = vsub.f32 %v15344_v60, %v15360_v36  ;;  %v15345_v24 = vmul.f32 0.125, %v15293_v57 }
0x1cdb   :  { %vm15471_vm10 = vcmp.ge.f32.partialorder %v15455_v63, 0.0  ;;  %v15487_v33 = vmul.f32 0.01, %v15455_v63  ;;  %v15244_v62 = vpop.xlane.xlu0 %15243  ;;  %v15452_v16 = vmul.f32 %v23169_v15, %v15404_v4  ;;  %v15502_v29 = vsel %vm15470_vm9, %v15454_v38, %v15486_v41 }
0x1cdc   :  { %v23171_v52 = vpop.eup %23170  ;;  %23172 = vrsqrt.f32 %v15426_v20  ;;  %v15427_v9 = vadd.f32 1e-05, %v15395_v55  ;;  %v15392_v58 = vmax.f32 %v15376_v7, 0.0  ;;  %v15377_v30 = vsub.f32 %v15345_v24, %v15361_v14 }
0x1cdd   :  { %v15503_v0 = vsel %vm15471_vm10, %v15455_v63, %v15487_v33  ;;  %v15247_v5 = vpop.xlane.xlu1 %15246  ;;  %v15453_v54 = vmul.f32 %v23171_v52, %v15405_v23  ;;  %v27183_v39 = vmul.f32 0.125, %v15244_v62  ;;  %vm15468_vm11 = vcmp.ge.f32.partialorder %v15452_v16, 0.0 }
0x1cde   :  { %v27181_v35 = vpack.c.bf16 %v15503_v0, %v15502_v29  ;;  %23174 = vrsqrt.f32 %v15427_v9  ;;  %v15424_v11 = vadd.f32 1e-05, %v15392_v58  ;;  %v15393_v53 = vmax.f32 %v15377_v30, 0.0 }
0x1cdf   :  { %v15238_v34 = vpop.xlane.xlu0 %15237  ;;  %vm15469_vm12 = vcmp.ge.f32.partialorder %v15453_v54, 0.0  ;;  %v15484_v25 = vmul.f32 0.01, %v15452_v16  ;;  %v15485_v27 = vmul.f32 0.01, %v15453_v54  ;;  %v27185_v47 = vmul.f32 0.125, %v15247_v5 }
0x1ce0   :  { %23176 = vrsqrt.f32 %v15424_v11  ;;  %v15425_v32 = vadd.f32 1e-05, %v15393_v53  ;;  %v15366_v28 = vmul.f32 %v27183_v39, %v27183_v39  ;;  %v27189_v6 = vmul.f32 0.125, %v15238_v34 }
0x1ce1   :  { %v15241_v12 = vpop.xlane.xlu1 %15240  ;;  %v15500_v1 = vsel %vm15468_vm11, %v15452_v16, %v15484_v25  ;;  %v15501_v13 = vsel %vm15469_vm12, %v15453_v54, %v15485_v27  ;;  %v15367_v36 = vmul.f32 %v27185_v47, %v27185_v47  ;;  %v15411_v60 = vsub.f32 %v27053_v45, %v27160_v59 }
0x1ce2   :  { %23178 = vrsqrt.f32 %v15425_v32  ;;  %v27191_v17 = vpack.c.bf16 %v15501_v13, %v15500_v1  ;;  %v27195_v4 = vmul.f32 0.125, %v15241_v12  ;;  %v15408_v18 = vsub.f32 %v27048_v3, %v27164_v44 }
0x1ce3   :  { %v15308_v43 = vpop.xlane.xlu0 %15307  ;;  %v15364_v63 = vmul.f32 %v27189_v6, %v27189_v6  ;;  %v15409_v33 = vsub.f32 %v27055_v56, %v27167_v10  ;;  %vm23226_vm11 = vmmov 0  }
0x1ce4   :  { %v15350_v40 = vmul.f32 0.125, %v15308_v43  ;;  %21654 = vmatprep.mubr.msk.bf16.mxu1 %vm15211_vm7, %v27191_v17  ;;  %v15365_v45 = vmul.f32 %v27195_v4, %v27195_v4 }
0x1ce5   :  { %v15311_v38 = vpop.xlane.xlu1 %15310  ;;  %21655 = vmatmul.mubr.msk.bf16.vlgmr.msra.gmra.mrb[8].mxu1 %vm15211_vm7, %v27181_v35 }
0x1ce6   :  { %v23173_v48 = vpop.eup %23172  ;;  %v15382_v8 = vsub.f32 %v15350_v40, %v15366_v28  ;;  %v15351_v37 = vmul.f32 0.125, %v15311_v38  ;;  %21671 = vmatpush3.bf16.msra.mxu1 %v15662_v46 }
0x1ce7   :  { %v15458_v22 = vmul.f32 %v23173_v48, %v15410_v49  ;;  %v15302_v31 = vpop.xlane.xlu0 %15301 }
0x1ce8   :  { %v23175_v41 = vpop.eup %23174  ;;  %v15398_v14 = vmax.f32 %v15382_v8, 0.0  ;;  %v15383_v57 = vsub.f32 %v15351_v37, %v15367_v36  ;;  %v15348_v15 = vmul.f32 0.125, %v15302_v31  ;;  %v15414_v36 = vsub.f32 %v27062_v26, %v27183_v39 }
0x1ce9   :  { %vm15474_vm13 = vcmp.ge.f32.partialorder %v15458_v22, 0.0  ;;  %v15490_v20 = vmul.f32 0.01, %v15458_v22  ;;  %v15459_v55 = vmul.f32 %v23175_v41, %v15411_v60  ;;  %v15305_v3 = vpop.xlane.xlu1 %15304  ;;  %v15415_v41 = vsub.f32 %v27068_v51, %v27185_v47 }
0x1cea   :  { %v23177_v59 = vpop.eup %23176  ;;  %v15430_v44 = vadd.f32 1e-05, %v15398_v14  ;;  %v15399_v7 = vmax.f32 %v15383_v57, 0.0  ;;  %v15380_v24 = vsub.f32 %v15348_v15, %v15364_v63  ;;  %v15349_v23 = vmul.f32 0.125, %v15305_v3 }
0x1ceb   :  { %vm15475_vm14 = vcmp.ge.f32.partialorder %v15459_v55, 0.0  ;;  %v15491_v62 = vmul.f32 0.01, %v15459_v55  ;;  %v15256_v16 = vpop.xlane.xlu0 %15255  ;;  %v15456_v52 = vmul.f32 %v23177_v59, %v15408_v18  ;;  %v15506_v0 = vsel %vm15474_vm13, %v15458_v22, %v15490_v20 }
0x1cec   :  { %v23179_v9 = vpop.eup %23178  ;;  %23180 = vrsqrt.f32 %v15430_v44  ;;  %v15431_v58 = vadd.f32 1e-05, %v15399_v7  ;;  %v15396_v30 = vmax.f32 %v15380_v24, 0.0  ;;  %v15381_v29 = vsub.f32 %v15349_v23, %v15365_v45 }
0x1ced   :  { %v15507_v5 = vsel %vm15475_vm14, %v15459_v55, %v15491_v62  ;;  %v15259_v54 = vpop.xlane.xlu1 %15258  ;;  %v15457_v11 = vmul.f32 %v23179_v9, %v15409_v33  ;;  %vm15472_vm15 = vcmp.ge.f32.partialorder %v15456_v52, 0.0  ;;  %v15488_v12 = vmul.f32 0.01, %v15456_v52 }
0x1cee   :  { %v27216_v53 = vpack.c.bf16 %v15507_v5, %v15506_v0  ;;  %23182 = vrsqrt.f32 %v15431_v58  ;;  %v15428_v34 = vadd.f32 1e-05, %v15396_v30  ;;  %v15397_v32 = vmax.f32 %v15381_v29, 0.0 }
0x1cef   :  { %v15250_v56 = vpop.xlane.xlu0 %15249  ;;  %vm15473_vm0 = vcmp.ge.f32.partialorder %v15457_v11, 0.0  ;;  %v15489_v43 = vmul.f32 0.01, %v15457_v11  ;;  %v15504_v28 = vsel %vm15472_vm15, %v15456_v52, %v15488_v12  ;;  %v27222_v49 = vmul.f32 0.125, %v15256_v16 }
0x1cf0   :  { %23184 = vrsqrt.f32 %v15428_v34  ;;  %v15429_v10 = vadd.f32 1e-05, %v15397_v32  ;;  %v27218_v25 = vmul.f32 0.125, %v15250_v56  ;;  %v27230_v8 = vmul.f32 0.125, %v15259_v54 }
0x1cf1   :  { %v15253_v27 = vpop.xlane.xlu1 %15252  ;;  %v15505_v40 = vsel %vm15473_vm0, %v15457_v11, %v15489_v43  ;;  %v15412_v63 = vsub.f32 %v27064_v21, %v27189_v6  ;;  %v15413_v26 = vsub.f32 %v27070_v42, %v27195_v4  ;;  %v15370_v15 = vmul.f32 %v27222_v49, %v27222_v49 }
0x1cf2   :  { %23186 = vrsqrt.f32 %v15429_v10  ;;  %v27220_v1 = vmul.f32 0.125, %v15253_v27  ;;  %v15368_v38 = vmul.f32 %v27218_v25, %v27218_v25  ;;  %v27226_v48 = vpack.c.bf16 %v15505_v40, %v15504_v28 }
0x1cf3   :  { %v15314_v13 = vpop.xlane.xlu0 %15313  ;;  %v15371_v21 = vmul.f32 %v27230_v8, %v27230_v8  ;;  %v15416_v10 = vsub.f32 %v27084_v19, %v27218_v25  ;;  %v15418_v28 = vsub.f32 %v27082_v2, %v27222_v49 }
0x1cf4   :  { %v15352_v46 = vmul.f32 0.125, %v15314_v13  ;;  %v15369_v18 = vmul.f32 %v27220_v1, %v27220_v1  ;;  %21658 = vmatprep.mubr.msk.bf16.mxu1 %vm15211_vm7, %v27226_v48  ;;  %v15417_v27 = vsub.f32 %v27091_v50, %v27220_v1 }
0x1cf5   :  { %v15317_v37 = vpop.xlane.xlu1 %15316  ;;  %21659 = vmatmul.mubr.msk.bf16.gmra.mrb[12].mxu1 %vm15211_vm7, %v27216_v53 }
0x1cf6   :  { %v23181_v60 = vpop.eup %23180  ;;  %v15384_v22 = vsub.f32 %v15352_v46, %v15368_v38  ;;  %v15353_v31 = vmul.f32 0.125, %v15317_v37 }
0x1cf7   :  { %v15462_v39 = vmul.f32 %v23181_v60, %v15414_v36  ;;  %v15320_v14 = vpop.xlane.xlu0 %15319  ;;  %v15419_v36 = vsub.f32 %v27089_v61, %v27230_v8  ;;  %v23225_v61 = vmov 0.0  }
0x1cf8   :  { %v23183_v57 = vpop.eup %23182  ;;  %v15400_v20 = vmax.f32 %v15384_v22, 0.0  ;;  %v15385_v55 = vsub.f32 %v15353_v31, %v15369_v18  ;;  %v15354_v45 = vmul.f32 0.125, %v15320_v14  ;;  %21688 = vmatprep.subr.bf16.mxu1 %v23225_v61 }
0x1cf9   :  { %vm15478_vm1 = vcmp.ge.f32.partialorder %v15462_v39, 0.0  ;;  %v15494_v51 = vmul.f32 0.01, %v15462_v39  ;;  %v15463_v47 = vmul.f32 %v23183_v57, %v15415_v41  ;;  %v15323_v6 = vpop.xlane.xlu1 %15322 }
0x1cfa   :  { %v23185_v42 = vpop.eup %23184  ;;  %v15432_v4 = vadd.f32 1e-05, %v15400_v20  ;;  %v15401_v3 = vmax.f32 %v15385_v55, 0.0  ;;  %v15386_v59 = vsub.f32 %v15354_v45, %v15370_v15  ;;  %v15355_v44 = vmul.f32 0.125, %v15323_v6 }
0x1cfb   :  { %v15510_v7 = vsel %vm15478_vm1, %v15462_v39, %v15494_v51  ;;  %vm15479_vm2 = vcmp.ge.f32.partialorder %v15463_v47, 0.0  ;;  %v15495_v24 = vmul.f32 0.01, %v15463_v47  ;;  %v15460_v23 = vmul.f32 %v23185_v42, %v15412_v63 }
0x1cfc   :  { %v23187_v33 = vpop.eup %23186  ;;  %23188 = vrsqrt.f32 %v15432_v4  ;;  %v15433_v62 = vadd.f32 1e-05, %v15401_v3  ;;  %v15402_v16 = vmax.f32 %v15386_v59, 0.0  ;;  %v15387_v52 = vsub.f32 %v15355_v44, %v15371_v21 }
0x1cfd   :  { %v15511_v9 = vsel %vm15479_vm2, %v15463_v47, %v15495_v24  ;;  %v15461_v58 = vmul.f32 %v23187_v33, %v15413_v26  ;;  %vm15476_vm3 = vcmp.ge.f32.partialorder %v15460_v23, 0.0  ;;  %v15492_v30 = vmul.f32 0.01, %v15460_v23 }
0x1cfe   :  { %v27248_v29 = vpack.c.bf16 %v15511_v9, %v15510_v7  ;;  %23190 = vrsqrt.f32 %v15433_v62  ;;  %v15434_v0 = vadd.f32 1e-05, %v15402_v16  ;;  %v15403_v5 = vmax.f32 %v15387_v52, 0.0 }
0x1cff   :  { %vm15477_vm4 = vcmp.ge.f32.partialorder %v15461_v58, 0.0  ;;  %v15493_v54 = vmul.f32 0.01, %v15461_v58  ;;  %v15508_v34 = vsel %vm15476_vm3, %v15460_v23, %v15492_v30 }
0x1d00   :  { %23192 = vrsqrt.f32 %v15434_v0  ;;  %v15435_v11 = vadd.f32 1e-05, %v15403_v5 }
0x1d01   :  { %v15509_v32 = vsel %vm15477_vm4, %v15461_v58, %v15493_v54 }
0x1d02   :  { %23194 = vrsqrt.f32 %v15435_v11  ;;  %v27250_v56 = vpack.c.bf16 %v15509_v32, %v15508_v34 }
0x1d04   :  { %21662 = vmatprep.mubr.msk.bf16.mxu1 %vm15211_vm7, %v27250_v56 }
0x1d05   :  { %21663 = vmatmul.mubr.msk.bf16.gmra.mrb[16].mxu1 %vm15211_vm7, %v27248_v29 }
0x1d06   :  { %v23189_v12 = vpop.eup %23188 }
0x1d07   :  { %v15464_v43 = vmul.f32 %v23189_v12, %v15416_v10 }
0x1d08   :  { %v23191_v13 = vpop.eup %23190 }
0x1d09   :  { %v15465_v40 = vmul.f32 %v23191_v13, %v15417_v27  ;;  %v15496_v38 = vmul.f32 0.01, %v15464_v43  ;;  %vm15480_vm5 = vcmp.ge.f32.partialorder %v15464_v43, 0.0 }
0x1d0a   :  { %v23193_v46 = vpop.eup %23192 }
0x1d0b   :  { %v15466_v19 = vmul.f32 %v23193_v46, %v15418_v28  ;;  %vm15481_vm6 = vcmp.ge.f32.partialorder %v15465_v40, 0.0  ;;  %v15497_v25 = vmul.f32 0.01, %v15465_v40  ;;  %v15512_v22 = vsel %vm15480_vm5, %v15464_v43, %v15496_v38 }
0x1d0c   :  { %v23195_v37 = vpop.eup %23194 }
0x1d0d   :  { %v15498_v60 = vmul.f32 0.01, %v15466_v19  ;;  %v15467_v18 = vmul.f32 %v23195_v37, %v15419_v36  ;;  %v15513_v50 = vsel %vm15481_vm6, %v15465_v40, %v15497_v25  ;;  %vm15482_vm9 = vcmp.ge.f32.partialorder %v15466_v19, 0.0 }
0x1d0e   :  { %v27264_v1 = vpack.c.bf16 %v15513_v50, %v15512_v22  ;;  %v15658_v22 = vld [vmem:[%s27436_s9] sm:$0x1] }
0x1d0f   :  { %vm15483_vm10 = vcmp.ge.f32.partialorder %v15467_v18, 0.0  ;;  %v15499_v2 = vmul.f32 0.01, %v15467_v18  ;;  %v15514_v49 = vsel %vm15482_vm9, %v15466_v19, %v15498_v60  ;;  %v19078_v60 = vld [vmem:[%s27436_s9 + $0x1] sm:$0x1] }
0x1d10   :  { %21666 = vmatprep.mubr.msk.bf16.mxu1 %vm15211_vm7, %v27264_v1 }
0x1d11   :  { %v15515_v31 = vsel %vm15483_vm10, %v15467_v18, %v15499_v2  ;;  %v19079_v18 = vld [vmem:[%s27435_s8 + $0x8] sm:$0xf] }
0x1d12   :  { %v27268_v41 = vpack.c.bf16 %v15515_v31, %v15514_v49  ;;  %v15854_v50 = vsel %vm15549_vm8, %v19079_v18, 0 }
0x1d14   :  { %21667 = vmatmul.mubr.msk.bf16.gmra.mrb[20].mxu1 %vm15211_vm7, %v27268_v41 }
0x1d15   :  { %21672 = vmatprep.mubr.msk.bf16.mxu1 %vm15211_vm7, %v27191_v17 }
0x1d1c   :  { %21673 = vmatmul.mubr.msk.bf16.vlgmr.msra.gmra.mrb[24].mxu1 %vm15211_vm7, %v27181_v35 }
0x1d1d   :  { %21676 = vmatprep.mubr.msk.bf16.mxu1 %vm15211_vm7, %v27226_v48 }
0x1d24   :  { %21677 = vmatmul.mubr.msk.bf16.gmra.mrb[28].mxu1 %vm15211_vm7, %v27216_v53 }
0x1d25   :  { %21680 = vmatprep.mubr.msk.bf16.mxu1 %vm15211_vm7, %v27250_v56 }
0x1d2c   :  { %21681 = vmatmul.mubr.msk.bf16.gmra.mrb[32].mxu1 %vm15211_vm7, %v27248_v29 }
0x1d2d   :  { %21684 = vmatprep.mubr.msk.bf16.mxu1 %vm15211_vm7, %v27264_v1 }
0x1d34   :  { %21685 = vmatmul.mubr.msk.bf16.gmra.mrb[36].mxu1 %vm15211_vm7, %v27268_v41 }
0x1d35   :  { %21704 = vmatprep.mubr.msk.bf16.mxu1 %vm23226_vm11, %v23225_v61 }
0x1db8   :  { %v27291_v8 = vpop.f32.mrb[8].mxu1 }
0x1db9   :  { %v27293_v63 = vpop.f32.mrb[9].mxu1 }
0x1dba   :  { %v27295_v26 = vpop.f32.mrb[10].mxu1 }
0x1dbb   :  { %v15651_v39 = vpack.c.bf16 %v27295_v26, %v27291_v8  ;;  %v15590_v14 = vpop.f32.mrb[11].mxu1 }
0x1dbc   :  { %v15650_v57 = vpack.c.bf16 %v15590_v14, %v27293_v63 }
0x1dc8   :  { %v27300_v15 = vpop.f32.mrb[12].mxu1 }
0x1dc9   :  { %v27302_v20 = vpop.f32.mrb[13].mxu1 }
0x1dca   :  { %v27304_v55 = vpop.f32.mrb[14].mxu1 }
0x1dcb   :  { %v15653_v45 = vpack.c.bf16 %v27304_v55, %v27300_v15  ;;  %v15606_v51 = vpop.f32.mrb[15].mxu1 }
0x1dcc   :  { %v15652_v47 = vpack.c.bf16 %v15606_v51, %v27302_v20 }
0x1dd8   :  { %v27309_v21 = vpop.f32.mrb[16].mxu1 }
0x1dd9   :  { %v15619_v6 = vpop.f32.mrb[17].mxu1 }
0x1dda   :  { %v27311_v42 = vpop.f32.mrb[18].mxu1 }
0x1ddb   :  { %v15655_v4 = vpack.c.bf16 %v27311_v42, %v27309_v21  ;;  %v15622_v3 = vpop.f32.mrb[19].mxu1 }
0x1ddc   :  { %v15654_v59 = vpack.c.bf16 %v15622_v3, %v15619_v6 }
0x1de7   :  { %v27315_v44 = vpop.f32.mrb[20].mxu1 }
0x1de8   :  { %v15635_v7 = vpop.f32.mrb[21].mxu1 }
0x1de9   :  { %v21669_v24 = vpop.f32.mrb[22].mxu1 }
0x1dea   :  { %v15657_v23 = vpack.c.bf16 %v21669_v24, %v27315_v44  ;;  %v15638_v33 = vpop.f32.mrb[23].mxu1 }
0x1deb   :  { %v15656_v62 = vpack.c.bf16 %v15638_v33, %v15635_v7 }
0x1def   :  { %v21674_v16 = vpop.f32.mrb[24].mxu1 }
0x1df0   :  { %v15698_v52 = vpop.f32.mrb[25].mxu1 }
0x1df1   :  { %v21675_v9 = vpop.f32.mrb[26].mxu1 }
0x1df2   :  { %v15762_v58 = vpack.c.bf16 %v21675_v9, %v21674_v16  ;;  %v15701_v30 = vpop.f32.mrb[27].mxu1 }
0x1df3   :  { %v15761_v0 = vpack.c.bf16 %v15701_v30, %v15698_v52 }
0x1df5   :  { %21689 = vmatpush3.bf16.msra.mxu1 %v15761_v0 }
0x1df6   :  { %21690 = vmatprep.subr.bf16.mxu1 %v23225_v61 }
0x1df7   :  { %v21678_v5 = vpop.f32.mrb[28].mxu1 }
0x1df8   :  { %v15714_v54 = vpop.f32.mrb[29].mxu1 }
0x1df9   :  { %v21679_v11 = vpop.f32.mrb[30].mxu1  ;;  %21691 = vmatpush3.bf16.msra.mxu1 %v15762_v58 }
0x1dfa   :  { %v15764_v34 = vpack.c.bf16 %v21679_v11, %v21678_v5  ;;  %v15717_v32 = vpop.f32.mrb[31].mxu1  ;;  %21692 = vmatprep.subr.bf16.mxu1 %v23225_v61  ;;  %v19089_v5 = vld [vmem:[%s27435_s8 + $0xc] sm:$0xf] }
0x1dfb   :  { %v15763_v10 = vpack.c.bf16 %v15717_v32, %v15714_v54  ;;  %v19088_v54 = vld [vmem:[%s27436_s9 + $0x2] sm:$0x1]  ;;  %v16007_v11 = vsel %vm15549_vm8, %v19089_v5, 0 }
0x1dfd   :  { %21693 = vmatpush3.bf16.msra.mxu1 %v15763_v10 }
0x1dfe   :  { %21694 = vmatprep.subr.bf16.mxu1 %v23225_v61 }
0x1dff   :  { %v21682_v12 = vpop.f32.mrb[32].mxu1 }
0x1e00   :  { %v15730_v27 = vpop.f32.mrb[33].mxu1 }
0x1e01   :  { %v21683_v43 = vpop.f32.mrb[34].mxu1  ;;  %21695 = vmatpush3.bf16.msra.mxu1 %v15764_v34 }
0x1e02   :  { %v15766_v13 = vpack.c.bf16 %v21683_v43, %v21682_v12  ;;  %v15733_v28 = vpop.f32.mrb[35].mxu1  ;;  %21696 = vmatprep.subr.bf16.mxu1 %v23225_v61 }
0x1e03   :  { %v15765_v40 = vpack.c.bf16 %v15733_v28, %v15730_v27 }
0x1e05   :  { %21697 = vmatpush3.bf16.msra.mxu1 %v15765_v40 }
0x1e06   :  { %21698 = vmatprep.subr.bf16.mxu1 %v23225_v61 }
0x1e07   :  { %v21686_v38 = vpop.f32.mrb[36].mxu1 }
0x1e08   :  { %v15746_v46 = vpop.f32.mrb[37].mxu1 }
0x1e09   :  { %v21687_v36 = vpop.f32.mrb[38].mxu1  ;;  %21699 = vmatpush3.bf16.msra.mxu1 %v15766_v13 }
0x1e0a   :  { %v15768_v19 = vpack.c.bf16 %v21687_v36, %v21686_v38  ;;  %v15749_v25 = vpop.f32.mrb[39].mxu1  ;;  %21700 = vmatprep.subr.bf16.mxu1 %v23225_v61 }
0x1e0b   :  { %v15767_v37 = vpack.c.bf16 %v15749_v25, %v15746_v46 }
0x1e0d   :  { %21701 = vmatpush3.bf16.msra.mxu1 %v15767_v37 }
0x1e0e   :  { %21702 = vmatprep.subr.bf16.mxu1 %v23225_v61 }
0x1e11   :  { %21703 = vmatpush3.bf16.msra.mxu1 %v15768_v19 }
0x1e12   :  { %21708 = vmatprep.subr.bf16.mxu1 %v23225_v61 }
0x1e14   :  { %21705 = vmatmul.mubr.bf16.vlgmr.msra.gmra.mrb[40].mxu1 %v19078_v60 }
0x1e15   :  { %21709 = vmatpush3.bf16.msra.mxu1 %v15650_v57  ;;  %21724 = vmatprep.mubr.msk.bf16.mxu1 %vm23226_vm11, %v23225_v61 }
0x1e16   :  { %21710 = vmatprep.subr.bf16.mxu1 %v23225_v61 }
0x1e19   :  { %21711 = vmatpush3.bf16.msra.mxu1 %v15651_v39 }
0x1e1a   :  { %21712 = vmatprep.subr.bf16.mxu1 %v23225_v61 }
0x1e1d   :  { %21713 = vmatpush3.bf16.msra.mxu1 %v15652_v47 }
0x1e1e   :  { %21714 = vmatprep.subr.bf16.mxu1 %v23225_v61 }
0x1e21   :  { %21715 = vmatpush3.bf16.msra.mxu1 %v15653_v45 }
0x1e22   :  { %21716 = vmatprep.subr.bf16.mxu1 %v23225_v61 }
0x1e25   :  { %21717 = vmatpush3.bf16.msra.mxu1 %v15654_v59 }
0x1e26   :  { %21718 = vmatprep.subr.bf16.mxu1 %v23225_v61 }
0x1e29   :  { %21719 = vmatpush3.bf16.msra.mxu1 %v15655_v4 }
0x1e2a   :  { %21720 = vmatprep.subr.bf16.mxu1 %v23225_v61 }
0x1e2d   :  { %21721 = vmatpush3.bf16.msra.mxu1 %v15656_v62 }
0x1e2e   :  { %21722 = vmatprep.subr.bf16.mxu1 %v23225_v61 }
0x1e31   :  { %21723 = vmatpush3.bf16.msra.mxu1 %v15657_v23 }
0x1e32   :  { %22226 = vmatprep.subr.msk.bf16.mxu1 %vm15549_vm8, %v19079_v18 }
0x1e34   :  { %21725 = vmatmul.mubr.bf16.vlgmr.msra.gmra.mrb[44].mxu1 %v15658_v22 }
0x1e35   :  { %21730 = vmatprep.mubr.msk.bf16.mxu1 %vm15211_vm7, %v27191_v17  ;;  %21729 = vmatpush3.bf16.msra.mxu1 %v15854_v50 }
0x1e36   :  { %21746 = vmatprep.subr.bf16.mxu1 %v23225_v61 }
0x1e3c   :  { %21731 = vmatmul.mubr.msk.bf16.vlgmr.msra.gmra.mrb[48].mxu1 %vm15211_vm7, %v27181_v35 }
0x1e3d   :  { %21734 = vmatprep.mubr.msk.bf16.mxu1 %vm15211_vm7, %v27226_v48 }
0x1e44   :  { %21735 = vmatmul.mubr.msk.bf16.gmra.mrb[52].mxu1 %vm15211_vm7, %v27216_v53 }
0x1e45   :  { %21738 = vmatprep.mubr.msk.bf16.mxu1 %vm15211_vm7, %v27250_v56 }
0x1e4c   :  { %21739 = vmatmul.mubr.msk.bf16.gmra.mrb[56].mxu1 %vm15211_vm7, %v27248_v29 }
0x1e4d   :  { %21742 = vmatprep.mubr.msk.bf16.mxu1 %vm15211_vm7, %v27264_v1 }
0x1e54   :  { %21743 = vmatmul.mubr.msk.bf16.gmra.mrb[60].mxu1 %vm15211_vm7, %v27268_v41 }
0x1e55   :  { %21762 = vmatprep.mubr.msk.bf16.mxu1 %vm23226_vm11, %v23225_v61 }
0x1ee7   :  { %v15805_v2 = vpop.f32.mrb[40].mxu1 }
0x1ee8   :  { %v21706_v49 = vpop.f32.mrb[41].mxu1 }
0x1ee9   :  { %v15808_v31 = vpop.f32.mrb[42].mxu1 }
0x1eea   :  { %v21707_v8 = vpop.f32.mrb[43].mxu1 }
0x1eeb   :  { %v19098_v8 = vld [vmem:[%s27436_s9 + $0x3] sm:$0x1]  ;;  %s23200_s9 = scalar_lea.vmem %s16183_s25, 16 }
0x1eec   :  { %p23201_p0 = scmp.ne.s32.totalorder %s16183_s25, %s23200_s9  ;;  %p23206_p2 = scmp.lt.s32.totalorder %s23204_s6, %s23200_s9 }
0x1eee   :  { %p23207_p3 = por %p23206_p2, %p23205_p1 }
0x1ef0   :  { %p23208_p4 = pnand %p23207_p3, %p23201_p0 }
0x1f07   :  { %v15845_v63 = vpop.f32.mrb[44].mxu1 }
0x1f08   :  { %v15846_v26 = vadd.f32 %v15845_v63, %v15805_v2  ;;  %v21726_v39 = vpop.f32.mrb[45].mxu1  ;;  %v16163_v63 = vlaneseq }
0x1f09   :  { %v15848_v14 = vpop.f32.mrb[46].mxu1 }
0x1f0a   :  { %v21727_v57 = vpop.f32.mrb[47].mxu1 }
0x1f0f   :  { %v21732_v15 = vpop.f32.mrb[48].mxu1 }
0x1f10   :  { %v15890_v20 = vpop.f32.mrb[49].mxu1 }
0x1f11   :  { %v21733_v55 = vpop.f32.mrb[50].mxu1 }
0x1f12   :  { %v15954_v45 = vpack.c.bf16 %v21733_v55, %v21732_v15  ;;  %v15893_v51 = vpop.f32.mrb[51].mxu1 }
0x1f13   :  { %v15953_v47 = vpack.c.bf16 %v15893_v51, %v15890_v20 }
0x1f15   :  { %21747 = vmatpush3.bf16.msra.mxu1 %v15953_v47 }
0x1f16   :  { %21748 = vmatprep.subr.bf16.mxu1 %v23225_v61 }
0x1f17   :  { %v21736_v21 = vpop.f32.mrb[52].mxu1 }
0x1f18   :  { %v15906_v6 = vpop.f32.mrb[53].mxu1 }
0x1f19   :  { %v21737_v42 = vpop.f32.mrb[54].mxu1  ;;  %21749 = vmatpush3.bf16.msra.mxu1 %v15954_v45 }
0x1f1a   :  { %v15956_v4 = vpack.c.bf16 %v21737_v42, %v21736_v21  ;;  %v15909_v3 = vpop.f32.mrb[55].mxu1  ;;  %21750 = vmatprep.subr.bf16.mxu1 %v23225_v61 }
0x1f1b   :  { %v15955_v59 = vpack.c.bf16 %v15909_v3, %v15906_v6 }
0x1f1d   :  { %21751 = vmatpush3.bf16.msra.mxu1 %v15955_v59 }
0x1f1e   :  { %21752 = vmatprep.subr.bf16.mxu1 %v23225_v61 }
0x1f1f   :  { %v21740_v44 = vpop.f32.mrb[56].mxu1 }
0x1f20   :  { %v15922_v7 = vpop.f32.mrb[57].mxu1 }
0x1f21   :  { %v21741_v24 = vpop.f32.mrb[58].mxu1  ;;  %21753 = vmatpush3.bf16.msra.mxu1 %v15956_v4 }
0x1f22   :  { %v15958_v23 = vpack.c.bf16 %v21741_v24, %v21740_v44  ;;  %v15925_v33 = vpop.f32.mrb[59].mxu1  ;;  %21754 = vmatprep.subr.bf16.mxu1 %v23225_v61 }
0x1f23   :  { %v15957_v62 = vpack.c.bf16 %v15925_v33, %v15922_v7 }
0x1f25   :  { %21755 = vmatpush3.bf16.msra.mxu1 %v15957_v62 }
0x1f26   :  { %21756 = vmatprep.subr.bf16.mxu1 %v23225_v61 }
0x1f27   :  { %v21744_v16 = vpop.f32.mrb[60].mxu1 }
0x1f28   :  { %v15938_v52 = vpop.f32.mrb[61].mxu1 }
0x1f29   :  { %v21745_v9 = vpop.f32.mrb[62].mxu1  ;;  %21757 = vmatpush3.bf16.msra.mxu1 %v15958_v23 }
0x1f2a   :  { %v15960_v58 = vpack.c.bf16 %v21745_v9, %v21744_v16  ;;  %v15941_v30 = vpop.f32.mrb[63].mxu1  ;;  %21758 = vmatprep.subr.bf16.mxu1 %v23225_v61 }
0x1f2b   :  { %v15959_v0 = vpack.c.bf16 %v15941_v30, %v15938_v52 }
0x1f2d   :  { %21759 = vmatpush3.bf16.msra.mxu1 %v15959_v0 }
0x1f2e   :  { %21760 = vmatprep.subr.bf16.mxu1 %v23225_v61 }
0x1f31   :  { %21761 = vmatpush3.bf16.msra.mxu1 %v15960_v58 }
0x1f32   :  { %22227 = vmatprep.subr.msk.bf16.mxu1 %vm15549_vm8, %v19089_v5 }
0x1f34   :  { %21763 = vmatmul.mubr.bf16.vlgmr.msra.gmra.mrb[64].mxu1 %v19088_v54 }
0x1f35   :  { %21768 = vmatprep.mubr.msk.bf16.mxu1 %vm15211_vm7, %v27191_v17  ;;  %21767 = vmatpush3.bf16.msra.mxu1 %v16007_v11 }
0x1f36   :  { %21784 = vmatprep.subr.bf16.mxu1 %v23225_v61 }
0x1f3c   :  { %21769 = vmatmul.mubr.msk.bf16.vlgmr.msra.gmra.mrb[68].mxu1 %vm15211_vm7, %v27181_v35  ;;  %v16157_v35 = vld [vmem:[#allocation2] sm:$0x1] }
0x1f3d   :  { %21772 = vmatprep.mubr.msk.bf16.mxu1 %vm15211_vm7, %v27226_v48  ;;  %16160 = vperm.xlu0 %22232, %v16157_v35  }
0x1f44   :  { %21773 = vmatmul.mubr.msk.bf16.gmra.mrb[72].mxu1 %vm15211_vm7, %v27216_v53 }
0x1f45   :  { %21776 = vmatprep.mubr.msk.bf16.mxu1 %vm15211_vm7, %v27250_v56 }
0x1f4c   :  { %21777 = vmatmul.mubr.msk.bf16.gmra.mrb[76].mxu1 %vm15211_vm7, %v27248_v29 }
0x1f4d   :  { %21780 = vmatprep.mubr.msk.bf16.mxu1 %vm15211_vm7, %v27264_v1 }
0x1f54   :  { %21781 = vmatmul.mubr.msk.bf16.gmra.mrb[80].mxu1 %vm15211_vm7, %v27268_v41  ;;  %vm16174_vm7 = vcmask 8192  }
0x1f55   :  { %21800 = vmatprep.mubr.msk.bf16.mxu1 %vm23226_vm11, %v23225_v61 }
0x1fbc   :  { %v16161_v14 = vpop.permute.xlu0 %16160 }
0x2007   :  { %v15997_v17 = vpop.f32.mrb[64].mxu1 }
0x2008   :  { %v16003_v48 = vadd.f32 %v15997_v17, %v15846_v26  ;;  %v21764_v53 = vpop.f32.mrb[65].mxu1  ;;  %v16164_v26 = vshrl.u32 %v16163_v63, 7 }
0x2009   :  { %v16000_v34 = vpop.f32.mrb[66].mxu1 }
0x200a   :  { %v21765_v32 = vpop.f32.mrb[67].mxu1  ;;  %v16165_v39 = vsub.s32 0, %v16164_v26 }
0x200c   :  { %v16166_v57 = vrot.slane %v16161_v14, %v16165_v39 }
0x200f   :  { %v21770_v56 = vpop.f32.mrb[68].mxu1 }
0x2010   :  { %v16043_v10 = vpop.f32.mrb[69].mxu1 }
0x2011   :  { %v21771_v12 = vpop.f32.mrb[70].mxu1 }
0x2012   :  { %v16107_v29 = vpack.c.bf16 %v21771_v12, %v21770_v56  ;;  %v16046_v27 = vpop.f32.mrb[71].mxu1 }
0x2013   :  { %v16106_v43 = vpack.c.bf16 %v16046_v27, %v16043_v10 }
0x2015   :  { %21785 = vmatpush3.bf16.msra.mxu1 %v16106_v43 }
0x2016   :  { %21786 = vmatprep.subr.bf16.mxu1 %v23225_v61 }
0x2017   :  { %v21774_v1 = vpop.f32.mrb[72].mxu1 }
0x2018   :  { %v16059_v41 = vpop.f32.mrb[73].mxu1 }
0x2019   :  { %v21775_v13 = vpop.f32.mrb[74].mxu1  ;;  %21787 = vmatpush3.bf16.msra.mxu1 %v16107_v29 }
0x201a   :  { %v16109_v28 = vpack.c.bf16 %v21775_v13, %v21774_v1  ;;  %v16062_v40 = vpop.f32.mrb[75].mxu1  ;;  %21788 = vmatprep.subr.bf16.mxu1 %v23225_v61 }
0x201b   :  { %v16108_v38 = vpack.c.bf16 %v16062_v40, %v16059_v41 }
0x201d   :  { %21789 = vmatpush3.bf16.msra.mxu1 %v16108_v38 }
0x201e   :  { %21790 = vmatprep.subr.bf16.mxu1 %v23225_v61 }
0x201f   :  { %v21778_v46 = vpop.f32.mrb[76].mxu1 }
0x2020   :  { %v16075_v36 = vpop.f32.mrb[77].mxu1 }
0x2021   :  { %v21779_v19 = vpop.f32.mrb[78].mxu1  ;;  %21791 = vmatpush3.bf16.msra.mxu1 %v16109_v28 }
0x2022   :  { %v16111_v25 = vpack.c.bf16 %v21779_v19, %v21778_v46  ;;  %v16078_v37 = vpop.f32.mrb[79].mxu1  ;;  %21792 = vmatprep.subr.bf16.mxu1 %v23225_v61 }
0x2023   :  { %v16110_v60 = vpack.c.bf16 %v16078_v37, %v16075_v36 }
0x2025   :  { %21793 = vmatpush3.bf16.msra.mxu1 %v16110_v60 }
0x2026   :  { %21794 = vmatprep.subr.bf16.mxu1 %v23225_v61 }
0x2027   :  { %v21782_v18 = vpop.f32.mrb[80].mxu1 }
0x2028   :  { %v16091_v22 = vpop.f32.mrb[81].mxu1 }
0x2029   :  { %v21783_v50 = vpop.f32.mrb[82].mxu1  ;;  %21795 = vmatpush3.bf16.msra.mxu1 %v16111_v25 }
0x202a   :  { %v16113_v2 = vpack.c.bf16 %v21783_v50, %v21782_v18  ;;  %v16094_v49 = vpop.f32.mrb[83].mxu1  ;;  %21796 = vmatprep.subr.bf16.mxu1 %v23225_v61 }
0x202b   :  { %v16112_v31 = vpack.c.bf16 %v16094_v49, %v16091_v22 }
0x202d   :  { %21797 = vmatpush3.bf16.msra.mxu1 %v16112_v31 }
0x202e   :  { %21798 = vmatprep.subr.bf16.mxu1 %v23225_v61 }
0x2031   :  { %21799 = vmatpush3.bf16.msra.mxu1 %v16113_v2 }
0x2034   :  { %21801 = vmatmul.mubr.bf16.vlgmr.msra.gmra.mrb[84].mxu1 %v19098_v8 }
0x2107   :  { %v16150_v15 = vpop.f32.mrb[84].mxu1 }
0x2108   :  { %v16156_v20 = vadd.f32 %v16150_v15, %v16003_v48  ;;  %v21802_v55 = vpop.f32.mrb[85].mxu1 }
0x2109   :  { %v16153_v45 = vpop.f32.mrb[86].mxu1 }
0x210a   :  { %v16167_v51 = vadd.f32 %v16166_v57, %v16156_v20  ;;  %v21803_v47 = vpop.f32.mrb[87].mxu1 }
0x210c   :  { %v19099_v21 = vmul.f32 -1.442695, %v16167_v51 }
0x210e   :  { %23196 = vpow2.f32 %v19099_v21 }
0x2118   :  { %v23197_v61 = vpop.eup %23196 }
0x2119   :  { %v16171_v6 = vadd.f32 1.0, %v23197_v61 }
0x211b   :  { %23198 = vrcp.f32 %v16171_v6 }
0x2125   :  { %v23199_v42 = vpop.eup %23198 }
0x2126   :  { %16175 = vst.msk [vmem:[#allocation3] sm:$0x1] %vm16174_vm7, %v23199_v42 }
0x2127   :  { %23211 = shalt.err (!%p23208_p4)
}
0x2128   :  { %s23212_s27 = scalar_lea.hbm %s27438_s11, 16 }
0x2129   :  { %p23213_p5 = scmp.ne.s32.totalorder %s27438_s11, %s23212_s27  ;;  %p23216_p6 = scmp.lt.u32.totalorder %s23212_s27, %s27438_s11 }
0x212b   :  { %p23218_p7 = pnand %p23216_p6, %p23213_p5 }
0x212d   :  { %23221 = shalt.err (!%p23218_p7)
}
0x212e   :  { %16185 = dma.vmem_to_hbm [thread:$0]  %s16183_s25, 16, %s27438_s11, [#allocation4]  }
0x212f   :  { %23222 = dma.done.wait [#allocation4], 16  }
0x2130   :  { %23223 = vsyncadd [#allocation4], 4294967280 }
0x2131   :  { %16189 = vsyncpa [#allocation4], 1 }

</bundles_post_ra>
